<compile_context>
chip_gen: v7x
topology: tpu7x:2x2x1
jax: 0.10.0
libtpu: 0.0.40
codegen_flags: <defaults>
</compile_context>

<pallas_src>
import jax
import jax.numpy as jnp
from jax.experimental import pallas as pl
from jax.experimental.pallas import tpu as pltpu

LANE = 128


def _round_up(x, m):
    return (x + m - 1) // m * m


def _cdiv(a, b):
    return -(-a // b)


def _cpad(c):
    return max(LANE, _round_up(c, LANE))


# --------------------------------------------------------------------------- #
# Fused 1x1 conv (matmul + folded BN + SiLU [+ residual]) kernel               #
#   - variable number of inputs  (multi-input == logical channel concat)       #
#   - variable number of outputs (multi-output == logical channel chunk/split) #
#   - weights fully VMEM-resident, no K grid axis, no accumulator scratch      #
# --------------------------------------------------------------------------- #
def _make_pointwise_kernel(n_in, n_out, fuse_residual):
    def kernel(*refs):
        # refs = [x_0..x_{n_in-1},
        #         (w_{o,0}..w_{o,n_in-1}, scale_o, bias_o) for each output o,
        #         out_0..out_{n_out-1}]
        xs = refs[:n_in]
        outs = refs[len(refs) - n_out:]
        x_vals = [x[...] for x in xs]            # each (tm, Cin_i_pad) bf16
        pos = n_in
        for o in range(n_out):
            acc = None
            for i in range(n_in):
                d = jnp.dot(x_vals[i], refs[pos][...],
                            preferred_element_type=jnp.float32)
                acc = d if acc is None else acc + d
                pos += 1
            scale = refs[pos][...]
            bias = refs[pos + 1][...]
            pos += 2
            y = acc * scale + bias
            # SiLU with one EUP op: sigmoid(y) = 0.5*tanh(0.5*y) + 0.5
            act = y * (0.5 * jnp.tanh(0.5 * y) + 0.5)
            if fuse_residual:
                # DPRC residual (x1 + x) fused into the producing conv epilogue
                act = act + x_vals[0].astype(jnp.float32)
            outs[o][...] = act.astype(outs[o].dtype)
    return kernel


def _pointwise_call(xs2d, w_per_out, scale_per_out, bias_per_out,
                    fuse_residual=False):
    """act(bn(sum_i x_i @ W_{o,i})) [+ x_0] for each output o.

    xs2d:          list of (M, Cin_i_pad) bf16 arrays (same M).
    w_per_out:     list (per output) of lists (per input) of
                   (Cin_i_pad, Cout_o_pad) bf16 weights.
    scale/bias:    list (per output) of (1, Cout_o_pad) f32 folded-BN params.
    Returns a list of (M, Cout_o_pad) bf16 arrays.
    """
    n_in = len(xs2d)
    n_out = len(w_per_out)
    M = xs2d[0].shape[0]
    cins = [x.shape[1] for x in xs2d]
    couts = [w_per_out[o][0].shape[1] for o in range(n_out)]
    if fuse_residual:
        assert n_in == 1 and all(co == cins[0] for co in couts)

    # Large M tiles, but keep >= 2 parallel grid steps when possible so v7x's
    # two TensorCores are both occupied.
    tm = 512
    while tm > 64 and _cdiv(M, tm) < 2:
        tm //= 2
    Mp = _round_up(M, tm)
    if Mp != M:
        xs2d = [jnp.pad(x, ((0, Mp - M), (0, 0))) for x in xs2d]
    grid = (Mp // tm,)

    # TODO(synk): for very large channel counts a Cout grid axis (tn tiles)
    # would be needed; all C2f layer widths here fit a single 128-lane tile.
    in_specs, args = [], []
    for x, cin in zip(xs2d, cins):
        in_specs.append(pl.BlockSpec((tm, cin), lambda i: (i, 0)))
        args.append(x)
    for o in range(n_out):
        for w, cin in zip(w_per_out[o], cins):
            in_specs.append(pl.BlockSpec((cin, couts[o]), lambda i: (0, 0)))
            args.append(w)
        in_specs.append(pl.BlockSpec((1, couts[o]), lambda i: (0, 0)))
        args.append(scale_per_out[o])
        in_specs.append(pl.BlockSpec((1, couts[o]), lambda i: (0, 0)))
        args.append(bias_per_out[o])

    out_specs = [pl.BlockSpec((tm, co), lambda i: (i, 0)) for co in couts]
    out_shapes = [jax.ShapeDtypeStruct((Mp, co), jnp.bfloat16) for co in couts]

    cost = pl.CostEstimate(
        flops=2 * Mp * sum(cins) * sum(couts) + 4 * Mp * sum(couts),
        transcendentals=Mp * sum(couts),
        bytes_accessed=(Mp * sum(cins) * 2 + Mp * sum(couts) * 2
                        + sum(cins) * sum(couts) * 2),
    )

    result = pl.pallas_call(
        _make_pointwise_kernel(n_in, n_out, fuse_residual),
        out_shape=tuple(out_shapes) if n_out > 1 else out_shapes[0],
        grid_spec=pltpu.PrefetchScalarGridSpec(
            num_scalar_prefetch=0,
            grid=grid,
            in_specs=in_specs,
            out_specs=out_specs if n_out > 1 else out_specs[0],
        ),
        compiler_params=pltpu.CompilerParams(
            dimension_semantics=("parallel",),
            vmem_limit_bytes=32 * 1024 * 1024,
        ),
        cost_estimate=cost,
    )(*args)

    outs = list(result) if n_out > 1 else [result]
    if Mp != M:
        outs = [o[:M] for o in outs]
    return outs


# --------------------------------------------------------------------------- #
# Fused dual 3x3 conv kernel (DPRC tail): cv3(z1) || cv4(z2) -> one output     #
#   - spatially padded images stay VMEM-resident, 9 taps accumulated in-kernel #
#   - each conv's outputs land in their own channel range (concat for free)    #
# --------------------------------------------------------------------------- #
def _conv3x3_pair_kernel(x1_ref, x2_ref, w1_ref, w2_ref, scale_ref, bias_ref,
                         o_ref):
    H, W, Cout = o_ref.shape[1], o_ref.shape[2], o_ref.shape[3]
    x1 = x1_ref[0]                                   # (H+2, W+2, Cin) bf16
    x2 = x2_ref[0]
    acc = jnp.zeros((H * W, Cout), jnp.float32)
    for t in range(9):                               # static unroll of the taps
        di, dj = divmod(t, 3)
        win1 = x1[di:di + H, dj:dj + W, :].reshape(H * W, x1.shape[-1])
        win2 = x2[di:di + H, dj:dj + W, :].reshape(H * W, x2.shape[-1])
        acc = acc + jnp.dot(win1, w1_ref[t], preferred_element_type=jnp.float32)
        acc = acc + jnp.dot(win2, w2_ref[t], preferred_element_type=jnp.float32)
    y = acc * scale_ref[...] + bias_ref[...]
    act = y * (0.5 * jnp.tanh(0.5 * y) + 0.5)        # SiLU, one transcendental
    o_ref[...] = act.reshape(1, H, W, Cout).astype(o_ref.dtype)


def _dprc_tail(z1, z2, w3p, w4p, scale, bias):
    """cat(cv3(z1), cv4(z2)) as one fused pallas call. z1/z2: (N,H,W,Cin) bf16."""
    N, H, W, Cin = z1.shape
    Cout = w3p.shape[-1]
    # TODO(synk): the spatial zero-pad is still an XLA copy; fusing it would
    # require halo masking inside the producing 1x1 kernel.
    z1p = jnp.pad(z1, ((0, 0), (1, 1), (1, 1), (0, 0)))
    z2p = jnp.pad(z2, ((0, 0), (1, 1), (1, 1), (0, 0)))

    cost = pl.CostEstimate(
        flops=2 * N * H * W * 9 * 2 * Cin * Cout + 4 * N * H * W * Cout,
        transcendentals=N * H * W * Cout,
        bytes_accessed=(2 * N * (H + 2) * (W + 2) * Cin * 2
                        + N * H * W * Cout * 2 + 2 * 9 * Cin * Cout * 2),
    )

    return pl.pallas_call(
        _conv3x3_pair_kernel,
        out_shape=jax.ShapeDtypeStruct((N, H, W, Cout), jnp.bfloat16),
        grid_spec=pltpu.PrefetchScalarGridSpec(
            num_scalar_prefetch=0,
            grid=(N,),
            in_specs=[
                pl.BlockSpec((1, H + 2, W + 2, Cin), lambda n: (n, 0, 0, 0)),
                pl.BlockSpec((1, H + 2, W + 2, Cin), lambda n: (n, 0, 0, 0)),
                pl.BlockSpec((9, Cin, Cout), lambda n: (0, 0, 0)),
                pl.BlockSpec((9, Cin, Cout), lambda n: (0, 0, 0)),
                pl.BlockSpec((1, Cout), lambda n: (0, 0)),
                pl.BlockSpec((1, Cout), lambda n: (0, 0)),
            ],
            out_specs=pl.BlockSpec((1, H, W, Cout), lambda n: (n, 0, 0, 0)),
        ),
        compiler_params=pltpu.CompilerParams(
            dimension_semantics=("parallel",),
            vmem_limit_bytes=32 * 1024 * 1024,
        ),
        cost_estimate=cost,
    )(z1p, z2p, w3p, w4p, scale, bias)


# --------------------------------------------------------------------------- #
# Parameter folding / padding helpers                                          #
# --------------------------------------------------------------------------- #
def _fold_bn(p, eps=1e-5):
    scale = p["gamma"] / jnp.sqrt(p["var"] + eps)
    bias = p["beta"] - p["mean"] * scale
    return scale, bias


def _pad_weight_2d(w2d, cin_pad, cout_pad, col_off=0):
    c1, c2 = w2d.shape
    wp = jnp.zeros((cin_pad, cout_pad), jnp.float32)
    wp = wp.at[:c1, col_off:col_off + c2].set(w2d)
    return wp.astype(jnp.bfloat16)


def _pad_scale_bias(scale, bias, cout_pad, col_off=0):
    c2 = scale.shape[0]
    # padded lanes: scale=1, bias=0  ->  silu(0)=0, so padded channels stay 0
    s = jnp.ones((1, cout_pad), jnp.float32).at[0, col_off:col_off + c2].set(scale)
    b = jnp.zeros((1, cout_pad), jnp.float32).at[0, col_off:col_off + c2].set(bias)
    return s, b


def _pad_weight_3x3(w_oihw, cin_pad, cout_pad, col_off=0):
    c2, c1, k, _ = w_oihw.shape
    w = jnp.transpose(w_oihw, (2, 3, 1, 0)).reshape(k * k, c1, c2)
    wp = jnp.zeros((k * k, cin_pad, cout_pad), jnp.float32)
    wp = wp.at[:, :c1, col_off:col_off + c2].set(w)
    return wp.astype(jnp.bfloat16)


# --------------------------------------------------------------------------- #
# C2f forward (with DPRC bottlenecks)                                          #
# --------------------------------------------------------------------------- #
@jax.jit
def c2f_forward(x_nchw, params):
    """C2f.forward. Input/output NCHW f32 (PyTorch layout); internally lane-
    padded NHWC bf16 with all conv/BN/SiLU blocks as fused Pallas kernels."""
    eps = 1e-5
    c = params["cv1"]["w"].shape[0] // 2          # hidden channels
    c1 = params["cv1"]["w"].shape[1]
    c2_out = params["cv2"]["w"].shape[0]
    n = len(params["m"])
    c1p, cp, c2p = _cpad(c1), _cpad(c), _cpad(c2_out)

    N, _, H, W = x_nchw.shape
    M = N * H * W

    # Module boundary: NCHW -> lane-padded NHWC bf16, once.
    x = jnp.transpose(x_nchw, (0, 2, 3, 1))
    x = jnp.pad(x, ((0, 0), (0, 0), (0, 0), (0, c1p - c1))).astype(jnp.bfloat16)
    x2d = x.reshape(M, c1p)

    # cv1 (1x1: c1 -> 2c) with chunk(2) fused: split the weight, two outputs.
    w_cv1 = params["cv1"]["w"].reshape(2 * c, c1).T          # (c1, 2c)
    s_cv1, b_cv1 = _fold_bn(params["cv1"], eps)
    wa = _pad_weight_2d(w_cv1[:, :c], c1p, cp)
    wb = _pad_weight_2d(w_cv1[:, c:], c1p, cp)
    sa, ba = _pad_scale_bias(s_cv1[:c], b_cv1[:c], cp)
    sb, bb = _pad_scale_bias(s_cv1[c:], b_cv1[c:], cp)
    y0, y1 = _pointwise_call([x2d], [[wa], [wb]], [sa, sb], [ba, bb])
    ys = [y0, y1]                                            # (M, cp) bf16 each

    for m in params["m"]:
        xin = ys[-1]
        # m.cv1 / m.cv2 (1x1: c -> c) in ONE kernel (x read once, two outputs),
        # with the DPRC residual (+x) fused into the epilogue of each output.
        w1p = _pad_weight_2d(m["cv1"]["w"].reshape(c, c).T, cp, cp)
        w2p = _pad_weight_2d(m["cv2"]["w"].reshape(c, c).T, cp, cp)
        s1, b1 = _fold_bn(m["cv1"], eps)
        s2, b2 = _fold_bn(m["cv2"], eps)
        s1p, b1p = _pad_scale_bias(s1, b1, cp)
        s2p, b2p = _pad_scale_bias(s2, b2, cp)
        z1, z2 = _pointwise_call([xin], [[w1p], [w2p]], [s1p, s2p], [b1p, b2p],
                                 fuse_residual=True)

        # Dual 3x3: cv3(z1) -> output channels [0:c//2], cv4(z2) -> [c//2:c].
        ch = c // 2
        w3p = _pad_weight_3x3(m["cv3"]["w"], cp, cp, col_off=0)
        w4p = _pad_weight_3x3(m["cv4"]["w"], cp, cp, col_off=ch)
        s3, b3 = _fold_bn(m["cv3"], eps)
        s4, b4 = _fold_bn(m["cv4"], eps)
        sc = jnp.ones((1, cp), jnp.float32).at[0, :ch].set(s3).at[0, ch:c].set(s4)
        bc = jnp.zeros((1, cp), jnp.float32).at[0, :ch].set(b3).at[0, ch:c].set(b4)
        out_m = _dprc_tail(z1.reshape(N, H, W, cp), z2.reshape(N, H, W, cp),
                           w3p, w4p, sc, bc)
        ys.append(out_m.reshape(M, cp))

    # Final cv2 (1x1: (2+n)c -> c2) over the logical concat of ys, expressed as
    # a multi-input accumulating matmul (no concat materialized).
    w_cv2 = params["cv2"]["w"].reshape(c2_out, (2 + n) * c).T   # ((2+n)c, c2)
    s_cv2, b_cv2 = _fold_bn(params["cv2"], eps)
    s2p_, b2p_ = _pad_scale_bias(s_cv2, b_cv2, c2p)
    w_parts = [_pad_weight_2d(w_cv2[i * c:(i + 1) * c, :], cp, c2p)
               for i in range(2 + n)]
    (out2d,) = _pointwise_call(ys, [w_parts], [s2p_], [b2p_])

    # Module boundary: lane-padded NHWC bf16 -> NCHW f32, once.
    out = out2d.reshape(N, H, W, c2p)[..., :c2_out]
    return jnp.transpose(out, (0, 3, 1, 2)).astype(jnp.float32)


# --------------------------------------------------------------------------- #
# Parameter init + pure-JAX reference                                          #
# --------------------------------------------------------------------------- #
def _init_conv_params(key, c1, c2, k):
    kw_, kg, kb, km, kv = jax.random.split(key, 5)
    return dict(
        w=0.1 * jax.random.normal(kw_, (c2, c1, k, k), jnp.float32),
        gamma=1.0 + 0.1 * jax.random.normal(kg, (c2,), jnp.float32),
        beta=0.1 * jax.random.normal(kb, (c2,), jnp.float32),
        mean=0.1 * jax.random.normal(km, (c2,), jnp.float32),
        var=1.0 + 0.1 * jax.random.uniform(kv, (c2,), jnp.float32),
    )


def init_c2f_params(key, c1, c2, n=1, e=0.5):
    c = int(c2 * e)
    keys = jax.random.split(key, 2 + n)
    params = dict(
        cv1=_init_conv_params(keys[0], c1, 2 * c, 1),
        cv2=_init_conv_params(keys[1], (2 + n) * c, c2, 1),
        m=[],
    )
    for i in range(n):
        ks = jax.random.split(keys[2 + i], 4)
        params["m"].append(dict(
            cv1=_init_conv_params(ks[0], c, c, 1),
            cv2=_init_conv_params(ks[1], c, c, 1),
            cv3=_init_conv_params(ks[2], c, c // 2, 3),
            cv4=_init_conv_params(ks[3], c, c // 2, 3),
        ))
    return params


def _bf(x):
    """Mirror the kernel's bf16 inter-layer storage / MXU operand rounding."""
    return x.astype(jnp.bfloat16).astype(jnp.float32)


def _ref_conv(x, p, eps=1e-5):
    k = p["w"].shape[-1]
    pad = k // 2
    y = jax.lax.conv_general_dilated(
        _bf(x), _bf(p["w"]), (1, 1), [(pad, pad), (pad, pad)],
        dimension_numbers=("NCHW", "OIHW", "NCHW"))
    scale = (p["gamma"] / jnp.sqrt(p["var"] + eps)).reshape(1, -1, 1, 1)
    bias = (p["beta"] - p["mean"] * p["gamma"] / jnp.sqrt(p["var"] + eps)
            ).reshape(1, -1, 1, 1)
    y = y * scale + bias
    return y * jax.nn.sigmoid(y)


def c2f_reference(x, params):
    y = _bf(_ref_conv(_bf(x), params["cv1"]))
    c = params["cv1"]["w"].shape[0] // 2
    ys = [y[:, :c], y[:, c:]]
    for m in params["m"]:
        xin = ys[-1]
        z1 = _bf(_ref_conv(xin, m["cv1"]) + xin)
        z2 = _bf(_ref_conv(xin, m["cv2"]) + xin)
        x3 = _bf(_ref_conv(z1, m["cv3"]))
        x4 = _bf(_ref_conv(z2, m["cv4"]))
        ys.append(jnp.concatenate([x3, x4], axis=1))
    return _ref_conv(jnp.concatenate(ys, axis=1), params["cv2"])


if __name__ == "__main__":
    # C2f(c1=4, c2=8, n=1, e=0.5) on a (2, 4, 16, 16) input.
    N, C1, C2, H, W, n = 2, 4, 8, 16, 16, 1

    key = jax.random.PRNGKey(0)
    kx, kp = jax.random.split(key)
    x = jax.random.normal(kx, (N, C1, H, W), dtype=jnp.float32)
    params = init_c2f_params(kp, C1, C2, n=n)

    out = jax.block_until_ready(c2f_forward(x, params))
    assert out.shape == (N, C2, H, W)

    ref = c2f_reference(x, params)
    max_err = float(jnp.max(jnp.abs(out - ref)))
    assert jnp.allclose(out, ref, atol=3e-2, rtol=3e-2), max_err

    print("KERNEL_OK")
</pallas_src>

<mosaic_0001>
module attributes {stable_mosaic.version = 11 : i64} {
  func.func @kernel(%arg0: i32, %arg1: memref<256x128xbf16, #tpu.memory_space<vmem>>, %arg2: memref<128x128xbf16, #tpu.memory_space<vmem>>, %arg3: memref<1x128xf32, #tpu.memory_space<vmem>>, %arg4: memref<1x128xf32, #tpu.memory_space<vmem>>, %arg5: memref<128x128xbf16, #tpu.memory_space<vmem>>, %arg6: memref<1x128xf32, #tpu.memory_space<vmem>>, %arg7: memref<1x128xf32, #tpu.memory_space<vmem>>, %arg8: memref<256x128xbf16, #tpu.memory_space<vmem>>, %arg9: memref<256x128xbf16, #tpu.memory_space<vmem>>) attributes {dimension_semantics = [#tpu.dimension_semantics<parallel>], iteration_bounds = array<i64: 2>, scalar_prefetch = 0 : i64, scratch_operands = 0 : i64, tpu.core_type = #tpu.core_type<tc>, window_params = [{transform_indices = @transform_0, window_bounds = array<i64: 256, 128>}, {pipeline_mode = #tpu.pipeline_mode<synchronous>, transform_indices = @transform_1, window_bounds = array<i64: 128, 128>}, {pipeline_mode = #tpu.pipeline_mode<synchronous>, transform_indices = @transform_2, window_bounds = array<i64: 1, 128>}, {pipeline_mode = #tpu.pipeline_mode<synchronous>, transform_indices = @transform_3, window_bounds = array<i64: 1, 128>}, {pipeline_mode = #tpu.pipeline_mode<synchronous>, transform_indices = @transform_4, window_bounds = array<i64: 128, 128>}, {pipeline_mode = #tpu.pipeline_mode<synchronous>, transform_indices = @transform_5, window_bounds = array<i64: 1, 128>}, {pipeline_mode = #tpu.pipeline_mode<synchronous>, transform_indices = @transform_6, window_bounds = array<i64: 1, 128>}, {transform_indices = @transform_7, window_bounds = array<i64: 256, 128>}, {transform_indices = @transform_8, window_bounds = array<i64: 256, 128>}]} {
    %c0 = arith.constant 0 : index
    %c0_0 = arith.constant 0 : index
    %0 = vector.load %arg1[%c0, %c0_0] : memref<256x128xbf16, #tpu.memory_space<vmem>>, vector<256x128xbf16>
    %c0_1 = arith.constant 0 : index
    %c0_2 = arith.constant 0 : index
    %1 = vector.load %arg2[%c0_1, %c0_2] : memref<128x128xbf16, #tpu.memory_space<vmem>>, vector<128x128xbf16>
    %cst = arith.constant dense<0.000000e+00> : vector<256x128xf32>
    %2 = tpu.matmul %0, %1, %cst {dimension_numbers = #tpu.dot_dimension_numbers<[1], [0], [0], [1], [0, 0, 1, 1], [], []>} : vector<256x128xbf16>, vector<128x128xbf16>, vector<256x128xf32> -> vector<256x128xf32>
    %c0_3 = arith.constant 0 : index
    %c0_4 = arith.constant 0 : index
    %3 = vector.load %arg3[%c0_3, %c0_4] : memref<1x128xf32, #tpu.memory_space<vmem>>, vector<1x128xf32>
    %c0_5 = arith.constant 0 : index
    %c0_6 = arith.constant 0 : index
    %4 = vector.load %arg4[%c0_5, %c0_6] : memref<1x128xf32, #tpu.memory_space<vmem>>, vector<1x128xf32>
    %5 = vector.broadcast %3 : vector<1x128xf32> to vector<256x128xf32>
    %6 = arith.mulf %2, %5 : vector<256x128xf32>
    %7 = vector.broadcast %4 : vector<1x128xf32> to vector<256x128xf32>
    %8 = arith.addf %6, %7 : vector<256x128xf32>
    %cst_7 = arith.constant 5.000000e-01 : f32
    %9 = vector.broadcast %cst_7 : f32 to vector<256x128xf32>
    %10 = arith.mulf %9, %8 : vector<256x128xf32>
    %11 = math.tanh %10 : vector<256x128xf32>
    %cst_8 = arith.constant 5.000000e-01 : f32
    %12 = vector.broadcast %cst_8 : f32 to vector<256x128xf32>
    %13 = arith.mulf %12, %11 : vector<256x128xf32>
    %cst_9 = arith.constant 5.000000e-01 : f32
    %14 = vector.broadcast %cst_9 : f32 to vector<256x128xf32>
    %15 = arith.addf %13, %14 : vector<256x128xf32>
    %16 = arith.mulf %8, %15 : vector<256x128xf32>
    %17 = arith.truncf %16 : vector<256x128xf32> to vector<256x128xbf16>
    %c0_10 = arith.constant 0 : index
    %c0_11 = arith.constant 0 : index
    %18 = vector.load %arg8[%c0_10, %c0_11] : memref<256x128xbf16, #tpu.memory_space<vmem>>, vector<256x128xbf16>
    tpu.vector_store %arg8[%c0_10, %c0_11], %17 {strides = array<i32>} : memref<256x128xbf16, #tpu.memory_space<vmem>>, vector<256x128xbf16>,
    %c0_12 = arith.constant 0 : index
    %c0_13 = arith.constant 0 : index
    %19 = vector.load %arg5[%c0_12, %c0_13] : memref<128x128xbf16, #tpu.memory_space<vmem>>, vector<128x128xbf16>
    %cst_14 = arith.constant dense<0.000000e+00> : vector<256x128xf32>
    %20 = tpu.matmul %0, %19, %cst_14 {dimension_numbers = #tpu.dot_dimension_numbers<[1], [0], [0], [1], [0, 0, 1, 1], [], []>} : vector<256x128xbf16>, vector<128x128xbf16>, vector<256x128xf32> -> vector<256x128xf32>
    %c0_15 = arith.constant 0 : index
    %c0_16 = arith.constant 0 : index
    %21 = vector.load %arg6[%c0_15, %c0_16] : memref<1x128xf32, #tpu.memory_space<vmem>>, vector<1x128xf32>
    %c0_17 = arith.constant 0 : index
    %c0_18 = arith.constant 0 : index
    %22 = vector.load %arg7[%c0_17, %c0_18] : memref<1x128xf32, #tpu.memory_space<vmem>>, vector<1x128xf32>
    %23 = vector.broadcast %21 : vector<1x128xf32> to vector<256x128xf32>
    %24 = arith.mulf %20, %23 : vector<256x128xf32>
    %25 = vector.broadcast %22 : vector<1x128xf32> to vector<256x128xf32>
    %26 = arith.addf %24, %25 : vector<256x128xf32>
    %cst_19 = arith.constant 5.000000e-01 : f32
    %27 = vector.broadcast %cst_19 : f32 to vector<256x128xf32>
    %28 = arith.mulf %27, %26 : vector<256x128xf32>
    %29 = math.tanh %28 : vector<256x128xf32>
    %cst_20 = arith.constant 5.000000e-01 : f32
    %30 = vector.broadcast %cst_20 : f32 to vector<256x128xf32>
    %31 = arith.mulf %30, %29 : vector<256x128xf32>
    %cst_21 = arith.constant 5.000000e-01 : f32
    %32 = vector.broadcast %cst_21 : f32 to vector<256x128xf32>
    %33 = arith.addf %31, %32 : vector<256x128xf32>
    %34 = arith.mulf %26, %33 : vector<256x128xf32>
    %35 = arith.truncf %34 : vector<256x128xf32> to vector<256x128xbf16>
    %c0_22 = arith.constant 0 : index
    %c0_23 = arith.constant 0 : index
    %36 = vector.load %arg9[%c0_22, %c0_23] : memref<256x128xbf16, #tpu.memory_space<vmem>>, vector<256x128xbf16>
    tpu.vector_store %arg9[%c0_22, %c0_23], %35 {strides = array<i32>} : memref<256x128xbf16, #tpu.memory_space<vmem>>, vector<256x128xbf16>,
    return
  }
  func.func @transform_0(%arg0: i32) -> (i32, i32) {
    %c0_i32 = arith.constant 0 : i32
    %c0_i32_0 = arith.constant 0 : i32
    return %arg0, %c0_i32 : i32, i32
  }
  func.func @transform_1(%arg0: i32) -> (i32, i32) {
    %c0_i32 = arith.constant 0 : i32
    %c0_i32_0 = arith.constant 0 : i32
    %c0_i32_1 = arith.constant 0 : i32
    return %c0_i32, %c0_i32_0 : i32, i32
  }
  func.func @transform_2(%arg0: i32) -> (i32, i32) {
    %c0_i32 = arith.constant 0 : i32
    %c0_i32_0 = arith.constant 0 : i32
    %c0_i32_1 = arith.constant 0 : i32
    return %c0_i32, %c0_i32_0 : i32, i32
  }
  func.func @transform_3(%arg0: i32) -> (i32, i32) {
    %c0_i32 = arith.constant 0 : i32
    %c0_i32_0 = arith.constant 0 : i32
    %c0_i32_1 = arith.constant 0 : i32
    return %c0_i32, %c0_i32_0 : i32, i32
  }
  func.func @transform_4(%arg0: i32) -> (i32, i32) {
    %c0_i32 = arith.constant 0 : i32
    %c0_i32_0 = arith.constant 0 : i32
    %c0_i32_1 = arith.constant 0 : i32
    return %c0_i32, %c0_i32_0 : i32, i32
  }
  func.func @transform_5(%arg0: i32) -> (i32, i32) {
    %c0_i32 = arith.constant 0 : i32
    %c0_i32_0 = arith.constant 0 : i32
    %c0_i32_1 = arith.constant 0 : i32
    return %c0_i32, %c0_i32_0 : i32, i32
  }
  func.func @transform_6(%arg0: i32) -> (i32, i32) {
    %c0_i32 = arith.constant 0 : i32
    %c0_i32_0 = arith.constant 0 : i32
    %c0_i32_1 = arith.constant 0 : i32
    return %c0_i32, %c0_i32_0 : i32, i32
  }
  func.func @transform_7(%arg0: i32) -> (i32, i32) {
    %c0_i32 = arith.constant 0 : i32
    %c0_i32_0 = arith.constant 0 : i32
    return %arg0, %c0_i32 : i32, i32
  }
  func.func @transform_8(%arg0: i32) -> (i32, i32) {
    %c0_i32 = arith.constant 0 : i32
    %c0_i32_0 = arith.constant 0 : i32
    return %arg0, %c0_i32 : i32, i32
  }
}

module attributes {stable_mosaic.version = 11 : i64} {
  func.func @kernel(%arg0: i32, %arg1: memref<256x128xbf16, #tpu.memory_space<vmem>>, %arg2: memref<128x128xbf16, #tpu.memory_space<vmem>>, %arg3: memref<1x128xf32, #tpu.memory_space<vmem>>, %arg4: memref<1x128xf32, #tpu.memory_space<vmem>>, %arg5: memref<128x128xbf16, #tpu.memory_space<vmem>>, %arg6: memref<1x128xf32, #tpu.memory_space<vmem>>, %arg7: memref<1x128xf32, #tpu.memory_space<vmem>>, %arg8: memref<256x128xbf16, #tpu.memory_space<vmem>>, %arg9: memref<256x128xbf16, #tpu.memory_space<vmem>>) attributes {dimension_semantics = [#tpu.dimension_semantics<parallel>], iteration_bounds = array<i64: 2>, scalar_prefetch = 0 : i64, scratch_operands = 0 : i64, tpu.core_type = #tpu.core_type<tc>, window_params = [{transform_indices = @transform_0, window_bounds = array<i64: 256, 128>}, {pipeline_mode = #tpu.pipeline_mode<synchronous>, transform_indices = @transform_1, window_bounds = array<i64: 128, 128>}, {pipeline_mode = #tpu.pipeline_mode<synchronous>, transform_indices = @transform_2, window_bounds = array<i64: 1, 128>}, {pipeline_mode = #tpu.pipeline_mode<synchronous>, transform_indices = @transform_3, window_bounds = array<i64: 1, 128>}, {pipeline_mode = #tpu.pipeline_mode<synchronous>, transform_indices = @transform_4, window_bounds = array<i64: 128, 128>}, {pipeline_mode = #tpu.pipeline_mode<synchronous>, transform_indices = @transform_5, window_bounds = array<i64: 1, 128>}, {pipeline_mode = #tpu.pipeline_mode<synchronous>, transform_indices = @transform_6, window_bounds = array<i64: 1, 128>}, {transform_indices = @transform_7, window_bounds = array<i64: 256, 128>}, {transform_indices = @transform_8, window_bounds = array<i64: 256, 128>}]} {
    %c0 = arith.constant 0 : index
    %c0_0 = arith.constant 0 : index
    %0 = vector.load %arg1[%c0, %c0_0] : memref<256x128xbf16, #tpu.memory_space<vmem>>, vector<256x128xbf16>
    %c0_1 = arith.constant 0 : index
    %c0_2 = arith.constant 0 : index
    %1 = vector.load %arg2[%c0_1, %c0_2] : memref<128x128xbf16, #tpu.memory_space<vmem>>, vector<128x128xbf16>
    %cst = arith.constant dense<0.000000e+00> : vector<256x128xf32>
    %2 = tpu.matmul %0, %1, %cst {dimension_numbers = #tpu.dot_dimension_numbers<[1], [0], [0], [1], [0, 0, 1, 1], [], []>} : vector<256x128xbf16>, vector<128x128xbf16>, vector<256x128xf32> -> vector<256x128xf32>
    %c0_3 = arith.constant 0 : index
    %c0_4 = arith.constant 0 : index
    %3 = vector.load %arg3[%c0_3, %c0_4] : memref<1x128xf32, #tpu.memory_space<vmem>>, vector<1x128xf32>
    %c0_5 = arith.constant 0 : index
    %c0_6 = arith.constant 0 : index
    %4 = vector.load %arg4[%c0_5, %c0_6] : memref<1x128xf32, #tpu.memory_space<vmem>>, vector<1x128xf32>
    %5 = vector.broadcast %3 : vector<1x128xf32> to vector<256x128xf32>
    %6 = arith.mulf %2, %5 : vector<256x128xf32>
    %7 = vector.broadcast %4 : vector<1x128xf32> to vector<256x128xf32>
    %8 = arith.addf %6, %7 : vector<256x128xf32>
    %cst_7 = arith.constant 5.000000e-01 : f32
    %9 = vector.broadcast %cst_7 : f32 to vector<256x128xf32>
    %10 = arith.mulf %9, %8 : vector<256x128xf32>
    %11 = math.tanh %10 : vector<256x128xf32>
    %cst_8 = arith.constant 5.000000e-01 : f32
    %12 = vector.broadcast %cst_8 : f32 to vector<256x128xf32>
    %13 = arith.mulf %12, %11 : vector<256x128xf32>
    %cst_9 = arith.constant 5.000000e-01 : f32
    %14 = vector.broadcast %cst_9 : f32 to vector<256x128xf32>
    %15 = arith.addf %13, %14 : vector<256x128xf32>
    %16 = arith.mulf %8, %15 : vector<256x128xf32>
    %17 = arith.extf %0 : vector<256x128xbf16> to vector<256x128xf32>
    %18 = arith.addf %16, %17 : vector<256x128xf32>
    %19 = arith.truncf %18 : vector<256x128xf32> to vector<256x128xbf16>
    %c0_10 = arith.constant 0 : index
    %c0_11 = arith.constant 0 : index
    %20 = vector.load %arg8[%c0_10, %c0_11] : memref<256x128xbf16, #tpu.memory_space<vmem>>, vector<256x128xbf16>
    tpu.vector_store %arg8[%c0_10, %c0_11], %19 {strides = array<i32>} : memref<256x128xbf16, #tpu.memory_space<vmem>>, vector<256x128xbf16>,
    %c0_12 = arith.constant 0 : index
    %c0_13 = arith.constant 0 : index
    %21 = vector.load %arg5[%c0_12, %c0_13] : memref<128x128xbf16, #tpu.memory_space<vmem>>, vector<128x128xbf16>
    %cst_14 = arith.constant dense<0.000000e+00> : vector<256x128xf32>
    %22 = tpu.matmul %0, %21, %cst_14 {dimension_numbers = #tpu.dot_dimension_numbers<[1], [0], [0], [1], [0, 0, 1, 1], [], []>} : vector<256x128xbf16>, vector<128x128xbf16>, vector<256x128xf32> -> vector<256x128xf32>
    %c0_15 = arith.constant 0 : index
    %c0_16 = arith.constant 0 : index
    %23 = vector.load %arg6[%c0_15, %c0_16] : memref<1x128xf32, #tpu.memory_space<vmem>>, vector<1x128xf32>
    %c0_17 = arith.constant 0 : index
    %c0_18 = arith.constant 0 : index
    %24 = vector.load %arg7[%c0_17, %c0_18] : memref<1x128xf32, #tpu.memory_space<vmem>>, vector<1x128xf32>
    %25 = vector.broadcast %23 : vector<1x128xf32> to vector<256x128xf32>
    %26 = arith.mulf %22, %25 : vector<256x128xf32>
    %27 = vector.broadcast %24 : vector<1x128xf32> to vector<256x128xf32>
    %28 = arith.addf %26, %27 : vector<256x128xf32>
    %cst_19 = arith.constant 5.000000e-01 : f32
    %29 = vector.broadcast %cst_19 : f32 to vector<256x128xf32>
    %30 = arith.mulf %29, %28 : vector<256x128xf32>
    %31 = math.tanh %30 : vector<256x128xf32>
    %cst_20 = arith.constant 5.000000e-01 : f32
    %32 = vector.broadcast %cst_20 : f32 to vector<256x128xf32>
    %33 = arith.mulf %32, %31 : vector<256x128xf32>
    %cst_21 = arith.constant 5.000000e-01 : f32
    %34 = vector.broadcast %cst_21 : f32 to vector<256x128xf32>
    %35 = arith.addf %33, %34 : vector<256x128xf32>
    %36 = arith.mulf %28, %35 : vector<256x128xf32>
    %37 = arith.extf %0 : vector<256x128xbf16> to vector<256x128xf32>
    %38 = arith.addf %36, %37 : vector<256x128xf32>
    %39 = arith.truncf %38 : vector<256x128xf32> to vector<256x128xbf16>
    %c0_22 = arith.constant 0 : index
    %c0_23 = arith.constant 0 : index
    %40 = vector.load %arg9[%c0_22, %c0_23] : memref<256x128xbf16, #tpu.memory_space<vmem>>, vector<256x128xbf16>
    tpu.vector_store %arg9[%c0_22, %c0_23], %39 {strides = array<i32>} : memref<256x128xbf16, #tpu.memory_space<vmem>>, vector<256x128xbf16>,
    return
  }
  func.func @transform_0(%arg0: i32) -> (i32, i32) {
    %c0_i32 = arith.constant 0 : i32
    %c0_i32_0 = arith.constant 0 : i32
    return %arg0, %c0_i32 : i32, i32
  }
  func.func @transform_1(%arg0: i32) -> (i32, i32) {
    %c0_i32 = arith.constant 0 : i32
    %c0_i32_0 = arith.constant 0 : i32
    %c0_i32_1 = arith.constant 0 : i32
    return %c0_i32, %c0_i32_0 : i32, i32
  }
  func.func @transform_2(%arg0: i32) -> (i32, i32) {
    %c0_i32 = arith.constant 0 : i32
    %c0_i32_0 = arith.constant 0 : i32
    %c0_i32_1 = arith.constant 0 : i32
    return %c0_i32, %c0_i32_0 : i32, i32
  }
  func.func @transform_3(%arg0: i32) -> (i32, i32) {
    %c0_i32 = arith.constant 0 : i32
    %c0_i32_0 = arith.constant 0 : i32
    %c0_i32_1 = arith.constant 0 : i32
    return %c0_i32, %c0_i32_0 : i32, i32
  }
  func.func @transform_4(%arg0: i32) -> (i32, i32) {
    %c0_i32 = arith.constant 0 : i32
    %c0_i32_0 = arith.constant 0 : i32
    %c0_i32_1 = arith.constant 0 : i32
    return %c0_i32, %c0_i32_0 : i32, i32
  }
  func.func @transform_5(%arg0: i32) -> (i32, i32) {
    %c0_i32 = arith.constant 0 : i32
    %c0_i32_0 = arith.constant 0 : i32
    %c0_i32_1 = arith.constant 0 : i32
    return %c0_i32, %c0_i32_0 : i32, i32
  }
  func.func @transform_6(%arg0: i32) -> (i32, i32) {
    %c0_i32 = arith.constant 0 : i32
    %c0_i32_0 = arith.constant 0 : i32
    %c0_i32_1 = arith.constant 0 : i32
    return %c0_i32, %c0_i32_0 : i32, i32
  }
  func.func @transform_7(%arg0: i32) -> (i32, i32) {
    %c0_i32 = arith.constant 0 : i32
    %c0_i32_0 = arith.constant 0 : i32
    return %arg0, %c0_i32 : i32, i32
  }
  func.func @transform_8(%arg0: i32) -> (i32, i32) {
    %c0_i32 = arith.constant 0 : i32
    %c0_i32_0 = arith.constant 0 : i32
    return %arg0, %c0_i32 : i32, i32
  }
}

module attributes {stable_mosaic.version = 11 : i64} {
  func.func @_conv3x3_pair_kernel(%arg0: i32, %arg1: memref<1x18x18x128xbf16, #tpu.memory_space<vmem>>, %arg2: memref<1x18x18x128xbf16, #tpu.memory_space<vmem>>, %arg3: memref<9x128x128xbf16, #tpu.memory_space<vmem>>, %arg4: memref<9x128x128xbf16, #tpu.memory_space<vmem>>, %arg5: memref<1x128xf32, #tpu.memory_space<vmem>>, %arg6: memref<1x128xf32, #tpu.memory_space<vmem>>, %arg7: memref<1x16x16x128xbf16, #tpu.memory_space<vmem>>) attributes {dimension_semantics = [#tpu.dimension_semantics<parallel>], iteration_bounds = array<i64: 2>, scalar_prefetch = 0 : i64, scratch_operands = 0 : i64, tpu.core_type = #tpu.core_type<tc>, window_params = [{transform_indices = @transform_0, window_bounds = array<i64: 1, 18, 18, 128>}, {transform_indices = @transform_1, window_bounds = array<i64: 1, 18, 18, 128>}, {pipeline_mode = #tpu.pipeline_mode<synchronous>, transform_indices = @transform_2, window_bounds = array<i64: 9, 128, 128>}, {pipeline_mode = #tpu.pipeline_mode<synchronous>, transform_indices = @transform_3, window_bounds = array<i64: 9, 128, 128>}, {pipeline_mode = #tpu.pipeline_mode<synchronous>, transform_indices = @transform_4, window_bounds = array<i64: 1, 128>}, {pipeline_mode = #tpu.pipeline_mode<synchronous>, transform_indices = @transform_5, window_bounds = array<i64: 1, 128>}, {transform_indices = @transform_6, window_bounds = array<i64: 1, 16, 16, 128>}]} {
    %c0 = arith.constant 0 : index
    %c0_0 = arith.constant 0 : index
    %c0_1 = arith.constant 0 : index
    %c0_2 = arith.constant 0 : index
    %0 = vector.load %arg1[%c0, %c0_0, %c0_1, %c0_2] : memref<1x18x18x128xbf16, #tpu.memory_space<vmem>>, vector<1x18x18x128xbf16>
    %1 = vector.shape_cast %0 : vector<1x18x18x128xbf16> to vector<18x18x128xbf16>
    %c0_3 = arith.constant 0 : index
    %c0_4 = arith.constant 0 : index
    %c0_5 = arith.constant 0 : index
    %c0_6 = arith.constant 0 : index
    %2 = vector.load %arg2[%c0_3, %c0_4, %c0_5, %c0_6] : memref<1x18x18x128xbf16, #tpu.memory_space<vmem>>, vector<1x18x18x128xbf16>
    %3 = vector.shape_cast %2 : vector<1x18x18x128xbf16> to vector<18x18x128xbf16>
    %cst = arith.constant 0.000000e+00 : f32
    %4 = vector.broadcast %cst : f32 to vector<256x128xf32>
    %5 = vector.extract_strided_slice %1 {offsets = [0, 0, 0], sizes = [16, 16, 128], strides = [1, 1, 1]} : vector<18x18x128xbf16> to vector<16x16x128xbf16>
    %6 = vector.shape_cast %5 : vector<16x16x128xbf16> to vector<256x128xbf16>
    %7 = vector.extract_strided_slice %3 {offsets = [0, 0, 0], sizes = [16, 16, 128], strides = [1, 1, 1]} : vector<18x18x128xbf16> to vector<16x16x128xbf16>
    %8 = vector.shape_cast %7 : vector<16x16x128xbf16> to vector<256x128xbf16>
    %c0_7 = arith.constant 0 : index
    %c0_8 = arith.constant 0 : index
    %c0_9 = arith.constant 0 : index
    %9 = vector.load %arg3[%c0_7, %c0_8, %c0_9] : memref<9x128x128xbf16, #tpu.memory_space<vmem>>, vector<1x128x128xbf16>
    %10 = vector.shape_cast %9 : vector<1x128x128xbf16> to vector<128x128xbf16>
    %cst_10 = arith.constant dense<0.000000e+00> : vector<256x128xf32>
    %11 = tpu.matmul %6, %10, %cst_10 {dimension_numbers = #tpu.dot_dimension_numbers<[1], [0], [0], [1], [0, 0, 1, 1], [], []>} : vector<256x128xbf16>, vector<128x128xbf16>, vector<256x128xf32> -> vector<256x128xf32>
    %12 = arith.addf %4, %11 : vector<256x128xf32>
    %c0_11 = arith.constant 0 : index
    %c0_12 = arith.constant 0 : index
    %c0_13 = arith.constant 0 : index
    %13 = vector.load %arg4[%c0_11, %c0_12, %c0_13] : memref<9x128x128xbf16, #tpu.memory_space<vmem>>, vector<1x128x128xbf16>
    %14 = vector.shape_cast %13 : vector<1x128x128xbf16> to vector<128x128xbf16>
    %cst_14 = arith.constant dense<0.000000e+00> : vector<256x128xf32>
    %15 = tpu.matmul %8, %14, %cst_14 {dimension_numbers = #tpu.dot_dimension_numbers<[1], [0], [0], [1], [0, 0, 1, 1], [], []>} : vector<256x128xbf16>, vector<128x128xbf16>, vector<256x128xf32> -> vector<256x128xf32>
    %16 = arith.addf %12, %15 : vector<256x128xf32>
    %17 = vector.extract_strided_slice %1 {offsets = [0, 1, 0], sizes = [16, 16, 128], strides = [1, 1, 1]} : vector<18x18x128xbf16> to vector<16x16x128xbf16>
    %18 = vector.shape_cast %17 : vector<16x16x128xbf16> to vector<256x128xbf16>
    %19 = vector.extract_strided_slice %3 {offsets = [0, 1, 0], sizes = [16, 16, 128], strides = [1, 1, 1]} : vector<18x18x128xbf16> to vector<16x16x128xbf16>
    %20 = vector.shape_cast %19 : vector<16x16x128xbf16> to vector<256x128xbf16>
    %c1 = arith.constant 1 : index
    %c0_15 = arith.constant 0 : index
    %c0_16 = arith.constant 0 : index
    %21 = vector.load %arg3[%c1, %c0_15, %c0_16] : memref<9x128x128xbf16, #tpu.memory_space<vmem>>, vector<1x128x128xbf16>
    %22 = vector.shape_cast %21 : vector<1x128x128xbf16> to vector<128x128xbf16>
    %cst_17 = arith.constant dense<0.000000e+00> : vector<256x128xf32>
    %23 = tpu.matmul %18, %22, %cst_17 {dimension_numbers = #tpu.dot_dimension_numbers<[1], [0], [0], [1], [0, 0, 1, 1], [], []>} : vector<256x128xbf16>, vector<128x128xbf16>, vector<256x128xf32> -> vector<256x128xf32>
    %24 = arith.addf %16, %23 : vector<256x128xf32>
    %c1_18 = arith.constant 1 : index
    %c0_19 = arith.constant 0 : index
    %c0_20 = arith.constant 0 : index
    %25 = vector.load %arg4[%c1_18, %c0_19, %c0_20] : memref<9x128x128xbf16, #tpu.memory_space<vmem>>, vector<1x128x128xbf16>
    %26 = vector.shape_cast %25 : vector<1x128x128xbf16> to vector<128x128xbf16>
    %cst_21 = arith.constant dense<0.000000e+00> : vector<256x128xf32>
    %27 = tpu.matmul %20, %26, %cst_21 {dimension_numbers = #tpu.dot_dimension_numbers<[1], [0], [0], [1], [0, 0, 1, 1], [], []>} : vector<256x128xbf16>, vector<128x128xbf16>, vector<256x128xf32> -> vector<256x128xf32>
    %28 = arith.addf %24, %27 : vector<256x128xf32>
    %29 = vector.extract_strided_slice %1 {offsets = [0, 2, 0], sizes = [16, 16, 128], strides = [1, 1, 1]} : vector<18x18x128xbf16> to vector<16x16x128xbf16>
    %30 = vector.shape_cast %29 : vector<16x16x128xbf16> to vector<256x128xbf16>
    %31 = vector.extract_strided_slice %3 {offsets = [0, 2, 0], sizes = [16, 16, 128], strides = [1, 1, 1]} : vector<18x18x128xbf16> to vector<16x16x128xbf16>
    %32 = vector.shape_cast %31 : vector<16x16x128xbf16> to vector<256x128xbf16>
    %c2 = arith.constant 2 : index
    %c0_22 = arith.constant 0 : index
    %c0_23 = arith.constant 0 : index
    %33 = vector.load %arg3[%c2, %c0_22, %c0_23] : memref<9x128x128xbf16, #tpu.memory_space<vmem>>, vector<1x128x128xbf16>
    %34 = vector.shape_cast %33 : vector<1x128x128xbf16> to vector<128x128xbf16>
    %cst_24 = arith.constant dense<0.000000e+00> : vector<256x128xf32>
    %35 = tpu.matmul %30, %34, %cst_24 {dimension_numbers = #tpu.dot_dimension_numbers<[1], [0], [0], [1], [0, 0, 1, 1], [], []>} : vector<256x128xbf16>, vector<128x128xbf16>, vector<256x128xf32> -> vector<256x128xf32>
    %36 = arith.addf %28, %35 : vector<256x128xf32>
    %c2_25 = arith.constant 2 : index
    %c0_26 = arith.constant 0 : index
    %c0_27 = arith.constant 0 : index
    %37 = vector.load %arg4[%c2_25, %c0_26, %c0_27] : memref<9x128x128xbf16, #tpu.memory_space<vmem>>, vector<1x128x128xbf16>
    %38 = vector.shape_cast %37 : vector<1x128x128xbf16> to vector<128x128xbf16>
    %cst_28 = arith.constant dense<0.000000e+00> : vector<256x128xf32>
    %39 = tpu.matmul %32, %38, %cst_28 {dimension_numbers = #tpu.dot_dimension_numbers<[1], [0], [0], [1], [0, 0, 1, 1], [], []>} : vector<256x128xbf16>, vector<128x128xbf16>, vector<256x128xf32> -> vector<256x128xf32>
    %40 = arith.addf %36, %39 : vector<256x128xf32>
    %41 = vector.extract_strided_slice %1 {offsets = [1, 0, 0], sizes = [16, 16, 128], strides = [1, 1, 1]} : vector<18x18x128xbf16> to vector<16x16x128xbf16>
    %42 = vector.shape_cast %41 : vector<16x16x128xbf16> to vector<256x128xbf16>
    %43 = vector.extract_strided_slice %3 {offsets = [1, 0, 0], sizes = [16, 16, 128], strides = [1, 1, 1]} : vector<18x18x128xbf16> to vector<16x16x128xbf16>
    %44 = vector.shape_cast %43 : vector<16x16x128xbf16> to vector<256x128xbf16>
    %c3 = arith.constant 3 : index
    %c0_29 = arith.constant 0 : index
    %c0_30 = arith.constant 0 : index
    %45 = vector.load %arg3[%c3, %c0_29, %c0_30] : memref<9x128x128xbf16, #tpu.memory_space<vmem>>, vector<1x128x128xbf16>
    %46 = vector.shape_cast %45 : vector<1x128x128xbf16> to vector<128x128xbf16>
    %cst_31 = arith.constant dense<0.000000e+00> : vector<256x128xf32>
    %47 = tpu.matmul %42, %46, %cst_31 {dimension_numbers = #tpu.dot_dimension_numbers<[1], [0], [0], [1], [0, 0, 1, 1], [], []>} : vector<256x128xbf16>, vector<128x128xbf16>, vector<256x128xf32> -> vector<256x128xf32>
    %48 = arith.addf %40, %47 : vector<256x128xf32>
    %c3_32 = arith.constant 3 : index
    %c0_33 = arith.constant 0 : index
    %c0_34 = arith.constant 0 : index
    %49 = vector.load %arg4[%c3_32, %c0_33, %c0_34] : memref<9x128x128xbf16, #tpu.memory_space<vmem>>, vector<1x128x128xbf16>
    %50 = vector.shape_cast %49 : vector<1x128x128xbf16> to vector<128x128xbf16>
    %cst_35 = arith.constant dense<0.000000e+00> : vector<256x128xf32>
    %51 = tpu.matmul %44, %50, %cst_35 {dimension_numbers = #tpu.dot_dimension_numbers<[1], [0], [0], [1], [0, 0, 1, 1], [], []>} : vector<256x128xbf16>, vector<128x128xbf16>, vector<256x128xf32> -> vector<256x128xf32>
    %52 = arith.addf %48, %51 : vector<256x128xf32>
    %53 = vector.extract_strided_slice %1 {offsets = [1, 1, 0], sizes = [16, 16, 128], strides = [1, 1, 1]} : vector<18x18x128xbf16> to vector<16x16x128xbf16>
    %54 = vector.shape_cast %53 : vector<16x16x128xbf16> to vector<256x128xbf16>
    %55 = vector.extract_strided_slice %3 {offsets = [1, 1, 0], sizes = [16, 16, 128], strides = [1, 1, 1]} : vector<18x18x128xbf16> to vector<16x16x128xbf16>
    %56 = vector.shape_cast %55 : vector<16x16x128xbf16> to vector<256x128xbf16>
    %c4 = arith.constant 4 : index
    %c0_36 = arith.constant 0 : index
    %c0_37 = arith.constant 0 : index
    %57 = vector.load %arg3[%c4, %c0_36, %c0_37] : memref<9x128x128xbf16, #tpu.memory_space<vmem>>, vector<1x128x128xbf16>
    %58 = vector.shape_cast %57 : vector<1x128x128xbf16> to vector<128x128xbf16>
    %cst_38 = arith.constant dense<0.000000e+00> : vector<256x128xf32>
    %59 = tpu.matmul %54, %58, %cst_38 {dimension_numbers = #tpu.dot_dimension_numbers<[1], [0], [0], [1], [0, 0, 1, 1], [], []>} : vector<256x128xbf16>, vector<128x128xbf16>, vector<256x128xf32> -> vector<256x128xf32>
    %60 = arith.addf %52, %59 : vector<256x128xf32>
    %c4_39 = arith.constant 4 : index
    %c0_40 = arith.constant 0 : index
    %c0_41 = arith.constant 0 : index
    %61 = vector.load %arg4[%c4_39, %c0_40, %c0_41] : memref<9x128x128xbf16, #tpu.memory_space<vmem>>, vector<1x128x128xbf16>
    %62 = vector.shape_cast %61 : vector<1x128x128xbf16> to vector<128x128xbf16>
    %cst_42 = arith.constant dense<0.000000e+00> : vector<256x128xf32>
    %63 = tpu.matmul %56, %62, %cst_42 {dimension_numbers = #tpu.dot_dimension_numbers<[1], [0], [0], [1], [0, 0, 1, 1], [], []>} : vector<256x128xbf16>, vector<128x128xbf16>, vector<256x128xf32> -> vector<256x128xf32>
    %64 = arith.addf %60, %63 : vector<256x128xf32>
    %65 = vector.extract_strided_slice %1 {offsets = [1, 2, 0], sizes = [16, 16, 128], strides = [1, 1, 1]} : vector<18x18x128xbf16> to vector<16x16x128xbf16>
    %66 = vector.shape_cast %65 : vector<16x16x128xbf16> to vector<256x128xbf16>
    %67 = vector.extract_strided_slice %3 {offsets = [1, 2, 0], sizes = [16, 16, 128], strides = [1, 1, 1]} : vector<18x18x128xbf16> to vector<16x16x128xbf16>
    %68 = vector.shape_cast %67 : vector<16x16x128xbf16> to vector<256x128xbf16>
    %c5 = arith.constant 5 : index
    %c0_43 = arith.constant 0 : index
    %c0_44 = arith.constant 0 : index
    %69 = vector.load %arg3[%c5, %c0_43, %c0_44] : memref<9x128x128xbf16, #tpu.memory_space<vmem>>, vector<1x128x128xbf16>
    %70 = vector.shape_cast %69 : vector<1x128x128xbf16> to vector<128x128xbf16>
    %cst_45 = arith.constant dense<0.000000e+00> : vector<256x128xf32>
    %71 = tpu.matmul %66, %70, %cst_45 {dimension_numbers = #tpu.dot_dimension_numbers<[1], [0], [0], [1], [0, 0, 1, 1], [], []>} : vector<256x128xbf16>, vector<128x128xbf16>, vector<256x128xf32> -> vector<256x128xf32>
    %72 = arith.addf %64, %71 : vector<256x128xf32>
    %c5_46 = arith.constant 5 : index
    %c0_47 = arith.constant 0 : index
    %c0_48 = arith.constant 0 : index
    %73 = vector.load %arg4[%c5_46, %c0_47, %c0_48] : memref<9x128x128xbf16, #tpu.memory_space<vmem>>, vector<1x128x128xbf16>
    %74 = vector.shape_cast %73 : vector<1x128x128xbf16> to vector<128x128xbf16>
    %cst_49 = arith.constant dense<0.000000e+00> : vector<256x128xf32>
    %75 = tpu.matmul %68, %74, %cst_49 {dimension_numbers = #tpu.dot_dimension_numbers<[1], [0], [0], [1], [0, 0, 1, 1], [], []>} : vector<256x128xbf16>, vector<128x128xbf16>, vector<256x128xf32> -> vector<256x128xf32>
    %76 = arith.addf %72, %75 : vector<256x128xf32>
    %77 = vector.extract_strided_slice %1 {offsets = [2, 0, 0], sizes = [16, 16, 128], strides = [1, 1, 1]} : vector<18x18x128xbf16> to vector<16x16x128xbf16>
    %78 = vector.shape_cast %77 : vector<16x16x128xbf16> to vector<256x128xbf16>
    %79 = vector.extract_strided_slice %3 {offsets = [2, 0, 0], sizes = [16, 16, 128], strides = [1, 1, 1]} : vector<18x18x128xbf16> to vector<16x16x128xbf16>
    %80 = vector.shape_cast %79 : vector<16x16x128xbf16> to vector<256x128xbf16>
    %c6 = arith.constant 6 : index
    %c0_50 = arith.constant 0 : index
    %c0_51 = arith.constant 0 : index
    %81 = vector.load %arg3[%c6, %c0_50, %c0_51] : memref<9x128x128xbf16, #tpu.memory_space<vmem>>, vector<1x128x128xbf16>
    %82 = vector.shape_cast %81 : vector<1x128x128xbf16> to vector<128x128xbf16>
    %cst_52 = arith.constant dense<0.000000e+00> : vector<256x128xf32>
    %83 = tpu.matmul %78, %82, %cst_52 {dimension_numbers = #tpu.dot_dimension_numbers<[1], [0], [0], [1], [0, 0, 1, 1], [], []>} : vector<256x128xbf16>, vector<128x128xbf16>, vector<256x128xf32> -> vector<256x128xf32>
    %84 = arith.addf %76, %83 : vector<256x128xf32>
    %c6_53 = arith.constant 6 : index
    %c0_54 = arith.constant 0 : index
    %c0_55 = arith.constant 0 : index
    %85 = vector.load %arg4[%c6_53, %c0_54, %c0_55] : memref<9x128x128xbf16, #tpu.memory_space<vmem>>, vector<1x128x128xbf16>
    %86 = vector.shape_cast %85 : vector<1x128x128xbf16> to vector<128x128xbf16>
    %cst_56 = arith.constant dense<0.000000e+00> : vector<256x128xf32>
    %87 = tpu.matmul %80, %86, %cst_56 {dimension_numbers = #tpu.dot_dimension_numbers<[1], [0], [0], [1], [0, 0, 1, 1], [], []>} : vector<256x128xbf16>, vector<128x128xbf16>, vector<256x128xf32> -> vector<256x128xf32>
    %88 = arith.addf %84, %87 : vector<256x128xf32>
    %89 = vector.extract_strided_slice %1 {offsets = [2, 1, 0], sizes = [16, 16, 128], strides = [1, 1, 1]} : vector<18x18x128xbf16> to vector<16x16x128xbf16>
    %90 = vector.shape_cast %89 : vector<16x16x128xbf16> to vector<256x128xbf16>
    %91 = vector.extract_strided_slice %3 {offsets = [2, 1, 0], sizes = [16, 16, 128], strides = [1, 1, 1]} : vector<18x18x128xbf16> to vector<16x16x128xbf16>
    %92 = vector.shape_cast %91 : vector<16x16x128xbf16> to vector<256x128xbf16>
    %c7 = arith.constant 7 : index
    %c0_57 = arith.constant 0 : index
    %c0_58 = arith.constant 0 : index
    %93 = vector.load %arg3[%c7, %c0_57, %c0_58] : memref<9x128x128xbf16, #tpu.memory_space<vmem>>, vector<1x128x128xbf16>
    %94 = vector.shape_cast %93 : vector<1x128x128xbf16> to vector<128x128xbf16>
    %cst_59 = arith.constant dense<0.000000e+00> : vector<256x128xf32>
    %95 = tpu.matmul %90, %94, %cst_59 {dimension_numbers = #tpu.dot_dimension_numbers<[1], [0], [0], [1], [0, 0, 1, 1], [], []>} : vector<256x128xbf16>, vector<128x128xbf16>, vector<256x128xf32> -> vector<256x128xf32>
    %96 = arith.addf %88, %95 : vector<256x128xf32>
    %c7_60 = arith.constant 7 : index
    %c0_61 = arith.constant 0 : index
    %c0_62 = arith.constant 0 : index
    %97 = vector.load %arg4[%c7_60, %c0_61, %c0_62] : memref<9x128x128xbf16, #tpu.memory_space<vmem>>, vector<1x128x128xbf16>
    %98 = vector.shape_cast %97 : vector<1x128x128xbf16> to vector<128x128xbf16>
    %cst_63 = arith.constant dense<0.000000e+00> : vector<256x128xf32>
    %99 = tpu.matmul %92, %98, %cst_63 {dimension_numbers = #tpu.dot_dimension_numbers<[1], [0], [0], [1], [0, 0, 1, 1], [], []>} : vector<256x128xbf16>, vector<128x128xbf16>, vector<256x128xf32> -> vector<256x128xf32>
    %100 = arith.addf %96, %99 : vector<256x128xf32>
    %101 = vector.extract_strided_slice %1 {offsets = [2, 2, 0], sizes = [16, 16, 128], strides = [1, 1, 1]} : vector<18x18x128xbf16> to vector<16x16x128xbf16>
    %102 = vector.shape_cast %101 : vector<16x16x128xbf16> to vector<256x128xbf16>
    %103 = vector.extract_strided_slice %3 {offsets = [2, 2, 0], sizes = [16, 16, 128], strides = [1, 1, 1]} : vector<18x18x128xbf16> to vector<16x16x128xbf16>
    %104 = vector.shape_cast %103 : vector<16x16x128xbf16> to vector<256x128xbf16>
    %c8 = arith.constant 8 : index
    %c0_64 = arith.constant 0 : index
    %c0_65 = arith.constant 0 : index
    %105 = vector.load %arg3[%c8, %c0_64, %c0_65] : memref<9x128x128xbf16, #tpu.memory_space<vmem>>, vector<1x128x128xbf16>
    %106 = vector.shape_cast %105 : vector<1x128x128xbf16> to vector<128x128xbf16>
    %cst_66 = arith.constant dense<0.000000e+00> : vector<256x128xf32>
    %107 = tpu.matmul %102, %106, %cst_66 {dimension_numbers = #tpu.dot_dimension_numbers<[1], [0], [0], [1], [0, 0, 1, 1], [], []>} : vector<256x128xbf16>, vector<128x128xbf16>, vector<256x128xf32> -> vector<256x128xf32>
    %108 = arith.addf %100, %107 : vector<256x128xf32>
    %c8_67 = arith.constant 8 : index
    %c0_68 = arith.constant 0 : index
    %c0_69 = arith.constant 0 : index
    %109 = vector.load %arg4[%c8_67, %c0_68, %c0_69] : memref<9x128x128xbf16, #tpu.memory_space<vmem>>, vector<1x128x128xbf16>
    %110 = vector.shape_cast %109 : vector<1x128x128xbf16> to vector<128x128xbf16>
    %cst_70 = arith.constant dense<0.000000e+00> : vector<256x128xf32>
    %111 = tpu.matmul %104, %110, %cst_70 {dimension_numbers = #tpu.dot_dimension_numbers<[1], [0], [0], [1], [0, 0, 1, 1], [], []>} : vector<256x128xbf16>, vector<128x128xbf16>, vector<256x128xf32> -> vector<256x128xf32>
    %112 = arith.addf %108, %111 : vector<256x128xf32>
    %c0_71 = arith.constant 0 : index
    %c0_72 = arith.constant 0 : index
    %113 = vector.load %arg5[%c0_71, %c0_72] : memref<1x128xf32, #tpu.memory_space<vmem>>, vector<1x128xf32>
    %114 = vector.broadcast %113 : vector<1x128xf32> to vector<256x128xf32>
    %115 = arith.mulf %112, %114 : vector<256x128xf32>
    %c0_73 = arith.constant 0 : index
    %c0_74 = arith.constant 0 : index
    %116 = vector.load %arg6[%c0_73, %c0_74] : memref<1x128xf32, #tpu.memory_space<vmem>>, vector<1x128xf32>
    %117 = vector.broadcast %116 : vector<1x128xf32> to vector<256x128xf32>
    %118 = arith.addf %115, %117 : vector<256x128xf32>
    %cst_75 = arith.constant 5.000000e-01 : f32
    %119 = vector.broadcast %cst_75 : f32 to vector<256x128xf32>
    %120 = arith.mulf %119, %118 : vector<256x128xf32>
    %121 = math.tanh %120 : vector<256x128xf32>
    %cst_76 = arith.constant 5.000000e-01 : f32
    %122 = vector.broadcast %cst_76 : f32 to vector<256x128xf32>
    %123 = arith.mulf %122, %121 : vector<256x128xf32>
    %cst_77 = arith.constant 5.000000e-01 : f32
    %124 = vector.broadcast %cst_77 : f32 to vector<256x128xf32>
    %125 = arith.addf %123, %124 : vector<256x128xf32>
    %126 = arith.mulf %118, %125 : vector<256x128xf32>
    %127 = vector.shape_cast %126 : vector<256x128xf32> to vector<1x16x16x128xf32>
    %128 = arith.truncf %127 : vector<1x16x16x128xf32> to vector<1x16x16x128xbf16>
    %c0_78 = arith.constant 0 : index
    %c0_79 = arith.constant 0 : index
    %c0_80 = arith.constant 0 : index
    %c0_81 = arith.constant 0 : index
    %129 = vector.load %arg7[%c0_78, %c0_79, %c0_80, %c0_81] : memref<1x16x16x128xbf16, #tpu.memory_space<vmem>>, vector<1x16x16x128xbf16>
    tpu.vector_store %arg7[%c0_78, %c0_79, %c0_80, %c0_81], %128 {strides = array<i32>} : memref<1x16x16x128xbf16, #tpu.memory_space<vmem>>, vector<1x16x16x128xbf16>,
    return
  }
  func.func @transform_0(%arg0: i32) -> (i32, i32, i32, i32) {
    %c0_i32 = arith.constant 0 : i32
    %c0_i32_0 = arith.constant 0 : i32
    %c0_i32_1 = arith.constant 0 : i32
    %c0_i32_2 = arith.constant 0 : i32
    return %arg0, %c0_i32, %c0_i32_0, %c0_i32_1 : i32, i32, i32, i32
  }
  func.func @transform_1(%arg0: i32) -> (i32, i32, i32, i32) {
    %c0_i32 = arith.constant 0 : i32
    %c0_i32_0 = arith.constant 0 : i32
    %c0_i32_1 = arith.constant 0 : i32
    %c0_i32_2 = arith.constant 0 : i32
    return %arg0, %c0_i32, %c0_i32_0, %c0_i32_1 : i32, i32, i32, i32
  }
  func.func @transform_2(%arg0: i32) -> (i32, i32, i32) {
    %c0_i32 = arith.constant 0 : i32
    %c0_i32_0 = arith.constant 0 : i32
    %c0_i32_1 = arith.constant 0 : i32
    %c0_i32_2 = arith.constant 0 : i32
    return %c0_i32, %c0_i32_0, %c0_i32_1 : i32, i32, i32
  }
  func.func @transform_3(%arg0: i32) -> (i32, i32, i32) {
    %c0_i32 = arith.constant 0 : i32
    %c0_i32_0 = arith.constant 0 : i32
    %c0_i32_1 = arith.constant 0 : i32
    %c0_i32_2 = arith.constant 0 : i32
    return %c0_i32, %c0_i32_0, %c0_i32_1 : i32, i32, i32
  }
  func.func @transform_4(%arg0: i32) -> (i32, i32) {
    %c0_i32 = arith.constant 0 : i32
    %c0_i32_0 = arith.constant 0 : i32
    %c0_i32_1 = arith.constant 0 : i32
    return %c0_i32, %c0_i32_0 : i32, i32
  }
  func.func @transform_5(%arg0: i32) -> (i32, i32) {
    %c0_i32 = arith.constant 0 : i32
    %c0_i32_0 = arith.constant 0 : i32
    %c0_i32_1 = arith.constant 0 : i32
    return %c0_i32, %c0_i32_0 : i32, i32
  }
  func.func @transform_6(%arg0: i32) -> (i32, i32, i32, i32) {
    %c0_i32 = arith.constant 0 : i32
    %c0_i32_0 = arith.constant 0 : i32
    %c0_i32_1 = arith.constant 0 : i32
    %c0_i32_2 = arith.constant 0 : i32
    return %arg0, %c0_i32, %c0_i32_0, %c0_i32_1 : i32, i32, i32, i32
  }
}

module attributes {stable_mosaic.version = 11 : i64} {
  func.func @kernel(%arg0: i32, %arg1: memref<256x128xbf16, #tpu.memory_space<vmem>>, %arg2: memref<256x128xbf16, #tpu.memory_space<vmem>>, %arg3: memref<256x128xbf16, #tpu.memory_space<vmem>>, %arg4: memref<128x128xbf16, #tpu.memory_space<vmem>>, %arg5: memref<128x128xbf16, #tpu.memory_space<vmem>>, %arg6: memref<128x128xbf16, #tpu.memory_space<vmem>>, %arg7: memref<1x128xf32, #tpu.memory_space<vmem>>, %arg8: memref<1x128xf32, #tpu.memory_space<vmem>>, %arg9: memref<256x128xbf16, #tpu.memory_space<vmem>>) attributes {dimension_semantics = [#tpu.dimension_semantics<parallel>], iteration_bounds = array<i64: 2>, scalar_prefetch = 0 : i64, scratch_operands = 0 : i64, tpu.core_type = #tpu.core_type<tc>, window_params = [{transform_indices = @transform_0, window_bounds = array<i64: 256, 128>}, {transform_indices = @transform_1, window_bounds = array<i64: 256, 128>}, {transform_indices = @transform_2, window_bounds = array<i64: 256, 128>}, {pipeline_mode = #tpu.pipeline_mode<synchronous>, transform_indices = @transform_3, window_bounds = array<i64: 128, 128>}, {pipeline_mode = #tpu.pipeline_mode<synchronous>, transform_indices = @transform_4, window_bounds = array<i64: 128, 128>}, {pipeline_mode = #tpu.pipeline_mode<synchronous>, transform_indices = @transform_5, window_bounds = array<i64: 128, 128>}, {pipeline_mode = #tpu.pipeline_mode<synchronous>, transform_indices = @transform_6, window_bounds = array<i64: 1, 128>}, {pipeline_mode = #tpu.pipeline_mode<synchronous>, transform_indices = @transform_7, window_bounds = array<i64: 1, 128>}, {transform_indices = @transform_8, window_bounds = array<i64: 256, 128>}]} {
    %c0 = arith.constant 0 : index
    %c0_0 = arith.constant 0 : index
    %0 = vector.load %arg1[%c0, %c0_0] : memref<256x128xbf16, #tpu.memory_space<vmem>>, vector<256x128xbf16>
    %c0_1 = arith.constant 0 : index
    %c0_2 = arith.constant 0 : index
    %1 = vector.load %arg2[%c0_1, %c0_2] : memref<256x128xbf16, #tpu.memory_space<vmem>>, vector<256x128xbf16>
    %c0_3 = arith.constant 0 : index
    %c0_4 = arith.constant 0 : index
    %2 = vector.load %arg3[%c0_3, %c0_4] : memref<256x128xbf16, #tpu.memory_space<vmem>>, vector<256x128xbf16>
    %c0_5 = arith.constant 0 : index
    %c0_6 = arith.constant 0 : index
    %3 = vector.load %arg4[%c0_5, %c0_6] : memref<128x128xbf16, #tpu.memory_space<vmem>>, vector<128x128xbf16>
    %cst = arith.constant dense<0.000000e+00> : vector<256x128xf32>
    %4 = tpu.matmul %0, %3, %cst {dimension_numbers = #tpu.dot_dimension_numbers<[1], [0], [0], [1], [0, 0, 1, 1], [], []>} : vector<256x128xbf16>, vector<128x128xbf16>, vector<256x128xf32> -> vector<256x128xf32>
    %c0_7 = arith.constant 0 : index
    %c0_8 = arith.constant 0 : index
    %5 = vector.load %arg5[%c0_7, %c0_8] : memref<128x128xbf16, #tpu.memory_space<vmem>>, vector<128x128xbf16>
    %cst_9 = arith.constant dense<0.000000e+00> : vector<256x128xf32>
    %6 = tpu.matmul %1, %5, %cst_9 {dimension_numbers = #tpu.dot_dimension_numbers<[1], [0], [0], [1], [0, 0, 1, 1], [], []>} : vector<256x128xbf16>, vector<128x128xbf16>, vector<256x128xf32> -> vector<256x128xf32>
    %7 = arith.addf %4, %6 : vector<256x128xf32>
    %c0_10 = arith.constant 0 : index
    %c0_11 = arith.constant 0 : index
    %8 = vector.load %arg6[%c0_10, %c0_11] : memref<128x128xbf16, #tpu.memory_space<vmem>>, vector<128x128xbf16>
    %cst_12 = arith.constant dense<0.000000e+00> : vector<256x128xf32>
    %9 = tpu.matmul %2, %8, %cst_12 {dimension_numbers = #tpu.dot_dimension_numbers<[1], [0], [0], [1], [0, 0, 1, 1], [], []>} : vector<256x128xbf16>, vector<128x128xbf16>, vector<256x128xf32> -> vector<256x128xf32>
    %10 = arith.addf %7, %9 : vector<256x128xf32>
    %c0_13 = arith.constant 0 : index
    %c0_14 = arith.constant 0 : index
    %11 = vector.load %arg7[%c0_13, %c0_14] : memref<1x128xf32, #tpu.memory_space<vmem>>, vector<1x128xf32>
    %c0_15 = arith.constant 0 : index
    %c0_16 = arith.constant 0 : index
    %12 = vector.load %arg8[%c0_15, %c0_16] : memref<1x128xf32, #tpu.memory_space<vmem>>, vector<1x128xf32>
    %13 = vector.broadcast %11 : vector<1x128xf32> to vector<256x128xf32>
    %14 = arith.mulf %10, %13 : vector<256x128xf32>
    %15 = vector.broadcast %12 : vector<1x128xf32> to vector<256x128xf32>
    %16 = arith.addf %14, %15 : vector<256x128xf32>
    %cst_17 = arith.constant 5.000000e-01 : f32
    %17 = vector.broadcast %cst_17 : f32 to vector<256x128xf32>
    %18 = arith.mulf %17, %16 : vector<256x128xf32>
    %19 = math.tanh %18 : vector<256x128xf32>
    %cst_18 = arith.constant 5.000000e-01 : f32
    %20 = vector.broadcast %cst_18 : f32 to vector<256x128xf32>
    %21 = arith.mulf %20, %19 : vector<256x128xf32>
    %cst_19 = arith.constant 5.000000e-01 : f32
    %22 = vector.broadcast %cst_19 : f32 to vector<256x128xf32>
    %23 = arith.addf %21, %22 : vector<256x128xf32>
    %24 = arith.mulf %16, %23 : vector<256x128xf32>
    %25 = arith.truncf %24 : vector<256x128xf32> to vector<256x128xbf16>
    %c0_20 = arith.constant 0 : index
    %c0_21 = arith.constant 0 : index
    %26 = vector.load %arg9[%c0_20, %c0_21] : memref<256x128xbf16, #tpu.memory_space<vmem>>, vector<256x128xbf16>
    tpu.vector_store %arg9[%c0_20, %c0_21], %25 {strides = array<i32>} : memref<256x128xbf16, #tpu.memory_space<vmem>>, vector<256x128xbf16>,
    return
  }
  func.func @transform_0(%arg0: i32) -> (i32, i32) {
    %c0_i32 = arith.constant 0 : i32
    %c0_i32_0 = arith.constant 0 : i32
    return %arg0, %c0_i32 : i32, i32
  }
  func.func @transform_1(%arg0: i32) -> (i32, i32) {
    %c0_i32 = arith.constant 0 : i32
    %c0_i32_0 = arith.constant 0 : i32
    return %arg0, %c0_i32 : i32, i32
  }
  func.func @transform_2(%arg0: i32) -> (i32, i32) {
    %c0_i32 = arith.constant 0 : i32
    %c0_i32_0 = arith.constant 0 : i32
    return %arg0, %c0_i32 : i32, i32
  }
  func.func @transform_3(%arg0: i32) -> (i32, i32) {
    %c0_i32 = arith.constant 0 : i32
    %c0_i32_0 = arith.constant 0 : i32
    %c0_i32_1 = arith.constant 0 : i32
    return %c0_i32, %c0_i32_0 : i32, i32
  }
  func.func @transform_4(%arg0: i32) -> (i32, i32) {
    %c0_i32 = arith.constant 0 : i32
    %c0_i32_0 = arith.constant 0 : i32
    %c0_i32_1 = arith.constant 0 : i32
    return %c0_i32, %c0_i32_0 : i32, i32
  }
  func.func @transform_5(%arg0: i32) -> (i32, i32) {
    %c0_i32 = arith.constant 0 : i32
    %c0_i32_0 = arith.constant 0 : i32
    %c0_i32_1 = arith.constant 0 : i32
    return %c0_i32, %c0_i32_0 : i32, i32
  }
  func.func @transform_6(%arg0: i32) -> (i32, i32) {
    %c0_i32 = arith.constant 0 : i32
    %c0_i32_0 = arith.constant 0 : i32
    %c0_i32_1 = arith.constant 0 : i32
    return %c0_i32, %c0_i32_0 : i32, i32
  }
  func.func @transform_7(%arg0: i32) -> (i32, i32) {
    %c0_i32 = arith.constant 0 : i32
    %c0_i32_0 = arith.constant 0 : i32
    %c0_i32_1 = arith.constant 0 : i32
    return %c0_i32, %c0_i32_0 : i32, i32
  }
  func.func @transform_8(%arg0: i32) -> (i32, i32) {
    %c0_i32 = arith.constant 0 : i32
    %c0_i32_0 = arith.constant 0 : i32
    return %arg0, %c0_i32 : i32, i32
  }
}

</mosaic_0001>

<bundles_post_ra>
// kernel: c2f_forward.4
= control target key start
LH: loop header
LB: loop body
LE: loop exit
PB: predicated region body
PF: predicated region fallthrough
CT: control target
= control target key end

     0   :  { %s2524_s27 = smov 0   ;;  %s3203_s0 = inlined_call_operand.vmem [shape: bf16[512,128], index: 0, kind: input, shape index: {}]   ;;  %s3204_s1 = inlined_call_operand.vmem [shape: bf16[128,128], index: 1, kind: input, shape index: {}]   ;;  %s3205_s2 = inlined_call_operand.vmem [shape: f32[1,128], index: 2, kind: input, shape index: {}]   ;;  %s3206_s3 = inlined_call_operand.vmem [shape: f32[1,128], index: 3, kind: input, shape index: {}]   ;;  %s3207_s4 = inlined_call_operand.vmem [shape: bf16[128,128], index: 4, kind: input, shape index: {}]   ;;  %s3208_s5 = inlined_call_operand.vmem [shape: f32[1,128], index: 5, kind: input, shape index: {}]   ;;  %s3209_s6 = inlined_call_operand.vmem [shape: f32[1,128], index: 6, kind: input, shape index: {}]   ;;  %s3210_s7 = inlined_call_operand.vmem [shape: bf16[512,128], index: 7, kind: output, shape index: {0}]   ;;  %s3211_s8 = inlined_call_operand.vmem [shape: bf16[512,128], index: 8, kind: output, shape index: {1}]  }
   0x1 LB: > { %s1788_s28 = sadd.s32 4294967295, %s2477_s27   ;;  %p1792_p0 = scmp.ge.s32.totalorder %s2477_s27, 1  ;;  %s2477_s27 = sphi %s2524_s27, %s19_s27  }
   0x2   : > { %p266_p1 = scmp.lt.s32.totalorder %s2477_s27, 3 }
   0x4   : > { %p267_p2 = pnand %p1792_p0, %p266_p1 }
   0x6   : > { %270 = sbr.rel (%p267_p2) target bundleno = 395 (0x18b), region = 48 }
   0xd   : > { %v2307_v0 = vld [vmem:[%s3204_s1] sm:$0xff]   ;;  %s1793_s9 = sshll.u32 %s1788_s28, 5  ;;  %v2309_v2 = vld [vmem:[%s3204_s1 + $0x8] sm:$0xff]   ;;  %v2311_v4 = vld [vmem:[%s3204_s1 + $0x10] sm:$0xff]  }
   0xe   : > { %v2308_v1 = vld [vmem:[%s3207_s4] sm:$0xff]   ;;  %2203 = vmatprep.subr.bf16.mxu0 %v2307_v0  ;;  %p306_p3 = scmp.lt.s32.totalorder %s1793_s9, 63  ;;  %v2310_v3 = vld [vmem:[%s3207_s4 + $0x8] sm:$0xff]   ;;  %v2312_v5 = vld [vmem:[%s3207_s4 + $0x10] sm:$0xff]  }
   0xf   : > { %2251 = vmatprep.subr.bf16.mxu1 %v2308_v1  ;;  %2204 = vmatpush3.bf16.msra.mxu0 %v2307_v0  ;;  %v2313_v6 = vld [vmem:[%s3204_s1 + $0x18] sm:$0xff]   ;;  %v2315_v8 = vld [vmem:[%s3204_s1 + $0x20] sm:$0xff]   ;;  %v2317_v10 = vld [vmem:[%s3204_s1 + $0x28] sm:$0xff]  }
  0x10   : > { %2252 = vmatpush3.bf16.msra.mxu1 %v2308_v1  ;;  %2205 = vmatprep.subr.bf16.mxu0 %v2309_v2  ;;  %s3217_s9 = smov (!%p306_p3, %s1793_s9), 63  ;;  %v2314_v7 = vld [vmem:[%s3207_s4 + $0x18] sm:$0xff]   ;;  %v2316_v9 = vld [vmem:[%s3207_s4 + $0x20] sm:$0xff]   ;;  %v2318_v12 = vld [vmem:[%s3207_s4 + $0x28] sm:$0xff]  }
  0x11   : > { %2253 = vmatprep.subr.bf16.mxu1 %v2310_v3  ;;  %s2556_s24 = sshll.u32 %s3217_s9, 2  ;;  %v2319_v13 = vld [vmem:[%s3204_s1 + $0x30] sm:$0xff]   ;;  %v2321_v15 = vld [vmem:[%s3204_s1 + $0x38] sm:$0xff]   ;;  %v2607_v32 = vld [vmem:[%s3205_s2] ss:$0 sm:$0xff] }
  0x12   : > { %s2568_s11 = scalar_lea.vmem %s3203_s0, %s2556_s24  ;;  %v2320_v14 = vld [vmem:[%s3207_s4 + $0x30] sm:$0xff]   ;;  %v2322_v16 = vld [vmem:[%s3207_s4 + $0x38] sm:$0xff]   ;;  %v2612_v33 = vld [vmem:[%s3208_s5] ss:$0 sm:$0xff]  ;;  %s2744_s13 = scalar_lea.vmem %s3210_s7, %s2556_s24 }
  0x13   : > { %2206 = vmatpush3.bf16.msra.mxu0 %v2309_v2  ;;  %v2323_v11 = vld [vmem:[%s2568_s11] sm:$0xff]   ;;  %v2324_v17 = vld [vmem:[%s2568_s11 + $0x8] sm:$0xff]   ;;  %v2325_v18 = vld [vmem:[%s2568_s11 + $0x10] sm:$0xff]   ;;  %s2758_s16 = scalar_lea.vmem %s3211_s8, %s2556_s24 }
  0x14   : > { %2254 = vmatpush3.bf16.msra.mxu1 %v2310_v3  ;;  %2207 = vmatprep.subr.bf16.mxu0 %v2311_v4  ;;  %v2326_v19 = vld [vmem:[%s2568_s11 + $0x18] sm:$0xff]   ;;  %v2327_v20 = vld [vmem:[%s2568_s11 + $0x20] sm:$0xff]   ;;  %v2328_v21 = vld [vmem:[%s2568_s11 + $0x28] sm:$0xff]  }
  0x15   : > { %2255 = vmatprep.subr.bf16.mxu1 %v2312_v5  ;;  %2219 = vmatprep.mubr.bf16.mxu0 %v2323_v11  ;;  %v2329_v22 = vld [vmem:[%s2568_s11 + $0x30] sm:$0xff]   ;;  %v2330_v23 = vld [vmem:[%s2568_s11 + $0x38] sm:$0xff]   ;;  %v2331_v24 = vld [vmem:[%s2568_s11 + $0x40] sm:$0xff]  }
  0x16   : > { %2267 = vmatprep.mubr.bf16.mxu1 %v2323_v11  ;;  %v2332_v25 = vld [vmem:[%s2568_s11 + $0x48] sm:$0xff]   ;;  %v2333_v26 = vld [vmem:[%s2568_s11 + $0x50] sm:$0xff]   ;;  %v2334_v27 = vld [vmem:[%s2568_s11 + $0x58] sm:$0xff]  }
  0x17   : > { %2208 = vmatpush3.bf16.msra.mxu0 %v2311_v4  ;;  %v2335_v28 = vld [vmem:[%s2568_s11 + $0x60] sm:$0xff]   ;;  %v2336_v29 = vld [vmem:[%s2568_s11 + $0x68] sm:$0xff]   ;;  %v2337_v30 = vld [vmem:[%s2568_s11 + $0x70] sm:$0xff]  }
  0x18   : > { %2256 = vmatpush3.bf16.msra.mxu1 %v2312_v5  ;;  %2209 = vmatprep.subr.bf16.mxu0 %v2313_v6  ;;  %v2338_v31 = vld [vmem:[%s2568_s11 + $0x78] sm:$0xff]   ;;  %v2617_v35 = vld [vmem:[%s3206_s3] ss:$0 sm:$0xff] }
  0x19   : > { %2257 = vmatprep.subr.bf16.mxu1 %v2314_v7  ;;  %v2623_v38 = vld [vmem:[%s3209_s6] ss:$0 sm:$0xff] }
  0x1b   : > { %2210 = vmatpush3.bf16.msra.mxu0 %v2313_v6 }
  0x1c   : > { %2258 = vmatpush3.bf16.msra.mxu1 %v2314_v7  ;;  %2211 = vmatprep.subr.bf16.mxu0 %v2315_v8 }
  0x1d   : > { %2259 = vmatprep.subr.bf16.mxu1 %v2316_v9 }
  0x1f   : > { %2212 = vmatpush3.bf16.msra.mxu0 %v2315_v8 }
  0x20   : > { %2260 = vmatpush3.bf16.msra.mxu1 %v2316_v9  ;;  %2213 = vmatprep.subr.bf16.mxu0 %v2317_v10 }
  0x21   : > { %2261 = vmatprep.subr.bf16.mxu1 %v2318_v12 }
  0x23   : > { %2214 = vmatpush3.bf16.msra.mxu0 %v2317_v10 }
  0x24   : > { %2262 = vmatpush3.bf16.msra.mxu1 %v2318_v12  ;;  %2215 = vmatprep.subr.bf16.mxu0 %v2319_v13 }
  0x25   : > { %2263 = vmatprep.subr.bf16.mxu1 %v2320_v14 }
  0x27   : > { %2216 = vmatpush3.bf16.msra.mxu0 %v2319_v13 }
  0x28   : > { %2264 = vmatpush3.bf16.msra.mxu1 %v2320_v14  ;;  %2217 = vmatprep.subr.bf16.mxu0 %v2321_v15 }
  0x29   : > { %2265 = vmatprep.subr.bf16.mxu1 %v2322_v16 }
  0x2b   : > { %2218 = vmatpush3.bf16.msra.mxu0 %v2321_v15 }
  0x2c   : > { %2266 = vmatpush3.bf16.msra.mxu1 %v2322_v16 }
  0x2e   : > { %2220 = vmatmul.mubr.bf16.vlgmr.msra.gmra.mrb[0].mxu0 %v2324_v17 }
  0x2f   : > { %2268 = vmatmul.mubr.bf16.vlgmr.msra.gmra.mrb[0].mxu1 %v2324_v17  ;;  %2223 = vmatprep.mubr.bf16.mxu0 %v2325_v18 }
  0x30   : > { %2271 = vmatprep.mubr.bf16.mxu1 %v2325_v18 }
  0x36   : > { %2224 = vmatmul.mubr.bf16.gmra.mrb[4].mxu0 %v2326_v19 }
  0x37   : > { %2272 = vmatmul.mubr.bf16.gmra.mrb[4].mxu1 %v2326_v19  ;;  %2227 = vmatprep.mubr.bf16.mxu0 %v2327_v20 }
  0x38   : > { %2275 = vmatprep.mubr.bf16.mxu1 %v2327_v20 }
  0x3e   : > { %2228 = vmatmul.mubr.bf16.gmra.mrb[8].mxu0 %v2328_v21 }
  0x3f   : > { %2276 = vmatmul.mubr.bf16.gmra.mrb[8].mxu1 %v2328_v21  ;;  %2231 = vmatprep.mubr.bf16.mxu0 %v2329_v22 }
  0x40   : > { %2279 = vmatprep.mubr.bf16.mxu1 %v2329_v22 }
  0x46   : > { %2232 = vmatmul.mubr.bf16.gmra.mrb[12].mxu0 %v2330_v23 }
  0x47   : > { %2280 = vmatmul.mubr.bf16.gmra.mrb[12].mxu1 %v2330_v23  ;;  %2235 = vmatprep.mubr.bf16.mxu0 %v2331_v24 }
  0x48   : > { %2283 = vmatprep.mubr.bf16.mxu1 %v2331_v24 }
  0x4e   : > { %2236 = vmatmul.mubr.bf16.gmra.mrb[16].mxu0 %v2332_v25 }
  0x4f   : > { %2284 = vmatmul.mubr.bf16.gmra.mrb[16].mxu1 %v2332_v25  ;;  %2239 = vmatprep.mubr.bf16.mxu0 %v2333_v26 }
  0x50   : > { %2287 = vmatprep.mubr.bf16.mxu1 %v2333_v26 }
  0x56   : > { %2240 = vmatmul.mubr.bf16.gmra.mrb[20].mxu0 %v2334_v27 }
  0x57   : > { %2288 = vmatmul.mubr.bf16.gmra.mrb[20].mxu1 %v2334_v27  ;;  %2243 = vmatprep.mubr.bf16.mxu0 %v2335_v28 }
  0x58   : > { %2291 = vmatprep.mubr.bf16.mxu1 %v2335_v28 }
  0x5e   : > { %2244 = vmatmul.mubr.bf16.gmra.mrb[24].mxu0 %v2336_v29 }
  0x5f   : > { %2292 = vmatmul.mubr.bf16.gmra.mrb[24].mxu1 %v2336_v29  ;;  %2247 = vmatprep.mubr.bf16.mxu0 %v2337_v30 }
  0x60   : > { %2295 = vmatprep.mubr.bf16.mxu1 %v2337_v30 }
  0x66   : > { %2248 = vmatmul.mubr.bf16.gmra.mrb[28].mxu0 %v2338_v31 }
  0x67   : > { %2296 = vmatmul.mubr.bf16.gmra.mrb[28].mxu1 %v2338_v31 }
 0x101   : > { %v2221_v34 = vpop.f32.mrb[0].mxu0 }
 0x102   : > { %v687_v36 = vmul.f32 %v2221_v34, %v2607_v32  ;;  %v2269_v37 = vpop.f32.mrb[0].mxu1  ;;  %v550_v39 = vpop.f32.mrb[1].mxu0 }
 0x103   : > { %v1310_v40 = vmul.f32 %v2269_v37, %v2612_v33  ;;  %v685_v41 = vmul.f32 %v2607_v32, %v550_v39  ;;  %v1173_v42 = vpop.f32.mrb[1].mxu1  ;;  %v2222_v43 = vpop.f32.mrb[2].mxu0 }
 0x104   : > { %v2628_v44 = vadd.f32 %v2617_v35, %v687_v36  ;;  %v1308_v45 = vmul.f32 %v2612_v33, %v1173_v42  ;;  %v688_v46 = vmul.f32 %v2222_v43, %v2607_v32  ;;  %v2270_v47 = vpop.f32.mrb[2].mxu1  ;;  %v553_v48 = vpop.f32.mrb[3].mxu0 }
 0x105   : > { %v2633_v49 = vadd.f32 %v2623_v38, %v1310_v40  ;;  %v2636_v50 = vadd.f32 %v2617_v35, %v685_v41  ;;  %v1311_v51 = vmul.f32 %v2270_v47, %v2612_v33  ;;  %v686_v52 = vmul.f32 %v2607_v32, %v553_v48  ;;  %v1176_v53 = vpop.f32.mrb[3].mxu1 }
 0x106   : > { %v757_v54 = vmul.f32 0.5, %v2628_v44  ;;  %v2642_v55 = vadd.f32 %v2623_v38, %v1308_v45  ;;  %v2645_v56 = vadd.f32 %v2617_v35, %v688_v46  ;;  %v1309_v57 = vmul.f32 %v2612_v33, %v1176_v53 }
 0x107   : > { %v1380_v58 = vmul.f32 0.5, %v2633_v49  ;;  %v755_v59 = vmul.f32 0.5, %v2636_v50  ;;  %v2651_v60 = vadd.f32 %v2623_v38, %v1311_v51  ;;  %v2654_v61 = vadd.f32 %v2617_v35, %v686_v52 }
 0x108   : > { %2339 = vtanh.f32 %v757_v54  ;;  %v1378_v62 = vmul.f32 0.5, %v2642_v55  ;;  %v758_v63 = vmul.f32 0.5, %v2645_v56  ;;  %v2659_v0 = vadd.f32 %v2623_v38, %v1309_v57 }
 0x109   : > { %2341 = vtanh.f32 %v1380_v58  ;;  %v1381_v1 = vmul.f32 0.5, %v2651_v60  ;;  %v2225_v2 = vpop.f32.mrb[4].mxu0  ;;  %v756_v3 = vmul.f32 0.5, %v2654_v61 }
 0x10a   : > { %2343 = vtanh.f32 %v755_v59  ;;  %v691_v4 = vmul.f32 %v2225_v2, %v2607_v32  ;;  %v2273_v5 = vpop.f32.mrb[4].mxu1  ;;  %v566_v6 = vpop.f32.mrb[5].mxu0  ;;  %v1379_v7 = vmul.f32 0.5, %v2659_v0 }
 0x10b   : > { %2345 = vtanh.f32 %v1378_v62  ;;  %v1314_v8 = vmul.f32 %v2273_v5, %v2612_v33  ;;  %v689_v9 = vmul.f32 %v2607_v32, %v566_v6  ;;  %v1189_v10 = vpop.f32.mrb[5].mxu1  ;;  %v2226_v11 = vpop.f32.mrb[6].mxu0 }
 0x10c   : > { %2347 = vtanh.f32 %v758_v63  ;;  %v2668_v12 = vadd.f32 %v2617_v35, %v691_v4  ;;  %v1312_v13 = vmul.f32 %v2612_v33, %v1189_v10  ;;  %v692_v14 = vmul.f32 %v2226_v11, %v2607_v32  ;;  %v2274_v15 = vpop.f32.mrb[6].mxu1  ;;  %v569_v16 = vpop.f32.mrb[7].mxu0 }
 0x10d   : > { %2349 = vtanh.f32 %v1381_v1  ;;  %v2673_v17 = vadd.f32 %v2623_v38, %v1314_v8  ;;  %v2676_v18 = vadd.f32 %v2617_v35, %v689_v9  ;;  %v1315_v19 = vmul.f32 %v2274_v15, %v2612_v33  ;;  %v1192_v20 = vpop.f32.mrb[7].mxu1 }
 0x10e   : > { %2351 = vtanh.f32 %v756_v3  ;;  %v761_v21 = vmul.f32 0.5, %v2668_v12  ;;  %v2681_v22 = vadd.f32 %v2623_v38, %v1312_v13  ;;  %v2684_v23 = vadd.f32 %v2617_v35, %v692_v14 }
 0x10f   : > { %2353 = vtanh.f32 %v1379_v7  ;;  %v1384_v24 = vmul.f32 0.5, %v2673_v17  ;;  %v759_v25 = vmul.f32 0.5, %v2676_v18  ;;  %v2689_v26 = vadd.f32 %v2623_v38, %v1315_v19 }
 0x110   : > { %2355 = vtanh.f32 %v761_v21  ;;  %v1382_v27 = vmul.f32 0.5, %v2681_v22  ;;  %v762_v28 = vmul.f32 0.5, %v2684_v23  ;;  %v690_v29 = vmul.f32 %v2607_v32, %v569_v16 }
 0x111   : > { %2357 = vtanh.f32 %v1384_v24  ;;  %v1385_v30 = vmul.f32 0.5, %v2689_v26  ;;  %v1313_v31 = vmul.f32 %v2612_v33, %v1192_v20  ;;  %v2229_v34 = vpop.f32.mrb[8].mxu0 }
 0x112   : > { %v2340_v36 = vpop.eup %2339  ;;  %2359 = vtanh.f32 %v759_v25  ;;  %v2697_v37 = vadd.f32 %v2617_v35, %v690_v29  ;;  %v695_v39 = vmul.f32 %v2229_v34, %v2607_v32  ;;  %v2277_v40 = vpop.f32.mrb[8].mxu1 }
 0x113   : > { %v582_v41 = vpop.f32.mrb[9].mxu0  ;;  %v2342_v42 = vpop.eup %2341  ;;  %v821_v43 = vmul.f32 0.5, %v2340_v36  ;;  %2361 = vtanh.f32 %v1382_v27  ;;  %v2701_v45 = vadd.f32 %v2623_v38, %v1313_v31  ;;  %v1318_v46 = vmul.f32 %v2277_v40, %v2612_v33 }
 0x114   : > { %v2704_v47 = vpop.f32.mrb[9].mxu1  ;;  %v2706_v48 = vpop.f32.mrb[10].mxu0  ;;  %v1444_v52 = vmul.f32 0.5, %v2342_v42  ;;  %2363 = vtanh.f32 %v762_v28  ;;  %v760_v53 = vmul.f32 0.5, %v2697_v37  ;;  %v2710_v54 = vadd.f32 %v2617_v35, %v695_v39 }
 0x115   : > { %v2344_v51 = vpop.eup %2343  ;;  %v2712_v57 = vpop.f32.mrb[10].mxu1  ;;  %v853_v62 = vadd.f32 0.5, %v821_v43  ;;  %2365 = vtanh.f32 %v1385_v30  ;;  %v1383_v1 = vmul.f32 0.5, %v2701_v45  ;;  %v2724_v24 = vadd.f32 %v2623_v38, %v1318_v46 }
 0x116   : > { %v2714_v58 = vpop.f32.mrb[11].mxu0  ;;  %v2346_v59 = vpop.eup %2345  ;;  %v819_v63 = vmul.f32 0.5, %v2344_v51  ;;  %v1476_v4 = vadd.f32 0.5, %v1444_v52  ;;  %2367 = vtanh.f32 %v760_v53  ;;  %v765_v6 = vmul.f32 0.5, %v2710_v54 }
 0x117   : > { %v2717_v2 = vpop.f32.mrb[11].mxu1  ;;  %v2348_v3 = vpop.eup %2347  ;;  %v1442_v5 = vmul.f32 0.5, %v2346_v59  ;;  %v885_v8 = vmul.f32 %v853_v62, %v2628_v44  ;;  %2369 = vtanh.f32 %v1383_v1  ;;  %v1388_v40 = vmul.f32 0.5, %v2724_v24 }
 0x118   : > { %v2350_v7 = vpop.eup %2349  ;;  %v851_v9 = vadd.f32 0.5, %v819_v63  ;;  %v822_v10 = vmul.f32 0.5, %v2348_v3  ;;  %v1508_v13 = vmul.f32 %v1476_v4, %v2633_v49  ;;  %2371 = vtanh.f32 %v765_v6 }
 0x119   : > { %v2352_v11 = vpop.eup %2351  ;;  %v1474_v14 = vadd.f32 0.5, %v1442_v5  ;;  %v1445_v15 = vmul.f32 0.5, %v2350_v7  ;;  %v2726_v25 = vpop.f32.mrb[12].mxu0  ;;  %v693_v49 = vmul.f32 %v2607_v32, %v582_v41  ;;  %2373 = vtanh.f32 %v1388_v40 }
 0x11a   : > { %v2354_v16 = vpop.eup %2353  ;;  %v883_v19 = vmul.f32 %v851_v9, %v2636_v50  ;;  %v854_v20 = vadd.f32 0.5, %v822_v10  ;;  %v820_v21 = vmul.f32 0.5, %v2352_v11  ;;  %v2730_v30 = vpop.f32.mrb[12].mxu1  ;;  %v1316_v40 = vmul.f32 %v2612_v33, %v2704_v47 }
 0x11b   : > { %v2356_v44 = vpop.eup %2355  ;;  %v1506_v27 = vmul.f32 %v1474_v14, %v2642_v55  ;;  %v1477_v28 = vadd.f32 0.5, %v1445_v15  ;;  %v1443_v29 = vmul.f32 0.5, %v2354_v16  ;;  %v2732_v31 = vpop.f32.mrb[13].mxu0 }
 0x11c   : > { %v2358_v50 = vpop.eup %2357  ;;  %v886_v34 = vmul.f32 %v854_v20, %v2645_v56  ;;  %v852_v36 = vadd.f32 0.5, %v820_v21  ;;  %v825_v39 = vmul.f32 0.5, %v2356_v44  ;;  %v2736_v42 = vpop.f32.mrb[13].mxu1  ;;  %v2748_v56 = vadd.f32 %v2617_v35, %v693_v49 }
 0x11d   : > { %v2738_v43 = vpop.f32.mrb[14].mxu0  ;;  %v2360_v55 = vpop.eup %2359  ;;  %v1509_v41 = vmul.f32 %v1477_v28, %v2651_v60  ;;  %v1475_v46 = vadd.f32 0.5, %v1443_v29  ;;  %v1448_v51 = vmul.f32 0.5, %v2358_v50 }
 0x11e   : > { %v2750_v52 = vpop.f32.mrb[14].mxu1  ;;  %v2752_v53 = vpop.f32.mrb[15].mxu0  ;;  %v1973_v62 = vpack.c.bf16 %v886_v34, %v885_v8  ;;  %v884_v63 = vmul.f32 %v852_v36, %v2654_v61  ;;  %v857_v60 = vadd.f32 0.5, %v825_v39  ;;  %v823_v1 = vmul.f32 0.5, %v2360_v55 }
 0x11f   : > { %v2362_v59 = vpop.eup %2361  ;;  %v2761_v3 = vpop.f32.mrb[15].mxu1  ;;  %v2053_v5 = vpack.c.bf16 %v1509_v41, %v1508_v13  ;;  %v1507_v6 = vmul.f32 %v1475_v46, %v2659_v0  ;;  %v1480_v7 = vadd.f32 0.5, %v1448_v51 }
 0x120   : > { %v2364_v4 = vpop.eup %2363  ;;  %v1446_v9 = vmul.f32 0.5, %v2362_v59  ;;  %2125 = vst [vmem:[%s2744_s13 + $0x8] sm:$0xff] %v1973_v62   ;;  %v1968_v10 = vpack.c.bf16 %v884_v63, %v883_v19  ;;  %v889_v11 = vmul.f32 %v857_v60, %v2668_v12  ;;  %v855_v14 = vadd.f32 0.5, %v823_v1 }
 0x121   : > { %v2366_v8 = vpop.eup %2365  ;;  %v826_v61 = vmul.f32 0.5, %v2364_v4  ;;  %2140 = vst [vmem:[%s2758_s16 + $0x8] sm:$0xff] %v2053_v5   ;;  %v2048_v16 = vpack.c.bf16 %v1507_v6, %v1506_v27  ;;  %v1512_v20 = vmul.f32 %v1480_v7, %v2673_v17  ;;  %v2770_v19 = vpop.f32.mrb[16].mxu0  ;;  %v763_v27 = vmul.f32 0.5, %v2748_v56 }
 0x122   : > { %v2368_v15 = vpop.eup %2367  ;;  %v1478_v21 = vadd.f32 0.5, %v1446_v9  ;;  %v1449_v13 = vmul.f32 0.5, %v2366_v8  ;;  %1969 = vst [vmem:[%s2744_s13] sm:$0xff] %v1968_v10   ;;  %v887_v0 = vmul.f32 %v855_v14, %v2676_v18  ;;  %v2775_v17 = vpop.f32.mrb[16].mxu1  ;;  %v696_v59 = vmul.f32 %v2706_v48, %v2607_v32 }
 0x123   : > { %v2370_v44 = vpop.eup %2369  ;;  %v858_v28 = vadd.f32 0.5, %v826_v61  ;;  %v824_v29 = vmul.f32 0.5, %v2368_v15  ;;  %2049 = vst [vmem:[%s2758_s16] sm:$0xff] %v2048_v16   ;;  %v2777_v36 = vpop.f32.mrb[17].mxu0  ;;  %2375 = vtanh.f32 %v763_v27  ;;  %v2795_v1 = vadd.f32 %v2623_v38, %v1316_v40 }
 0x124   : > { %v2372_v12 = vpop.eup %2371  ;;  %v1510_v49 = vmul.f32 %v1478_v21, %v2681_v22  ;;  %v1481_v50 = vadd.f32 0.5, %v1449_v13  ;;  %v1447_v34 = vmul.f32 0.5, %v2370_v44  ;;  %v2782_v41 = vpop.f32.mrb[17].mxu1  ;;  %v2801_v48 = vadd.f32 %v2617_v35, %v696_v59 }
 0x125   : > { %v890_v39 = vmul.f32 %v858_v28, %v2684_v23  ;;  %v856_v18 = vadd.f32 0.5, %v824_v29  ;;  %v829_v55 = vmul.f32 0.5, %v2372_v12  ;;  %v2784_v46 = vpop.f32.mrb[18].mxu0  ;;  %v2789_v62 = vpop.f32.mrb[18].mxu1  ;;  %v1319_v6 = vmul.f32 %v2712_v57, %v2612_v33 }
 0x126   : > { %v1513_v22 = vmul.f32 %v1481_v50, %v2689_v26  ;;  %v1479_v51 = vadd.f32 0.5, %v1447_v34  ;;  %v2791_v23 = vpop.f32.mrb[19].mxu0  ;;  %v2797_v4 = vpop.f32.mrb[19].mxu1  ;;  %v1386_v9 = vmul.f32 0.5, %v2795_v1  ;;  %v694_v8 = vmul.f32 %v2607_v32, %v2714_v58 }
 0x127   : > { %v1983_v63 = vpack.c.bf16 %v890_v39, %v889_v11  ;;  %v888_v47 = vmul.f32 %v856_v18, %v2697_v37  ;;  %v861_v60 = vadd.f32 0.5, %v829_v55  ;;  %v2815_v11 = vadd.f32 %v2623_v38, %v1319_v6 }
 0x128   : > { %v2063_v26 = vpack.c.bf16 %v1513_v22, %v1512_v20  ;;  %v1511_v5 = vmul.f32 %v1479_v51, %v2701_v45  ;;  %v766_v45 = vmul.f32 0.5, %v2801_v48  ;;  %v1317_v57 = vmul.f32 %v2612_v33, %v2717_v2 }
 0x129   : > { %2127 = vst [vmem:[%s2744_s13 + $0x18] sm:$0xff] %v1983_v63   ;;  %v1978_v7 = vpack.c.bf16 %v888_v47, %v887_v0  ;;  %v2807_v37 = vmul.f32 %v861_v60, %v2710_v54  ;;  %2377 = vtanh.f32 %v1386_v9  ;;  %v2821_v54 = vadd.f32 %v2617_v35, %v694_v8  ;;  %v2827_v61 = vpop.f32.mrb[20].mxu0 }
 0x12a   : > { %2142 = vst [vmem:[%s2758_s16 + $0x18] sm:$0xff] %v2063_v26   ;;  %v2058_v10 = vpack.c.bf16 %v1511_v5, %v1510_v49  ;;  %v699_v14 = vmul.f32 %v2726_v25, %v2607_v32  ;;  %v1322_v58 = vmul.f32 %v2730_v30, %v2612_v33  ;;  %2379 = vtanh.f32 %v766_v45  ;;  %v2836_v20 = vpop.f32.mrb[20].mxu1  ;;  %v2838_v21 = vpop.f32.mrb[21].mxu0 }
 0x12b   : > { %2126 = vst [vmem:[%s2744_s13 + $0x10] sm:$0xff] %v1978_v7   ;;  %v1389_v15 = vmul.f32 0.5, %v2815_v11  ;;  %v2832_v16 = vadd.f32 %v2623_v38, %v1317_v57  ;;  %v697_v2 = vmul.f32 %v2607_v32, %v2732_v31  ;;  %v2374_v25 = vpop.eup %2373  ;;  %v764_v13 = vmul.f32 0.5, %v2821_v54  ;;  %v2849_v28 = vpop.f32.mrb[21].mxu1 }
 0x12c   : > { %2141 = vst [vmem:[%s2758_s16 + $0x10] sm:$0xff] %v2058_v10   ;;  %v2842_v30 = vadd.f32 %v2617_v35, %v699_v14  ;;  %v2845_v44 = vadd.f32 %v2623_v38, %v1322_v58  ;;  %v1320_v0 = vmul.f32 %v2612_v33, %v2736_v42  ;;  %v2851_v29 = vpop.f32.mrb[22].mxu0  ;;  %v1452_v31 = vmul.f32 0.5, %v2374_v25  ;;  %v2857_v50 = vpop.f32.mrb[22].mxu1 }
 0x12d   : > { %2381 = vtanh.f32 %v1389_v15  ;;  %v1387_v12 = vmul.f32 0.5, %v2832_v16  ;;  %v2855_v49 = vadd.f32 %v2617_v35, %v697_v2  ;;  %v2859_v34 = vpop.f32.mrb[23].mxu0  ;;  %v2866_v18 = vpop.f32.mrb[23].mxu1  ;;  %v700_v51 = vmul.f32 %v2738_v43, %v2607_v32 }
 0x12e   : > { %2383 = vtanh.f32 %v764_v13  ;;  %v769_v27 = vmul.f32 0.5, %v2842_v30  ;;  %v1392_v42 = vmul.f32 0.5, %v2845_v44  ;;  %v2864_v39 = vadd.f32 %v2623_v38, %v1320_v0  ;;  %v2376_v55 = vpop.eup %2375 }
 0x12f   : > { %v1484_v40 = vadd.f32 0.5, %v1452_v31  ;;  %2385 = vtanh.f32 %v1387_v12  ;;  %v767_v22 = vmul.f32 0.5, %v2855_v49  ;;  %v827_v59 = vmul.f32 0.5, %v2376_v55 }
 0x130   : > { %2387 = vtanh.f32 %v769_v27  ;;  %v1390_v63 = vmul.f32 0.5, %v2864_v39  ;;  %v1323_v47 = vmul.f32 %v2750_v52, %v2612_v33  ;;  %v2878_v26 = vadd.f32 %v2617_v35, %v700_v51 }
 0x131   : > { %v2875_v60 = vmul.f32 %v1484_v40, %v2724_v24  ;;  %2389 = vtanh.f32 %v1392_v42  ;;  %v698_v5 = vmul.f32 %v2607_v32, %v2752_v53  ;;  %v859_v6 = vadd.f32 0.5, %v827_v59  ;;  %v2887_v9 = vpop.f32.mrb[24].mxu0 }
 0x132   : > { %2391 = vtanh.f32 %v767_v22  ;;  %v2883_v43 = vadd.f32 %v2623_v38, %v1323_v47  ;;  %v1321_v7 = vmul.f32 %v2612_v33, %v2761_v3  ;;  %v770_v24 = vmul.f32 0.5, %v2878_v26  ;;  %v2895_v53 = vpop.f32.mrb[24].mxu1  ;;  %v2897_v10 = vpop.f32.mrb[25].mxu0 }
 0x133   : > { %2393 = vtanh.f32 %v1390_v63  ;;  %v2891_v52 = vadd.f32 %v2617_v35, %v698_v5  ;;  %v703_v8 = vmul.f32 %v2770_v19, %v2607_v32  ;;  %v2378_v45 = vpop.eup %2377  ;;  %v2900_v57 = vmul.f32 %v859_v6, %v2748_v56  ;;  %v2908_v15 = vpop.f32.mrb[25].mxu1 }
 0x134   : > { %v1393_v3 = vmul.f32 0.5, %v2883_v43  ;;  %v2904_v14 = vadd.f32 %v2623_v38, %v1321_v7  ;;  %v1326_v58 = vmul.f32 %v2775_v17, %v2612_v33  ;;  %v2910_v2 = vpop.f32.mrb[26].mxu0  ;;  %v2380_v19 = vpop.eup %2379  ;;  %v1450_v25 = vmul.f32 0.5, %v2378_v45 }
 0x135   : > { %2395 = vtanh.f32 %v770_v24  ;;  %v768_v13 = vmul.f32 0.5, %v2891_v52  ;;  %v2914_v56 = vadd.f32 %v2617_v35, %v703_v8  ;;  %v2916_v0 = vpop.f32.mrb[26].mxu1  ;;  %v2918_v31 = vpop.f32.mrb[27].mxu0  ;;  %v830_v12 = vmul.f32 0.5, %v2380_v19 }
 0x136   : > { %2397 = vtanh.f32 %v1393_v3  ;;  %v1391_v17 = vmul.f32 0.5, %v2904_v14  ;;  %v2922_v27 = vadd.f32 %v2623_v38, %v1326_v58  ;;  %v2924_v42 = vpop.f32.mrb[27].mxu1  ;;  %v1482_v40 = vadd.f32 0.5, %v1450_v25 }
 0x137   : > { %v2382_v55 = vpop.eup %2381  ;;  %2399 = vtanh.f32 %v768_v13  ;;  %v773_v22 = vmul.f32 0.5, %v2914_v56  ;;  %v701_v51 = vmul.f32 %v2607_v32, %v2777_v36  ;;  %v862_v63 = vadd.f32 0.5, %v830_v12 }
 0x138   : > { %v2384_v59 = vpop.eup %2383  ;;  %v1453_v47 = vmul.f32 0.5, %v2382_v55  ;;  %2401 = vtanh.f32 %v1391_v17  ;;  %v1396_v5 = vmul.f32 0.5, %v2922_v27  ;;  %v1514_v7 = vmul.f32 %v1482_v40, %v2795_v1 }
 0x139   : > { %v2386_v6 = vpop.eup %2385  ;;  %v828_v24 = vmul.f32 0.5, %v2384_v59  ;;  %2403 = vtanh.f32 %v773_v22  ;;  %v2932_v8 = vadd.f32 %v2617_v35, %v701_v51  ;;  %v894_v3 = vmul.f32 %v862_v63, %v2801_v48  ;;  %v2935_v36 = vpop.f32.mrb[28].mxu0 }
 0x13a   : > { %v2388_v45 = vpop.eup %2387  ;;  %v1485_v58 = vadd.f32 0.5, %v1453_v47  ;;  %v1451_v19 = vmul.f32 0.5, %v2386_v6  ;;  %2405 = vtanh.f32 %v1396_v5  ;;  %v1324_v1 = vmul.f32 %v2612_v33, %v2782_v41  ;;  %v2940_v55 = vpop.f32.mrb[28].mxu1 }
 0x13b   : > { %v2390_v25 = vpop.eup %2389  ;;  %v860_v13 = vadd.f32 0.5, %v828_v24  ;;  %v833_v12 = vmul.f32 0.5, %v2388_v45  ;;  %v771_v17 = vmul.f32 0.5, %v2932_v8  ;;  %3212 = vst [vmem:[#allocation2_spill] sm:$0xff] %v2940_v55  ;;  %v2942_v40 = vpop.f32.mrb[29].mxu0  ;;  %v1993_v48 = vpack.c.bf16 %v894_v3, %v2807_v37 }
 0x13c   : > { %3213 = vst [vmem:[#allocation3_spill] sm:$0xff] %v2942_v40  ;;  %v2392_v22 = vpop.eup %2391  ;;  %v1517_v51 = vmul.f32 %v1485_v58, %v2815_v11  ;;  %v1483_v59 = vadd.f32 0.5, %v1451_v19  ;;  %v1456_v63 = vmul.f32 0.5, %v2390_v25  ;;  %v2946_v47 = vpop.f32.mrb[29].mxu1 }
 0x13d   : > { %v2948_v5 = vpop.f32.mrb[30].mxu0  ;;  %v2394_v6 = vpop.eup %2393  ;;  %v892_v24 = vmul.f32 %v860_v13, %v2821_v54  ;;  %v865_v41 = vadd.f32 0.5, %v833_v12  ;;  %v831_v45 = vmul.f32 0.5, %v2392_v22  ;;  %2407 = vtanh.f32 %v771_v17  ;;  %2129 = vst [vmem:[%s2744_s13 + $0x28] sm:$0xff] %v1993_v48  }
 0x13e   : > { %v2951_v55 = vpop.f32.mrb[30].mxu1  ;;  %v2953_v40 = vpop.f32.mrb[31].mxu0  ;;  %v2073_v37 = vpack.c.bf16 %v1517_v51, %v2875_v60  ;;  %v1515_v11 = vmul.f32 %v1483_v59, %v2832_v16  ;;  %v1488_v3 = vadd.f32 0.5, %v1456_v63  ;;  %v1454_v58 = vmul.f32 0.5, %v2394_v6 }
 0x13f   : > { %v2958_v19 = vpop.f32.mrb[31].mxu1  ;;  %v2396_v25 = vpop.eup %2395  ;;  %v1988_v54 = vpack.c.bf16 %v892_v24, %v2900_v57  ;;  %v897_v13 = vmul.f32 %v865_v41, %v2842_v30  ;;  %v863_v12 = vadd.f32 0.5, %v831_v45  ;;  %v2963_v17 = vadd.f32 %v2623_v38, %v1324_v1 }
 0x140   : > { %v2398_v22 = vpop.eup %2397  ;;  %2144 = vst [vmem:[%s2758_s16 + $0x28] sm:$0xff] %v2073_v37   ;;  %v2068_v60 = vpack.c.bf16 %v1515_v11, %v1514_v7  ;;  %v1520_v16 = vmul.f32 %v1488_v3, %v2845_v44  ;;  %v1486_v48 = vadd.f32 0.5, %v1454_v58  ;;  %v834_v51 = vmul.f32 0.5, %v2396_v25 }
 0x141   : > { %v2400_v59 = vpop.eup %2399  ;;  %2128 = vst [vmem:[%s2744_s13 + $0x20] sm:$0xff] %v1988_v54   ;;  %v895_v63 = vmul.f32 %v863_v12, %v2855_v49  ;;  %v1457_v6 = vmul.f32 0.5, %v2398_v22  ;;  %v1394_v57 = vmul.f32 0.5, %v2963_v17  ;;  %v704_v30 = vmul.f32 %v2784_v46, %v2607_v32 }
 0x142   : > { %v2402_v24 = vpop.eup %2401  ;;  %2143 = vst [vmem:[%s2758_s16 + $0x20] sm:$0xff] %v2068_v60   ;;  %v1518_v1 = vmul.f32 %v1486_v48, %v2864_v39  ;;  %v866_v41 = vadd.f32 0.5, %v834_v51  ;;  %v832_v7 = vmul.f32 0.5, %v2400_v59  ;;  %v1327_v44 = vmul.f32 %v2789_v62, %v2612_v33 }
 0x143   : > { %v2404_v45 = vpop.eup %2403  ;;  %v1489_v37 = vadd.f32 0.5, %v1457_v6  ;;  %v1455_v11 = vmul.f32 0.5, %v2402_v24  ;;  %2409 = vtanh.f32 %v1394_v57  ;;  %v2977_v49 = vadd.f32 %v2617_v35, %v704_v30 }
 0x144   : > { %v2406_v3 = vpop.eup %2405  ;;  %v898_v58 = vmul.f32 %v866_v41, %v2878_v26  ;;  %v864_v46 = vadd.f32 0.5, %v832_v7  ;;  %v837_v25 = vmul.f32 0.5, %v2404_v45  ;;  %v2981_v39 = vadd.f32 %v2623_v38, %v1327_v44 }
 0x145   : > { %v1521_v54 = vmul.f32 %v1489_v37, %v2883_v43  ;;  %v1487_v12 = vadd.f32 0.5, %v1455_v11  ;;  %v1460_v62 = vmul.f32 0.5, %v2406_v3  ;;  %v774_v22 = vmul.f32 0.5, %v2977_v49 }
 0x146   : > { %v2003_v60 = vpack.c.bf16 %v898_v58, %v897_v13  ;;  %v896_v48 = vmul.f32 %v864_v46, %v2891_v52  ;;  %v869_v51 = vadd.f32 0.5, %v837_v25  ;;  %v1397_v59 = vmul.f32 0.5, %v2981_v39 }
 0x147   : > { %v2408_v26 = vpop.eup %2407  ;;  %v2083_v6 = vpack.c.bf16 %v1521_v54, %v1520_v16  ;;  %v1519_v57 = vmul.f32 %v1487_v12, %v2904_v14  ;;  %v1492_v30 = vadd.f32 0.5, %v1460_v62  ;;  %2411 = vtanh.f32 %v774_v22 }
 0x148   : > { %2131 = vst [vmem:[%s2744_s13 + $0x38] sm:$0xff] %v2003_v60   ;;  %v1998_v43 = vpack.c.bf16 %v896_v48, %v895_v63  ;;  %v2990_v24 = vmul.f32 %v869_v51, %v2914_v56  ;;  %v835_v41 = vmul.f32 0.5, %v2408_v26  ;;  %2413 = vtanh.f32 %v1397_v59 }
 0x149   : > { %2146 = vst [vmem:[%s2758_s16 + $0x38] sm:$0xff] %v2083_v6   ;;  %v2078_v52 = vpack.c.bf16 %v1519_v57, %v1518_v1  ;;  %v2994_v13 = vmul.f32 %v1492_v30, %v2922_v27  ;;  %v702_v16 = vmul.f32 %v2607_v32, %v2791_v23  ;;  %v1325_v14 = vmul.f32 %v2612_v33, %v2797_v4 }
 0x14a   : > { %2130 = vst [vmem:[%s2744_s13 + $0x30] sm:$0xff] %v1998_v43   ;;  %v867_v7 = vadd.f32 0.5, %v835_v41  ;;  %v707_v63 = vmul.f32 %v2827_v61, %v2607_v32  ;;  %v1330_v56 = vmul.f32 %v2836_v20, %v2612_v33  ;;  %v705_v1 = vmul.f32 %v2607_v32, %v2838_v21 }
 0x14b   : > { %2145 = vst [vmem:[%s2758_s16 + $0x30] sm:$0xff] %v2078_v52   ;;  %v3009_v27 = vadd.f32 %v2617_v35, %v702_v16  ;;  %v3012_v23 = vadd.f32 %v2623_v38, %v1325_v14  ;;  %v1328_v4 = vmul.f32 %v2612_v33, %v2849_v28  ;;  %v708_v44 = vmul.f32 %v2851_v29, %v2607_v32 }
 0x14c   : > { %v3019_v61 = vmul.f32 %v867_v7, %v2932_v8  ;;  %v3022_v20 = vadd.f32 %v2617_v35, %v707_v63  ;;  %v3025_v21 = vadd.f32 %v2623_v38, %v1330_v56  ;;  %v3028_v45 = vadd.f32 %v2617_v35, %v705_v1 }
 0x14d   : > { %v2410_v37 = vpop.eup %2409  ;;  %v772_v11 = vmul.f32 0.5, %v3009_v27  ;;  %v1395_v28 = vmul.f32 0.5, %v3012_v23  ;;  %v3033_v3 = vadd.f32 %v2623_v38, %v1328_v4  ;;  %v3036_v29 = vadd.f32 %v2617_v35, %v708_v44 }
 0x14e   : > { %v1458_v8 = vmul.f32 0.5, %v2410_v37  ;;  %v777_v58 = vmul.f32 0.5, %v3022_v20  ;;  %v1400_v46 = vmul.f32 0.5, %v3025_v21  ;;  %v775_v25 = vmul.f32 0.5, %v3028_v45 }
 0x14f   : > { %2415 = vtanh.f32 %v772_v11  ;;  %v1398_v54 = vmul.f32 0.5, %v3033_v3  ;;  %v778_v12 = vmul.f32 0.5, %v3036_v29  ;;  %v1331_v62 = vmul.f32 %v2857_v50, %v2612_v33 }
 0x150   : > { %v1490_v22 = vadd.f32 0.5, %v1458_v8  ;;  %2417 = vtanh.f32 %v1395_v28  ;;  %v706_v60 = vmul.f32 %v2607_v32, %v2859_v34  ;;  %v1329_v48 = vmul.f32 %v2612_v33, %v2866_v18 }
 0x151   : > { %v2412_v51 = vpop.eup %2411  ;;  %2419 = vtanh.f32 %v777_v58  ;;  %v3050_v59 = vadd.f32 %v2623_v38, %v1331_v62  ;;  %v711_v26 = vmul.f32 %v2887_v9, %v2607_v32  ;;  %v1334_v6 = vmul.f32 %v2895_v53, %v2612_v33 }
 0x152   : > { %v2414_v50 = vpop.eup %2413  ;;  %v3057_v57 = vmul.f32 %v1490_v22, %v2963_v17  ;;  %v838_v30 = vmul.f32 0.5, %v2412_v51  ;;  %2421 = vtanh.f32 %v1400_v46  ;;  %v3060_v34 = vadd.f32 %v2617_v35, %v706_v60 }
 0x153   : > { %v1461_v18 = vmul.f32 0.5, %v2414_v50  ;;  %2423 = vtanh.f32 %v775_v25  ;;  %v1401_v43 = vmul.f32 0.5, %v3050_v59  ;;  %v3064_v41 = vadd.f32 %v2623_v38, %v1329_v48 }
 0x154   : > { %v870_v9 = vadd.f32 0.5, %v838_v30  ;;  %2425 = vtanh.f32 %v1398_v54  ;;  %v776_v53 = vmul.f32 0.5, %v3060_v34  ;;  %v3068_v52 = vadd.f32 %v2617_v35, %v711_v26 }
 0x155   : > { %v1493_v17 = vadd.f32 0.5, %v1461_v18  ;;  %2427 = vtanh.f32 %v778_v12  ;;  %v1399_v16 = vmul.f32 0.5, %v3064_v41  ;;  %v3072_v14 = vadd.f32 %v2623_v38, %v1334_v6 }
 0x156   : > { %v902_v7 = vmul.f32 %v870_v9, %v2977_v49  ;;  %2429 = vtanh.f32 %v1401_v43  ;;  %v781_v63 = vmul.f32 0.5, %v3068_v52  ;;  %v709_v56 = vmul.f32 %v2607_v32, %v2897_v10 }
 0x157   : > { %v1525_v1 = vmul.f32 %v1493_v17, %v2981_v39  ;;  %2431 = vtanh.f32 %v776_v53  ;;  %v1404_v4 = vmul.f32 0.5, %v3072_v14  ;;  %v1332_v44 = vmul.f32 %v2612_v33, %v2908_v15 }
 0x158   : > { %v2013_v37 = vpack.c.bf16 %v902_v7, %v2990_v24  ;;  %2433 = vtanh.f32 %v1399_v16  ;;  %v3084_v49 = vadd.f32 %v2617_v35, %v709_v56  ;;  %v712_v11 = vmul.f32 %v2910_v2, %v2607_v32 }
 0x159   : > { %v2416_v28 = vpop.eup %2415  ;;  %v2093_v10 = vpack.c.bf16 %v1525_v1, %v2994_v13  ;;  %2435 = vtanh.f32 %v781_v63  ;;  %v3090_v39 = vadd.f32 %v2623_v38, %v1332_v44  ;;  %v1335_v15 = vmul.f32 %v2916_v0, %v2612_v33 }
 0x15a   : > { %v2418_v8 = vpop.eup %2417  ;;  %2133 = vst [vmem:[%s2744_s13 + $0x48] sm:$0xff] %v2013_v37   ;;  %v836_v24 = vmul.f32 0.5, %v2416_v28  ;;  %2437 = vtanh.f32 %v1404_v4  ;;  %v779_v58 = vmul.f32 0.5, %v3084_v49  ;;  %v3097_v46 = vadd.f32 %v2617_v35, %v712_v11 }
 0x15b   : > { %v2420_v2 = vpop.eup %2419  ;;  %2148 = vst [vmem:[%s2758_s16 + $0x48] sm:$0xff] %v2093_v10   ;;  %v1459_v25 = vmul.f32 0.5, %v2418_v8  ;;  %v1402_v13 = vmul.f32 0.5, %v3090_v39  ;;  %v3102_v54 = vadd.f32 %v2623_v38, %v1335_v15  ;;  %v710_v33 = vmul.f32 %v2607_v32, %v2918_v31 }
 0x15c   : > { %v2422_v0 = vpop.eup %2421  ;;  %v868_v12 = vadd.f32 0.5, %v836_v24  ;;  %v841_v62 = vmul.f32 0.5, %v2420_v2  ;;  %2439 = vtanh.f32 %v779_v58  ;;  %v782_v22 = vmul.f32 0.5, %v3097_v46 }
 0x15d   : > { %v2424_v60 = vpop.eup %2423  ;;  %v1491_v48 = vadd.f32 0.5, %v1459_v25  ;;  %v1464_v51 = vmul.f32 0.5, %v2422_v0  ;;  %2441 = vtanh.f32 %v1402_v13  ;;  %v1405_v26 = vmul.f32 0.5, %v3102_v54  ;;  %v3133_v13 = vld [vmem:[%s3209_s6] ss:$0 sm:$0xff] }
 0x15e   : > { %v2426_v6 = vpop.eup %2425  ;;  %v900_v50 = vmul.f32 %v868_v12, %v3009_v27  ;;  %v873_v38 = vadd.f32 0.5, %v841_v62  ;;  %v839_v30 = vmul.f32 0.5, %v2424_v60  ;;  %2443 = vtanh.f32 %v782_v22 }
 0x15f   : > { %v2428_v32 = vpop.eup %2427  ;;  %v1523_v31 = vmul.f32 %v1491_v48, %v3012_v23  ;;  %v1496_v18 = vadd.f32 0.5, %v1464_v51  ;;  %v1462_v43 = vmul.f32 0.5, %v2426_v6  ;;  %2445 = vtanh.f32 %v1405_v26 }
 0x160   : > { %v2430_v9 = vpop.eup %2429  ;;  %v2008_v53 = vpack.c.bf16 %v900_v50, %v3019_v61  ;;  %v871_v17 = vadd.f32 0.5, %v839_v30  ;;  %v842_v16 = vmul.f32 0.5, %v2428_v32  ;;  %v905_v27 = vmul.f32 %v873_v38, %v3022_v20  ;;  %v3123_v20 = vld [vmem:[%s3208_s5] ss:$0 sm:$0xff] }
 0x161   : > { %v2432_v7 = vpop.eup %2431  ;;  %v2088_v63 = vpack.c.bf16 %v1523_v31, %v3057_v57  ;;  %v1528_v56 = vmul.f32 %v1496_v18, %v3025_v21  ;;  %v1465_v1 = vmul.f32 0.5, %v2430_v9  ;;  %v1494_v23 = vadd.f32 0.5, %v1462_v43 }
 0x162   : > { %v2434_v4 = vpop.eup %2433  ;;  %2132 = vst [vmem:[%s2744_s13 + $0x40] sm:$0xff] %v2008_v53   ;;  %v874_v44 = vadd.f32 0.5, %v842_v16  ;;  %v840_v37 = vmul.f32 0.5, %v2432_v7  ;;  %v3116_v11 = vadd.f32 %v2617_v35, %v710_v33  ;;  %v903_v61 = vmul.f32 %v871_v17, %v3028_v45  ;;  %v3214_v53 = vld [vmem:[#allocation2_spill] sm:$0xff]  ;;  %v3215_v16 = vld [vmem:[#allocation3_spill] sm:$0xff] }
 0x163   : > { %v2436_v28 = vpop.eup %2435  ;;  %2147 = vst [vmem:[%s2758_s16 + $0x40] sm:$0xff] %v2088_v63   ;;  %v1497_v10 = vadd.f32 0.5, %v1465_v1  ;;  %v1463_v15 = vmul.f32 0.5, %v2434_v4  ;;  %v1333_v21 = vmul.f32 %v3123_v20, %v2924_v42  ;;  %v1526_v62 = vmul.f32 %v1494_v23, %v3033_v3 }
 0x164   : > { %v2438_v57 = vpop.eup %2437  ;;  %v906_v8 = vmul.f32 %v874_v44, %v3036_v29  ;;  %v872_v24 = vadd.f32 0.5, %v840_v37  ;;  %v845_v35 = vmul.f32 0.5, %v2436_v28  ;;  %v780_v58 = vmul.f32 0.5, %v3116_v11 }
 0x165   : > { %v1529_v2 = vmul.f32 %v1497_v10, %v3050_v59  ;;  %v1495_v45 = vadd.f32 0.5, %v1463_v15  ;;  %v1468_v25 = vmul.f32 0.5, %v2438_v57  ;;  %v3136_v33 = vadd.f32 %v3133_v13, %v1333_v21 }
 0x166   : > { %v2440_v42 = vpop.eup %2439  ;;  %v2023_v29 = vpack.c.bf16 %v906_v8, %v905_v27  ;;  %v904_v0 = vmul.f32 %v872_v24, %v3060_v34  ;;  %v877_v12 = vadd.f32 0.5, %v845_v35  ;;  %2447 = vtanh.f32 %v780_v58  ;;  %v2470_v27 = vld [vmem:[%s3206_s3] ss:$0 sm:$0xff] }
 0x167   : > { %v2442_v59 = vpop.eup %2441  ;;  %v2103_v22 = vpack.c.bf16 %v1529_v2, %v1528_v56  ;;  %v1527_v60 = vmul.f32 %v1495_v45, %v3064_v41  ;;  %v1500_v48 = vadd.f32 0.5, %v1468_v25  ;;  %v843_v6 = vmul.f32 0.5, %v2440_v42  ;;  %v2469_v41 = vld [vmem:[%s3205_s2] ss:$0 sm:$0xff] }
 0x168   : > { %v2444_v51 = vpop.eup %2443  ;;  %2135 = vst [vmem:[%s2744_s13 + $0x58] sm:$0xff] %v2023_v29   ;;  %v2018_v26 = vpack.c.bf16 %v904_v0, %v903_v61  ;;  %v1403_v50 = vmul.f32 0.5, %v3136_v33  ;;  %v909_v30 = vmul.f32 %v877_v12, %v3068_v52  ;;  %v1466_v31 = vmul.f32 0.5, %v2442_v59 }
 0x169   : > { %v2446_v38 = vpop.eup %2445  ;;  %2150 = vst [vmem:[%s2758_s16 + $0x58] sm:$0xff] %v2103_v22   ;;  %v2098_v34 = vpack.c.bf16 %v1527_v60, %v1526_v62  ;;  %v846_v32 = vmul.f32 0.5, %v2444_v51  ;;  %v715_v18 = vmul.f32 %v2469_v41, %v2935_v36  ;;  %v1532_v43 = vmul.f32 %v1500_v48, %v3072_v14 }
 0x16a   : > { %2134 = vst [vmem:[%s2744_s13 + $0x50] sm:$0xff] %v2018_v26   ;;  %v1469_v3 = vmul.f32 0.5, %v2446_v38  ;;  %2449 = vtanh.f32 %v1403_v50  ;;  %v1338_v17 = vmul.f32 %v3123_v20, %v3214_v53  ;;  %v713_v52 = vmul.f32 %v2469_v41, %v3215_v16 }
 0x16b   : > { %2149 = vst [vmem:[%s2758_s16 + $0x50] sm:$0xff] %v2098_v34   ;;  %v878_v9 = vadd.f32 0.5, %v846_v32  ;;  %v875_v7 = vadd.f32 0.5, %v843_v6  ;;  %v3158_v56 = vadd.f32 %v2470_v27, %v715_v18  ;;  %v1336_v36 = vmul.f32 %v3123_v20, %v2946_v47 }
 0x16c   : > { %v1501_v63 = vadd.f32 0.5, %v1469_v3  ;;  %v3164_v14 = vadd.f32 %v3133_v13, %v1338_v17  ;;  %v3166_v4 = vadd.f32 %v2470_v27, %v713_v52  ;;  %v716_v23 = vmul.f32 %v2469_v41, %v2948_v5 }
 0x16d   : > { %v910_v1 = vmul.f32 %v878_v9, %v3097_v46  ;;  %v785_v37 = vmul.f32 0.5, %v3158_v56  ;;  %v3172_v28 = vadd.f32 %v3133_v13, %v1336_v36  ;;  %v1339_v47 = vmul.f32 %v3123_v20, %v2951_v55 }
 0x16e   : > { %v1533_v44 = vmul.f32 %v1501_v63, %v3102_v54  ;;  %v1408_v61 = vmul.f32 0.5, %v3164_v14  ;;  %v783_v10 = vmul.f32 0.5, %v3166_v4  ;;  %v754_v15 = vadd.f32 %v2470_v27, %v716_v23 }
 0x16f   : > { %v2033_v46 = vpack.c.bf16 %v910_v1, %v909_v30  ;;  %2451 = vtanh.f32 %v785_v37  ;;  %v1406_v5 = vmul.f32 0.5, %v3172_v28  ;;  %v1377_v54 = vadd.f32 %v3133_v13, %v1339_v47 }
 0x170   : > { %v2448_v21 = vpop.eup %2447  ;;  %v2113_v57 = vpack.c.bf16 %v1533_v44, %v1532_v43  ;;  %2453 = vtanh.f32 %v1408_v61  ;;  %v786_v24 = vmul.f32 0.5, %v754_v15  ;;  %v714_v35 = vmul.f32 %v2469_v41, %v2953_v40 }
 0x171   : > { %2137 = vst [vmem:[%s2744_s13 + $0x68] sm:$0xff] %v2033_v46   ;;  %v844_v8 = vmul.f32 0.5, %v2448_v21  ;;  %2455 = vtanh.f32 %v783_v10  ;;  %v1409_v55 = vmul.f32 0.5, %v1377_v54  ;;  %v1337_v58 = vmul.f32 %v3123_v20, %v2958_v19 }
 0x172   : > { %2152 = vst [vmem:[%s2758_s16 + $0x68] sm:$0xff] %v2113_v57   ;;  %2457 = vtanh.f32 %v1406_v5  ;;  %v752_v45 = vadd.f32 %v2470_v27, %v714_v35  ;;  %v907_v42 = vmul.f32 %v875_v7, %v3084_v49  ;;  %v1498_v29 = vadd.f32 0.5, %v1466_v31 }
 0x173   : > { %v876_v2 = vadd.f32 0.5, %v844_v8  ;;  %2459 = vtanh.f32 %v786_v24  ;;  %v1375_v0 = vadd.f32 %v3133_v13, %v1337_v58 }
 0x174   : > { %v2450_v25 = vpop.eup %2449  ;;  %2461 = vtanh.f32 %v1409_v55  ;;  %v784_v59 = vmul.f32 0.5, %v752_v45  ;;  %v1530_v20 = vmul.f32 %v1498_v29, %v3090_v39 }
 0x175   : > { %v908_v12 = vmul.f32 %v876_v2, %v3116_v11  ;;  %v1467_v40 = vmul.f32 0.5, %v2450_v25  ;;  %v1407_v62 = vmul.f32 0.5, %v1375_v0 }
 0x176   : > { %2463 = vtanh.f32 %v784_v59 }
 0x177   : > { %v2028_v22 = vpack.c.bf16 %v908_v12, %v907_v42  ;;  %v1499_v19 = vadd.f32 0.5, %v1467_v40  ;;  %2465 = vtanh.f32 %v1407_v62 }
 0x179   : > { %2136 = vst [vmem:[%s2744_s13 + $0x60] sm:$0xff] %v2028_v22   ;;  %v1531_v49 = vmul.f32 %v1499_v19, %v3136_v33  ;;  %v2452_v60 = vpop.eup %2451 }
 0x17a   : > { %v2454_v48 = vpop.eup %2453  ;;  %v849_v13 = vmul.f32 0.5, %v2452_v60 }
 0x17b   : > { %v2108_v51 = vpack.c.bf16 %v1531_v49, %v1530_v20  ;;  %v2456_v26 = vpop.eup %2455  ;;  %v1472_v11 = vmul.f32 0.5, %v2454_v48 }
 0x17c   : > { %v2458_v6 = vpop.eup %2457  ;;  %v847_v38 = vmul.f32 0.5, %v2456_v26  ;;  %v881_v30 = vadd.f32 0.5, %v849_v13 }
 0x17d   : > { %2151 = vst [vmem:[%s2758_s16 + $0x60] sm:$0xff] %v2108_v51   ;;  %v2460_v50 = vpop.eup %2459  ;;  %v1470_v32 = vmul.f32 0.5, %v2458_v6  ;;  %v1504_v3 = vadd.f32 0.5, %v1472_v11 }
 0x17e   : > { %v2462_v34 = vpop.eup %2461  ;;  %v850_v31 = vmul.f32 0.5, %v2460_v50  ;;  %v879_v33 = vadd.f32 0.5, %v847_v38  ;;  %v913_v17 = vmul.f32 %v881_v30, %v3158_v56 }
 0x17f   : > { %v1473_v41 = vmul.f32 0.5, %v2462_v34  ;;  %v1502_v16 = vadd.f32 0.5, %v1470_v32  ;;  %v1536_v63 = vmul.f32 %v1504_v3, %v3164_v14 }
 0x180   : > { %v2464_v39 = vpop.eup %2463  ;;  %v882_v18 = vadd.f32 0.5, %v850_v31  ;;  %v911_v44 = vmul.f32 %v879_v33, %v3166_v4 }
 0x181   : > { %v2466_v43 = vpop.eup %2465  ;;  %v1505_v9 = vadd.f32 0.5, %v1473_v41  ;;  %v848_v53 = vmul.f32 0.5, %v2464_v39  ;;  %v1534_v46 = vmul.f32 %v1502_v16, %v3172_v28 }
 0x182   : > { %v914_v52 = vmul.f32 %v882_v18, %v754_v15  ;;  %v1471_v7 = vmul.f32 0.5, %v2466_v43 }
 0x183   : > { %v1537_v27 = vmul.f32 %v1505_v9, %v1377_v54  ;;  %v880_v36 = vadd.f32 0.5, %v848_v53 }
 0x184   : > { %v2043_v1 = vpack.c.bf16 %v914_v52, %v913_v17  ;;  %v1503_v23 = vadd.f32 0.5, %v1471_v7 }
 0x185   : > { %v2123_v37 = vpack.c.bf16 %v1537_v27, %v1536_v63  ;;  %v912_v47 = vmul.f32 %v880_v36, %v752_v45 }
 0x186   : > { %2139 = vst [vmem:[%s2744_s13 + $0x78] sm:$0xff] %v2043_v1   ;;  %v1535_v61 = vmul.f32 %v1503_v23, %v1375_v0 }
 0x187   : > { %2154 = vst [vmem:[%s2758_s16 + $0x78] sm:$0xff] %v2123_v37   ;;  %v2038_v56 = vpack.c.bf16 %v912_v47, %v911_v44 }
 0x188   : > { %v2118_v10 = vpack.c.bf16 %v1535_v61, %v1534_v46 }
 0x189   : > { %2138 = vst [vmem:[%s2744_s13 + $0x70] sm:$0xff] %v2038_v56  }
 0x18a   : > { %2153 = vst [vmem:[%s2758_s16 + $0x70] sm:$0xff] %v2118_v10  }
 0x18b PF: > { %s19_s27 = sadd.s32 1, %s2477_s27  }
 0x18c   : > { %p16_p4 = scmp.ge.s32.totalorder %s19_s27, 4  }
 0x18e   :  { %18 = sbr.rel (!%p16_p4) target bundleno = 1 (0x1), region = 90 }

// kernel: c2f_forward.5
= control target key start
LH: loop header
LB: loop body
LE: loop exit
PB: predicated region body
PF: predicated region fallthrough
CT: control target
= control target key end

     0   :  { %s2640_s27 = smov 0   ;;  %s3526_s0 = inlined_call_operand.vmem [shape: bf16[512,128], index: 0, kind: input, shape index: {}]   ;;  %s3527_s1 = inlined_call_operand.vmem [shape: bf16[128,128], index: 1, kind: input, shape index: {}]   ;;  %s3528_s2 = inlined_call_operand.vmem [shape: f32[1,128], index: 2, kind: input, shape index: {}]   ;;  %s3529_s3 = inlined_call_operand.vmem [shape: f32[1,128], index: 3, kind: input, shape index: {}]   ;;  %s3530_s4 = inlined_call_operand.vmem [shape: bf16[128,128], index: 4, kind: input, shape index: {}]   ;;  %s3531_s5 = inlined_call_operand.vmem [shape: f32[1,128], index: 5, kind: input, shape index: {}]   ;;  %s3532_s6 = inlined_call_operand.vmem [shape: f32[1,128], index: 6, kind: input, shape index: {}]   ;;  %s3533_s7 = inlined_call_operand.vmem [shape: bf16[512,128], index: 7, kind: output, shape index: {0}]   ;;  %s3534_s8 = inlined_call_operand.vmem [shape: bf16[512,128], index: 8, kind: output, shape index: {1}]  }
   0x1 LB: > { %s1884_s28 = sadd.s32 4294967295, %s2593_s27   ;;  %p1888_p0 = scmp.ge.s32.totalorder %s2593_s27, 1  ;;  %s2593_s27 = sphi %s2640_s27, %s19_s27  }
   0x2   : > { %p266_p1 = scmp.lt.s32.totalorder %s2593_s27, 3 }
   0x4   : > { %p267_p2 = pnand %p1888_p0, %p266_p1 }
   0x6   : > { %270 = sbr.rel (%p267_p2) target bundleno = 423 (0x1a7), region = 48 }
   0xd   : > { %v2403_v0 = vld [vmem:[%s3527_s1] sm:$0xff]   ;;  %s1889_s9 = sshll.u32 %s1884_s28, 5  ;;  %v2405_v2 = vld [vmem:[%s3527_s1 + $0x8] sm:$0xff]   ;;  %v2407_v4 = vld [vmem:[%s3527_s1 + $0x10] sm:$0xff]  }
   0xe   : > { %v2404_v1 = vld [vmem:[%s3530_s4] sm:$0xff]   ;;  %2299 = vmatprep.subr.bf16.mxu0 %v2403_v0  ;;  %p306_p3 = scmp.lt.s32.totalorder %s1889_s9, 63  ;;  %v2406_v3 = vld [vmem:[%s3530_s4 + $0x8] sm:$0xff]   ;;  %v2408_v5 = vld [vmem:[%s3530_s4 + $0x10] sm:$0xff]  }
   0xf   : > { %2347 = vmatprep.subr.bf16.mxu1 %v2404_v1  ;;  %2300 = vmatpush3.bf16.msra.mxu0 %v2403_v0  ;;  %v2409_v6 = vld [vmem:[%s3527_s1 + $0x18] sm:$0xff]   ;;  %v2411_v8 = vld [vmem:[%s3527_s1 + $0x20] sm:$0xff]   ;;  %v2413_v10 = vld [vmem:[%s3527_s1 + $0x28] sm:$0xff]  }
  0x10   : > { %2348 = vmatpush3.bf16.msra.mxu1 %v2404_v1  ;;  %2301 = vmatprep.subr.bf16.mxu0 %v2405_v2  ;;  %s3634_s9 = smov (!%p306_p3, %s1889_s9), 63  ;;  %v2410_v7 = vld [vmem:[%s3530_s4 + $0x18] sm:$0xff]   ;;  %v2412_v9 = vld [vmem:[%s3530_s4 + $0x20] sm:$0xff]   ;;  %v2414_v12 = vld [vmem:[%s3530_s4 + $0x28] sm:$0xff]  }
  0x11   : > { %2349 = vmatprep.subr.bf16.mxu1 %v2406_v3  ;;  %s2672_s24 = sshll.u32 %s3634_s9, 2  ;;  %v2415_v13 = vld [vmem:[%s3527_s1 + $0x30] sm:$0xff]   ;;  %v2417_v15 = vld [vmem:[%s3527_s1 + $0x38] sm:$0xff]   ;;  %v2786_v39 = vld [vmem:[%s3528_s2] ss:$0 sm:$0xff] }
  0x12   : > { %s2684_s11 = scalar_lea.vmem %s3526_s0, %s2672_s24  ;;  %v2416_v14 = vld [vmem:[%s3530_s4 + $0x30] sm:$0xff]   ;;  %v2418_v16 = vld [vmem:[%s3530_s4 + $0x38] sm:$0xff]   ;;  %v2795_v44 = vld [vmem:[%s3531_s5] ss:$0 sm:$0xff]  ;;  %s2959_s14 = scalar_lea.vmem %s3533_s7, %s2672_s24 }
  0x13   : > { %2302 = vmatpush3.bf16.msra.mxu0 %v2405_v2  ;;  %v2690_v11 = vld [vmem:[%s2684_s11] sm:$0xff]   ;;  %v2710_v17 = vld [vmem:[%s2684_s11 + $0x8] sm:$0xff]   ;;  %v2713_v18 = vld [vmem:[%s2684_s11 + $0x10] sm:$0xff]   ;;  %s2968_s17 = scalar_lea.vmem %s3534_s8, %s2672_s24 }
  0x14   : > { %2350 = vmatpush3.bf16.msra.mxu1 %v2406_v3  ;;  %2303 = vmatprep.subr.bf16.mxu0 %v2407_v4  ;;  %v2719_v19 = vld [vmem:[%s2684_s11 + $0x18] sm:$0xff]   ;;  %v2723_v20 = vld [vmem:[%s2684_s11 + $0x20] sm:$0xff]   ;;  %v2729_v21 = vld [vmem:[%s2684_s11 + $0x28] sm:$0xff]   ;;  %v917_v34 = vunpack.c.l.bf16 %v2710_v17 }
  0x15   : > { %2351 = vmatprep.subr.bf16.mxu1 %v2408_v5  ;;  %2315 = vmatprep.mubr.bf16.mxu0 %v2690_v11  ;;  %v2733_v22 = vld [vmem:[%s2684_s11 + $0x30] sm:$0xff]   ;;  %v2739_v23 = vld [vmem:[%s2684_s11 + $0x38] sm:$0xff]   ;;  %v2743_v24 = vld [vmem:[%s2684_s11 + $0x40] sm:$0xff]  }
  0x16   : > { %2363 = vmatprep.mubr.bf16.mxu1 %v2690_v11  ;;  %v2749_v25 = vld [vmem:[%s2684_s11 + $0x48] sm:$0xff]   ;;  %v2753_v26 = vld [vmem:[%s2684_s11 + $0x50] sm:$0xff]   ;;  %v2759_v27 = vld [vmem:[%s2684_s11 + $0x58] sm:$0xff]  }
  0x17   : > { %2304 = vmatpush3.bf16.msra.mxu0 %v2407_v4  ;;  %3543 = vst [vmem:[#allocation2_spill] sm:$0xff] %v2753_v26  ;;  %3544 = vst [vmem:[#allocation3_spill] sm:$0xff] %v2759_v27  ;;  %v2763_v28 = vld [vmem:[%s2684_s11 + $0x60] sm:$0xff]   ;;  %v2769_v29 = vld [vmem:[%s2684_s11 + $0x68] sm:$0xff]  }
  0x18   : > { %2352 = vmatpush3.bf16.msra.mxu1 %v2408_v5  ;;  %2305 = vmatprep.subr.bf16.mxu0 %v2409_v6  ;;  %3545 = vst [vmem:[#allocation4_spill] sm:$0xff] %v2763_v28  ;;  %3546 = vst [vmem:[#allocation5_spill] sm:$0xff] %v2769_v29  ;;  %v352_v30 = vld [vmem:[%s2684_s11 + $0x70] sm:$0xff]   ;;  %v354_v31 = vld [vmem:[%s2684_s11 + $0x78] sm:$0xff]  }
  0x19   : > { %2353 = vmatprep.subr.bf16.mxu1 %v2410_v7  ;;  %v2804_v50 = vld [vmem:[%s3529_s3] ss:$0 sm:$0xff] }
  0x1a   : > { %v2813_v56 = vld [vmem:[%s3532_s6] ss:$0 sm:$0xff] }
  0x1b   : > { %2306 = vmatpush3.bf16.msra.mxu0 %v2409_v6 }
  0x1c   : > { %2354 = vmatpush3.bf16.msra.mxu1 %v2410_v7  ;;  %2307 = vmatprep.subr.bf16.mxu0 %v2411_v8 }
  0x1d   : > { %2355 = vmatprep.subr.bf16.mxu1 %v2412_v9 }
  0x1f   : > { %2308 = vmatpush3.bf16.msra.mxu0 %v2411_v8 }
  0x20   : > { %2356 = vmatpush3.bf16.msra.mxu1 %v2412_v9  ;;  %2309 = vmatprep.subr.bf16.mxu0 %v2413_v10 }
  0x21   : > { %2357 = vmatprep.subr.bf16.mxu1 %v2414_v12 }
  0x23   : > { %2310 = vmatpush3.bf16.msra.mxu0 %v2413_v10 }
  0x24   : > { %2358 = vmatpush3.bf16.msra.mxu1 %v2414_v12  ;;  %2311 = vmatprep.subr.bf16.mxu0 %v2415_v13 }
  0x25   : > { %2359 = vmatprep.subr.bf16.mxu1 %v2416_v14 }
  0x27   : > { %2312 = vmatpush3.bf16.msra.mxu0 %v2415_v13 }
  0x28   : > { %2360 = vmatpush3.bf16.msra.mxu1 %v2416_v14  ;;  %2313 = vmatprep.subr.bf16.mxu0 %v2417_v15 }
  0x29   : > { %2361 = vmatprep.subr.bf16.mxu1 %v2418_v16 }
  0x2b   : > { %2314 = vmatpush3.bf16.msra.mxu0 %v2417_v15 }
  0x2c   : > { %2362 = vmatpush3.bf16.msra.mxu1 %v2418_v16 }
  0x2e   : > { %2316 = vmatmul.mubr.bf16.vlgmr.msra.gmra.mrb[0].mxu0 %v2710_v17 }
  0x2f   : > { %2364 = vmatmul.mubr.bf16.vlgmr.msra.gmra.mrb[0].mxu1 %v2710_v17  ;;  %2319 = vmatprep.mubr.bf16.mxu0 %v2713_v18 }
  0x30   : > { %2367 = vmatprep.mubr.bf16.mxu1 %v2713_v18 }
  0x36   : > { %2320 = vmatmul.mubr.bf16.gmra.mrb[4].mxu0 %v2719_v19 }
  0x37   : > { %2368 = vmatmul.mubr.bf16.gmra.mrb[4].mxu1 %v2719_v19  ;;  %2323 = vmatprep.mubr.bf16.mxu0 %v2723_v20 }
  0x38   : > { %2371 = vmatprep.mubr.bf16.mxu1 %v2723_v20 }
  0x3e   : > { %2324 = vmatmul.mubr.bf16.gmra.mrb[8].mxu0 %v2729_v21 }
  0x3f   : > { %2372 = vmatmul.mubr.bf16.gmra.mrb[8].mxu1 %v2729_v21  ;;  %2327 = vmatprep.mubr.bf16.mxu0 %v2733_v22 }
  0x40   : > { %2375 = vmatprep.mubr.bf16.mxu1 %v2733_v22 }
  0x46   : > { %2328 = vmatmul.mubr.bf16.gmra.mrb[12].mxu0 %v2739_v23 }
  0x47   : > { %2376 = vmatmul.mubr.bf16.gmra.mrb[12].mxu1 %v2739_v23  ;;  %2331 = vmatprep.mubr.bf16.mxu0 %v2743_v24 }
  0x48   : > { %2379 = vmatprep.mubr.bf16.mxu1 %v2743_v24 }
  0x4e   : > { %2332 = vmatmul.mubr.bf16.gmra.mrb[16].mxu0 %v2749_v25 }
  0x4f   : > { %2380 = vmatmul.mubr.bf16.gmra.mrb[16].mxu1 %v2749_v25  ;;  %2335 = vmatprep.mubr.bf16.mxu0 %v2753_v26 }
  0x50   : > { %2383 = vmatprep.mubr.bf16.mxu1 %v2753_v26 }
  0x56   : > { %2336 = vmatmul.mubr.bf16.gmra.mrb[20].mxu0 %v2759_v27 }
  0x57   : > { %2384 = vmatmul.mubr.bf16.gmra.mrb[20].mxu1 %v2759_v27  ;;  %2339 = vmatprep.mubr.bf16.mxu0 %v2763_v28 }
  0x58   : > { %2387 = vmatprep.mubr.bf16.mxu1 %v2763_v28 }
  0x5e   : > { %2340 = vmatmul.mubr.bf16.gmra.mrb[24].mxu0 %v2769_v29 }
  0x5f   : > { %2388 = vmatmul.mubr.bf16.gmra.mrb[24].mxu1 %v2769_v29  ;;  %2343 = vmatprep.mubr.bf16.mxu0 %v352_v30 }
  0x60   : > { %2391 = vmatprep.mubr.bf16.mxu1 %v352_v30 }
  0x66   : > { %2344 = vmatmul.mubr.bf16.gmra.mrb[28].mxu0 %v354_v31 }
  0x67   : > { %2392 = vmatmul.mubr.bf16.gmra.mrb[28].mxu1 %v354_v31 }
 0x101   : > { %v2317_v49 = vpop.f32.mrb[0].mxu0 }
 0x102   : > { %v687_v54 = vmul.f32 %v2317_v49, %v2786_v39  ;;  %v2365_v55 = vpop.f32.mrb[0].mxu1  ;;  %v550_v57 = vpop.f32.mrb[1].mxu0 }
 0x103   : > { %v1374_v60 = vmul.f32 %v2365_v55, %v2795_v44  ;;  %v685_v61 = vmul.f32 %v2786_v39, %v550_v57  ;;  %v1237_v62 = vpop.f32.mrb[1].mxu1  ;;  %v2318_v63 = vpop.f32.mrb[2].mxu0 }
 0x104   : > { %v2821_v1 = vadd.f32 %v2804_v50, %v687_v54  ;;  %v1372_v2 = vmul.f32 %v2795_v44, %v1237_v62  ;;  %v688_v3 = vmul.f32 %v2318_v63, %v2786_v39  ;;  %v2366_v4 = vpop.f32.mrb[2].mxu1  ;;  %v553_v5 = vpop.f32.mrb[3].mxu0 }
 0x105   : > { %v2826_v6 = vadd.f32 %v2813_v56, %v1374_v60  ;;  %v2829_v7 = vadd.f32 %v2804_v50, %v685_v61  ;;  %v1375_v8 = vmul.f32 %v2366_v4, %v2795_v44  ;;  %v686_v9 = vmul.f32 %v2786_v39, %v553_v5  ;;  %v1240_v10 = vpop.f32.mrb[3].mxu1 }
 0x106   : > { %v757_v12 = vmul.f32 0.5, %v2821_v1  ;;  %v2835_v13 = vadd.f32 %v2813_v56, %v1372_v2  ;;  %v2838_v14 = vadd.f32 %v2804_v50, %v688_v3  ;;  %v1373_v15 = vmul.f32 %v2795_v44, %v1240_v10 }
 0x107   : > { %v1444_v16 = vmul.f32 0.5, %v2826_v6  ;;  %v755_v30 = vmul.f32 0.5, %v2829_v7  ;;  %v2844_v31 = vadd.f32 %v2813_v56, %v1375_v8  ;;  %v2847_v49 = vadd.f32 %v2804_v50, %v686_v9 }
 0x108   : > { %2451 = vtanh.f32 %v757_v12  ;;  %v1442_v54 = vmul.f32 0.5, %v2835_v13  ;;  %v758_v55 = vmul.f32 0.5, %v2838_v14  ;;  %v2852_v57 = vadd.f32 %v2813_v56, %v1373_v15 }
 0x109   : > { %2453 = vtanh.f32 %v1444_v16  ;;  %v1445_v62 = vmul.f32 0.5, %v2844_v31  ;;  %v2321_v63 = vpop.f32.mrb[4].mxu0  ;;  %v756_v3 = vmul.f32 0.5, %v2847_v49 }
 0x10a   : > { %2455 = vtanh.f32 %v755_v30  ;;  %v691_v4 = vmul.f32 %v2321_v63, %v2786_v39  ;;  %v2369_v5 = vpop.f32.mrb[4].mxu1  ;;  %v566_v8 = vpop.f32.mrb[5].mxu0  ;;  %v1443_v9 = vmul.f32 0.5, %v2852_v57 }
 0x10b   : > { %2457 = vtanh.f32 %v1442_v54  ;;  %v1378_v10 = vmul.f32 %v2369_v5, %v2795_v44  ;;  %v689_v12 = vmul.f32 %v2786_v39, %v566_v8  ;;  %v1253_v15 = vpop.f32.mrb[5].mxu1  ;;  %v2322_v16 = vpop.f32.mrb[6].mxu0 }
 0x10c   : > { %2459 = vtanh.f32 %v758_v55  ;;  %v2864_v60 = vadd.f32 %v2804_v50, %v691_v4  ;;  %v1376_v30 = vmul.f32 %v2795_v44, %v1253_v15  ;;  %v692_v2 = vmul.f32 %v2322_v16, %v2786_v39  ;;  %v2370_v63 = vpop.f32.mrb[6].mxu1  ;;  %v569_v0 = vpop.f32.mrb[7].mxu0 }
 0x10d   : > { %2461 = vtanh.f32 %v1445_v62  ;;  %v2869_v54 = vadd.f32 %v2813_v56, %v1378_v10  ;;  %v2872_v5 = vadd.f32 %v2804_v50, %v689_v12  ;;  %v1379_v8 = vmul.f32 %v2370_v63, %v2795_v44  ;;  %v1256_v61 = vpop.f32.mrb[7].mxu1 }
 0x10e   : > { %2463 = vtanh.f32 %v756_v3  ;;  %v761_v55 = vmul.f32 0.5, %v2864_v60  ;;  %v2877_v4 = vadd.f32 %v2813_v56, %v1376_v30  ;;  %v2880_v15 = vadd.f32 %v2804_v50, %v692_v2 }
 0x10f   : > { %2465 = vtanh.f32 %v1443_v9  ;;  %v1448_v62 = vmul.f32 0.5, %v2869_v54  ;;  %v759_v10 = vmul.f32 0.5, %v2872_v5  ;;  %v2885_v12 = vadd.f32 %v2813_v56, %v1379_v8 }
 0x110   : > { %2467 = vtanh.f32 %v761_v55  ;;  %v1446_v16 = vmul.f32 0.5, %v2877_v4  ;;  %v762_v3 = vmul.f32 0.5, %v2880_v15  ;;  %v690_v63 = vmul.f32 %v2786_v39, %v569_v0 }
 0x111   : > { %2469 = vtanh.f32 %v1448_v62  ;;  %v1449_v2 = vmul.f32 0.5, %v2885_v12  ;;  %v1377_v9 = vmul.f32 %v2795_v44, %v1256_v61  ;;  %v2325_v53 = vpop.f32.mrb[8].mxu0 }
 0x112   : > { %v2452_v59 = vpop.eup %2451  ;;  %2471 = vtanh.f32 %v759_v10  ;;  %v2895_v8 = vadd.f32 %v2804_v50, %v690_v63  ;;  %v695_v55 = vmul.f32 %v2325_v53, %v2786_v39  ;;  %v2373_v58 = vpop.f32.mrb[8].mxu1 }
 0x113   : > { %v2898_v47 = vpop.f32.mrb[9].mxu0  ;;  %v2454_v0 = vpop.eup %2453  ;;  %v821_v30 = vmul.f32 0.5, %v2452_v59  ;;  %2473 = vtanh.f32 %v1446_v16  ;;  %v2901_v62 = vadd.f32 %v2813_v56, %v1377_v9  ;;  %v2904_v61 = vmul.f32 %v2373_v58, %v2795_v44 }
 0x114   : > { %v2906_v51 = vpop.f32.mrb[9].mxu1  ;;  %v2908_v10 = vpop.f32.mrb[10].mxu0  ;;  %v1508_v52 = vmul.f32 0.5, %v2454_v0  ;;  %2475 = vtanh.f32 %v762_v3  ;;  %v760_v53 = vmul.f32 0.5, %v2895_v8  ;;  %v2912_v46 = vadd.f32 %v2804_v50, %v695_v55 }
 0x115   : > { %v2456_v63 = vpop.eup %2455  ;;  %v2914_v59 = vpop.f32.mrb[10].mxu1  ;;  %v853_v48 = vadd.f32 0.5, %v821_v30  ;;  %2477 = vtanh.f32 %v1449_v2  ;;  %v1447_v42 = vmul.f32 0.5, %v2901_v62 }
 0x116   : > { %v2916_v16 = vpop.f32.mrb[11].mxu0  ;;  %v2458_v9 = vpop.eup %2457  ;;  %v819_v58 = vmul.f32 0.5, %v2456_v63  ;;  %v1540_v0 = vadd.f32 0.5, %v1508_v52  ;;  %2479 = vtanh.f32 %v760_v53  ;;  %v765_v43 = vmul.f32 0.5, %v2912_v46 }
 0x117   : > { %v2919_v45 = vpop.f32.mrb[11].mxu1  ;;  %v2460_v41 = vpop.eup %2459  ;;  %v1506_v3 = vmul.f32 0.5, %v2458_v9  ;;  %v885_v37 = vmul.f32 %v853_v48, %v2821_v1  ;;  %2481 = vtanh.f32 %v1447_v42 }
 0x118   : > { %v2462_v55 = vpop.eup %2461  ;;  %v851_v40 = vadd.f32 0.5, %v819_v58  ;;  %v822_v36 = vmul.f32 0.5, %v2460_v41  ;;  %v1572_v30 = vmul.f32 %v1540_v0, %v2826_v6  ;;  %2483 = vtanh.f32 %v765_v43 }
 0x119   : > { %v2464_v38 = vpop.eup %2463  ;;  %v1538_v2 = vadd.f32 0.5, %v1506_v3  ;;  %v1509_v63 = vmul.f32 0.5, %v2462_v55  ;;  %v949_v52 = vadd.f32 %v917_v34, %v885_v37  ;;  %v2927_v32 = vpop.f32.mrb[12].mxu0  ;;  %v3547_v37 = vunpack.c.l.bf16 %v2690_v11 }
 0x11a   : > { %v2466_v33 = vpop.eup %2465  ;;  %v883_v53 = vmul.f32 %v851_v40, %v2829_v7  ;;  %v854_v9 = vadd.f32 0.5, %v822_v36  ;;  %v820_v35 = vmul.f32 0.5, %v2464_v38  ;;  %v1604_v41 = vadd.f32 %v1572_v30, %v917_v34  ;;  %v2932_v58 = vpop.f32.mrb[12].mxu1 }
 0x11b   : > { %v2468_v48 = vpop.eup %2467  ;;  %v1570_v42 = vmul.f32 %v1538_v2, %v2835_v13  ;;  %v1541_v1 = vadd.f32 0.5, %v1509_v63  ;;  %v1507_v6 = vmul.f32 0.5, %v2466_v33  ;;  %v2934_v43 = vpop.f32.mrb[13].mxu0  ;;  %v3548_v33 = vmov %v3547_v37 }
 0x11c   : > { %v2470_v0 = vpop.eup %2469  ;;  %v947_v40 = vadd.f32 %v3547_v37, %v883_v53  ;;  %v886_v36 = vmul.f32 %v854_v9, %v2838_v14  ;;  %v852_v38 = vadd.f32 0.5, %v820_v35  ;;  %v825_v7 = vmul.f32 0.5, %v2468_v48  ;;  %v2939_v3 = vpop.f32.mrb[13].mxu1 }
 0x11d   : > { %v2941_v34 = vpop.f32.mrb[14].mxu0  ;;  %v2472_v13 = vpop.eup %2471  ;;  %v1602_v55 = vadd.f32 %v1570_v42, %v3548_v33  ;;  %v1573_v30 = vmul.f32 %v1541_v1, %v2844_v31  ;;  %v1539_v2 = vadd.f32 0.5, %v1507_v6  ;;  %v1512_v63 = vmul.f32 0.5, %v2470_v0 }
 0x11e   : > { %v2946_v28 = vpop.f32.mrb[14].mxu1  ;;  %v2948_v53 = vpop.f32.mrb[15].mxu0  ;;  %v3549_v14 = vunpack.c.h.bf16 %v2710_v17  ;;  %v884_v48 = vmul.f32 %v852_v38, %v2847_v49  ;;  %v857_v37 = vadd.f32 0.5, %v825_v7  ;;  %v823_v29 = vmul.f32 0.5, %v2472_v13 }
 0x11f   : > { %v2474_v35 = vpop.eup %2473  ;;  %v2953_v26 = vpop.f32.mrb[15].mxu1  ;;  %v1571_v6 = vmul.f32 %v1539_v2, %v2852_v57  ;;  %v1544_v0 = vadd.f32 0.5, %v1512_v63  ;;  %v3551_v38 = vunpack.c.h.bf16 %v2690_v11 }
 0x120   : > { %v950_v9 = vadd.f32 %v3549_v14, %v886_v36  ;;  %v2476_v42 = vpop.eup %2475  ;;  %v3550_v31 = vmov %v3549_v14  ;;  %v1510_v36 = vmul.f32 0.5, %v2474_v35  ;;  %v889_v13 = vmul.f32 %v857_v37, %v2864_v60 }
 0x121   : > { %v1605_v1 = vadd.f32 %v1573_v30, %v3550_v31  ;;  %v2478_v33 = vpop.eup %2477  ;;  %v948_v7 = vadd.f32 %v3551_v38, %v884_v48  ;;  %v855_v17 = vadd.f32 0.5, %v823_v29  ;;  %v3552_v57 = vmov %v3551_v38  ;;  %v2980_v60 = vpop.f32.mrb[16].mxu0 }
 0x122   : > { %v2069_v49 = vpack.c.bf16 %v950_v9, %v949_v52  ;;  %v2480_v30 = vpop.eup %2479  ;;  %v1603_v2 = vadd.f32 %v1571_v6, %v3552_v57  ;;  %v1576_v63 = vmul.f32 %v1544_v0, %v2869_v54  ;;  %v1542_v52 = vadd.f32 0.5, %v1510_v36  ;;  %v2986_v6 = vpop.f32.mrb[16].mxu1 }
 0x123   : > { %v2149_v14 = vpack.c.bf16 %v1605_v1, %v1604_v41  ;;  %v2482_v35 = vpop.eup %2481  ;;  %v2064_v9 = vpack.c.bf16 %v948_v7, %v947_v40  ;;  %v3553_v31 = vunpack.c.l.bf16 %v2719_v19  ;;  %v887_v48 = vmul.f32 %v855_v17, %v2872_v5  ;;  %v2988_v40 = vpop.f32.mrb[17].mxu0 }
 0x124   : > { %2221 = vst [vmem:[%s2959_s14 + $0x8] sm:$0xff] %v2069_v49   ;;  %v826_v38 = vmul.f32 0.5, %v2476_v42  ;;  %v2484_v29 = vpop.eup %2483  ;;  %v2144_v11 = vpack.c.bf16 %v1603_v2, %v1602_v55  ;;  %v1574_v37 = vmul.f32 %v1542_v52, %v2877_v4  ;;  %v1513_v1 = vmul.f32 0.5, %v2478_v33  ;;  %v2993_v7 = vpop.f32.mrb[17].mxu1 }
 0x125   : > { %v953_v27 = vadd.f32 %v3553_v31, %v889_v13  ;;  %2236 = vst [vmem:[%s2968_s17 + $0x8] sm:$0xff] %v2149_v14   ;;  %v3554_v41 = vmov %v3553_v31  ;;  %2065 = vst [vmem:[%s2959_s14] sm:$0xff] %v2064_v9   ;;  %v3555_v5 = vunpack.c.l.bf16 %v2713_v18  ;;  %v824_v36 = vmul.f32 0.5, %v2480_v30  ;;  %v2995_v55 = vpop.f32.mrb[18].mxu0  ;;  %v3004_v57 = vpop.f32.mrb[18].mxu1 }
 0x126   : > { %v1608_v54 = vadd.f32 %v1576_v63, %v3554_v41  ;;  %v858_v0 = vadd.f32 0.5, %v826_v38  ;;  %v1511_v49 = vmul.f32 0.5, %v2482_v35  ;;  %2145 = vst [vmem:[%s2968_s17] sm:$0xff] %v2144_v11   ;;  %v1545_v33 = vadd.f32 0.5, %v1513_v1  ;;  %v3006_v2 = vpop.f32.mrb[19].mxu0  ;;  %v3011_v9 = vpop.f32.mrb[19].mxu1 }
 0x127   : > { %v951_v42 = vadd.f32 %v3555_v5, %v887_v48  ;;  %v3556_v13 = vmov %v3555_v5  ;;  %v829_v17 = vmul.f32 0.5, %v2484_v29  ;;  %v3002_v14 = vadd.f32 %v2813_v56, %v2904_v61 }
 0x128   : > { %v1606_v4 = vadd.f32 %v1574_v37, %v3556_v13  ;;  %v890_v30 = vmul.f32 %v858_v0, %v2880_v15  ;;  %v856_v63 = vadd.f32 0.5, %v824_v36  ;;  %v1543_v52 = vadd.f32 0.5, %v1511_v49 }
 0x129   : > { %v693_v35 = vmul.f32 %v2786_v39, %v2898_v47  ;;  %v1577_v31 = vmul.f32 %v1545_v33, %v2885_v12  ;;  %v861_v48 = vadd.f32 0.5, %v829_v17  ;;  %v1452_v38 = vmul.f32 0.5, %v3002_v14  ;;  %v3035_v13 = vpop.f32.mrb[20].mxu0 }
 0x12a   : > { %v1380_v61 = vmul.f32 %v2795_v44, %v2906_v51  ;;  %v3557_v29 = vunpack.c.h.bf16 %v2719_v19  ;;  %v888_v15 = vmul.f32 %v856_v63, %v2895_v8  ;;  %v1575_v41 = vmul.f32 %v1543_v52, %v2901_v62 }
 0x12b   : > { %v3022_v37 = vadd.f32 %v2804_v50, %v693_v35  ;;  %v893_v1 = vmul.f32 %v861_v48, %v2912_v46  ;;  %2485 = vtanh.f32 %v1452_v38  ;;  %v3559_v0 = vunpack.c.h.bf16 %v2713_v18  ;;  %v3046_v18 = vpop.f32.mrb[21].mxu0 }
 0x12c   : > { %v954_v11 = vadd.f32 %v3557_v29, %v890_v30  ;;  %v3558_v47 = vmov %v3557_v29  ;;  %v3028_v5 = vadd.f32 %v2813_v56, %v1380_v61  ;;  %v3561_v33 = vunpack.c.l.bf16 %v2729_v21  ;;  %v3044_v30 = vpop.f32.mrb[20].mxu1 }
 0x12d   : > { %v1609_v12 = vadd.f32 %v1577_v31, %v3558_v47  ;;  %v952_v36 = vadd.f32 %v3559_v0, %v888_v15  ;;  %v3560_v8 = vmov %v3559_v0  ;;  %v763_v49 = vmul.f32 0.5, %v3022_v37  ;;  %v3051_v35 = vpop.f32.mrb[21].mxu1  ;;  %v3053_v31 = vpop.f32.mrb[22].mxu0 }
 0x12e   : > { %v2079_v51 = vpack.c.bf16 %v954_v11, %v953_v27  ;;  %v1607_v62 = vadd.f32 %v1575_v41, %v3560_v8  ;;  %v3039_v46 = vadd.f32 %v3561_v33, %v893_v1  ;;  %v1450_v17 = vmul.f32 0.5, %v3028_v5  ;;  %v3065_v38 = vpop.f32.mrb[23].mxu0 }
 0x12f   : > { %v2159_v19 = vpack.c.bf16 %v1609_v12, %v1608_v54  ;;  %v696_v27 = vmul.f32 %v2908_v10, %v2786_v39  ;;  %v2074_v63 = vpack.c.bf16 %v952_v36, %v951_v42  ;;  %2487 = vtanh.f32 %v763_v49 }
 0x130   : > { %2223 = vst [vmem:[%s2959_s14 + $0x18] sm:$0xff] %v2079_v51   ;;  %v2154_v52 = vpack.c.bf16 %v1607_v62, %v1606_v4  ;;  %v1383_v54 = vmul.f32 %v2914_v59, %v2795_v44  ;;  %2489 = vtanh.f32 %v1450_v17  ;;  %v694_v48 = vmul.f32 %v2786_v39, %v2916_v16  ;;  %v3063_v4 = vpop.f32.mrb[22].mxu1 }
 0x131   : > { %2238 = vst [vmem:[%s2968_s17 + $0x18] sm:$0xff] %v2159_v19   ;;  %v3057_v10 = vadd.f32 %v2804_v50, %v696_v27  ;;  %v1381_v42 = vmul.f32 %v2795_v44, %v2919_v45  ;;  %2222 = vst [vmem:[%s2959_s14 + $0x10] sm:$0xff] %v2074_v63   ;;  %v699_v61 = vmul.f32 %v2927_v32, %v2786_v39  ;;  %v3078_v11 = vpop.f32.mrb[23].mxu1  ;;  %v3107_v62 = vpop.f32.mrb[24].mxu0 }
 0x132   : > { %2237 = vst [vmem:[%s2968_s17 + $0x10] sm:$0xff] %v2154_v52   ;;  %v3070_v59 = vadd.f32 %v2813_v56, %v1383_v54  ;;  %v1386_v29 = vmul.f32 %v2932_v58, %v2795_v44  ;;  %v697_v16 = vmul.f32 %v2786_v39, %v2934_v43  ;;  %v3082_v15 = vadd.f32 %v2804_v50, %v694_v48  ;;  %v3114_v27 = vpop.f32.mrb[24].mxu1  ;;  %v3116_v63 = vpop.f32.mrb[25].mxu0 }
 0x133   : > { %v766_v45 = vmul.f32 0.5, %v3057_v10  ;;  %v3085_v41 = vadd.f32 %v2813_v56, %v1381_v42  ;;  %v1384_v47 = vmul.f32 %v2795_v44, %v2939_v3  ;;  %v3091_v58 = vadd.f32 %v2804_v50, %v699_v61  ;;  %3562 = vst [vmem:[#allocation6_spill] sm:$0xff] %v3107_v62  ;;  %3563 = vst [vmem:[#allocation7_spill] sm:$0xff] %v3114_v27  ;;  %v3122_v42 = vpop.f32.mrb[25].mxu1  ;;  %v3124_v61 = vpop.f32.mrb[26].mxu0 }
 0x134   : > { %v1453_v32 = vmul.f32 0.5, %v3070_v59  ;;  %v3094_v43 = vadd.f32 %v2813_v56, %v1386_v29  ;;  %v3097_v12 = vadd.f32 %v2804_v50, %v697_v16  ;;  %v764_v1 = vmul.f32 0.5, %v3082_v15  ;;  %3564 = vst [vmem:[#allocation8_spill] sm:$0xff] %v3116_v63  ;;  %3565 = vst [vmem:[#allocation9_spill] sm:$0xff] %v3122_v42  ;;  %v3134_v16 = vpop.f32.mrb[26].mxu1 }
 0x135   : > { %2491 = vtanh.f32 %v766_v45  ;;  %v1451_v51 = vmul.f32 0.5, %v3085_v41  ;;  %v3102_v0 = vadd.f32 %v2813_v56, %v1384_v47  ;;  %v769_v3 = vmul.f32 0.5, %v3091_v58  ;;  %v2486_v49 = vpop.eup %2485  ;;  %3566 = vst [vmem:[#allocation10_spill] sm:$0xff] %v3124_v61  ;;  %3567 = vst [vmem:[#allocation11_spill] sm:$0xff] %v3134_v16 }
 0x136   : > { %2493 = vtanh.f32 %v1453_v32  ;;  %v1456_v36 = vmul.f32 0.5, %v3094_v43  ;;  %v767_v8 = vmul.f32 0.5, %v3097_v12  ;;  %v700_v33 = vmul.f32 %v2941_v34, %v2786_v39 }
 0x137   : > { %2495 = vtanh.f32 %v764_v1  ;;  %v1454_v19 = vmul.f32 0.5, %v3102_v0  ;;  %v1387_v17 = vmul.f32 %v2946_v28, %v2795_v44  ;;  %v1516_v52 = vmul.f32 0.5, %v2486_v49  ;;  %v3144_v1 = vpop.f32.mrb[27].mxu1 }
 0x138   : > { %2497 = vtanh.f32 %v1451_v51  ;;  %v698_v54 = vmul.f32 %v2786_v39, %v2948_v53  ;;  %v1385_v48 = vmul.f32 %v2795_v44, %v2953_v26  ;;  %v3127_v34 = vadd.f32 %v2804_v50, %v700_v33  ;;  %v3136_v53 = vpop.f32.mrb[27].mxu0  ;;  %3569 = vst [vmem:[#allocation13_spill] sm:$0xff] %v3144_v1 }
 0x139   : > { %2499 = vtanh.f32 %v769_v3  ;;  %v3130_v28 = vadd.f32 %v2813_v56, %v1387_v17  ;;  %v703_v29 = vmul.f32 %v2980_v60, %v2786_v39  ;;  %3568 = vst [vmem:[#allocation12_spill] sm:$0xff] %v3136_v53  ;;  %v2488_v45 = vpop.eup %2487  ;;  %v1548_v26 = vadd.f32 0.5, %v1516_v52 }
 0x13a   : > { %2501 = vtanh.f32 %v1456_v36  ;;  %v3139_v47 = vadd.f32 %v2804_v50, %v698_v54  ;;  %v3142_v32 = vadd.f32 %v2813_v56, %v1385_v48  ;;  %v2490_v51 = vpop.eup %2489  ;;  %v827_v3 = vmul.f32 0.5, %v2488_v45 }
 0x13b   : > { %2503 = vtanh.f32 %v767_v8  ;;  %v770_v60 = vmul.f32 0.5, %v3127_v34  ;;  %v1457_v49 = vmul.f32 0.5, %v3130_v28  ;;  %v1580_v33 = vmul.f32 %v1548_v26, %v3002_v14  ;;  %v3160_v26 = vpop.f32.mrb[28].mxu0 }
 0x13c   : > { %v1514_v17 = vmul.f32 0.5, %v2490_v51  ;;  %2505 = vtanh.f32 %v1454_v19  ;;  %v768_v36 = vmul.f32 0.5, %v3139_v47  ;;  %v859_v52 = vadd.f32 0.5, %v827_v3  ;;  %3571 = vst [vmem:[#allocation14_spill] sm:$0xff] %v3160_v26 }
 0x13d   : > { %2507 = vtanh.f32 %v770_v60  ;;  %v1455_v54 = vmul.f32 0.5, %v3142_v32  ;;  %v3152_v48 = vadd.f32 %v2804_v50, %v703_v29  ;;  %v3570_v45 = vunpack.c.l.bf16 %v2729_v21  ;;  %v3166_v60 = vpop.f32.mrb[28].mxu1 }
 0x13e   : > { %v1546_v1 = vadd.f32 0.5, %v1514_v17  ;;  %2509 = vtanh.f32 %v1457_v49  ;;  %v1390_v14 = vmul.f32 %v2986_v6, %v2795_v44  ;;  %v891_v51 = vmul.f32 %v859_v52, %v3022_v37  ;;  %3572 = vst [vmem:[#allocation15_spill] sm:$0xff] %v3166_v60  ;;  %v3174_v26 = vpop.f32.mrb[29].mxu1 }
 0x13f   : > { %v3156_v8 = vadd.f32 %v1580_v33, %v3570_v45  ;;  %v2492_v19 = vpop.eup %2491  ;;  %2511 = vtanh.f32 %v768_v36  ;;  %v773_v3 = vmul.f32 0.5, %v3152_v48  ;;  %v701_v29 = vmul.f32 %v2786_v39, %v2988_v40  ;;  %v3168_v33 = vpop.f32.mrb[29].mxu0  ;;  %3574 = vst [vmem:[#allocation17_spill] sm:$0xff] %v3174_v26 }
 0x140   : > { %3573 = vst [vmem:[#allocation16_spill] sm:$0xff] %v3168_v33  ;;  %v2494_v17 = vpop.eup %2493  ;;  %v1578_v49 = vmul.f32 %v1546_v1, %v3028_v5  ;;  %v830_v45 = vmul.f32 0.5, %v2492_v19  ;;  %2513 = vtanh.f32 %v1455_v54  ;;  %v3172_v6 = vadd.f32 %v2813_v56, %v1390_v14  ;;  %v3176_v37 = vpop.f32.mrb[30].mxu0 }
 0x141   : > { %3575 = vst [vmem:[#allocation18_spill] sm:$0xff] %v3176_v37  ;;  %v2496_v36 = vpop.eup %2495  ;;  %v3576_v52 = vunpack.c.l.bf16 %v2723_v20  ;;  %v1517_v53 = vmul.f32 0.5, %v2494_v17  ;;  %2515 = vtanh.f32 %v773_v3  ;;  %v3181_v33 = vadd.f32 %v2804_v50, %v701_v29  ;;  %v3183_v60 = vpop.f32.mrb[30].mxu1 }
 0x142   : > { %3577 = vst [vmem:[#allocation19_spill] sm:$0xff] %v3183_v60  ;;  %v3185_v5 = vpop.f32.mrb[31].mxu0  ;;  %v2498_v1 = vpop.eup %2497  ;;  %v862_v19 = vadd.f32 0.5, %v830_v45  ;;  %v828_v26 = vmul.f32 0.5, %v2496_v36  ;;  %v1460_v37 = vmul.f32 0.5, %v3172_v6 }
 0x143   : > { %v955_v40 = vadd.f32 %v3576_v52, %v891_v51  ;;  %3578 = vst [vmem:[#allocation20_spill] sm:$0xff] %v3185_v5  ;;  %v3579_v54 = vmov %v3576_v52  ;;  %v3190_v16 = vpop.f32.mrb[31].mxu1  ;;  %v2500_v51 = vpop.eup %2499  ;;  %v1549_v17 = vadd.f32 0.5, %v1517_v53  ;;  %v1515_v3 = vmul.f32 0.5, %v2498_v1 }
 0x144   : > { %v1610_v14 = vadd.f32 %v1578_v49, %v3579_v54  ;;  %3580 = vst [vmem:[#allocation21_spill] sm:$0xff] %v3190_v16  ;;  %v771_v29 = vmul.f32 0.5, %v3181_v33  ;;  %v1388_v52 = vmul.f32 %v2795_v44, %v2993_v7  ;;  %v2502_v60 = vpop.eup %2501  ;;  %v894_v5 = vmul.f32 %v862_v19, %v3057_v10 }
 0x145   : > { %v860_v61 = vadd.f32 0.5, %v828_v26  ;;  %v833_v42 = vmul.f32 0.5, %v2500_v51  ;;  %2517 = vtanh.f32 %v1460_v37  ;;  %v2504_v49 = vpop.eup %2503  ;;  %v1581_v45 = vmul.f32 %v1549_v17, %v3070_v59 }
 0x146   : > { %v1547_v36 = vadd.f32 0.5, %v1515_v3  ;;  %v1520_v54 = vmul.f32 0.5, %v2502_v60  ;;  %2519 = vtanh.f32 %v771_v29  ;;  %v2506_v16 = vpop.eup %2505  ;;  %v3581_v53 = vunpack.c.h.bf16 %v2729_v21 }
 0x147   : > { %v892_v63 = vmul.f32 %v860_v61, %v3082_v15  ;;  %v865_v27 = vadd.f32 0.5, %v833_v42  ;;  %v831_v7 = vmul.f32 0.5, %v2504_v49  ;;  %v2508_v62 = vpop.eup %2507  ;;  %v1518_v59 = vmul.f32 0.5, %v2506_v16 }
 0x148   : > { %v958_v1 = vadd.f32 %v3581_v53, %v894_v5  ;;  %v3582_v10 = vmov %v3581_v53  ;;  %v1579_v37 = vmul.f32 %v1547_v36, %v3085_v41  ;;  %v1552_v19 = vadd.f32 0.5, %v1520_v54  ;;  %v2510_v51 = vpop.eup %2509 }
 0x149   : > { %v1613_v26 = vadd.f32 %v1581_v45, %v3582_v10  ;;  %v3583_v17 = vunpack.c.h.bf16 %v2723_v20  ;;  %v897_v15 = vmul.f32 %v865_v27, %v3091_v58  ;;  %v863_v42 = vadd.f32 0.5, %v831_v7  ;;  %v2512_v61 = vpop.eup %2511 }
 0x14a   : > { %v2089_v60 = vpack.c.bf16 %v958_v1, %v3039_v46  ;;  %v1584_v41 = vmul.f32 %v1552_v19, %v3094_v43  ;;  %v1550_v16 = vadd.f32 0.5, %v1518_v59  ;;  %v2514_v49 = vpop.eup %2513  ;;  %v3585_v45 = vunpack.c.l.bf16 %v2739_v23 }
 0x14b   : > { %v956_v5 = vadd.f32 %v3583_v17, %v892_v63  ;;  %v2169_v3 = vpack.c.bf16 %v1613_v26, %v3156_v8  ;;  %v3584_v21 = vmov %v3583_v17  ;;  %v895_v58 = vmul.f32 %v863_v42, %v3097_v12  ;;  %v2516_v36 = vpop.eup %2515 }
 0x14c   : > { %v1611_v29 = vadd.f32 %v1579_v37, %v3584_v21  ;;  %2225 = vst [vmem:[%s2959_s14 + $0x28] sm:$0xff] %v2089_v60   ;;  %v961_v63 = vadd.f32 %v3585_v45, %v897_v15  ;;  %v834_v27 = vmul.f32 0.5, %v2508_v62  ;;  %v3586_v20 = vmov %v3585_v45 }
 0x14d   : > { %v2084_v46 = vpack.c.bf16 %v956_v5, %v955_v40  ;;  %2240 = vst [vmem:[%s2968_s17 + $0x28] sm:$0xff] %v2169_v3   ;;  %v1616_v54 = vadd.f32 %v1584_v41, %v3586_v20  ;;  %v1582_v53 = vmul.f32 %v1550_v16, %v3102_v0  ;;  %v1521_v43 = vmul.f32 0.5, %v2510_v51 }
 0x14e   : > { %v2164_v8 = vpack.c.bf16 %v1611_v29, %v1610_v14  ;;  %v3587_v1 = vunpack.c.l.bf16 %v2733_v22  ;;  %v866_v40 = vadd.f32 0.5, %v834_v27  ;;  %v832_v10 = vmul.f32 0.5, %v2512_v61 }
 0x14f   : > { %2224 = vst [vmem:[%s2959_s14 + $0x20] sm:$0xff] %v2084_v46   ;;  %v1519_v26 = vmul.f32 0.5, %v2514_v49  ;;  %v1553_v37 = vadd.f32 0.5, %v1521_v43  ;;  %v837_v19 = vmul.f32 0.5, %v2516_v36  ;;  %v3226_v14 = vadd.f32 %v2813_v56, %v1388_v52  ;;  %v2518_v59 = vpop.eup %2517 }
 0x150   : > { %v959_v7 = vadd.f32 %v3587_v1, %v895_v58  ;;  %2239 = vst [vmem:[%s2968_s17 + $0x20] sm:$0xff] %v2164_v8   ;;  %v3588_v12 = vmov %v3587_v1  ;;  %v898_v0 = vmul.f32 %v866_v40, %v3127_v34  ;;  %v864_v51 = vadd.f32 0.5, %v832_v10  ;;  %v2520_v5 = vpop.eup %2519 }
 0x151   : > { %v1614_v62 = vadd.f32 %v1582_v53, %v3588_v12  ;;  %v1551_v60 = vadd.f32 0.5, %v1519_v26  ;;  %v704_v17 = vmul.f32 %v2995_v55, %v2786_v39  ;;  %v1585_v15 = vmul.f32 %v1553_v37, %v3130_v28 }
 0x152   : > { %v869_v42 = vadd.f32 0.5, %v837_v19  ;;  %v1524_v61 = vmul.f32 0.5, %v2518_v59  ;;  %v1458_v3 = vmul.f32 0.5, %v3226_v14  ;;  %v3589_v21 = vunpack.c.h.bf16 %v2739_v23 }
 0x153   : > { %v896_v52 = vmul.f32 %v864_v51, %v3139_v47  ;;  %v1583_v34 = vmul.f32 %v1551_v60, %v3142_v32  ;;  %v835_v41 = vmul.f32 0.5, %v2520_v5  ;;  %v3591_v45 = vunpack.c.h.bf16 %v2733_v22 }
 0x154   : > { %v962_v29 = vadd.f32 %v3589_v21, %v898_v0  ;;  %v3590_v16 = vmov %v3589_v21  ;;  %v901_v55 = vmul.f32 %v869_v42, %v3152_v48  ;;  %v1556_v28 = vadd.f32 0.5, %v1524_v61 }
 0x155   : > { %v1617_v49 = vadd.f32 %v1585_v15, %v3590_v16  ;;  %2521 = vtanh.f32 %v1458_v3  ;;  %v960_v58 = vadd.f32 %v3591_v45, %v896_v52  ;;  %v3592_v27 = vmov %v3591_v45  ;;  %v3596_v16 = vld [vmem:[#allocation6_spill] sm:$0xff] }
 0x156   : > { %v2099_v46 = vpack.c.bf16 %v962_v29, %v961_v63  ;;  %v1615_v36 = vadd.f32 %v1583_v34, %v3592_v27  ;;  %v867_v47 = vadd.f32 0.5, %v835_v41  ;;  %v3593_v8 = vunpack.c.l.bf16 %v2749_v25 }
 0x157   : > { %v2179_v32 = vpack.c.bf16 %v1617_v49, %v1616_v54  ;;  %v1588_v48 = vmul.f32 %v1556_v28, %v3172_v6  ;;  %v3250_v20 = vadd.f32 %v2804_v50, %v704_v17  ;;  %v2094_v63 = vpack.c.bf16 %v960_v58, %v959_v7  ;;  %v3597_v28 = vld [vmem:[#allocation7_spill] sm:$0xff] }
 0x158   : > { %v3246_v23 = vadd.f32 %v3593_v8, %v901_v55  ;;  %2227 = vst [vmem:[%s2959_s14 + $0x38] sm:$0xff] %v2099_v46   ;;  %v2174_v53 = vpack.c.bf16 %v1615_v36, %v1614_v62  ;;  %v899_v43 = vmul.f32 %v867_v47, %v3181_v33  ;;  %v1391_v22 = vmul.f32 %v3004_v57, %v2795_v44 }
 0x159   : > { %2242 = vst [vmem:[%s2968_s17 + $0x38] sm:$0xff] %v2179_v32   ;;  %v3594_v54 = vmov %v3593_v8  ;;  %v774_v40 = vmul.f32 0.5, %v3250_v20  ;;  %v702_v6 = vmul.f32 %v2786_v39, %v3006_v2  ;;  %v1389_v10 = vmul.f32 %v2795_v44, %v3011_v9  ;;  %2226 = vst [vmem:[%s2959_s14 + $0x30] sm:$0xff] %v2094_v63   ;;  %v3598_v32 = vld [vmem:[#allocation8_spill] sm:$0xff] }
 0x15a   : > { %v3259_v1 = vadd.f32 %v1588_v48, %v3594_v54  ;;  %2241 = vst [vmem:[%s2968_s17 + $0x30] sm:$0xff] %v2174_v53   ;;  %v3595_v33 = vunpack.c.l.bf16 %v2743_v24  ;;  %v3273_v57 = vadd.f32 %v2813_v56, %v1391_v22  ;;  %v707_v26 = vmul.f32 %v3035_v13, %v2786_v39  ;;  %v3600_v54 = vld [vmem:[#allocation9_spill] sm:$0xff] }
 0x15b   : > { %v1394_v12 = vmul.f32 %v3044_v30, %v2795_v44  ;;  %2523 = vtanh.f32 %v774_v40  ;;  %v3280_v2 = vadd.f32 %v2804_v50, %v702_v6  ;;  %v3283_v9 = vadd.f32 %v2813_v56, %v1389_v10 }
 0x15c   : > { %v3270_v7 = vadd.f32 %v3595_v33, %v899_v43  ;;  %v705_v62 = vmul.f32 %v2786_v39, %v3046_v18  ;;  %v1461_v37 = vmul.f32 0.5, %v3273_v57  ;;  %v3289_v19 = vadd.f32 %v2804_v50, %v707_v26 }
 0x15d   : > { %v3292_v13 = vadd.f32 %v2813_v56, %v1394_v12  ;;  %v1392_v30 = vmul.f32 %v2795_v44, %v3051_v35  ;;  %v772_v59 = vmul.f32 0.5, %v3280_v2  ;;  %v1459_v0 = vmul.f32 0.5, %v3283_v9  ;;  %v3602_v12 = vld [vmem:[#allocation11_spill] sm:$0xff] }
 0x15e   : > { %v3299_v51 = vadd.f32 %v2804_v50, %v705_v62  ;;  %v708_v18 = vmul.f32 %v3053_v31, %v2786_v39  ;;  %2525 = vtanh.f32 %v1461_v37  ;;  %v777_v60 = vmul.f32 0.5, %v3289_v19 }
 0x15f   : > { %v1464_v17 = vmul.f32 0.5, %v3292_v13  ;;  %v3306_v5 = vadd.f32 %v2813_v56, %v1392_v30  ;;  %v2522_v15 = vpop.eup %2521  ;;  %2527 = vtanh.f32 %v772_v59  ;;  %v1395_v61 = vmul.f32 %v3063_v4, %v2795_v44 }
 0x160   : > { %v775_v35 = vmul.f32 0.5, %v3299_v51  ;;  %v3310_v42 = vadd.f32 %v2804_v50, %v708_v18  ;;  %v1522_v3 = vmul.f32 0.5, %v2522_v15  ;;  %2529 = vtanh.f32 %v1459_v0 }
 0x161   : > { %v1462_v31 = vmul.f32 0.5, %v3306_v5  ;;  %v706_v21 = vmul.f32 %v2786_v39, %v3065_v38  ;;  %2531 = vtanh.f32 %v777_v60  ;;  %v3319_v52 = vadd.f32 %v2813_v56, %v1395_v61 }
 0x162   : > { %v778_v29 = vmul.f32 0.5, %v3310_v42  ;;  %v1393_v34 = vmul.f32 %v2795_v44, %v3078_v11  ;;  %v1554_v41 = vadd.f32 0.5, %v1522_v3  ;;  %2533 = vtanh.f32 %v1464_v17 }
 0x163   : > { %v3324_v4 = vadd.f32 %v2804_v50, %v706_v21  ;;  %v711_v49 = vmul.f32 %v3596_v16, %v2786_v39  ;;  %2535 = vtanh.f32 %v775_v35  ;;  %v1465_v38 = vmul.f32 0.5, %v3319_v52 }
 0x164   : > { %v3330_v55 = vadd.f32 %v2813_v56, %v1393_v34  ;;  %v1398_v46 = vmul.f32 %v3597_v28, %v2795_v44  ;;  %v1586_v45 = vmul.f32 %v1554_v41, %v3226_v14  ;;  %2537 = vtanh.f32 %v1462_v31 }
 0x165   : > { %v776_v11 = vmul.f32 0.5, %v3324_v4  ;;  %v3337_v58 = vadd.f32 %v2804_v50, %v711_v49  ;;  %v2524_v27 = vpop.eup %2523  ;;  %2539 = vtanh.f32 %v778_v29  ;;  %v709_v8 = vmul.f32 %v2786_v39, %v3598_v32 }
 0x166   : > { %v1463_v36 = vmul.f32 0.5, %v3330_v55  ;;  %v3341_v47 = vadd.f32 %v2813_v56, %v1398_v46  ;;  %v3599_v48 = vmov %v3595_v33  ;;  %v838_v14 = vmul.f32 0.5, %v2524_v27  ;;  %v3601_v33 = vld [vmem:[#allocation10_spill] sm:$0xff] }
 0x167   : > { %v3347_v63 = vadd.f32 %v1586_v45, %v3599_v48  ;;  %2541 = vtanh.f32 %v1465_v38  ;;  %v781_v53 = vmul.f32 0.5, %v3337_v58  ;;  %v3352_v22 = vadd.f32 %v2804_v50, %v709_v8 }
 0x168   : > { %2543 = vtanh.f32 %v776_v11  ;;  %v1468_v43 = vmul.f32 0.5, %v3341_v47  ;;  %v1396_v40 = vmul.f32 %v2795_v44, %v3600_v54  ;;  %v2526_v6 = vpop.eup %2525  ;;  %v870_v10 = vadd.f32 0.5, %v838_v14 }
 0x169   : > { %2545 = vtanh.f32 %v1463_v36  ;;  %v712_v26 = vmul.f32 %v3601_v33, %v2786_v39  ;;  %v3360_v62 = vmul.f32 %v3602_v12, %v2795_v44  ;;  %v2528_v37 = vpop.eup %2527  ;;  %v1525_v30 = vmul.f32 0.5, %v2526_v6  ;;  %v3607_v12 = vld [vmem:[#allocation3_spill] sm:$0xff] }
 0x16a   : > { %2547 = vtanh.f32 %v781_v53  ;;  %v779_v59 = vmul.f32 0.5, %v3352_v22  ;;  %v3364_v0 = vadd.f32 %v2813_v56, %v1396_v40  ;;  %v2530_v18 = vpop.eup %2529  ;;  %v902_v60 = vmul.f32 %v870_v10, %v3250_v20 }
 0x16b   : > { %v836_v17 = vmul.f32 0.5, %v2528_v37  ;;  %2549 = vtanh.f32 %v1468_v43  ;;  %v3368_v15 = vadd.f32 %v2804_v50, %v712_v26  ;;  %v2532_v39 = vpop.eup %2531  ;;  %v1557_v35 = vadd.f32 0.5, %v1525_v30 }
 0x16c   : > { %v1523_v44 = vmul.f32 0.5, %v2530_v18  ;;  %2551 = vtanh.f32 %v779_v59  ;;  %v1466_v61 = vmul.f32 0.5, %v3364_v0  ;;  %v2534_v3 = vpop.eup %2533  ;;  %v3603_v31 = vunpack.c.h.bf16 %v2749_v25 }
 0x16d   : > { %v868_v56 = vadd.f32 0.5, %v836_v17  ;;  %v841_v29 = vmul.f32 0.5, %v2532_v39  ;;  %v782_v34 = vmul.f32 0.5, %v3368_v15  ;;  %v2536_v20 = vpop.eup %2535  ;;  %v1589_v41 = vmul.f32 %v1557_v35, %v3273_v57 }
 0x16e   : > { %v966_v21 = vadd.f32 %v3603_v31, %v902_v60  ;;  %v1555_v50 = vadd.f32 0.5, %v1523_v44  ;;  %v1528_v16 = vmul.f32 0.5, %v2534_v3  ;;  %2553 = vtanh.f32 %v1466_v61  ;;  %v2538_v49 = vpop.eup %2537 }
 0x16f   : > { %v900_v28 = vmul.f32 %v868_v56, %v3280_v2  ;;  %v873_v46 = vadd.f32 0.5, %v841_v29  ;;  %v839_v45 = vmul.f32 0.5, %v2536_v20  ;;  %v2540_v11 = vpop.eup %2539  ;;  %v3604_v27 = vmov %v3603_v31 }
 0x170   : > { %v2109_v38 = vpack.c.bf16 %v966_v21, %v3246_v23  ;;  %v1621_v36 = vadd.f32 %v1589_v41, %v3604_v27  ;;  %v1587_v32 = vmul.f32 %v1555_v50, %v3283_v9  ;;  %v1560_v8 = vadd.f32 0.5, %v1528_v16 }
 0x171   : > { %v1526_v48 = vmul.f32 0.5, %v2538_v49  ;;  %v2542_v14 = vpop.eup %2541  ;;  %v3605_v57 = vunpack.c.h.bf16 %v2743_v24  ;;  %v905_v23 = vmul.f32 %v873_v46, %v3289_v19  ;;  %v871_v43 = vadd.f32 0.5, %v839_v45 }
 0x172   : > { %2229 = vst [vmem:[%s2959_s14 + $0x48] sm:$0xff] %v2109_v38   ;;  %v842_v2 = vmul.f32 0.5, %v2540_v11  ;;  %v2544_v54 = vpop.eup %2543  ;;  %v2189_v40 = vpack.c.bf16 %v1621_v36, %v3259_v1  ;;  %v1592_v9 = vmul.f32 %v1560_v8, %v3292_v13  ;;  %v3608_v37 = vunpack.c.l.bf16 %v3607_v12 }
 0x173   : > { %v964_v53 = vadd.f32 %v3605_v57, %v900_v28  ;;  %v3606_v25 = vmov %v3605_v57  ;;  %v1558_v10 = vadd.f32 0.5, %v1526_v48  ;;  %v2546_v33 = vpop.eup %2545  ;;  %v903_v19 = vmul.f32 %v871_v43, %v3299_v51 }
 0x174   : > { %v1619_v6 = vadd.f32 %v1587_v32, %v3606_v25  ;;  %v969_v30 = vadd.f32 %v3608_v37, %v905_v23  ;;  %v874_v59 = vadd.f32 0.5, %v842_v2  ;;  %v2548_v18 = vpop.eup %2547  ;;  %2244 = vst [vmem:[%s2968_s17 + $0x48] sm:$0xff] %v2189_v40   ;;  %v3609_v24 = vmov %v3608_v37  ;;  %v2580_v37 = vld [vmem:[%s3528_s2] ss:$0 sm:$0xff] }
 0x175   : > { %v2104_v26 = vpack.c.bf16 %v964_v53, %v3270_v7  ;;  %v1624_v60 = vadd.f32 %v1592_v9, %v3609_v24  ;;  %v1590_v13 = vmul.f32 %v1558_v10, %v3306_v5  ;;  %v1529_v17 = vmul.f32 0.5, %v2542_v14  ;;  %v2550_v39 = vpop.eup %2549  ;;  %v3610_v7 = vld [vmem:[#allocation2_spill] sm:$0xff]  ;;  %v3620_v10 = vld [vmem:[#allocation4_spill] sm:$0xff] }
 0x176   : > { %v2184_v1 = vpack.c.bf16 %v1619_v6, %v3347_v63  ;;  %v3611_v35 = vunpack.c.l.bf16 %v3610_v7  ;;  %v906_v61 = vmul.f32 %v874_v59, %v3310_v42  ;;  %v840_v3 = vmul.f32 0.5, %v2544_v54  ;;  %v2552_v31 = vpop.eup %2551  ;;  %v2581_v59 = vld [vmem:[%s3531_s5] ss:$0 sm:$0xff] }
 0x177   : > { %2228 = vst [vmem:[%s2959_s14 + $0x40] sm:$0xff] %v2104_v26   ;;  %v1527_v51 = vmul.f32 0.5, %v2546_v33  ;;  %v1561_v56 = vadd.f32 0.5, %v1529_v17  ;;  %v845_v29 = vmul.f32 0.5, %v2548_v18  ;;  %v1532_v20 = vmul.f32 0.5, %v2550_v39  ;;  %v3623_v18 = vld [vmem:[#allocation13_spill] sm:$0xff] }
 0x178   : > { %v967_v44 = vadd.f32 %v3611_v35, %v903_v19  ;;  %2243 = vst [vmem:[%s2968_s17 + $0x40] sm:$0xff] %v2184_v1   ;;  %v3612_v21 = vmov %v3611_v35  ;;  %v3613_v5 = vunpack.c.h.bf16 %v3607_v12  ;;  %v872_v50 = vadd.f32 0.5, %v840_v3  ;;  %v2554_v38 = vpop.eup %2553  ;;  %v3624_v24 = vld [vmem:[#allocation14_spill] sm:$0xff] }
 0x179   : > { %v1622_v63 = vadd.f32 %v1590_v13, %v3612_v21  ;;  %v1559_v16 = vadd.f32 0.5, %v1527_v51  ;;  %v843_v49 = vmul.f32 0.5, %v2552_v31  ;;  %v1593_v42 = vmul.f32 %v1561_v56, %v3319_v52  ;;  %v3625_v13 = vld [vmem:[#allocation15_spill] sm:$0xff]  ;;  %v2582_v3 = vld [vmem:[%s3529_s3] ss:$0 sm:$0xff] }
 0x17a   : > { %v970_v41 = vadd.f32 %v3613_v5, %v906_v61  ;;  %v877_v28 = vadd.f32 0.5, %v845_v29  ;;  %v1564_v46 = vadd.f32 0.5, %v1532_v20  ;;  %2555 = vtanh.f32 %v782_v34  ;;  %v3629_v20 = vld [vmem:[#allocation18_spill] sm:$0xff] }
 0x17b   : > { %v904_v11 = vmul.f32 %v872_v50, %v3324_v4  ;;  %v1591_v27 = vmul.f32 %v1559_v16, %v3330_v55  ;;  %v875_v36 = vadd.f32 0.5, %v843_v49  ;;  %v3614_v32 = vmov %v3613_v5  ;;  %v2579_v55 = vld [vmem:[%s3532_s6] ss:$0 sm:$0xff] }
 0x17c   : > { %v2119_v45 = vpack.c.bf16 %v970_v41, %v969_v30  ;;  %v1625_v8 = vadd.f32 %v1593_v42, %v3614_v32  ;;  %v909_v48 = vmul.f32 %v877_v28, %v3337_v58  ;;  %v1596_v14 = vmul.f32 %v1564_v46, %v3341_v47  ;;  %v3617_v47 = vld [vmem:[#allocation5_spill] sm:$0xff]  ;;  %v3622_v30 = vld [vmem:[#allocation12_spill] sm:$0xff]  ;;  %v2583_v28 = vld [vmem:[%s2684_s11 + $0x68] sm:$0xff]  }
 0x17d   : > { %v1530_v57 = vmul.f32 0.5, %v2554_v38  ;;  %v3615_v52 = vunpack.c.h.bf16 %v3610_v7  ;;  %v907_v4 = vmul.f32 %v875_v36, %v3352_v22  ;;  %v3423_v43 = vadd.f32 %v2579_v55, %v3360_v62  ;;  %v3627_v7 = vld [vmem:[#allocation17_spill] sm:$0xff]  ;;  %v3630_v38 = vld [vmem:[#allocation19_spill] sm:$0xff] }
 0x17e   : > { %2231 = vst [vmem:[%s2959_s14 + $0x58] sm:$0xff] %v2119_v45   ;;  %v2199_v58 = vpack.c.bf16 %v1625_v8, %v1624_v60  ;;  %v3618_v2 = vunpack.c.l.bf16 %v3617_v47  ;;  %v3621_v33 = vunpack.c.l.bf16 %v3620_v10  ;;  %v710_v19 = vmul.f32 %v2580_v37, %v3622_v30  ;;  %v3631_v8 = vld [vmem:[#allocation20_spill] sm:$0xff] }
 0x17f   : > { %v968_v53 = vadd.f32 %v3615_v52, %v904_v11  ;;  %v3616_v34 = vmov %v3615_v52  ;;  %v1562_v6 = vadd.f32 0.5, %v1530_v57  ;;  %v1469_v62 = vmul.f32 0.5, %v3423_v43  ;;  %v3632_v52 = vld [vmem:[#allocation21_spill] sm:$0xff] }
 0x180   : > { %v1623_v23 = vadd.f32 %v1591_v27, %v3616_v34  ;;  %v3427_v54 = vadd.f32 %v3618_v2, %v909_v48  ;;  %v3619_v40 = vmov %v3618_v2  ;;  %v3435_v26 = vadd.f32 %v3621_v33, %v907_v4  ;;  %2246 = vst [vmem:[%s2968_s17 + $0x58] sm:$0xff] %v2199_v58  }
 0x181   : > { %v3431_v25 = vadd.f32 %v1596_v14, %v3619_v40  ;;  %v2114_v22 = vpack.c.bf16 %v968_v53, %v967_v44  ;;  %v1594_v12 = vmul.f32 %v1562_v6, %v3364_v0  ;;  %v1397_v1 = vmul.f32 %v2581_v59, %v3623_v18  ;;  %v3626_v0 = vld [vmem:[#allocation16_spill] sm:$0xff]  ;;  %v2584_v18 = vld [vmem:[%s2684_s11 + $0x60] sm:$0xff]  }
 0x182   : > { %v2194_v9 = vpack.c.bf16 %v1623_v23, %v1622_v63  ;;  %v715_v60 = vmul.f32 %v2580_v37, %v3624_v24  ;;  %2557 = vtanh.f32 %v1469_v62  ;;  %v1402_v17 = vmul.f32 %v2581_v59, %v3625_v13  ;;  %v2585_v13 = vld [vmem:[%s2684_s11 + $0x70] sm:$0xff]  }
 0x183   : > { %2230 = vst [vmem:[%s2959_s14 + $0x50] sm:$0xff] %v2114_v22   ;;  %v713_v39 = vmul.f32 %v2580_v37, %v3626_v0  ;;  %v1400_v35 = vmul.f32 %v2581_v59, %v3627_v7  ;;  %v3628_v44 = vmov %v3621_v33  ;;  %v3461_v51 = vadd.f32 %v2582_v3, %v710_v19 }
 0x184   : > { %2245 = vst [vmem:[%s2968_s17 + $0x50] sm:$0xff] %v2194_v9   ;;  %v3456_v61 = vadd.f32 %v1594_v12, %v3628_v44  ;;  %v3463_v31 = vadd.f32 %v2579_v55, %v1397_v1  ;;  %v3465_v21 = vadd.f32 %v2582_v3, %v715_v60  ;;  %v3467_v63 = vadd.f32 %v2579_v55, %v1402_v17  ;;  %v2556_v41 = vpop.eup %2555 }
 0x185   : > { %v3469_v56 = vadd.f32 %v2582_v3, %v713_v39  ;;  %v3471_v29 = vadd.f32 %v2579_v55, %v1400_v35  ;;  %v716_v5 = vmul.f32 %v2580_v37, %v3629_v20  ;;  %v780_v50 = vmul.f32 0.5, %v3461_v51  ;;  %v2586_v35 = vld [vmem:[%s2684_s11 + $0x78] sm:$0xff]  }
 0x186   : > { %v1467_v16 = vmul.f32 0.5, %v3463_v31  ;;  %v785_v49 = vmul.f32 0.5, %v3465_v21  ;;  %v1403_v42 = vmul.f32 %v2581_v59, %v3630_v38  ;;  %v942_v46 = vunpack.c.h.bf16 %v2583_v28 }
 0x187   : > { %v846_v45 = vmul.f32 0.5, %v2556_v41  ;;  %v1472_v11 = vmul.f32 0.5, %v3467_v63  ;;  %v783_v27 = vmul.f32 0.5, %v3469_v56  ;;  %2559 = vtanh.f32 %v780_v50 }
 0x188   : > { %v3481_v36 = vadd.f32 %v2582_v3, %v716_v5  ;;  %v3483_v32 = vadd.f32 %v2579_v55, %v1403_v42  ;;  %v714_v48 = vmul.f32 %v2580_v37, %v3631_v8  ;;  %2561 = vtanh.f32 %v1467_v16 }
 0x189   : > { %v878_v14 = vadd.f32 0.5, %v846_v45  ;;  %v1470_v57 = vmul.f32 0.5, %v3471_v29  ;;  %v1401_v53 = vmul.f32 %v2581_v59, %v3632_v52  ;;  %2563 = vtanh.f32 %v785_v49 }
 0x18a   : > { %v786_v34 = vmul.f32 0.5, %v3481_v36  ;;  %v3489_v23 = vadd.f32 %v2582_v3, %v714_v48  ;;  %2565 = vtanh.f32 %v1472_v11  ;;  %v1473_v58 = vmul.f32 0.5, %v3483_v32 }
 0x18b   : > { %v910_v4 = vmul.f32 %v878_v14, %v3368_v15  ;;  %v3493_v47 = vadd.f32 %v2579_v55, %v1401_v53  ;;  %2567 = vtanh.f32 %v783_v27  ;;  %v940_v1 = vunpack.c.h.bf16 %v2584_v18 }
 0x18c   : > { %v784_v2 = vmul.f32 0.5, %v3489_v23  ;;  %v2558_v40 = vpop.eup %2557  ;;  %2569 = vtanh.f32 %v1470_v57  ;;  %v943_v17 = vunpack.c.l.bf16 %v2585_v13  ;;  %v945_v44 = vunpack.c.l.bf16 %v2586_v35 }
 0x18d   : > { %v974_v6 = vadd.f32 %v942_v46, %v910_v4  ;;  %v1471_v22 = vmul.f32 0.5, %v3493_v47  ;;  %v1533_v9 = vmul.f32 0.5, %v2558_v40  ;;  %2571 = vtanh.f32 %v786_v34 }
 0x18e   : > { %2573 = vtanh.f32 %v1473_v58  ;;  %v946_v50 = vunpack.c.h.bf16 %v2586_v35 }
 0x18f   : > { %v2129_v10 = vpack.c.bf16 %v974_v6, %v3427_v54  ;;  %v1565_v15 = vadd.f32 0.5, %v1533_v9  ;;  %2575 = vtanh.f32 %v784_v2 }
 0x190   : > { %2577 = vtanh.f32 %v1471_v22 }
 0x191   : > { %2233 = vst [vmem:[%s2959_s14 + $0x68] sm:$0xff] %v2129_v10   ;;  %v2560_v55 = vpop.eup %2559  ;;  %v1597_v33 = vmul.f32 %v1565_v15, %v3423_v43 }
 0x192   : > { %v2562_v62 = vpop.eup %2561  ;;  %v844_v12 = vmul.f32 0.5, %v2560_v55 }
 0x193   : > { %v2564_v37 = vpop.eup %2563  ;;  %v1629_v30 = vadd.f32 %v1597_v33, %v942_v46  ;;  %v1531_v19 = vmul.f32 0.5, %v2562_v62 }
 0x194   : > { %v2566_v59 = vpop.eup %2565  ;;  %v876_v24 = vadd.f32 0.5, %v844_v12  ;;  %v849_v54 = vmul.f32 0.5, %v2564_v37 }
 0x195   : > { %v2568_v60 = vpop.eup %2567  ;;  %v2209_v0 = vpack.c.bf16 %v1629_v30, %v3431_v25  ;;  %v1563_v39 = vadd.f32 0.5, %v1531_v19  ;;  %v1536_v7 = vmul.f32 0.5, %v2566_v59 }
 0x196   : > { %v2570_v43 = vpop.eup %2569  ;;  %v908_v3 = vmul.f32 %v876_v24, %v3461_v51  ;;  %v881_v20 = vadd.f32 0.5, %v849_v54  ;;  %v847_v5 = vmul.f32 0.5, %v2568_v60 }
 0x197   : > { %v2572_v41 = vpop.eup %2571  ;;  %2248 = vst [vmem:[%s2968_s17 + $0x68] sm:$0xff] %v2209_v0   ;;  %v1595_v16 = vmul.f32 %v1563_v39, %v3463_v31  ;;  %v1568_v49 = vadd.f32 0.5, %v1536_v7  ;;  %v1534_v38 = vmul.f32 0.5, %v2570_v43 }
 0x198   : > { %v2574_v42 = vpop.eup %2573  ;;  %v972_v28 = vadd.f32 %v940_v1, %v908_v3  ;;  %v913_v25 = vmul.f32 %v881_v20, %v3465_v21  ;;  %v879_v46 = vadd.f32 0.5, %v847_v5  ;;  %v850_v45 = vmul.f32 0.5, %v2572_v41 }
 0x199   : > { %v2576_v11 = vpop.eup %2575  ;;  %v1627_v27 = vadd.f32 %v1595_v16, %v940_v1  ;;  %v1600_v51 = vmul.f32 %v1568_v49, %v3467_v63  ;;  %v1566_v8 = vadd.f32 0.5, %v1534_v38  ;;  %v1537_v48 = vmul.f32 0.5, %v2574_v42 }
 0x19a   : > { %v2578_v14 = vpop.eup %2577  ;;  %v2124_v57 = vpack.c.bf16 %v972_v28, %v3435_v26  ;;  %v977_v31 = vadd.f32 %v945_v44, %v913_v25  ;;  %v911_v52 = vmul.f32 %v879_v46, %v3469_v56  ;;  %v882_v53 = vadd.f32 0.5, %v850_v45 }
 0x19b   : > { %v2204_v34 = vpack.c.bf16 %v1627_v27, %v3456_v61  ;;  %v1632_v21 = vadd.f32 %v1600_v51, %v945_v44  ;;  %v1598_v4 = vmul.f32 %v1566_v8, %v3471_v29  ;;  %v1569_v58 = vadd.f32 0.5, %v1537_v48 }
 0x19c   : > { %2232 = vst [vmem:[%s2959_s14 + $0x60] sm:$0xff] %v2124_v57   ;;  %v975_v2 = vadd.f32 %v943_v17, %v911_v52  ;;  %v914_v63 = vmul.f32 %v882_v53, %v3481_v36  ;;  %v848_v40 = vmul.f32 0.5, %v2576_v11  ;;  %v1535_v6 = vmul.f32 0.5, %v2578_v14 }
 0x19d   : > { %2247 = vst [vmem:[%s2968_s17 + $0x60] sm:$0xff] %v2204_v34   ;;  %v1630_v26 = vadd.f32 %v1598_v4, %v943_v17  ;;  %v1601_v22 = vmul.f32 %v1569_v58, %v3483_v32  ;;  %v944_v56 = vunpack.c.h.bf16 %v2585_v13 }
 0x19e   : > { %v978_v61 = vadd.f32 %v946_v50, %v914_v63  ;;  %v880_v9 = vadd.f32 0.5, %v848_v40  ;;  %v1567_v10 = vadd.f32 0.5, %v1535_v6 }
 0x19f   : > { %v1633_v29 = vadd.f32 %v1601_v22, %v946_v50 }
 0x1a0   : > { %v2139_v15 = vpack.c.bf16 %v978_v61, %v977_v31  ;;  %v912_v55 = vmul.f32 %v880_v9, %v3489_v23  ;;  %v1599_v33 = vmul.f32 %v1567_v10, %v3493_v47 }
 0x1a1   : > { %v2219_v36 = vpack.c.bf16 %v1633_v29, %v1632_v21 }
 0x1a2   : > { %2235 = vst [vmem:[%s2959_s14 + $0x78] sm:$0xff] %v2139_v15   ;;  %v976_v62 = vadd.f32 %v944_v56, %v912_v55  ;;  %v1631_v12 = vadd.f32 %v1599_v33, %v944_v56 }
 0x1a3   : > { %2250 = vst [vmem:[%s2968_s17 + $0x78] sm:$0xff] %v2219_v36  }
 0x1a4   : > { %v2134_v37 = vpack.c.bf16 %v976_v62, %v975_v2  ;;  %v2214_v30 = vpack.c.bf16 %v1631_v12, %v1630_v26 }
 0x1a6   : > { %2234 = vst [vmem:[%s2959_s14 + $0x70] sm:$0xff] %v2134_v37   ;;  %2249 = vst [vmem:[%s2968_s17 + $0x70] sm:$0xff] %v2214_v30  }
 0x1a7 PF: > { %s19_s27 = sadd.s32 1, %s2593_s27  }
 0x1a8   : > { %p16_p4 = scmp.ge.s32.totalorder %s19_s27, 4  }
 0x1aa   :  { %18 = sbr.rel (!%p16_p4) target bundleno = 1 (0x1), region = 90 }

// kernel: c2f_forward.7
= control target key start
LH: loop header
LB: loop body
LE: loop exit
PB: predicated region body
PF: predicated region fallthrough
CT: control target
= control target key end

     0   :  { %s2664_s27 = smov 0   ;;  %s3090_s0 = inlined_call_operand.vmem [shape: bf16[512,128], index: 0, kind: input, shape index: {}]   ;;  %s3091_s1 = inlined_call_operand.vmem [shape: bf16[512,128], index: 1, kind: input, shape index: {}]   ;;  %s3092_s2 = inlined_call_operand.vmem [shape: bf16[512,128], index: 2, kind: input, shape index: {}]   ;;  %s3093_s3 = inlined_call_operand.vmem [shape: bf16[128,128], index: 3, kind: input, shape index: {}]   ;;  %s3094_s4 = inlined_call_operand.vmem [shape: bf16[128,128], index: 4, kind: input, shape index: {}]   ;;  %s3095_s5 = inlined_call_operand.vmem [shape: bf16[128,128], index: 5, kind: input, shape index: {}]   ;;  %s3096_s6 = inlined_call_operand.vmem [shape: f32[1,128], index: 6, kind: input, shape index: {}]   ;;  %s3097_s7 = inlined_call_operand.vmem [shape: f32[1,128], index: 7, kind: input, shape index: {}]   ;;  %s3098_s8 = inlined_call_operand.vmem [shape: bf16[512,128], index: 8, kind: output, shape index: {}]  }
   0x1 LB: > { %s1923_s28 = sadd.s32 4294967295, %s2617_s27   ;;  %p1927_p0 = scmp.ge.s32.totalorder %s2617_s27, 1  ;;  %s2617_s27 = sphi %s2664_s27, %s18_s27  }
   0x2   : > { %p285_p1 = scmp.lt.s32.totalorder %s2617_s27, 3 }
   0x4   : > { %p286_p2 = pnand %p1927_p0, %p285_p1 }
   0x5   : > { %v2475_v0 = vld [vmem:[%s3094_s4] sm:$0xff] (!%p286_p2)   ;;  %s1928_s9 = sshll.u32 (!%p286_p2), %s1923_s28, 5  ;;  %v2477_v2 = vld [vmem:[%s3094_s4 + $0x8] sm:$0xff] (!%p286_p2)   ;;  %v2479_v4 = vld [vmem:[%s3094_s4 + $0x10] sm:$0xff] (!%p286_p2)  }
   0x6   : > { %289 = sbr.rel (%p286_p2) target bundleno = 375 (0x177), region = 52  ;;  %v2678_v1 = vld [vmem:[%s3093_s3] sm:$0xff] (!%p286_p2)   ;;  %2243 = vmatprep.subr.bf16.mxu1 (!%p286_p2), %v2475_v0  ;;  %p330_p3 = scmp.lt.s32.totalorder (!%p286_p2), %s1928_s9, 63  ;;  %v2687_v3 = vld [vmem:[%s3093_s3 + $0x8] sm:$0xff] (!%p286_p2)   ;;  %v2697_v5 = vld [vmem:[%s3093_s3 + $0x10] sm:$0xff] (!%p286_p2)  }
   0x7   : > { %2291 = vmatprep.subr.bf16.mxu0 (!%p286_p2), %v2678_v1  ;;  %2244 = vmatpush3.bf16.msra.mxu1 (!%p286_p2), %v2475_v0  ;;  %v2481_v6 = vld [vmem:[%s3094_s4 + $0x18] sm:$0xff] (!%p286_p2)   ;;  %v2483_v8 = vld [vmem:[%s3094_s4 + $0x20] sm:$0xff] (!%p286_p2)   ;;  %v2485_v10 = vld [vmem:[%s3094_s4 + $0x28] sm:$0xff] (!%p286_p2)  }
   0x8   : > { %2292 = vmatpush3.bf16.msra.mxu0 (!%p286_p2), %v2678_v1  ;;  %2245 = vmatprep.subr.bf16.mxu1 (!%p286_p2), %v2477_v2  ;;  %v2707_v7 = vld [vmem:[%s3093_s3 + $0x18] sm:$0xff] (!%p286_p2)   ;;  %v2719_v9 = vld [vmem:[%s3093_s3 + $0x20] sm:$0xff] (!%p286_p2)   ;;  %v2739_v11 = vld [vmem:[%s3093_s3 + $0x28] sm:$0xff] (!%p286_p2)  }
   0x9   : > { %2293 = vmatprep.subr.bf16.mxu0 (!%p286_p2), %v2687_v3  ;;  %v2487_v14 = vld [vmem:[%s3094_s4 + $0x30] sm:$0xff] (!%p286_p2)   ;;  %v2489_v16 = vld [vmem:[%s3094_s4 + $0x38] sm:$0xff] (!%p286_p2)   ;;  %v2495_v19 = vld [vmem:[%s3095_s5] sm:$0xff] (!%p286_p2)  }
   0xa   : > { %v2753_v15 = vld [vmem:[%s3093_s3 + $0x30] sm:$0xff] (!%p286_p2)   ;;  %v2763_v17 = vld [vmem:[%s3093_s3 + $0x38] sm:$0xff] (!%p286_p2)   ;;  %v2496_v21 = vld [vmem:[%s3095_s5 + $0x8] sm:$0xff] (!%p286_p2)  }
   0xb   : > { %2246 = vmatpush3.bf16.msra.mxu1 (!%p286_p2), %v2477_v2  ;;  %v2501_v25 = vld [vmem:[%s3095_s5 + $0x10] sm:$0xff] (!%p286_p2)   ;;  %v2502_v29 = vld [vmem:[%s3095_s5 + $0x18] sm:$0xff] (!%p286_p2)   ;;  %v2507_v31 = vld [vmem:[%s3095_s5 + $0x20] sm:$0xff] (!%p286_p2)  }
   0xc   : > { %2294 = vmatpush3.bf16.msra.mxu0 (!%p286_p2), %v2687_v3  ;;  %2247 = vmatprep.subr.bf16.mxu1 (!%p286_p2), %v2479_v4  ;;  %v2508_v35 = vld [vmem:[%s3095_s5 + $0x28] sm:$0xff] (!%p286_p2)   ;;  %v2513_v37 = vld [vmem:[%s3095_s5 + $0x30] sm:$0xff] (!%p286_p2)   ;;  %v2514_v41 = vld [vmem:[%s3095_s5 + $0x38] sm:$0xff] (!%p286_p2)  }
   0xd   : > { %s3100_s9 = smov (!%p330_p3, %s1928_s9), 63  ;;  %2295 = vmatprep.subr.bf16.mxu0 %v2697_v5 }
   0xe   : > { %s2709_s24 = sshll.u32 %s3100_s9, 2 }
   0xf   : > { %2248 = vmatpush3.bf16.msra.mxu1 %v2479_v4  ;;  %s2725_s10 = scalar_lea.vmem %s3091_s1, %s2709_s24  ;;  %s2734_s15 = scalar_lea.vmem %s3090_s0, %s2709_s24 }
  0x10   : > { %2296 = vmatpush3.bf16.msra.mxu0 %v2697_v5  ;;  %2249 = vmatprep.subr.bf16.mxu1 %v2481_v6  ;;  %v2491_v12 = vld [vmem:[%s2725_s10] sm:$0xff]   ;;  %v2493_v18 = vld [vmem:[%s2725_s10 + $0x8] sm:$0xff]   ;;  %v2497_v22 = vld [vmem:[%s2725_s10 + $0x10] sm:$0xff]   ;;  %s2794_s16 = scalar_lea.vmem %s3092_s2, %s2709_s24  ;;  %s2949_s12 = scalar_lea.vmem %s3098_s8, %s2709_s24 }
  0x11   : > { %2297 = vmatprep.subr.bf16.mxu0 %v2707_v7  ;;  %v2492_v13 = vld [vmem:[%s2734_s15] sm:$0xff]   ;;  %2259 = vmatprep.mubr.bf16.mxu1 %v2491_v12  ;;  %v2494_v20 = vld [vmem:[%s2734_s15 + $0x8] sm:$0xff]   ;;  %v2498_v23 = vld [vmem:[%s2734_s15 + $0x10] sm:$0xff]  }
  0x12   : > { %2307 = vmatprep.mubr.bf16.mxu0 %v2492_v13  ;;  %v2499_v24 = vld [vmem:[%s2725_s10 + $0x18] sm:$0xff]   ;;  %v2503_v27 = vld [vmem:[%s2725_s10 + $0x20] sm:$0xff]   ;;  %v2505_v30 = vld [vmem:[%s2725_s10 + $0x28] sm:$0xff]  }
  0x13   : > { %2250 = vmatpush3.bf16.msra.mxu1 %v2481_v6  ;;  %v2500_v26 = vld [vmem:[%s2734_s15 + $0x18] sm:$0xff]   ;;  %v2504_v28 = vld [vmem:[%s2734_s15 + $0x20] sm:$0xff]   ;;  %v2506_v32 = vld [vmem:[%s2734_s15 + $0x28] sm:$0xff]  }
  0x14   : > { %2298 = vmatpush3.bf16.msra.mxu0 %v2707_v7  ;;  %2251 = vmatprep.subr.bf16.mxu1 %v2483_v8  ;;  %v2509_v33 = vld [vmem:[%s2725_s10 + $0x30] sm:$0xff]   ;;  %v2511_v36 = vld [vmem:[%s2725_s10 + $0x38] sm:$0xff]   ;;  %v2515_v39 = vld [vmem:[%s2725_s10 + $0x40] sm:$0xff]  }
  0x15   : > { %2299 = vmatprep.subr.bf16.mxu0 %v2719_v9  ;;  %v2510_v34 = vld [vmem:[%s2734_s15 + $0x30] sm:$0xff]   ;;  %v2512_v38 = vld [vmem:[%s2734_s15 + $0x38] sm:$0xff]   ;;  %v2516_v40 = vld [vmem:[%s2794_s16] sm:$0xff]  }
  0x16   : > { %v2517_v42 = vld [vmem:[%s2725_s10 + $0x48] sm:$0xff]   ;;  %v2519_v44 = vld [vmem:[%s2725_s10 + $0x50] sm:$0xff]   ;;  %v2521_v46 = vld [vmem:[%s2725_s10 + $0x58] sm:$0xff]  }
  0x17   : > { %2252 = vmatpush3.bf16.msra.mxu1 %v2483_v8  ;;  %v2518_v43 = vld [vmem:[%s2794_s16 + $0x8] sm:$0xff]   ;;  %v2520_v45 = vld [vmem:[%s2794_s16 + $0x10] sm:$0xff]   ;;  %v2522_v47 = vld [vmem:[%s2794_s16 + $0x18] sm:$0xff]  }
  0x18   : > { %2300 = vmatpush3.bf16.msra.mxu0 %v2719_v9  ;;  %2253 = vmatprep.subr.bf16.mxu1 %v2485_v10  ;;  %v2523_v48 = vld [vmem:[%s2725_s10 + $0x60] sm:$0xff]   ;;  %v2525_v50 = vld [vmem:[%s2725_s10 + $0x68] sm:$0xff]   ;;  %v2527_v52 = vld [vmem:[%s2725_s10 + $0x70] sm:$0xff]  }
  0x19   : > { %2301 = vmatprep.subr.bf16.mxu0 %v2739_v11  ;;  %v2524_v49 = vld [vmem:[%s2794_s16 + $0x20] sm:$0xff]   ;;  %v2526_v51 = vld [vmem:[%s2794_s16 + $0x28] sm:$0xff]   ;;  %v2528_v53 = vld [vmem:[%s2794_s16 + $0x30] sm:$0xff]  }
  0x1a   : > { %v2529_v54 = vld [vmem:[%s2725_s10 + $0x78] sm:$0xff]   ;;  %v2531_v56 = vld [vmem:[%s2734_s15 + $0x40] sm:$0xff]   ;;  %v2533_v58 = vld [vmem:[%s2734_s15 + $0x48] sm:$0xff]  }
  0x1b   : > { %2254 = vmatpush3.bf16.msra.mxu1 %v2485_v10  ;;  %v2530_v55 = vld [vmem:[%s2794_s16 + $0x38] sm:$0xff]   ;;  %v2532_v57 = vld [vmem:[%s2794_s16 + $0x40] sm:$0xff]   ;;  %v2534_v59 = vld [vmem:[%s2794_s16 + $0x48] sm:$0xff]  }
  0x1c   : > { %2302 = vmatpush3.bf16.msra.mxu0 %v2739_v11  ;;  %2255 = vmatprep.subr.bf16.mxu1 %v2487_v14  ;;  %v2535_v60 = vld [vmem:[%s2734_s15 + $0x50] sm:$0xff]   ;;  %v2537_v62 = vld [vmem:[%s2734_s15 + $0x58] sm:$0xff]   ;;  %v2539_v0 = vld [vmem:[%s2734_s15 + $0x60] sm:$0xff]  }
  0x1d   : > { %2303 = vmatprep.subr.bf16.mxu0 %v2753_v15  ;;  %v2536_v61 = vld [vmem:[%s2794_s16 + $0x50] sm:$0xff]   ;;  %v2538_v63 = vld [vmem:[%s2794_s16 + $0x58] sm:$0xff]   ;;  %v2541_v2 = vld [vmem:[%s2734_s15 + $0x68] sm:$0xff]  }
  0x1e   : > { %v2543_v4 = vld [vmem:[%s2734_s15 + $0x70] sm:$0xff]   ;;  %v2545_v6 = vld [vmem:[%s2734_s15 + $0x78] sm:$0xff]  }
  0x1f   : > { %2256 = vmatpush3.bf16.msra.mxu1 %v2487_v14 }
  0x20   : > { %2304 = vmatpush3.bf16.msra.mxu0 %v2753_v15  ;;  %2257 = vmatprep.subr.bf16.mxu1 %v2489_v16 }
  0x21   : > { %2305 = vmatprep.subr.bf16.mxu0 %v2763_v17 }
  0x23   : > { %2258 = vmatpush3.bf16.msra.mxu1 %v2489_v16 }
  0x24   : > { %2306 = vmatpush3.bf16.msra.mxu0 %v2763_v17  ;;  %2387 = vmatprep.subr.bf16.mxu1 %v2678_v1 }
  0x25   : > { %2339 = vmatprep.subr.bf16.mxu0 %v2495_v19 }
  0x26   : > { %2260 = vmatmul.mubr.bf16.vlgmr.msra.gmra.mrb[0].mxu1 %v2493_v18 }
  0x27   : > { %2308 = vmatmul.mubr.bf16.vlgmr.msra.gmra.mrb[0].mxu0 %v2494_v20  ;;  %2395 = vmatpush3.bf16.msra.mxu1 %v2678_v1  ;;  %v2540_v1 = vld [vmem:[%s2794_s16 + $0x60] sm:$0xff]  }
  0x28   : > { %2340 = vmatpush3.bf16.msra.mxu0 %v2495_v19  ;;  %2263 = vmatprep.mubr.bf16.mxu1 %v2497_v22 }
  0x29   : > { %2341 = vmatprep.subr.bf16.mxu0 %v2496_v21  ;;  %2311 = vmatprep.mubr.bf16.mxu0 %v2498_v23 }
  0x2a   : > { %2388 = vmatprep.subr.bf16.mxu1 %v2687_v3 }
  0x2b   : > { %2396 = vmatpush3.bf16.msra.mxu1 %v2687_v3  ;;  %v2542_v3 = vld [vmem:[%s2794_s16 + $0x68] sm:$0xff]  }
  0x2c   : > { %2342 = vmatpush3.bf16.msra.mxu0 %v2496_v21  ;;  %2389 = vmatprep.subr.bf16.mxu1 %v2697_v5 }
  0x2d   : > { %2343 = vmatprep.subr.bf16.mxu0 %v2501_v25 }
  0x2e   : > { %2264 = vmatmul.mubr.bf16.gmra.mrb[4].mxu1 %v2499_v24 }
  0x2f   : > { %2312 = vmatmul.mubr.bf16.gmra.mrb[4].mxu0 %v2500_v26  ;;  %2267 = vmatprep.mubr.bf16.mxu1 %v2503_v27 }
  0x30   : > { %2344 = vmatpush3.bf16.msra.mxu0 %v2501_v25  ;;  %2315 = vmatprep.mubr.bf16.mxu0 %v2504_v28  ;;  %v2873_v25 = vld [vmem:[%s3096_s6] ss:$0 sm:$0xff] }
  0x31   : > { %2345 = vmatprep.subr.bf16.mxu0 %v2502_v29  ;;  %2397 = vmatpush3.bf16.msra.mxu1 %v2697_v5  ;;  %v2544_v5 = vld [vmem:[%s2794_s16 + $0x70] sm:$0xff]   ;;  %v2878_v28 = vld [vmem:[%s3097_s7] ss:$0 sm:$0xff] }
  0x32   : > { %2390 = vmatprep.subr.bf16.mxu1 %v2707_v7 }
  0x34   : > { %2346 = vmatpush3.bf16.msra.mxu0 %v2502_v29 }
  0x35   : > { %2347 = vmatprep.subr.bf16.mxu0 %v2507_v31  ;;  %2398 = vmatpush3.bf16.msra.mxu1 %v2707_v7  ;;  %v2546_v7 = vld [vmem:[%s2794_s16 + $0x78] sm:$0xff]  }
  0x36   : > { %2268 = vmatmul.mubr.bf16.gmra.mrb[8].mxu1 %v2505_v30  ;;  %2391 = vmatprep.subr.bf16.mxu1 %v2719_v9 }
  0x37   : > { %2316 = vmatmul.mubr.bf16.gmra.mrb[8].mxu0 %v2506_v32  ;;  %2271 = vmatprep.mubr.bf16.mxu1 %v2509_v33 }
  0x38   : > { %2348 = vmatpush3.bf16.msra.mxu0 %v2507_v31  ;;  %2319 = vmatprep.mubr.bf16.mxu0 %v2510_v34 }
  0x39   : > { %2349 = vmatprep.subr.bf16.mxu0 %v2508_v35  ;;  %2399 = vmatpush3.bf16.msra.mxu1 %v2719_v9 }
  0x3a   : > { %2392 = vmatprep.subr.bf16.mxu1 %v2739_v11 }
  0x3c   : > { %2350 = vmatpush3.bf16.msra.mxu0 %v2508_v35 }
  0x3d   : > { %2351 = vmatprep.subr.bf16.mxu0 %v2513_v37  ;;  %2400 = vmatpush3.bf16.msra.mxu1 %v2739_v11 }
  0x3e   : > { %2272 = vmatmul.mubr.bf16.gmra.mrb[12].mxu1 %v2511_v36  ;;  %2393 = vmatprep.subr.bf16.mxu1 %v2753_v15 }
  0x3f   : > { %2320 = vmatmul.mubr.bf16.gmra.mrb[12].mxu0 %v2512_v38  ;;  %2275 = vmatprep.mubr.bf16.mxu1 %v2515_v39 }
  0x40   : > { %2352 = vmatpush3.bf16.msra.mxu0 %v2513_v37  ;;  %2355 = vmatprep.mubr.bf16.mxu0 %v2516_v40 }
  0x41   : > { %2353 = vmatprep.subr.bf16.mxu0 %v2514_v41  ;;  %2401 = vmatpush3.bf16.msra.mxu1 %v2753_v15 }
  0x42   : > { %2394 = vmatprep.subr.bf16.mxu1 %v2763_v17 }
  0x44   : > { %2354 = vmatpush3.bf16.msra.mxu0 %v2514_v41 }
  0x45   : > { %2402 = vmatpush3.bf16.msra.mxu1 %v2763_v17 }
  0x46   : > { %2276 = vmatmul.mubr.bf16.gmra.mrb[16].mxu1 %v2517_v42 }
  0x47   : > { %2356 = vmatmul.mubr.bf16.vlgmr.msra.gmra.mrb[0].mxu0 %v2518_v43  ;;  %2279 = vmatprep.mubr.bf16.mxu1 %v2519_v44 }
  0x48   : > { %2359 = vmatprep.mubr.bf16.mxu0 %v2520_v45 }
  0x4e   : > { %2280 = vmatmul.mubr.bf16.gmra.mrb[20].mxu1 %v2521_v46 }
  0x4f   : > { %2360 = vmatmul.mubr.bf16.gmra.mrb[4].mxu0 %v2522_v47  ;;  %2283 = vmatprep.mubr.bf16.mxu1 %v2523_v48 }
  0x50   : > { %2363 = vmatprep.mubr.bf16.mxu0 %v2524_v49 }
  0x56   : > { %2284 = vmatmul.mubr.bf16.gmra.mrb[24].mxu1 %v2525_v50 }
  0x57   : > { %2364 = vmatmul.mubr.bf16.gmra.mrb[8].mxu0 %v2526_v51  ;;  %2287 = vmatprep.mubr.bf16.mxu1 %v2527_v52 }
  0x58   : > { %2367 = vmatprep.mubr.bf16.mxu0 %v2528_v53 }
  0x5e   : > { %2288 = vmatmul.mubr.bf16.gmra.mrb[28].mxu1 %v2529_v54 }
  0x5f   : > { %2368 = vmatmul.mubr.bf16.gmra.mrb[12].mxu0 %v2530_v55  ;;  %2323 = vmatprep.mubr.bf16.mxu1 %v2531_v56 }
  0x60   : > { %2371 = vmatprep.mubr.bf16.mxu0 %v2532_v57 }
  0x66   : > { %2324 = vmatmul.mubr.bf16.vlgmr.msra.gmra.mrb[16].mxu1 %v2533_v58 }
  0x67   : > { %2372 = vmatmul.mubr.bf16.gmra.mrb[16].mxu0 %v2534_v59  ;;  %2327 = vmatprep.mubr.bf16.mxu1 %v2535_v60 }
  0x68   : > { %2375 = vmatprep.mubr.bf16.mxu0 %v2536_v61 }
  0x6e   : > { %2328 = vmatmul.mubr.bf16.gmra.mrb[20].mxu1 %v2537_v62 }
  0x6f   : > { %2376 = vmatmul.mubr.bf16.gmra.mrb[20].mxu0 %v2538_v63  ;;  %2331 = vmatprep.mubr.bf16.mxu1 %v2539_v0 }
  0x70   : > { %2379 = vmatprep.mubr.bf16.mxu0 %v2540_v1 }
  0x76   : > { %2332 = vmatmul.mubr.bf16.gmra.mrb[24].mxu1 %v2541_v2 }
  0x77   : > { %2380 = vmatmul.mubr.bf16.gmra.mrb[24].mxu0 %v2542_v3  ;;  %2335 = vmatprep.mubr.bf16.mxu1 %v2543_v4 }
  0x78   : > { %2383 = vmatprep.mubr.bf16.mxu0 %v2544_v5 }
  0x7e   : > { %2336 = vmatmul.mubr.bf16.gmra.mrb[28].mxu1 %v2545_v6 }
  0x7f   : > { %2384 = vmatmul.mubr.bf16.gmra.mrb[28].mxu0 %v2546_v7 }
  0xf9   : > { %v2261_v8 = vpop.f32.mrb[0].mxu1 }
  0xfa   : > { %v660_v9 = vpop.f32.mrb[1].mxu1 }
  0xfb   : > { %v2262_v10 = vpop.f32.mrb[2].mxu1 }
  0xfc   : > { %v663_v11 = vpop.f32.mrb[3].mxu1 }
 0x101   : > { %v2265_v12 = vpop.f32.mrb[4].mxu1 }
 0x102   : > { %v676_v13 = vpop.f32.mrb[5].mxu1 }
 0x103   : > { %v2266_v14 = vpop.f32.mrb[6].mxu1 }
 0x104   : > { %v679_v15 = vpop.f32.mrb[7].mxu1 }
 0x109   : > { %v2269_v16 = vpop.f32.mrb[8].mxu1 }
 0x10a   : > { %v692_v17 = vpop.f32.mrb[9].mxu1 }
 0x10b   : > { %v2270_v18 = vpop.f32.mrb[10].mxu1 }
 0x10c   : > { %v2860_v19 = vpop.f32.mrb[11].mxu1 }
 0x111   : > { %v2862_v20 = vpop.f32.mrb[12].mxu1 }
 0x112   : > { %v2864_v21 = vpop.f32.mrb[13].mxu1 }
 0x113   : > { %v2866_v22 = vpop.f32.mrb[14].mxu1 }
 0x114   : > { %v2868_v23 = vpop.f32.mrb[15].mxu1 }
 0x11a   : > { %v2357_v24 = vpop.f32.mrb[0].mxu0 }
 0x11b   : > { %v2403_v26 = vadd.f32 %v2357_v24, %v2261_v8  ;;  %v1286_v27 = vpop.f32.mrb[1].mxu0 }
 0x11c   : > { %v2404_v29 = vadd.f32 %v1286_v27, %v660_v9  ;;  %v2358_v30 = vpop.f32.mrb[2].mxu0 }
 0x11d   : > { %v1455_v31 = vmul.f32 %v2403_v26, %v2873_v25  ;;  %v2405_v32 = vadd.f32 %v2358_v30, %v2262_v10  ;;  %v1289_v33 = vpop.f32.mrb[3].mxu0 }
 0x11e   : > { %v1453_v34 = vmul.f32 %v2404_v29, %v2873_v25  ;;  %v2406_v35 = vadd.f32 %v1289_v33, %v663_v11 }
 0x11f   : > { %v2883_v36 = vadd.f32 %v2878_v28, %v1455_v31  ;;  %v1456_v37 = vmul.f32 %v2405_v32, %v2873_v25 }
 0x120   : > { %v2887_v38 = vadd.f32 %v2878_v28, %v1453_v34  ;;  %v1454_v39 = vmul.f32 %v2406_v35, %v2873_v25 }
 0x121   : > { %v1525_v40 = vmul.f32 0.5, %v2883_v36  ;;  %v2892_v41 = vadd.f32 %v2878_v28, %v1456_v37 }
 0x122   : > { %v1523_v42 = vmul.f32 0.5, %v2887_v38  ;;  %v2896_v43 = vadd.f32 %v2878_v28, %v1454_v39  ;;  %v2361_v44 = vpop.f32.mrb[4].mxu0 }
 0x123   : > { %2547 = vtanh.f32 %v1525_v40  ;;  %v1526_v45 = vmul.f32 0.5, %v2892_v41  ;;  %v2407_v46 = vadd.f32 %v2361_v44, %v2265_v12  ;;  %v1302_v47 = vpop.f32.mrb[5].mxu0 }
 0x124   : > { %2549 = vtanh.f32 %v1523_v42  ;;  %v1524_v48 = vmul.f32 0.5, %v2896_v43  ;;  %v2408_v49 = vadd.f32 %v1302_v47, %v676_v13  ;;  %v2362_v50 = vpop.f32.mrb[6].mxu0 }
 0x125   : > { %2551 = vtanh.f32 %v1526_v45  ;;  %v1459_v51 = vmul.f32 %v2407_v46, %v2873_v25  ;;  %v2409_v52 = vadd.f32 %v2362_v50, %v2266_v14  ;;  %v1305_v53 = vpop.f32.mrb[7].mxu0 }
 0x126   : > { %2553 = vtanh.f32 %v1524_v48  ;;  %v1457_v54 = vmul.f32 %v2408_v49, %v2873_v25  ;;  %v2410_v55 = vadd.f32 %v1305_v53, %v679_v15 }
 0x127   : > { %v2903_v56 = vadd.f32 %v2878_v28, %v1459_v51  ;;  %v1460_v57 = vmul.f32 %v2409_v52, %v2873_v25 }
 0x128   : > { %v2907_v58 = vadd.f32 %v2878_v28, %v1457_v54  ;;  %v1458_v59 = vmul.f32 %v2410_v55, %v2873_v25 }
 0x129   : > { %v1529_v60 = vmul.f32 0.5, %v2903_v56  ;;  %v2912_v61 = vadd.f32 %v2878_v28, %v1460_v57 }
 0x12a   : > { %v1527_v62 = vmul.f32 0.5, %v2907_v58  ;;  %v2916_v63 = vadd.f32 %v2878_v28, %v1458_v59  ;;  %v2365_v0 = vpop.f32.mrb[8].mxu0 }
 0x12b   : > { %2555 = vtanh.f32 %v1529_v60  ;;  %v1530_v1 = vmul.f32 0.5, %v2912_v61  ;;  %v2411_v2 = vadd.f32 %v2365_v0, %v2269_v16  ;;  %v1318_v3 = vpop.f32.mrb[9].mxu0 }
 0x12c   : > { %2557 = vtanh.f32 %v1527_v62  ;;  %v1528_v4 = vmul.f32 0.5, %v2916_v63  ;;  %v2412_v5 = vadd.f32 %v1318_v3, %v692_v17  ;;  %v2366_v6 = vpop.f32.mrb[10].mxu0 }
 0x12d   : > { %v2548_v7 = vpop.eup %2547  ;;  %2559 = vtanh.f32 %v1530_v1  ;;  %v1463_v8 = vmul.f32 %v2411_v2, %v2873_v25  ;;  %v2413_v9 = vadd.f32 %v2366_v6, %v2270_v18  ;;  %v1321_v10 = vpop.f32.mrb[11].mxu0 }
 0x12e   : > { %v2550_v11 = vpop.eup %2549  ;;  %v1589_v12 = vmul.f32 0.5, %v2548_v7  ;;  %2561 = vtanh.f32 %v1528_v4  ;;  %v1461_v13 = vmul.f32 %v2412_v5, %v2873_v25  ;;  %v2414_v14 = vadd.f32 %v1321_v10, %v2860_v19 }
 0x12f   : > { %v2552_v15 = vpop.eup %2551  ;;  %v1587_v16 = vmul.f32 0.5, %v2550_v11  ;;  %v2924_v24 = vadd.f32 %v2878_v28, %v1463_v8  ;;  %v1464_v17 = vmul.f32 %v2413_v9, %v2873_v25 }
 0x130   : > { %v2554_v26 = vpop.eup %2553  ;;  %v1621_v27 = vadd.f32 0.5, %v1589_v12  ;;  %v1590_v29 = vmul.f32 0.5, %v2552_v15  ;;  %v2928_v18 = vadd.f32 %v2878_v28, %v1461_v13  ;;  %v1462_v30 = vmul.f32 %v2414_v14, %v2873_v25 }
 0x131   : > { %v1619_v31 = vadd.f32 0.5, %v1587_v16  ;;  %v1588_v32 = vmul.f32 0.5, %v2554_v26  ;;  %v1533_v33 = vmul.f32 0.5, %v2924_v24  ;;  %v2933_v19 = vadd.f32 %v2878_v28, %v1464_v17 }
 0x132   : > { %v1653_v34 = vmul.f32 %v1621_v27, %v2883_v36  ;;  %v1622_v35 = vadd.f32 0.5, %v1590_v29  ;;  %v1531_v37 = vmul.f32 0.5, %v2928_v18  ;;  %v2938_v39 = vadd.f32 %v2878_v28, %v1462_v30  ;;  %v2369_v40 = vpop.f32.mrb[12].mxu0 }
 0x133   : > { %v1651_v42 = vmul.f32 %v1619_v31, %v2887_v38  ;;  %v1620_v44 = vadd.f32 0.5, %v1588_v32  ;;  %2563 = vtanh.f32 %v1533_v33  ;;  %v1534_v45 = vmul.f32 0.5, %v2933_v19  ;;  %v1334_v46 = vpop.f32.mrb[13].mxu0 }
 0x134   : > { %v1654_v47 = vmul.f32 %v1622_v35, %v2892_v41  ;;  %2565 = vtanh.f32 %v1531_v37  ;;  %v1532_v36 = vmul.f32 0.5, %v2938_v39  ;;  %v2415_v48 = vadd.f32 %v2369_v40, %v2862_v20  ;;  %v2370_v49 = vpop.f32.mrb[14].mxu0 }
 0x135   : > { %v2556_v50 = vpop.eup %2555  ;;  %v1652_v38 = vmul.f32 %v1620_v44, %v2896_v43  ;;  %2567 = vtanh.f32 %v1534_v45  ;;  %v2416_v51 = vadd.f32 %v1334_v46, %v2864_v21  ;;  %v2417_v41 = vadd.f32 %v2370_v49, %v2866_v22  ;;  %v1337_v52 = vpop.f32.mrb[15].mxu0 }
 0x136   : > { %v2558_v53 = vpop.eup %2557  ;;  %v2084_v54 = vpack.c.bf16 %v1654_v47, %v1653_v34  ;;  %v1593_v20 = vmul.f32 0.5, %v2556_v50  ;;  %2569 = vtanh.f32 %v1532_v36  ;;  %v1467_v55 = vmul.f32 %v2415_v48, %v2873_v25 }
 0x137   : > { %v2560_v57 = vpop.eup %2559  ;;  %v2079_v59 = vpack.c.bf16 %v1652_v38, %v1651_v42  ;;  %v1591_v60 = vmul.f32 0.5, %v2558_v53  ;;  %v1465_v62 = vmul.f32 %v2416_v51, %v2873_v25  ;;  %v1468_v43 = vmul.f32 %v2417_v41, %v2873_v25 }
 0x138   : > { %v2562_v0 = vpop.eup %2561  ;;  %2156 = vst [vmem:[%s2949_s12 + $0x8] sm:$0xff] %v2084_v54   ;;  %v1625_v21 = vadd.f32 0.5, %v1593_v20  ;;  %v1594_v1 = vmul.f32 0.5, %v2560_v57  ;;  %v2959_v22 = vadd.f32 %v2878_v28, %v1467_v55  ;;  %v2418_v2 = vadd.f32 %v1337_v52, %v2868_v23 }
 0x139   : > { %2080 = vst [vmem:[%s2949_s12] sm:$0xff] %v2079_v59   ;;  %v1623_v3 = vadd.f32 0.5, %v1591_v60  ;;  %v1592_v4 = vmul.f32 0.5, %v2562_v0  ;;  %v2964_v5 = vadd.f32 %v2878_v28, %v1465_v62  ;;  %v2967_v6 = vadd.f32 %v2878_v28, %v1468_v43  ;;  %v2325_v7 = vpop.f32.mrb[16].mxu1 }
 0x13a   : > { %v1657_v8 = vmul.f32 %v1625_v21, %v2903_v56  ;;  %v1626_v9 = vadd.f32 0.5, %v1594_v1  ;;  %v1537_v10 = vmul.f32 0.5, %v2959_v22  ;;  %v1466_v11 = vmul.f32 %v2418_v2, %v2873_v25  ;;  %v2373_v12 = vpop.f32.mrb[16].mxu0  ;;  %v1029_v13 = vpop.f32.mrb[17].mxu1 }
 0x13b   : > { %v1655_v23 = vmul.f32 %v1623_v3, %v2907_v58  ;;  %v1624_v14 = vadd.f32 0.5, %v1592_v4  ;;  %v1535_v15 = vmul.f32 0.5, %v2964_v5  ;;  %v1538_v16 = vmul.f32 0.5, %v2967_v6  ;;  %v1350_v17 = vpop.f32.mrb[17].mxu0  ;;  %v2326_v26 = vpop.f32.mrb[18].mxu1 }
 0x13c   : > { %v1658_v27 = vmul.f32 %v1626_v9, %v2912_v61  ;;  %2571 = vtanh.f32 %v1537_v10  ;;  %v2977_v56 = vadd.f32 %v2878_v28, %v1466_v11  ;;  %v2419_v29 = vadd.f32 %v2373_v12, %v2325_v7  ;;  %v2374_v30 = vpop.f32.mrb[18].mxu0  ;;  %v1032_v31 = vpop.f32.mrb[19].mxu1 }
 0x13d   : > { %v2564_v32 = vpop.eup %2563  ;;  %v1656_v33 = vmul.f32 %v1624_v14, %v2916_v63  ;;  %2573 = vtanh.f32 %v1535_v15  ;;  %v2420_v58 = vadd.f32 %v1350_v17, %v1029_v13  ;;  %v2421_v34 = vadd.f32 %v2374_v30, %v2326_v26  ;;  %v1353_v35 = vpop.f32.mrb[19].mxu0 }
 0x13e   : > { %v2566_v37 = vpop.eup %2565  ;;  %v2094_v40 = vpack.c.bf16 %v1658_v27, %v1657_v8  ;;  %v1597_v42 = vmul.f32 0.5, %v2564_v32  ;;  %2575 = vtanh.f32 %v1538_v16  ;;  %v1536_v61 = vmul.f32 0.5, %v2977_v56 }
 0x13f   : > { %v2568_v44 = vpop.eup %2567  ;;  %v2089_v45 = vpack.c.bf16 %v1656_v33, %v1655_v23  ;;  %v1595_v46 = vmul.f32 0.5, %v2566_v37  ;;  %v1471_v47 = vmul.f32 %v2419_v29, %v2873_v25  ;;  %v1469_v36 = vmul.f32 %v2420_v58, %v2873_v25 }
 0x140   : > { %v2570_v63 = vpop.eup %2569  ;;  %2158 = vst [vmem:[%s2949_s12 + $0x18] sm:$0xff] %v2094_v40   ;;  %v1629_v48 = vadd.f32 0.5, %v1597_v42  ;;  %v1598_v49 = vmul.f32 0.5, %v2568_v44  ;;  %2577 = vtanh.f32 %v1536_v61  ;;  %v1472_v50 = vmul.f32 %v2421_v34, %v2873_v25 }
 0x141   : > { %2157 = vst [vmem:[%s2949_s12 + $0x10] sm:$0xff] %v2089_v45   ;;  %v1627_v38 = vadd.f32 0.5, %v1595_v46  ;;  %v1596_v51 = vmul.f32 0.5, %v2570_v63  ;;  %v2987_v41 = vadd.f32 %v2878_v28, %v1471_v47  ;;  %v2990_v52 = vadd.f32 %v2878_v28, %v1469_v36  ;;  %v2329_v53 = vpop.f32.mrb[20].mxu1 }
 0x142   : > { %v1661_v54 = vmul.f32 %v1629_v48, %v2924_v24  ;;  %v1630_v20 = vadd.f32 0.5, %v1598_v49  ;;  %v2994_v55 = vadd.f32 %v2878_v28, %v1472_v50  ;;  %v2422_v57 = vadd.f32 %v1353_v35, %v1032_v31  ;;  %v2377_v59 = vpop.f32.mrb[20].mxu0  ;;  %v1045_v60 = vpop.f32.mrb[21].mxu1 }
 0x143   : > { %v1659_v62 = vmul.f32 %v1627_v38, %v2928_v18  ;;  %v1628_v43 = vadd.f32 0.5, %v1596_v51  ;;  %v1541_v0 = vmul.f32 0.5, %v2987_v41  ;;  %v1539_v21 = vmul.f32 0.5, %v2990_v52  ;;  %v1366_v1 = vpop.f32.mrb[21].mxu0  ;;  %v2330_v2 = vpop.f32.mrb[22].mxu1 }
 0x144   : > { %v1662_v3 = vmul.f32 %v1630_v20, %v2933_v19  ;;  %v1542_v24 = vmul.f32 0.5, %v2994_v55  ;;  %v1470_v4 = vmul.f32 %v2422_v57, %v2873_v25  ;;  %v2423_v7 = vadd.f32 %v2377_v59, %v2329_v53  ;;  %v2378_v8 = vpop.f32.mrb[22].mxu0  ;;  %v1048_v9 = vpop.f32.mrb[23].mxu1 }
 0x145   : > { %v1660_v10 = vmul.f32 %v1628_v43, %v2938_v39  ;;  %2579 = vtanh.f32 %v1541_v0  ;;  %v2424_v18 = vadd.f32 %v1366_v1, %v1045_v60  ;;  %v2425_v11 = vadd.f32 %v2378_v8, %v2330_v2  ;;  %v1369_v12 = vpop.f32.mrb[23].mxu0 }
 0x146   : > { %v2572_v13 = vpop.eup %2571  ;;  %v2104_v23 = vpack.c.bf16 %v1662_v3, %v1661_v54  ;;  %2581 = vtanh.f32 %v1539_v21  ;;  %v3004_v19 = vadd.f32 %v2878_v28, %v1470_v4  ;;  %v1475_v14 = vmul.f32 %v2423_v7, %v2873_v25 }
 0x147   : > { %v2574_v15 = vpop.eup %2573  ;;  %v2099_v16 = vpack.c.bf16 %v1660_v10, %v1659_v62  ;;  %v1601_v17 = vmul.f32 0.5, %v2572_v13  ;;  %2583 = vtanh.f32 %v1542_v24  ;;  %v1473_v39 = vmul.f32 %v2424_v18, %v2873_v25 }
 0x148   : > { %v2576_v26 = vpop.eup %2575  ;;  %2160 = vst [vmem:[%s2949_s12 + $0x28] sm:$0xff] %v2104_v23   ;;  %v1599_v27 = vmul.f32 0.5, %v2574_v15  ;;  %v1540_v29 = vmul.f32 0.5, %v3004_v19  ;;  %v3011_v30 = vadd.f32 %v2878_v28, %v1475_v14  ;;  %v1476_v31 = vmul.f32 %v2425_v11, %v2873_v25 }
 0x149   : > { %2159 = vst [vmem:[%s2949_s12 + $0x20] sm:$0xff] %v2099_v16   ;;  %v1633_v32 = vadd.f32 0.5, %v1601_v17  ;;  %v1602_v33 = vmul.f32 0.5, %v2576_v26  ;;  %v3016_v58 = vadd.f32 %v2878_v28, %v1473_v39  ;;  %v2426_v34 = vadd.f32 %v1369_v12, %v1048_v9  ;;  %v2333_v35 = vpop.f32.mrb[24].mxu1 }
 0x14a   : > { %v2578_v37 = vpop.eup %2577  ;;  %v1631_v40 = vadd.f32 0.5, %v1599_v27  ;;  %2585 = vtanh.f32 %v1540_v29  ;;  %v1545_v42 = vmul.f32 0.5, %v3011_v30  ;;  %v3020_v61 = vadd.f32 %v2878_v28, %v1476_v31  ;;  %v2381_v44 = vpop.f32.mrb[24].mxu0 }
 0x14b   : > { %v1061_v45 = vpop.f32.mrb[25].mxu1  ;;  %v1665_v46 = vmul.f32 %v1633_v32, %v2959_v22  ;;  %v1634_v47 = vadd.f32 0.5, %v1602_v33  ;;  %v1600_v36 = vmul.f32 0.5, %v2578_v37  ;;  %v1543_v63 = vmul.f32 0.5, %v3016_v58  ;;  %v1382_v48 = vpop.f32.mrb[25].mxu0 }
 0x14c   : > { %v2334_v49 = vpop.f32.mrb[26].mxu1  ;;  %v1663_v50 = vmul.f32 %v1631_v40, %v2964_v5  ;;  %2587 = vtanh.f32 %v1545_v42  ;;  %v1546_v38 = vmul.f32 0.5, %v3020_v61  ;;  %v1474_v51 = vmul.f32 %v2426_v34, %v2873_v25  ;;  %v2382_v53 = vpop.f32.mrb[26].mxu0 }
 0x14d   : > { %v1064_v54 = vpop.f32.mrb[27].mxu1  ;;  %v1666_v20 = vmul.f32 %v1634_v47, %v2967_v6  ;;  %v1632_v57 = vadd.f32 0.5, %v1600_v36  ;;  %2589 = vtanh.f32 %v1543_v63  ;;  %v2427_v22 = vadd.f32 %v2381_v44, %v2333_v35  ;;  %v1385_v59 = vpop.f32.mrb[27].mxu0 }
 0x14e   : > { %2591 = vtanh.f32 %v1546_v38  ;;  %v3029_v60 = vadd.f32 %v2878_v28, %v1474_v51  ;;  %v2428_v62 = vadd.f32 %v1382_v48, %v1061_v45  ;;  %v2429_v5 = vadd.f32 %v2382_v53, %v2334_v49 }
 0x14f   : > { %v2580_v43 = vpop.eup %2579  ;;  %v2114_v0 = vpack.c.bf16 %v1666_v20, %v1665_v46  ;;  %v1664_v21 = vmul.f32 %v1632_v57, %v2977_v56  ;;  %v1479_v1 = vmul.f32 %v2427_v22, %v2873_v25  ;;  %v2430_v2 = vadd.f32 %v1385_v59, %v1064_v54 }
 0x150   : > { %v2582_v3 = vpop.eup %2581  ;;  %v1605_v6 = vmul.f32 0.5, %v2580_v43  ;;  %v1544_v24 = vmul.f32 0.5, %v3029_v60  ;;  %v1477_v4 = vmul.f32 %v2428_v62, %v2873_v25  ;;  %v1480_v7 = vmul.f32 %v2429_v5, %v2873_v25 }
 0x151   : > { %v2584_v8 = vpop.eup %2583  ;;  %2162 = vst [vmem:[%s2949_s12 + $0x38] sm:$0xff] %v2114_v0   ;;  %v2109_v9 = vpack.c.bf16 %v1664_v21, %v1663_v50  ;;  %v1603_v10 = vmul.f32 0.5, %v2582_v3  ;;  %v3038_v18 = vadd.f32 %v2878_v28, %v1479_v1  ;;  %v1478_v56 = vmul.f32 %v2430_v2, %v2873_v25  ;;  %v2337_v11 = vpop.f32.mrb[28].mxu1 }
 0x152   : > { %v1637_v12 = vadd.f32 0.5, %v1605_v6  ;;  %v1606_v13 = vmul.f32 0.5, %v2584_v8  ;;  %2593 = vtanh.f32 %v1544_v24  ;;  %v3042_v23 = vadd.f32 %v2878_v28, %v1477_v4  ;;  %v2385_v14 = vpop.f32.mrb[28].mxu0  ;;  %v1077_v15 = vpop.f32.mrb[29].mxu1 }
 0x153   : > { %2161 = vst [vmem:[%s2949_s12 + $0x30] sm:$0xff] %v2109_v9   ;;  %v1635_v16 = vadd.f32 0.5, %v1603_v10  ;;  %v1549_v17 = vmul.f32 0.5, %v3038_v18  ;;  %v3047_v39 = vadd.f32 %v2878_v28, %v1480_v7  ;;  %v3050_v26 = vadd.f32 %v2878_v28, %v1478_v56  ;;  %v1398_v27 = vpop.f32.mrb[29].mxu0  ;;  %v2338_v29 = vpop.f32.mrb[30].mxu1 }
 0x154   : > { %v2586_v31 = vpop.eup %2585  ;;  %v1669_v32 = vmul.f32 %v1637_v12, %v2987_v41  ;;  %v1638_v33 = vadd.f32 0.5, %v1606_v13  ;;  %v1547_v34 = vmul.f32 0.5, %v3042_v23  ;;  %v2431_v35 = vadd.f32 %v2385_v14, %v2337_v11  ;;  %v2386_v37 = vpop.f32.mrb[30].mxu0 }
 0x155   : > { %v1080_v40 = vpop.f32.mrb[31].mxu1  ;;  %v1667_v42 = vmul.f32 %v1635_v16, %v2990_v52  ;;  %v1604_v44 = vmul.f32 0.5, %v2586_v31  ;;  %2595 = vtanh.f32 %v1549_v17  ;;  %v1550_v45 = vmul.f32 0.5, %v3047_v39  ;;  %v1401_v46 = vpop.f32.mrb[31].mxu0 }
 0x156   : > { %v2588_v47 = vpop.eup %2587  ;;  %v1670_v36 = vmul.f32 %v1638_v33, %v2994_v55  ;;  %2597 = vtanh.f32 %v1547_v34  ;;  %v1548_v63 = vmul.f32 0.5, %v3050_v26  ;;  %v1483_v41 = vmul.f32 %v2431_v35, %v2873_v25 }
 0x157   : > { %v2590_v48 = vpop.eup %2589  ;;  %v1636_v49 = vadd.f32 0.5, %v1604_v44  ;;  %v1609_v50 = vmul.f32 0.5, %v2588_v47  ;;  %2599 = vtanh.f32 %v1550_v45  ;;  %v2432_v38 = vadd.f32 %v1398_v27, %v1077_v15 }
 0x158   : > { %v2592_v52 = vpop.eup %2591  ;;  %v2124_v51 = vpack.c.bf16 %v1670_v36, %v1669_v32  ;;  %v1607_v53 = vmul.f32 0.5, %v2590_v48  ;;  %2601 = vtanh.f32 %v1548_v63  ;;  %v3060_v54 = vadd.f32 %v2878_v28, %v1483_v41 }
 0x159   : > { %v1668_v55 = vmul.f32 %v1636_v49, %v3004_v19  ;;  %v1641_v20 = vadd.f32 0.5, %v1609_v50  ;;  %v1610_v57 = vmul.f32 0.5, %v2592_v52  ;;  %v1481_v22 = vmul.f32 %v2432_v38, %v2873_v25 }
 0x15a   : > { %2164 = vst [vmem:[%s2949_s12 + $0x48] sm:$0xff] %v2124_v51   ;;  %v1553_v59 = vmul.f32 0.5, %v3060_v54  ;;  %v2433_v62 = vadd.f32 %v2386_v37, %v2338_v29  ;;  %v2434_v5 = vadd.f32 %v1401_v46, %v1080_v40  ;;  %v1639_v2 = vadd.f32 0.5, %v1607_v53 }
 0x15b   : > { %v2119_v43 = vpack.c.bf16 %v1668_v55, %v1667_v42  ;;  %v1642_v0 = vadd.f32 0.5, %v1610_v57  ;;  %v1519_v21 = vadd.f32 %v2878_v28, %v1481_v22  ;;  %v1673_v6 = vmul.f32 %v1641_v20, %v3011_v30 }
 0x15c   : > { %v2594_v1 = vpop.eup %2593  ;;  %2603 = vtanh.f32 %v1553_v59  ;;  %v1484_v3 = vmul.f32 %v2433_v62, %v2873_v25  ;;  %v1482_v19 = vmul.f32 %v2434_v5, %v2873_v25  ;;  %v1671_v30 = vmul.f32 %v1639_v2, %v3016_v58 }
 0x15d   : > { %2163 = vst [vmem:[%s2949_s12 + $0x40] sm:$0xff] %v2119_v43   ;;  %v1674_v24 = vmul.f32 %v1642_v0, %v3020_v61  ;;  %v1608_v4 = vmul.f32 0.5, %v2594_v1  ;;  %v1551_v7 = vmul.f32 0.5, %v1519_v21 }
 0x15e   : > { %v1522_v8 = vadd.f32 %v2878_v28, %v1484_v3  ;;  %v1520_v9 = vadd.f32 %v2878_v28, %v1482_v19 }
 0x15f   : > { %v2596_v10 = vpop.eup %2595  ;;  %v2134_v56 = vpack.c.bf16 %v1674_v24, %v1673_v6  ;;  %v1640_v11 = vadd.f32 0.5, %v1608_v4  ;;  %2605 = vtanh.f32 %v1551_v7 }
 0x160   : > { %v2598_v12 = vpop.eup %2597  ;;  %v1613_v13 = vmul.f32 0.5, %v2596_v10  ;;  %v1554_v14 = vmul.f32 0.5, %v1522_v8  ;;  %v1552_v25 = vmul.f32 0.5, %v1520_v9 }
 0x161   : > { %v2600_v15 = vpop.eup %2599  ;;  %2166 = vst [vmem:[%s2949_s12 + $0x58] sm:$0xff] %v2134_v56   ;;  %v1672_v61 = vmul.f32 %v1640_v11, %v3029_v60  ;;  %v1611_v16 = vmul.f32 0.5, %v2598_v12 }
 0x162   : > { %v2602_v17 = vpop.eup %2601  ;;  %v1645_v27 = vadd.f32 0.5, %v1613_v13  ;;  %v1614_v29 = vmul.f32 0.5, %v2600_v15  ;;  %2607 = vtanh.f32 %v1554_v14 }
 0x163   : > { %v2129_v28 = vpack.c.bf16 %v1672_v61, %v1671_v30  ;;  %v1643_v31 = vadd.f32 0.5, %v1611_v16  ;;  %v1612_v32 = vmul.f32 0.5, %v2602_v17  ;;  %2609 = vtanh.f32 %v1552_v25 }
 0x164   : > { %v1646_v33 = vadd.f32 0.5, %v1614_v29  ;;  %v1677_v58 = vmul.f32 %v1645_v27, %v3038_v18 }
 0x165   : > { %2165 = vst [vmem:[%s2949_s12 + $0x50] sm:$0xff] %v2129_v28   ;;  %v1644_v34 = vadd.f32 0.5, %v1612_v32  ;;  %v1675_v60 = vmul.f32 %v1643_v31, %v3042_v23 }
 0x166   : > { %v2604_v35 = vpop.eup %2603  ;;  %v1678_v37 = vmul.f32 %v1646_v33, %v3047_v39 }
 0x167   : > { %v1676_v40 = vmul.f32 %v1644_v34, %v3050_v26  ;;  %v1617_v46 = vmul.f32 0.5, %v2604_v35 }
 0x168   : > { %v2144_v42 = vpack.c.bf16 %v1678_v37, %v1677_v58 }
 0x169   : > { %v2606_v44 = vpop.eup %2605  ;;  %v2139_v45 = vpack.c.bf16 %v1676_v40, %v1675_v60  ;;  %v1649_v41 = vadd.f32 0.5, %v1617_v46 }
 0x16a   : > { %2168 = vst [vmem:[%s2949_s12 + $0x68] sm:$0xff] %v2144_v42   ;;  %v1615_v47 = vmul.f32 0.5, %v2606_v44 }
 0x16b   : > { %2167 = vst [vmem:[%s2949_s12 + $0x60] sm:$0xff] %v2139_v45   ;;  %v1681_v23 = vmul.f32 %v1649_v41, %v3060_v54 }
 0x16c   : > { %v2608_v36 = vpop.eup %2607  ;;  %v1647_v18 = vadd.f32 0.5, %v1615_v47 }
 0x16d   : > { %v2610_v63 = vpop.eup %2609  ;;  %v1618_v48 = vmul.f32 0.5, %v2608_v36 }
 0x16e   : > { %v1616_v49 = vmul.f32 0.5, %v2610_v63  ;;  %v1679_v38 = vmul.f32 %v1647_v18, %v1519_v21 }
 0x16f   : > { %v1650_v39 = vadd.f32 0.5, %v1618_v48 }
 0x170   : > { %v1648_v50 = vadd.f32 0.5, %v1616_v49 }
 0x171   : > { %v1682_v26 = vmul.f32 %v1650_v39, %v1522_v8 }
 0x172   : > { %v1680_v52 = vmul.f32 %v1648_v50, %v1520_v9 }
 0x173   : > { %v2154_v51 = vpack.c.bf16 %v1682_v26, %v1681_v23 }
 0x174   : > { %v2149_v53 = vpack.c.bf16 %v1680_v52, %v1679_v38 }
 0x175   : > { %2170 = vst [vmem:[%s2949_s12 + $0x78] sm:$0xff] %v2154_v51  }
 0x176   : > { %2169 = vst [vmem:[%s2949_s12 + $0x70] sm:$0xff] %v2149_v53  }
 0x177 PF: > { %s18_s27 = sadd.s32 1, %s2617_s27  }
 0x178   : > { %p15_p4 = scmp.ge.s32.totalorder %s18_s27, 4  }
 0x17a   :  { %17 = sbr.rel (!%p15_p4) target bundleno = 1 (0x1), region = 88 }

// kernel: c2f_forward.6
= control target key start
LH: loop header
LB: loop body
LE: loop exit
PB: predicated region body
PF: predicated region fallthrough
CT: control target
= control target key end

     0   :  { %s10010_s21 = smov 0   ;;  %s11927_s0 = inlined_call_operand.vmem [shape: bf16[2,18,18,128], index: 0, kind: input, shape index: {}]   ;;  %s11928_s1 = inlined_call_operand.vmem [shape: bf16[2,18,18,128], index: 1, kind: input, shape index: {}]   ;;  %s11929_s2 = inlined_call_operand.vmem [shape: bf16[9,128,128], index: 2, kind: input, shape index: {}]   ;;  %s11930_s3 = inlined_call_operand.vmem [shape: bf16[9,128,128], index: 3, kind: input, shape index: {}]   ;;  %s11931_s4 = inlined_call_operand.vmem [shape: f32[1,128], index: 4, kind: input, shape index: {}]   ;;  %s11932_s5 = inlined_call_operand.vmem [shape: f32[1,128], index: 5, kind: input, shape index: {}]   ;;  %s11933_s6 = inlined_call_operand.vmem [shape: bf16[2,16,16,128], index: 6, kind: output, shape index: {}]  }
   0x1 LB: > { %s7086_s22 = sadd.s32 4294967295, %s9973_s21   ;;  %p7090_p0 = scmp.ge.s32.totalorder %s9973_s21, 1  ;;  %s9973_s21 = sphi %s10010_s21, %s16_s21  }
   0x2   : > { %p222_p1 = scmp.lt.s32.totalorder %s9973_s21, 3 }
   0x4   : > { %p223_p2 = pnand %p7090_p0, %p222_p1 }
   0x6   : > { %226 = sbr.rel (%p223_p2) target bundleno = 866 (0x362), region = 44 }
   0xd   : > { %v9652_v0 = vld [vmem:[%s11930_s3] sm:$0xff]   ;;  %p257_p3 = scmp.lt.s32.totalorder %s7086_s22, 1  ;;  %v9654_v2 = vld [vmem:[%s11930_s3 + $0x8] sm:$0xff]   ;;  %v9656_v4 = vld [vmem:[%s11930_s3 + $0x10] sm:$0xff]   ;;  %vm1023_vm0 = vsmask.f32 3328 }
   0xe   : > { %v9653_v1 = vld [vmem:[%s11930_s3 + $0x100] sm:$0xff]   ;;  %8235 = vmatprep.subr.bf16.mxu1 %v9652_v0  ;;  %v9655_v3 = vld [vmem:[%s11930_s3 + $0x108] sm:$0xff]   ;;  %v9657_v5 = vld [vmem:[%s11930_s3 + $0x110] sm:$0xff]   ;;  %vm1024_vm1 = vsmask.f32 7440  ;;  %vm2454_vm3 = vcmask 1042432  }
   0xf   : > { %8667 = vmatprep.subr.bf16.mxu0 %v9653_v1  ;;  %8236 = vmatpush3.bf16.msra.mxu1 %v9652_v0  ;;  %s12308_s22 = smov (!%p257_p3, %s7086_s22), 1  ;;  %v9658_v6 = vld [vmem:[%s11930_s3 + $0x18] sm:$0xff]   ;;  %v9660_v8 = vld [vmem:[%s11930_s3 + $0x20] sm:$0xff]   ;;  %v9662_v10 = vld [vmem:[%s11930_s3 + $0x28] sm:$0xff]   ;;  %vm2455_vm4 = vcmask 1046532  }
  0x10   : > { %8668 = vmatpush3.bf16.msra.mxu0 %v9653_v1  ;;  %8237 = vmatprep.subr.bf16.mxu1 %v9654_v2  ;;  %v9659_v7 = vld [vmem:[%s11930_s3 + $0x118] sm:$0xff]   ;;  %s9643_s15 = smul.u32 216, %s12308_s22  ;;  %v9661_v9 = vld [vmem:[%s11930_s3 + $0x120] sm:$0xff]   ;;  %v9663_v14 = vld [vmem:[%s11930_s3 + $0x128] sm:$0xff]   ;;  %s7675_s10 = sshll.u32 %s12308_s22, 7 }
  0x11   : > { %8669 = vmatprep.subr.bf16.mxu0 %v9655_v3  ;;  %v9664_v23 = vld [vmem:[%s11930_s3 + $0x30] sm:$0xff]   ;;  %v9666_v41 = vld [vmem:[%s11930_s3 + $0x38] sm:$0xff]   ;;  %vm10096_vm2 = vmor %vm1023_vm0, %vm1024_vm1 }
  0x12   : > { %s10056_s24 = scalar_lea.vmem %s11928_s1, %s9643_s15  ;;  %v9665_v24 = vld [vmem:[%s11930_s3 + $0x130] sm:$0xff]   ;;  %v9667_v47 = vld [vmem:[%s11930_s3 + $0x138] sm:$0xff]   ;;  %v9670_v0 = vld [vmem:[%s11929_s2] sm:$0xff]   ;;  %s10340_s11 = scalar_lea.vmem %s11927_s0, %s9643_s15 }
  0x13   : > { %8238 = vmatpush3.bf16.msra.mxu1 %v9654_v2  ;;  %v327_v11 = vld [vmem:[%s10056_s24] sm:$0xf]  ;;  %v328_v12 = vld [vmem:[%s10056_s24 + $0x4] sm:$0xf]  ;;  %v330_v13 = vld [vmem:[%s10056_s24 + $0xc] sm:$0xf]  ;;  %s11789_s15 = scalar_lea.vmem %s11933_s6, %s7675_s10 }
  0x14   : > { %8670 = vmatpush3.bf16.msra.mxu0 %v9655_v3  ;;  %8239 = vmatprep.subr.bf16.mxu1 %v9656_v4  ;;  %v7095_v15 = vcombine.low %v327_v11, %v328_v12  ;;  %v1411_v16 = vshrl.u32 %v327_v11, 16  ;;  %v1414_v17 = vshll.u32 %v327_v11, 16  ;;  %v1420_v18 = vshll.u32 %v328_v12, 16  ;;  %v331_v20 = vld [vmem:[%s10056_s24 + $0x10] sm:$0xf]  ;;  %vm10390_vm5 = vmor %vm2454_vm3, %vm2455_vm4 }
  0x15   : > { %8671 = vmatprep.subr.bf16.mxu0 %v9657_v5  ;;  %v1424_v19 = vshrl.u32 %v328_v12, 16  ;;  %v332_v21 = vld [vmem:[%s10056_s24 + $0x14] sm:$0x1]  ;;  %v1435_v22 = vshrl.u32 %v330_v13, 16  ;;  %v1438_v28 = vshll.u32 %v330_v13, 16  ;;  %v1444_v30 = vshll.u32 %v331_v20, 16 }
  0x16   : > { %8251 = vmatprep.mubr.bf16.mxu1 %v7095_v15  ;;  %v10075_v25 = vrot.slane %v1411_v16, 4  ;;  %v10077_v26 = vrot.slane %v1414_v17, 5  ;;  %v10079_v29 = vrot.slane %v1420_v18, 5  ;;  %v1448_v31 = vshrl.u32 %v331_v20, 16  ;;  %v333_v35 = vld [vmem:[%s10056_s24 + $0x18] sm:$0xf] }
  0x17   : > { %8240 = vmatpush3.bf16.msra.mxu1 %v9656_v4  ;;  %v1437_v27 = vrot.slane %v1435_v22, 4  ;;  %v1454_v32 = vshll.u32 %v332_v21, 16  ;;  %v10081_v33 = vrot.slane %v1424_v19, 4  ;;  %v1440_v34 = vrot.slane %v1438_v28, 5  ;;  %v334_v39 = vld [vmem:[%s10056_s24 + $0x1c] sm:$0xf] }
  0x18   : > { %8672 = vmatpush3.bf16.msra.mxu0 %v9657_v5  ;;  %8241 = vmatprep.subr.bf16.mxu1 %v9658_v6  ;;  %12085 = vst [vmem:[#allocation2_spill] sm:$0xff] %v10075_v25  ;;  %12086 = vst [vmem:[#allocation3_spill] sm:$0xff] %v10077_v26  ;;  %v1446_v36 = vrot.slane %v1444_v30, 5  ;;  %v1450_v37 = vrot.slane %v1448_v31, 4  ;;  %v1459_v40 = vshrl.u32 %v333_v35, 16  ;;  %v1462_v44 = vshll.u32 %v333_v35, 16 }
  0x19   : > { %8673 = vmatprep.subr.bf16.mxu0 %v9659_v7  ;;  %v1456_v38 = vrot.slane %v1454_v32, 5  ;;  %v1441_v42 = vor.u32 %v1440_v34, %v1437_v27  ;;  %v10089_v43 = vld [vmem:[%s10056_s24 + $0x20] sm:$0x1]  ;;  %v1468_v45 = vshll.u32 %v334_v39, 16  ;;  %v1472_v46 = vshrl.u32 %v334_v39, 16  ;;  %v9675_v34 = vld [vmem:[%s11929_s2 + $0x148] sm:$0xff]  }
  0x1a   : > { %v1451_v49 = vor.u32 %v1450_v37, %v1446_v36  ;;  %v1461_v50 = vrot.slane %v1459_v40, 4  ;;  %v1478_v51 = vshll.u32 %v10089_v43, 16  ;;  %v1464_v54 = vrot.slane %v1462_v44, 5  ;;  %v336_v61 = vld [vmem:[%s10056_s24 + $0x24] sm:$0xf]  ;;  %v9820_v48 = vld [vmem:[%s11929_s2 + $0x110] sm:$0xff]  }
  0x1b   : > { %8242 = vmatpush3.bf16.msra.mxu1 %v9658_v6  ;;  %v1442_v53 = vrot.slane %v1441_v42, 4  ;;  %v1470_v55 = vrot.slane %v1468_v45, 5  ;;  %v1474_v56 = vrot.slane %v1472_v46, 4  ;;  %v10102_v58 = vcombine.low %v330_v13, %v331_v20  ;;  %v337_v62 = vld [vmem:[%s10056_s24 + $0x28] sm:$0xf]  ;;  %v9671_v6 = vld [vmem:[%s11929_s2 + $0x140] sm:$0xff]  }
  0x1c   : > { %8674 = vmatpush3.bf16.msra.mxu0 %v9659_v7  ;;  %8243 = vmatprep.subr.bf16.mxu1 %v9660_v8  ;;  %v1452_v57 = vrot.slane %v1451_v49, 4  ;;  %v1480_v59 = vrot.slane %v1478_v51, 5  ;;  %v10104_v60 = vcombine.low %v333_v35, %v334_v39  ;;  %v1465_v1 = vor.u32 %v1464_v54, %v1461_v50  ;;  %v338_v3 = vld [vmem:[%s10056_s24 + $0x2c] sm:$0x1]  ;;  %v340_v19 = vld [vmem:[%s10056_s24 + $0x34] sm:$0xf] }
  0x1d   : > { %8675 = vmatprep.subr.bf16.mxu0 %v9661_v9  ;;  %12089 = vst [vmem:[#allocation4_spill] sm:$0xff] %v10102_v58  ;;  %v1447_v63 = vsel %vm10096_vm2, %v1442_v53, %v1446_v36  ;;  %v1475_v2 = vor.u32 %v1474_v56, %v1470_v55  ;;  %v1483_v4 = vshrl.u32 %v336_v61, 16  ;;  %v1486_v7 = vshll.u32 %v336_v61, 16  ;;  %v342_v35 = vld [vmem:[%s10056_s24 + $0x3c] sm:$0xf]  ;;  %v9679_v49 = vld [vmem:[%s11929_s2 + $0x150] sm:$0xff]  }
  0x1e   : > { %12090 = vst [vmem:[#allocation5_spill] sm:$0xff] %v10104_v60  ;;  %v1457_v5 = vsel %vm10096_vm2, %v1452_v57, %v1456_v38  ;;  %v1466_v11 = vrot.slane %v1465_v1, 4  ;;  %v1502_v18 = vshll.u32 %v338_v3, 16  ;;  %v10128_v22 = vcombine.low %v336_v61, %v337_v62  ;;  %v343_v40 = vld [vmem:[%s10056_s24 + $0x40] sm:$0xf] }
  0x1f   : > { %8244 = vmatpush3.bf16.msra.mxu1 %v9660_v8  ;;  %v1492_v8 = vshll.u32 %v337_v62, 16  ;;  %v1476_v12 = vrot.slane %v1475_v2, 4  ;;  %v1485_v13 = vrot.slane %v1483_v4, 4  ;;  %v1488_v15 = vrot.slane %v1486_v7, 5  ;;  %v344_v46 = vld [vmem:[%s10056_s24 + $0x44] sm:$0x1] }
  0x20   : > { %8676 = vmatpush3.bf16.msra.mxu0 %v9661_v9  ;;  %8245 = vmatprep.subr.bf16.mxu1 %v9662_v10  ;;  %v1496_v9 = vshrl.u32 %v337_v62, 16  ;;  %v1471_v20 = vsel %vm10096_vm2, %v1466_v11, %v1470_v55  ;;  %12092 = vst [vmem:[#allocation7_spill] sm:$0xff] %v10128_v22  ;;  %v1504_v32 = vrot.slane %v1502_v18, 5  ;;  %v1516_v38 = vshll.u32 %v340_v19, 16  ;;  %v345_v61 = vld [vmem:[%s10056_s24 + $0x48] sm:$0xf] }
  0x21   : > { %8677 = vmatprep.subr.bf16.mxu0 %v9663_v14  ;;  %v1494_v16 = vrot.slane %v1492_v8, 5  ;;  %v1481_v21 = vsel %vm10096_vm2, %v1476_v12, %v1480_v59  ;;  %v1489_v30 = vor.u32 %v1488_v15, %v1485_v13  ;;  %v1520_v39 = vshrl.u32 %v340_v19, 16  ;;  %v346_v2 = vld [vmem:[%s10056_s24 + $0x4c] sm:$0xf]  ;;  %v9682_v12 = vld [vmem:[%s11929_s2 + $0x18] sm:$0xff]  }
  0x22   : > { %v1498_v17 = vrot.slane %v1496_v9, 4  ;;  %v10134_v28 = vcombine.low %v1471_v20, %v1481_v21  ;;  %v1518_v51 = vrot.slane %v1516_v38, 5  ;;  %v1531_v54 = vshrl.u32 %v342_v35, 16  ;;  %v9683_v18 = vld [vmem:[%s11929_s2 + $0x158] sm:$0xff]  }
  0x23   : > { %8246 = vmatpush3.bf16.msra.mxu1 %v9662_v10  ;;  %v10119_v10 = vcombine.low %v1447_v63, %v1457_v5  ;;  %v1522_v53 = vrot.slane %v1520_v39, 4  ;;  %v1534_v59 = vshll.u32 %v342_v35, 16  ;;  %v1540_v4 = vshll.u32 %v343_v40, 16  ;;  %v349_v38 = vld [vmem:[%s10056_s24 + $0x58] sm:$0xf]  ;;  %v9686_v39 = vld [vmem:[%s11929_s2 + $0x20] sm:$0xff]  }
  0x24   : > { %8678 = vmatpush3.bf16.msra.mxu0 %v9663_v14  ;;  %8247 = vmatprep.subr.bf16.mxu1 %v9664_v23  ;;  %v339_v14 = vld [vmem:[%s10056_s24 + $0x30] sm:$0xf]  ;;  %12093 = vst [vmem:[#allocation8_spill] sm:$0xff] %v10134_v28  ;;  %v1499_v31 = vor.u32 %v1498_v17, %v1494_v16  ;;  %v1533_v1 = vrot.slane %v1531_v54, 4  ;;  %v1544_v5 = vshrl.u32 %v343_v40, 16  ;;  %v10162_v9 = vcombine.low %v342_v35, %v343_v40 }
  0x25   : > { %8679 = vmatprep.subr.bf16.mxu0 %v9665_v24  ;;  %12091 = vst [vmem:[#allocation6_spill] sm:$0xff] %v10119_v10  ;;  %8683 = vmatprep.mubr.bf16.mxu0 %v10119_v10  ;;  %v1507_v27 = vshrl.u32 %v339_v14, 16  ;;  %v1510_v37 = vshll.u32 %v339_v14, 16  ;;  %v10143_v45 = vcombine.low %v339_v14, %v340_v19  ;;  %v1536_v3 = vrot.slane %v1534_v59, 5  ;;  %v347_v17 = vld [vmem:[%s10056_s24 + $0x50] sm:$0x1] }
  0x26   : > { %v1500_v42 = vrot.slane %v1499_v31, 4  ;;  %12096 = vst [vmem:[#allocation11_spill] sm:$0xff] %v10162_v9  ;;  %v1555_v11 = vshrl.u32 %v345_v61, 16  ;;  %v1542_v14 = vrot.slane %v1540_v4, 5  ;;  %v1546_v15 = vrot.slane %v1544_v5, 4 }
  0x27   : > { %8248 = vmatpush3.bf16.msra.mxu1 %v9664_v23  ;;  %v9674_v23 = vld [vmem:[%s11929_s2 + $0x8] sm:$0xff]   ;;  %v1509_v36 = vrot.slane %v1507_v27, 4  ;;  %12094 = vst [vmem:[#allocation9_spill] sm:$0xff] %v10143_v45  ;;  %v1512_v50 = vrot.slane %v1510_v37, 5  ;;  %v1537_v13 = vor.u32 %v1536_v3, %v1533_v1  ;;  %v1568_v35 = vshrl.u32 %v346_v2, 16 }
  0x28   : > { %8680 = vmatpush3.bf16.msra.mxu0 %v9665_v24  ;;  %8249 = vmatprep.subr.bf16.mxu1 %v9666_v41  ;;  %v341_v24 = vld [vmem:[%s10056_s24 + $0x38] sm:$0x1]  ;;  %v1505_v56 = vsel %vm10096_vm2, %v1500_v42, %v1504_v32  ;;  %v1557_v21 = vrot.slane %v1555_v11, 4  ;;  %v1547_v31 = vor.u32 %v1546_v15, %v1542_v14  ;;  %v1564_v32 = vshll.u32 %v346_v2, 16  ;;  %v351_v54 = vld [vmem:[%s10056_s24 + $0x60] sm:$0xf] }
  0x29   : > { %8681 = vmatprep.subr.bf16.mxu0 %v9667_v47  ;;  %v1526_v44 = vshll.u32 %v341_v24, 16  ;;  %v1513_v63 = vor.u32 %v1512_v50, %v1509_v36  ;;  %v348_v24 = vld [vmem:[%s10056_s24 + $0x54] sm:$0xf]  ;;  %v1574_v36 = vshll.u32 %v347_v17, 16  ;;  %v10180_v37 = vcombine.low %v345_v61, %v346_v2  ;;  %v352_v3 = vld [vmem:[%s10056_s24 + $0x64] sm:$0xf] }
  0x2a   : > { %v1566_v42 = vrot.slane %v1564_v32, 5  ;;  %v1570_v50 = vrot.slane %v1568_v35, 4  ;;  %v1592_v59 = vshrl.u32 %v349_v38, 16  ;;  %v1603_v15 = vshrl.u32 %v351_v54, 16  ;;  %v305_v10 = vld [vmem:[%s10340_s11 + $0x80] sm:$0x1] }
  0x2b   : > { %8250 = vmatpush3.bf16.msra.mxu1 %v9666_v41  ;;  %v1490_v41 = vrot.slane %v1489_v30, 4  ;;  %v1528_v57 = vrot.slane %v1526_v44, 5  ;;  %v1514_v7 = vrot.slane %v1513_v63, 4  ;;  %v1538_v30 = vrot.slane %v1537_v13, 4  ;;  %12098 = vst [vmem:[#allocation13_spill] sm:$0xff] %v10180_v37 }
  0x2c   : > { %8682 = vmatpush3.bf16.msra.mxu0 %v9667_v47  ;;  %8283 = vmatprep.subr.bf16.mxu1 %v9670_v0  ;;  %v9678_v47 = vld [vmem:[%s11929_s2 + $0x10] sm:$0xff]   ;;  %v350_v44 = vld [vmem:[%s10056_s24 + $0x5c] sm:$0x1]  ;;  %v1571_v1 = vor.u32 %v1570_v50, %v1566_v42  ;;  %v1594_v5 = vrot.slane %v1592_v59, 4 }
  0x2d   : > { %8715 = vmatprep.subr.bf16.mxu0 %v9671_v6  ;;  %v1495_v55 = vsel %vm10096_vm2, %v1490_v41, %v1494_v16  ;;  %v1519_v19 = vsel %vm10096_vm2, %v1514_v7, %v1518_v51  ;;  %v1543_v40 = vsel %vm10096_vm2, %v1538_v30, %v1542_v14  ;;  %v1548_v41 = vrot.slane %v1547_v31, 4  ;;  %v353_v14 = vld [vmem:[%s10056_s24 + $0x68] sm:$0x1]  ;;  %v354_v30 = vld [vmem:[%s10056_s24 + $0x6c] sm:$0xf]  ;;  %v9694_v31 = vld [vmem:[%s11929_s2 + $0x30] sm:$0xff]  }
  0x2e   : > { %8252 = vmatmul.mubr.bf16.vlgmr.msra.gmra.mrb[0].mxu1 %v10102_v58  ;;  %v10158_v62 = vcombine.low %v1495_v55, %v1505_v56  ;;  %v10202_v7 = vcombine.low %v348_v24, %v349_v38  ;;  %v356_v50 = vld [vmem:[%s10056_s24 + $0x74] sm:$0x1] }
  0x2f   : > { %8684 = vmatmul.mubr.bf16.vlgmr.msra.gmra.mrb[0].mxu0 %v10134_v28  ;;  %8284 = vmatpush3.bf16.msra.mxu1 %v9670_v0  ;;  %v1523_v0 = vor.u32 %v1522_v53, %v1518_v51  ;;  %v1576_v51 = vrot.slane %v1574_v36, 5  ;;  %v1582_v53 = vshll.u32 %v348_v24, 16 }
  0x30   : > { %8716 = vmatpush3.bf16.msra.mxu0 %v9671_v6  ;;  %8255 = vmatprep.mubr.bf16.mxu1 %v10104_v60  ;;  %12095 = vst [vmem:[#allocation10_spill] sm:$0xff] %v10158_v62  ;;  %v1550_v6 = vshll.u32 %v344_v46, 16  ;;  %v1579_v46 = vshrl.u32 %v348_v24, 16  ;;  %12100 = vst [vmem:[#allocation15_spill] sm:$0xff] %v10202_v7  ;;  %v1616_v24 = vshrl.u32 %v352_v3, 16 }
  0x31   : > { %8285 = vmatprep.subr.bf16.mxu1 %v9674_v23  ;;  %8717 = vmatprep.subr.bf16.mxu0 %v9675_v34  ;;  %v1524_v8 = vrot.slane %v1523_v0, 4  ;;  %v1584_v2 = vrot.slane %v1582_v53, 5  ;;  %v1630_v53 = vshll.u32 %v354_v30, 16  ;;  %v10497_v60 = vld [vmem:[%s10340_s11 + $0x58] sm:$0xf] }
  0x32   : > { %8687 = vmatprep.mubr.bf16.mxu0 %v10158_v62  ;;  %v1552_v16 = vrot.slane %v1550_v6, 5  ;;  %v1581_v56 = vrot.slane %v1579_v46, 4  ;;  %v1598_v6 = vshll.u32 %v350_v44, 16  ;;  %v10227_v44 = vcombine.low %v351_v54, %v352_v3  ;;  %v9698_v46 = vld [vmem:[%s11929_s2 + $0x38] sm:$0xff]   ;;  %12128 = vst [vmem:[#allocation41_spill] sm:$0xff] %v10497_v60 }
  0x33   : > { %8286 = vmatpush3.bf16.msra.mxu1 %v9674_v23  ;;  %v1529_v20 = vsel %vm10096_vm2, %v1524_v8, %v1528_v57  ;;  %v1558_v23 = vshll.u32 %v345_v61, 16  ;;  %v1588_v57 = vshll.u32 %v349_v38, 16  ;;  %v9690_v61 = vld [vmem:[%s11929_s2 + $0x28] sm:$0xff]   ;;  %v355_v38 = vld [vmem:[%s10056_s24 + $0x70] sm:$0xf] }
  0x34   : > { %8718 = vmatpush3.bf16.msra.mxu0 %v9675_v34  ;;  %8287 = vmatprep.subr.bf16.mxu1 %v9678_v47  ;;  %v10177_v27 = vcombine.low %v1519_v19, %v1529_v20  ;;  %v1553_v55 = vsel %vm10096_vm2, %v1548_v41, %v1552_v16  ;;  %v9691_v8 = vld [vmem:[%s11929_s2 + $0x168] sm:$0xff]   ;;  %v1585_v13 = vor.u32 %v1584_v2, %v1581_v56  ;;  %v1600_v17 = vrot.slane %v1598_v6, 5  ;;  %v10570_v62 = vld [vmem:[%s10340_s11 + $0x78] sm:$0xf] }
  0x35   : > { %8719 = vmatprep.subr.bf16.mxu0 %v9679_v49  ;;  %v1560_v34 = vrot.slane %v1558_v23, 5  ;;  %v10199_v63 = vcombine.low %v1543_v40, %v1553_v55  ;;  %v1590_v4 = vrot.slane %v1588_v57, 5  ;;  %v1612_v19 = vshll.u32 %v352_v3, 16  ;;  %12102 = vst [vmem:[#allocation17_spill] sm:$0xff] %v10227_v44  ;;  %v9699_v55 = vld [vmem:[%s11929_s2 + $0x178] sm:$0xff]   ;;  %12142 = vst [vmem:[#allocation55_spill] sm:$0xff] %v10570_v62 }
  0x36   : > { %8256 = vmatmul.mubr.bf16.gmra.mrb[4].mxu1 %v10128_v22  ;;  %12097 = vst [vmem:[#allocation12_spill] sm:$0xff] %v10177_v27  ;;  %v1605_v23 = vrot.slane %v1603_v15, 4  ;;  %v1618_v41 = vrot.slane %v1616_v24, 4  ;;  %v1636_v59 = vshll.u32 %v355_v38, 16  ;;  %v359_v15 = vld [vmem:[%s10056_s24 + $0x80] sm:$0x1] }
  0x37   : > { %8259 = vmatprep.mubr.bf16.mxu1 %v10143_v45  ;;  %8288 = vmatpush3.bf16.msra.mxu1 %v9678_v47  ;;  %v9687_v47 = vld [vmem:[%s11929_s2 + $0x160] sm:$0xff]   ;;  %12099 = vst [vmem:[#allocation14_spill] sm:$0xff] %v10199_v63  ;;  %v1595_v16 = vor.u32 %v1594_v5, %v1590_v4  ;;  %v1614_v36 = vrot.slane %v1612_v19, 5  ;;  %v1640_v5 = vshrl.u32 %v355_v38, 16  ;;  %v10494_v22 = vld [vmem:[%s10340_s11 + $0x54] sm:$0xf] }
  0x38   : > { %8720 = vmatpush3.bf16.msra.mxu0 %v9679_v49  ;;  %8289 = vmatprep.subr.bf16.mxu1 %v9682_v12  ;;  %v1561_v49 = vor.u32 %v1560_v34, %v1557_v21  ;;  %v1586_v21 = vrot.slane %v1585_v13, 4  ;;  %v1638_v6 = vrot.slane %v1636_v59, 5  ;;  %v10262_v24 = vld [vmem:[%s11930_s3 + $0x140] sm:$0xff]  }
  0x39   : > { %8688 = vmatmul.mubr.bf16.gmra.mrb[4].mxu0 %v10177_v27  ;;  %8721 = vmatprep.subr.bf16.mxu0 %v9683_v18  ;;  %v1596_v34 = vrot.slane %v1595_v16, 4  ;;  %v1619_v56 = vor.u32 %v1618_v41, %v1614_v36  ;;  %v1670_v41 = vshll.u32 %v359_v15, 16 }
  0x3a   : > { %v1562_v0 = vrot.slane %v1561_v49, 4  ;;  %8691 = vmatprep.mubr.bf16.mxu0 %v10199_v63  ;;  %v1591_v40 = vsel %vm10096_vm2, %v1586_v21, %v1590_v4  ;;  %v1632_v4 = vrot.slane %v1630_v53, 5  ;;  %v363_v53 = vld [vmem:[%s10056_s24 + $0x90] sm:$0xf]  ;;  %v9714_v63 = vld [vmem:[%s11929_s2 + $0x58] sm:$0xff]  }
  0x3b   : > { %8290 = vmatpush3.bf16.msra.mxu1 %v9682_v12  ;;  %v1572_v12 = vrot.slane %v1571_v1, 4  ;;  %v358_v1 = vld [vmem:[%s10056_s24 + $0x7c] sm:$0xf]  ;;  %v1672_v59 = vrot.slane %v1670_v41, 5 }
  0x3c   : > { %8722 = vmatpush3.bf16.msra.mxu0 %v9683_v18  ;;  %8291 = vmatprep.subr.bf16.mxu1 %v9686_v39  ;;  %v1567_v11 = vsel %vm10096_vm2, %v1562_v0, %v1566_v42  ;;  %v1606_v18 = vshll.u32 %v351_v54, 16  ;;  %v1622_v42 = vshll.u32 %v353_v14, 16  ;;  %v357_v0 = vld [vmem:[%s10056_s24 + $0x78] sm:$0xf]  ;;  %v1642_v14 = vrot.slane %v1640_v5, 4 }
  0x3d   : > { %8723 = vmatprep.subr.bf16.mxu0 %v9687_v47  ;;  %v1577_v20 = vsel %vm10096_vm2, %v1572_v12, %v1576_v51  ;;  %v1627_v51 = vshrl.u32 %v354_v30, 16  ;;  %v10245_v12 = vcombine.low %v354_v30, %v355_v38  ;;  %v1651_v16 = vshrl.u32 %v357_v0, 16 }
  0x3e   : > { %8260 = vmatmul.mubr.bf16.gmra.mrb[8].mxu1 %v10162_v9  ;;  %v10219_v32 = vcombine.low %v1567_v11, %v1577_v20  ;;  %v1608_v35 = vrot.slane %v1606_v18, 5  ;;  %v1624_v57 = vrot.slane %v1622_v42, 5  ;;  %v1646_v11 = vshll.u32 %v356_v50, 16  ;;  %v361_v42 = vld [vmem:[%s10056_s24 + $0x88] sm:$0xf] }
  0x3f   : > { %8263 = vmatprep.mubr.bf16.mxu1 %v10180_v37  ;;  %8292 = vmatpush3.bf16.msra.mxu1 %v9686_v39  ;;  %v9695_v39 = vld [vmem:[%s11929_s2 + $0x170] sm:$0xff]   ;;  %v1629_v3 = vrot.slane %v1627_v51, 4  ;;  %12104 = vst [vmem:[#allocation19_spill] sm:$0xff] %v10245_v12  ;;  %v1654_v20 = vshll.u32 %v357_v0, 16  ;;  %v1660_v21 = vshll.u32 %v358_v1, 16  ;;  %v1684_v5 = vshll.u32 %v361_v42, 16 }
  0x40   : > { %8724 = vmatpush3.bf16.msra.mxu0 %v9687_v47  ;;  %8293 = vmatprep.subr.bf16.mxu1 %v9690_v61  ;;  %12101 = vst [vmem:[#allocation16_spill] sm:$0xff] %v10219_v32  ;;  %v1601_v47 = vsel %vm10096_vm2, %v1596_v34, %v1600_v17  ;;  %v1609_v49 = vor.u32 %v1608_v35, %v1605_v23  ;;  %v10254_v17 = vld [vmem:[%s11929_s2 + $0x40] sm:$0xff]   ;;  %v1648_v19 = vrot.slane %v1646_v11, 5  ;;  %v1653_v35 = vrot.slane %v1651_v16, 4  ;;  %v362_v50 = vld [vmem:[%s10056_s24 + $0x8c] sm:$0x1] }
  0x41   : > { %8725 = vmatprep.subr.bf16.mxu0 %v9691_v8  ;;  %8692 = vmatmul.mubr.bf16.gmra.mrb[8].mxu0 %v10219_v32  ;;  %v10239_v54 = vcombine.low %v1591_v40, %v1601_v47  ;;  %v1633_v13 = vor.u32 %v1632_v4, %v1629_v3  ;;  %v360_v23 = vld [vmem:[%s10056_s24 + $0x84] sm:$0xf]  ;;  %v1643_v34 = vor.u32 %v1642_v14, %v1638_v6  ;;  %v1662_v38 = vrot.slane %v1660_v21, 5  ;;  %v364_v11 = vld [vmem:[%s10056_s24 + $0x94] sm:$0xf] }
  0x42   : > { %v1610_v2 = vrot.slane %v1609_v49, 4  ;;  %v1664_v40 = vshrl.u32 %v358_v1, 16  ;;  %v10270_v49 = vcombine.low %v357_v0, %v358_v1  ;;  %v1675_v51 = vshrl.u32 %v360_v23, 16  ;;  %v9710_v37 = vld [vmem:[%s11929_s2 + $0x50] sm:$0xff]  }
  0x43   : > { %8294 = vmatpush3.bf16.msra.mxu1 %v9690_v61  ;;  %12103 = vst [vmem:[#allocation18_spill] sm:$0xff] %v10239_v54  ;;  %8695 = vmatprep.mubr.bf16.mxu0 %v10239_v54  ;;  %v1620_v61 = vrot.slane %v1619_v56, 4  ;;  %v1644_v47 = vrot.slane %v1643_v34, 4  ;;  %v10283_v14 = vcombine.low %v360_v23, %v361_v42  ;;  %v1702_v34 = vshll.u32 %v363_v53, 16  ;;  %v10545_v54 = vld [vmem:[%s10340_s11 + $0x70] sm:$0xf] }
  0x44   : > { %8726 = vmatpush3.bf16.msra.mxu0 %v9691_v8  ;;  %8295 = vmatprep.subr.bf16.mxu1 %v9694_v31  ;;  %v1615_v8 = vsel %vm10096_vm2, %v1610_v2, %v1614_v36  ;;  %v1656_v36 = vrot.slane %v1654_v20, 5  ;;  %12106 = vst [vmem:[#allocation21_spill] sm:$0xff] %v10270_v49  ;;  %v1678_v2 = vshll.u32 %v360_v23, 16  ;;  %v1677_v4 = vrot.slane %v1675_v51, 4  ;;  %v367_v51 = vld [vmem:[%s10056_s24 + $0xa0] sm:$0xf] }
  0x45   : > { %8727 = vmatprep.subr.bf16.mxu0 %v9695_v39  ;;  %v1625_v18 = vsel %vm10096_vm2, %v1620_v61, %v1624_v57  ;;  %v1666_v57 = vrot.slane %v1664_v40, 4  ;;  %v1649_v3 = vsel %vm10096_vm2, %v1644_v47, %v1648_v19  ;;  %v1688_v61 = vshrl.u32 %v361_v42, 16  ;;  %12108 = vst [vmem:[#allocation23_spill] sm:$0xff] %v10283_v14  ;;  %v366_v42 = vld [vmem:[%s10056_s24 + $0x9c] sm:$0xf]  ;;  %12139 = vst [vmem:[#allocation52_spill] sm:$0xff] %v10545_v54 }
  0x46   : > { %8264 = vmatmul.mubr.bf16.gmra.mrb[12].mxu1 %v10202_v7  ;;  %v10264_v30 = vcombine.low %v1615_v8, %v1625_v18  ;;  %v1657_v56 = vor.u32 %v1656_v36, %v1653_v35  ;;  %v1699_v19 = vshrl.u32 %v363_v53, 16  ;;  %v1708_v35 = vshll.u32 %v364_v11, 16  ;;  %v10548_v32 = vld [vmem:[%s10340_s11 + $0x74] sm:$0x1] }
  0x47   : > { %8267 = vmatprep.mubr.bf16.mxu1 %v10227_v44  ;;  %8296 = vmatpush3.bf16.msra.mxu1 %v9694_v31  ;;  %v1634_v31 = vrot.slane %v1633_v13, 4  ;;  %v1667_v1 = vor.u32 %v1666_v57, %v1662_v38  ;;  %v1690_v8 = vrot.slane %v1688_v61, 4  ;;  %v1694_v13 = vshll.u32 %v362_v50, 16  ;;  %12140 = vst [vmem:[#allocation53_spill] sm:$0xff] %v10548_v32 }
  0x48   : > { %8728 = vmatpush3.bf16.msra.mxu0 %v9695_v39  ;;  %8297 = vmatprep.subr.bf16.mxu1 %v9698_v46  ;;  %12105 = vst [vmem:[#allocation20_spill] sm:$0xff] %v10264_v30  ;;  %v1701_v23 = vrot.slane %v1699_v19, 4  ;;  %v1712_v41 = vshrl.u32 %v364_v11, 16  ;;  %v1704_v47 = vrot.slane %v1702_v34, 5  ;;  %v1710_v50 = vrot.slane %v1708_v35, 5 }
  0x49   : > { %8729 = vmatprep.subr.bf16.mxu0 %v9699_v55  ;;  %8696 = vmatmul.mubr.bf16.gmra.mrb[12].mxu0 %v10264_v30  ;;  %v1639_v39 = vsel %vm10096_vm2, %v1634_v31, %v1638_v6  ;;  %v1680_v6 = vrot.slane %v1678_v2, 5  ;;  %v1668_v16 = vrot.slane %v1667_v1, 4  ;;  %v1696_v21 = vrot.slane %v1694_v13, 5  ;;  %v365_v31 = vld [vmem:[%s10056_s24 + $0x98] sm:$0x1] }
  0x4a   : > { %v10278_v0 = vcombine.low %v1639_v39, %v1649_v3  ;;  %v1714_v57 = vrot.slane %v1712_v41, 4  ;;  %v1718_v2 = vshll.u32 %v365_v31, 16  ;;  %v10297_v3 = vcombine.low %v363_v53, %v364_v11  ;;  %v369_v1 = vld [vmem:[%s10056_s24 + $0xa8] sm:$0xf]  ;;  %v370_v53 = vld [vmem:[%s10056_s24 + $0xac] sm:$0xf] }
  0x4b   : > { %8298 = vmatpush3.bf16.msra.mxu1 %v9698_v46  ;;  %v1658_v46 = vrot.slane %v1657_v56, 4  ;;  %v1681_v18 = vor.u32 %v1680_v6, %v1677_v4  ;;  %v1673_v36 = vsel %vm10096_vm2, %v1668_v16, %v1672_v59  ;;  %v1705_v4 = vor.u32 %v1704_v47, %v1701_v23  ;;  %v10542_v30 = vld [vmem:[%s10340_s11 + $0x6c] sm:$0xf] }
  0x4c   : > { %8730 = vmatpush3.bf16.msra.mxu0 %v9699_v55  ;;  %8331 = vmatprep.subr.bf16.mxu1 %v10254_v17  ;;  %12107 = vst [vmem:[#allocation22_spill] sm:$0xff] %v10278_v0  ;;  %v1686_v55 = vrot.slane %v1684_v5, 5  ;;  %12110 = vst [vmem:[#allocation25_spill] sm:$0xff] %v10297_v3  ;;  %v368_v5 = vld [vmem:[%s10056_s24 + $0xa4] sm:$0x1]  ;;  %v1723_v61 = vshrl.u32 %v366_v42, 16  ;;  %v10310_v31 = vcombine.low %v366_v42, %v367_v51 }
  0x4d   : > { %8763 = vmatprep.subr.bf16.mxu0 %v10262_v24  ;;  %8699 = vmatprep.mubr.bf16.mxu0 %v10278_v0  ;;  %v1663_v15 = vsel %vm10096_vm2, %v1658_v46, %v1662_v38  ;;  %v1682_v40 = vrot.slane %v1681_v18, 4  ;;  %v1726_v46 = vshll.u32 %v366_v42, 16  ;;  %v1732_v13 = vshll.u32 %v367_v51, 16  ;;  %12138 = vst [vmem:[#allocation51_spill] sm:$0xff] %v10542_v30 }
  0x4e   : > { %8268 = vmatmul.mubr.bf16.gmra.mrb[16].mxu1 %v10245_v12  ;;  %v1691_v20 = vor.u32 %v1690_v8, %v1686_v55  ;;  %v10292_v39 = vcombine.low %v1663_v15, %v1673_v36  ;;  %v1720_v8 = vrot.slane %v1718_v2, 5  ;;  %v1706_v11 = vrot.slane %v1705_v4, 4  ;;  %12112 = vst [vmem:[#allocation27_spill] sm:$0xff] %v10310_v31  ;;  %v373_v4 = vld [vmem:[%s10056_s24 + $0xb8] sm:$0xf] }
  0x4f   : > { %8271 = vmatprep.mubr.bf16.mxu1 %v10270_v49  ;;  %v1687_v56 = vsel %vm10096_vm2, %v1682_v40, %v1686_v55  ;;  %v1715_v55 = vor.u32 %v1714_v57, %v1710_v50  ;;  %v1725_v15 = vrot.slane %v1723_v61, 4  ;;  %v1728_v16 = vrot.slane %v1726_v46, 5  ;;  %v371_v40 = vld [vmem:[%s10056_s24 + $0xb0] sm:$0x1]  ;;  %v372_v57 = vld [vmem:[%s10056_s24 + $0xb4] sm:$0xf] }
  0x50   : > { %12109 = vst [vmem:[#allocation24_spill] sm:$0xff] %v10292_v39  ;;  %v1692_v38 = vrot.slane %v1691_v20, 4  ;;  %v1736_v18 = vshrl.u32 %v367_v51, 16  ;;  %v1734_v20 = vrot.slane %v1732_v13, 5  ;;  %v1711_v34 = vsel %vm10096_vm2, %v1706_v11, %v1710_v50  ;;  %v374_v11 = vld [vmem:[%s10056_s24 + $0xbc] sm:$0x1] }
  0x51   : > { %8700 = vmatmul.mubr.bf16.gmra.mrb[16].mxu0 %v10292_v39  ;;  %v1716_v19 = vrot.slane %v1715_v55, 4  ;;  %v1729_v35 = vor.u32 %v1728_v16, %v1725_v15  ;;  %v1747_v23 = vshrl.u32 %v369_v1, 16  ;;  %v1750_v47 = vshll.u32 %v369_v1, 16  ;;  %v10453_v49 = vld [vmem:[%s10340_s11 + $0x40] sm:$0xf] }
  0x52   : > { %v1697_v59 = vsel %vm10096_vm2, %v1692_v38, %v1696_v21  ;;  %v1742_v21 = vshll.u32 %v368_v5, 16  ;;  %v1738_v36 = vrot.slane %v1736_v18, 4  ;;  %v1760_v61 = vshrl.u32 %v370_v53, 16  ;;  %v10456_v12 = vld [vmem:[%s10340_s11 + $0x44] sm:$0x1] }
  0x53   : > { %v10304_v6 = vcombine.low %v1687_v56, %v1697_v59  ;;  %v1721_v41 = vsel %vm10096_vm2, %v1716_v19, %v1720_v8  ;;  %v1756_v56 = vshll.u32 %v370_v53, 16  ;;  %v1730_v59 = vrot.slane %v1729_v35, 4 }
  0x54   : > { %v1744_v38 = vrot.slane %v1742_v21, 5  ;;  %v10318_v2 = vcombine.low %v1711_v34, %v1721_v41  ;;  %v1739_v42 = vor.u32 %v1738_v36, %v1734_v20  ;;  %v1749_v51 = vrot.slane %v1747_v23, 4  ;;  %v375_v34 = vld [vmem:[%s10056_s24 + $0xc0] sm:$0xf] }
  0x55   : > { %12111 = vst [vmem:[#allocation26_spill] sm:$0xff] %v10304_v6  ;;  %8703 = vmatprep.mubr.bf16.mxu0 %v10304_v6  ;;  %v1752_v50 = vrot.slane %v1750_v47, 5  ;;  %v1758_v5 = vrot.slane %v1756_v56, 5  ;;  %v1766_v46 = vshll.u32 %v371_v40, 16  ;;  %v1735_v55 = vsel %vm10096_vm2, %v1730_v59, %v1734_v20  ;;  %v376_v47 = vld [vmem:[%s10056_s24 + $0xc4] sm:$0xf] }
  0x56   : > { %8272 = vmatmul.mubr.bf16.gmra.mrb[20].mxu1 %v10283_v14  ;;  %12113 = vst [vmem:[#allocation28_spill] sm:$0xff] %v10318_v2  ;;  %v1740_v8 = vrot.slane %v1739_v42, 4  ;;  %v10324_v13 = vcombine.low %v369_v1, %v370_v53  ;;  %v1771_v15 = vshrl.u32 %v372_v57, 16  ;;  %v1762_v18 = vrot.slane %v1760_v61, 4  ;;  %v10531_v6 = vld [vmem:[%s10340_s11 + $0x68] sm:$0x1] }
  0x57   : > { %8275 = vmatprep.mubr.bf16.mxu1 %v10297_v3  ;;  %v1753_v16 = vor.u32 %v1752_v50, %v1749_v51  ;;  %v1768_v19 = vrot.slane %v1766_v46, 5  ;;  %v1774_v21 = vshll.u32 %v372_v57, 16  ;;  %v1780_v1 = vshll.u32 %v373_v4, 16  ;;  %v377_v51 = vld [vmem:[%s10056_s24 + $0xc8] sm:$0x1]  ;;  %12135 = vst [vmem:[#allocation48_spill] sm:$0xff] %v10531_v6 }
  0x58   : > { %12114 = vst [vmem:[#allocation29_spill] sm:$0xff] %v10324_v13  ;;  %v1745_v35 = vsel %vm10096_vm2, %v1740_v8, %v1744_v38  ;;  %v1773_v20 = vrot.slane %v1771_v15, 4  ;;  %v1784_v53 = vshrl.u32 %v373_v4, 16  ;;  %v1763_v23 = vor.u32 %v1762_v18, %v1758_v5  ;;  %v10346_v50 = vld [vmem:[%s10340_s11] sm:$0xf] }
  0x59   : > { %8704 = vmatmul.mubr.bf16.gmra.mrb[20].mxu0 %v10318_v2  ;;  %v10332_v36 = vcombine.low %v1735_v55, %v1745_v35  ;;  %v1754_v40 = vrot.slane %v1753_v16, 4  ;;  %v1776_v41 = vrot.slane %v1774_v21, 5  ;;  %v1782_v38 = vrot.slane %v1780_v1, 5  ;;  %v10352_v15 = vld [vmem:[%s10340_s11 + $0x4] sm:$0xf] }
  0x5a   : > { %v1786_v56 = vrot.slane %v1784_v53, 4  ;;  %v1790_v59 = vshll.u32 %v374_v11, 16  ;;  %v10342_v42 = vcombine.low %v372_v57, %v373_v4  ;;  %v1764_v46 = vrot.slane %v1763_v23, 4 }
  0x5b   : > { %12115 = vst [vmem:[#allocation30_spill] sm:$0xff] %v10332_v36  ;;  %8707 = vmatprep.mubr.bf16.mxu0 %v10332_v36  ;;  %v1759_v61 = vsel %vm10096_vm2, %v1754_v40, %v1758_v5  ;;  %v1777_v55 = vor.u32 %v1776_v41, %v1773_v20  ;;  %v3894_v8 = vshrl.u32 %v375_v34, 16  ;;  %v3897_v21 = vshll.u32 %v375_v34, 16  ;;  %v10509_v36 = vld [vmem:[%s10340_s11 + $0x60] sm:$0xf] }
  0x5c   : > { %12116 = vst [vmem:[#allocation31_spill] sm:$0xff] %v10342_v42  ;;  %v1787_v16 = vor.u32 %v1786_v56, %v1782_v38  ;;  %v1792_v18 = vrot.slane %v1790_v59, 5  ;;  %v3903_v35 = vshll.u32 %v376_v47, 16  ;;  %v1769_v57 = vsel %vm10096_vm2, %v1764_v46, %v1768_v19  ;;  %v276_v59 = vld [vmem:[%s10340_s11 + $0xc] sm:$0xf]  ;;  %12131 = vst [vmem:[#allocation44_spill] sm:$0xff] %v10509_v36 }
  0x5d   : > { %v1778_v4 = vrot.slane %v1777_v55, 4  ;;  %v3896_v11 = vrot.slane %v3894_v8, 4  ;;  %v3907_v1 = vshrl.u32 %v376_v47, 16  ;;  %v10356_v53 = vcombine.low %v1759_v61, %v1769_v57  ;;  %v10373_v8 = vld [vmem:[%s10340_s11 + $0x10] sm:$0xf] }
  0x5e   : > { %8276 = vmatmul.mubr.bf16.gmra.mrb[24].mxu1 %v10310_v31  ;;  %v1788_v52 = vrot.slane %v1787_v16, 4  ;;  %v3899_v5 = vrot.slane %v3897_v21, 5  ;;  %v3905_v40 = vrot.slane %v3903_v35, 5  ;;  %v3913_v23 = vshll.u32 %v377_v51, 16  ;;  %v10378_v57 = vld [vmem:[%s10340_s11 + $0x18] sm:$0xf] }
  0x5f   : > { %8279 = vmatprep.mubr.bf16.mxu1 %v10324_v13  ;;  %12117 = vst [vmem:[#allocation32_spill] sm:$0xff] %v10356_v53  ;;  %v1783_v20 = vsel %vm10096_vm2, %v1778_v4, %v1782_v38  ;;  %v3909_v34 = vrot.slane %v3907_v1, 4  ;;  %v7119_v19 = vcombine.low %v10346_v50, %v10352_v15  ;;  %v1054_v21 = vshll.u32 %v276_v59, 16  ;;  %v10381_v4 = vld [vmem:[%s10340_s11 + $0x1c] sm:$0xf] }
  0x60   : > { %v1793_v41 = vsel %vm10096_vm2, %v1788_v52, %v1792_v18  ;;  %v3900_v47 = vor.u32 %v3899_v5, %v3896_v11  ;;  %v3915_v46 = vrot.slane %v3913_v23, 5  ;;  %v278_v52 = vld [vmem:[%s10340_s11 + $0x14] sm:$0x1]  ;;  %v1051_v18 = vshrl.u32 %v276_v59, 16  ;;  %v10384_v11 = vld [vmem:[%s10340_s11 + $0x20] sm:$0x1] }
  0x61   : > { %8708 = vmatmul.mubr.bf16.gmra.mrb[24].mxu0 %v10356_v53  ;;  %v10369_v61 = vcombine.low %v1783_v20, %v1793_v41  ;;  %v3910_v51 = vor.u32 %v3909_v34, %v3905_v40  ;;  %v1064_v5 = vshrl.u32 %v10373_v8, 16  ;;  %v1070_v20 = vshll.u32 %v278_v52, 16  ;;  %v10398_v41 = vld [vmem:[%s10340_s11 + $0x28] sm:$0xf]  ;;  %v10408_v38 = vld [vmem:[%s10340_s11 + $0x2c] sm:$0x1] }
  0x62   : > { %v3901_v16 = vrot.slane %v3900_v47, 4  ;;  %v12119_v34 = vmov 0  ;;  %v7224_v23 = vrot.slane %v276_v59, 9  ;;  %v10404_v35 = vrot.slane %v1054_v21, 5  ;;  %v10417_v31 = vld [vmem:[%s10340_s11 + $0x30] sm:$0xf] }
  0x63   : > { %12118 = vst [vmem:[#allocation33_spill] sm:$0xff] %v10369_v61  ;;  %8711 = vmatprep.mubr.bf16.mxu0 %v10369_v61  ;;  %v3911_v1 = vrot.slane %v3910_v51, 4  ;;  %v12120_v34 = vsel %vm10390_vm5, 4294967295, %v12119_v34  ;;  %v10402_v51 = vrot.slane %v1051_v18, 4  ;;  %v2466_v55 = vrot.slane %v10373_v8, 5 }
  0x64   : > { %12121 = vst [vmem:[#allocation34_spill] sm:$0xff] %v12120_v34  ;;  %v3906_v47 = vsel %vm10096_vm2, %v3901_v16, %v3905_v40  ;;  %v10412_v58 = vrot.slane %v1064_v5, 4  ;;  %v2469_v13 = vrot.slane %v278_v52, 5  ;;  %v10420_v40 = vld [vmem:[%s10340_s11 + $0x34] sm:$0xf]  ;;  %v10427_v3 = vcombine.low %v276_v59, %v10373_v8  ;;  %v12230_v34 = vld [vmem:[#allocation13_spill] sm:$0xff] }
  0x65   : > { %v3916_v56 = vsel %vm10096_vm2, %v3911_v1, %v3915_v46  ;;  %v2467_v18 = vsel %vm10390_vm5, %v7224_v23, %v2466_v55  ;;  %v2468_v21 = vrot.slane %v2466_v55, 4  ;;  %v9706_v46 = vld [vmem:[%s11929_s2 + $0x48] sm:$0xff]   ;;  %v10433_v52 = vld [vmem:[%s10340_s11 + $0x38] sm:$0x1]  ;;  %v10436_v1 = vld [vmem:[%s10340_s11 + $0x3c] sm:$0xf]  ;;  %v10443_v55 = vcombine.low %v10378_v57, %v10381_v4 }
  0x66   : > { %8280 = vmatmul.mubr.bf16.gmra.mrb[28].mxu1 %v10342_v42  ;;  %v10414_v42 = vrot.slane %v1070_v20, 5  ;;  %v10422_v16 = vcombine.low %v3906_v47, %v3916_v56  ;;  %12123 = vst [vmem:[#allocation36_spill] sm:$0xff] %v10427_v3  ;;  %v7225_v56 = vrot.slane %v10378_v57, 9  ;;  %v2473_v5 = vrot.slane %v10381_v4, 5  ;;  %v10506_v53 = vld [vmem:[%s10340_s11 + $0x5c] sm:$0x1] }
  0x67   : > { %8299 = vmatprep.mubr.bf16.mxu1 %v7119_v19  ;;  %v10395_v19 = vld [vmem:[%s10340_s11 + $0x24] sm:$0xf]  ;;  %v2476_v20 = vrot.slane %v10384_v11, 5  ;;  %12124 = vst [vmem:[#allocation37_spill] sm:$0xff] %v10443_v55  ;;  %v2470_v59 = vsel %vm10390_vm5, %v2468_v21, %v2469_v13  ;;  %v2480_v47 = vrot.slane %v10398_v41, 5  ;;  %v2483_v14 = vrot.slane %v10408_v38, 5 }
  0x68   : > { %12122 = vst [vmem:[#allocation35_spill] sm:$0xff] %v10422_v16  ;;  %v7226_v23 = vrot.slane %v10395_v19, 9  ;;  %v10458_v44 = vcombine.low %v2467_v18, %v2470_v59  ;;  %v2475_v7 = vrot.slane %v2473_v5, 4  ;;  %v10466_v13 = vcombine.low %v10395_v19, %v10398_v41  ;;  %v10469_v21 = vld [vmem:[%s10340_s11 + $0x48] sm:$0xf]  ;;  %12130 = vst [vmem:[#allocation43_spill] sm:$0xff] %v10506_v53 }
  0x69   : > { %8712 = vmatmul.mubr.bf16.gmra.mrb[28].mxu0 %v10422_v16  ;;  %v2474_v16 = vsel %vm10390_vm5, %v7225_v56, %v2473_v5  ;;  %v10475_v18 = vld [vmem:[%s10340_s11 + $0x50] sm:$0x1]  ;;  %v2482_v5 = vrot.slane %v2480_v47, 4  ;;  %v2487_v59 = vrot.slane %v10420_v40, 5  ;;  %v2490_v45 = vrot.slane %v10433_v52, 5 }
  0x6a   : > { %12125 = vst [vmem:[#allocation38_spill] sm:$0xff] %v10458_v44  ;;  %12126 = vst [vmem:[#allocation39_spill] sm:$0xff] %v10466_v13  ;;  %v2481_v56 = vsel %vm10390_vm5, %v7226_v23, %v2480_v47  ;;  %8731 = vmatprep.mubr.bf16.mxu0 %v10458_v44  ;;  %v2477_v9 = vsel %vm10390_vm5, %v2475_v7, %v2476_v20  ;;  %v10490_v23 = vcombine.low %v10417_v31, %v10420_v40 }
  0x6b   : > { %v7228_v47 = vrot.slane %v10436_v1, 9  ;;  %v10499_v61 = vcombine.low %v2474_v16, %v2477_v9  ;;  %v2484_v44 = vsel %vm10390_vm5, %v2482_v5, %v2483_v14  ;;  %v2489_v20 = vrot.slane %v2487_v59, 4 }
  0x6c   : > { %12127 = vst [vmem:[#allocation40_spill] sm:$0xff] %v10490_v23  ;;  %v10511_v2 = vcombine.low %v2481_v56, %v2484_v44  ;;  %v2494_v9 = vrot.slane %v10453_v49, 5  ;;  %v2497_v16 = vrot.slane %v10456_v12, 5  ;;  %v10517_v14 = vcombine.low %v10436_v1, %v10453_v49  ;;  %v9707_v44 = vld [vmem:[%s11930_s3 + $0x148] sm:$0xff]  }
  0x6d   : > { %12129 = vst [vmem:[#allocation42_spill] sm:$0xff] %v10499_v61  ;;  %v2491_v5 = vsel %vm10390_vm5, %v2489_v20, %v2490_v45  ;;  %v7231_v27 = vrot.slane %v10509_v36, 9 }
  0x6e   : > { %8300 = vmatmul.mubr.bf16.vlgmr.msra.gmra.mrb[0].mxu1 %v10427_v3  ;;  %v10472_v3 = vld [vmem:[%s10340_s11 + $0x4c] sm:$0xf]  ;;  %12132 = vst [vmem:[#allocation45_spill] sm:$0xff] %v10511_v2  ;;  %12133 = vst [vmem:[#allocation46_spill] sm:$0xff] %v10517_v14  ;;  %v2495_v45 = vsel %vm10390_vm5, %v7228_v47, %v2494_v9  ;;  %v2496_v20 = vrot.slane %v2494_v9, 4  ;;  %v7230_v9 = vrot.slane %v10494_v22, 9 }
  0x6f   : > { %8332 = vmatpush3.bf16.msra.mxu1 %v10254_v17  ;;  %8303 = vmatprep.mubr.bf16.mxu1 %v10443_v55  ;;  %v7227_v17 = vrot.slane %v10417_v31, 9  ;;  %v2501_v56 = vrot.slane %v10472_v3, 5  ;;  %v10539_v0 = vcombine.low %v10469_v21, %v10472_v3 }
  0x70   : > { %8333 = vmatprep.subr.bf16.mxu1 %v9706_v46 }
  0x71   : > { %v2488_v7 = vsel %vm10390_vm5, %v7227_v17, %v2487_v59  ;;  %v2504_v17 = vrot.slane %v10475_v18, 5  ;;  %v10528_v59 = vld [vmem:[%s10340_s11 + $0x64] sm:$0xf]  ;;  %12137 = vst [vmem:[#allocation50_spill] sm:$0xff] %v10539_v0  ;;  %8732 = vmatmul.mubr.bf16.vlgmr.msra.gmra.mrb[0].mxu0 %v10499_v61  ;;  %v2503_v47 = vrot.slane %v2501_v56, 4  ;;  %v2498_v61 = vsel %vm10390_vm5, %v2496_v20, %v2497_v16  ;;  %v9711_v16 = vld [vmem:[%s11930_s3 + $0x150] sm:$0xff]  }
  0x72   : > { %12134 = vst [vmem:[#allocation47_spill] sm:$0xff] %v10528_v59  ;;  %v10533_v39 = vcombine.low %v2488_v7, %v2491_v5  ;;  %v2508_v5 = vrot.slane %v10497_v60, 5  ;;  %8764 = vmatpush3.bf16.msra.mxu0 %v10262_v24  ;;  %8735 = vmatprep.mubr.bf16.mxu0 %v10511_v2  ;;  %v10573_v28 = vcombine.low %v2495_v45, %v2498_v61  ;;  %v2515_v61 = vrot.slane %v10528_v59, 5 }
  0x73   : > { %8334 = vmatpush3.bf16.msra.mxu1 %v9706_v46  ;;  %v7229_v46 = vrot.slane %v10469_v21, 9  ;;  %8765 = vmatprep.subr.bf16.mxu0 %v9707_v44  ;;  %v2505_v24 = vsel %vm10390_vm5, %v2503_v47, %v2504_v17  ;;  %v2518_v17 = vrot.slane %v10531_v6, 5  ;;  %v10592_v45 = vcombine.low %v10509_v36, %v10528_v59  ;;  %v307_v59 = vld [vmem:[%s10340_s11 + $0x88] sm:$0xf]  ;;  %v308_v36 = vld [vmem:[%s10340_s11 + $0x8c] sm:$0x1] }
  0x74   : > { %8335 = vmatprep.subr.bf16.mxu1 %v9710_v37  ;;  %12136 = vst [vmem:[#allocation49_spill] sm:$0xff] %v10533_v39  ;;  %12143 = vst [vmem:[#allocation56_spill] sm:$0xff] %v10573_v28  ;;  %v2509_v20 = vsel %vm10390_vm5, %v7230_v9, %v2508_v5  ;;  %v2510_v2 = vrot.slane %v2508_v5, 4  ;;  %v7232_v9 = vrot.slane %v10542_v30, 9  ;;  %v306_v5 = vld [vmem:[%s10340_s11 + $0x84] sm:$0xf] }
  0x75   : > { %v2502_v7 = vsel %vm10390_vm5, %v7229_v46, %v2501_v56  ;;  %v2511_v46 = vrot.slane %v10506_v53, 5  ;;  %v10566_v56 = vcombine.low %v10494_v22, %v10497_v60  ;;  %12146 = vst [vmem:[#allocation59_spill] sm:$0xff] %v10592_v45  ;;  %v2517_v6 = vrot.slane %v2515_v61, 4 }
  0x76   : > { %8304 = vmatmul.mubr.bf16.gmra.mrb[4].mxu1 %v10466_v13  ;;  %v10583_v13 = vld [vmem:[%s10340_s11 + $0x7c] sm:$0xf]  ;;  %v10586_v55 = vcombine.low %v2502_v7, %v2505_v24  ;;  %v2522_v7 = vrot.slane %v10545_v54, 5  ;;  %8766 = vmatpush3.bf16.msra.mxu0 %v9707_v44 }
  0x77   : > { %12141 = vst [vmem:[#allocation54_spill] sm:$0xff] %v10566_v56  ;;  %8307 = vmatprep.mubr.bf16.mxu1 %v10490_v23  ;;  %12144 = vst [vmem:[#allocation57_spill] sm:$0xff] %v10583_v13  ;;  %8336 = vmatpush3.bf16.msra.mxu1 %v9710_v37  ;;  %v2512_v47 = vsel %vm10390_vm5, %v2510_v2, %v2511_v46  ;;  %v2525_v37 = vrot.slane %v10548_v32, 5  ;;  %v2516_v23 = vsel %vm10390_vm5, %v7231_v27, %v2515_v61  ;;  %v9715_v2 = vld [vmem:[%s11930_s3 + $0x158] sm:$0xff]   ;;  %v9718_v27 = vld [vmem:[%s11929_s2 + $0x60] sm:$0xff]  }
  0x78   : > { %12145 = vst [vmem:[#allocation58_spill] sm:$0xff] %v10586_v55  ;;  %8337 = vmatprep.subr.bf16.mxu1 %v9714_v63  ;;  %v10600_v24 = vcombine.low %v2509_v20, %v2512_v47  ;;  %v10609_v46 = vcombine.low %v10542_v30, %v10545_v54  ;;  %8767 = vmatprep.subr.bf16.mxu0 %v9711_v16  ;;  %v2524_v20 = vrot.slane %v2522_v7, 4  ;;  %v7233_v61 = vrot.slane %v10570_v62, 9 }
  0x79   : > { %v2523_v44 = vsel %vm10390_vm5, %v7232_v9, %v2522_v7  ;;  %v2529_v47 = vrot.slane %v10583_v13, 5  ;;  %v2519_v32 = vsel %vm10390_vm5, %v2517_v6, %v2518_v17  ;;  %v2532_v54 = vrot.slane %v305_v10, 5  ;;  %v309_v7 = vld [vmem:[%s10340_s11 + $0x90] sm:$0xf]  ;;  %8736 = vmatmul.mubr.bf16.gmra.mrb[4].mxu0 %v10533_v39  ;;  %v10638_v10 = vld [vmem:[%s11929_s2 + $0x68] sm:$0xff]  }
  0x7a   : > { %12147 = vst [vmem:[#allocation60_spill] sm:$0xff] %v10600_v24  ;;  %12148 = vst [vmem:[#allocation61_spill] sm:$0xff] %v10609_v46  ;;  %v10624_v30 = vcombine.low %v10570_v62, %v10583_v13  ;;  %v7234_v9 = vrot.slane %v306_v5, 9  ;;  %v10629_v53 = vcombine.low %v2516_v23, %v2519_v32  ;;  %v2526_v60 = vsel %vm10390_vm5, %v2524_v20, %v2525_v37  ;;  %v310_v17 = vld [vmem:[%s10340_s11 + $0x94] sm:$0xf] }
  0x7b   : > { %8338 = vmatpush3.bf16.msra.mxu1 %v9714_v63  ;;  %v2530_v6 = vsel %vm10390_vm5, %v7233_v61, %v2529_v47  ;;  %v2531_v63 = vrot.slane %v2529_v47, 4  ;;  %v311_v13 = vld [vmem:[%s10340_s11 + $0x98] sm:$0x1]  ;;  %8739 = vmatprep.mubr.bf16.mxu0 %v10573_v28  ;;  %v10643_v32 = vcombine.low %v2523_v44, %v2526_v60  ;;  %v2536_v23 = vrot.slane %v307_v59, 5  ;;  %v9719_v47 = vld [vmem:[%s11930_s3 + $0x160] sm:$0xff]  }
  0x7c   : > { %12149 = vst [vmem:[#allocation62_spill] sm:$0xff] %v10624_v30  ;;  %8768 = vmatpush3.bf16.msra.mxu0 %v9711_v16  ;;  %v2539_v37 = vrot.slane %v308_v36, 5  ;;  %v10645_v20 = vcombine.low %v306_v5, %v307_v59  ;;  %v7235_v28 = vrot.slane %v309_v7, 9  ;;  %v2543_v16 = vrot.slane %v310_v17, 5  ;;  %v312_v44 = vld [vmem:[%s10340_s11 + $0x9c] sm:$0xf]  ;;  %8339 = vmatprep.subr.bf16.mxu1 %v9718_v27 }
  0x7d   : > { %8769 = vmatprep.subr.bf16.mxu0 %v9715_v2  ;;  %v2533_v61 = vsel %vm10390_vm5, %v2531_v63, %v2532_v54  ;;  %v2546_v60 = vrot.slane %v311_v13, 5  ;;  %v2537_v36 = vsel %vm10390_vm5, %v7234_v9, %v2536_v23  ;;  %v2538_v59 = vrot.slane %v2536_v23, 4  ;;  %v314_v54 = vld [vmem:[%s10340_s11 + $0xa4] sm:$0x1] }
  0x7e   : > { %8308 = vmatmul.mubr.bf16.gmra.mrb[8].mxu1 %v10517_v14  ;;  %12150 = vst [vmem:[#allocation63_spill] sm:$0xff] %v10645_v20  ;;  %v10654_v39 = vcombine.low %v2530_v6, %v2533_v61  ;;  %v10658_v5 = vcombine.low %v309_v7, %v310_v17  ;;  %v2544_v63 = vsel %vm10390_vm5, %v7235_v28, %v2543_v16  ;;  %v2545_v14 = vrot.slane %v2543_v16, 4  ;;  %v315_v17 = vld [vmem:[%s10340_s11 + $0xa8] sm:$0xf]  ;;  %v316_v16 = vld [vmem:[%s10340_s11 + $0xac] sm:$0xf] }
  0x7f   : > { %8311 = vmatprep.mubr.bf16.mxu1 %v10539_v0  ;;  %v313_v0 = vld [vmem:[%s10340_s11 + $0xa0] sm:$0xf]  ;;  %8340 = vmatpush3.bf16.msra.mxu1 %v9718_v27  ;;  %v7236_v13 = vrot.slane %v312_v44, 9  ;;  %v2540_v6 = vsel %vm10390_vm5, %v2538_v59, %v2539_v37  ;;  %v2553_v9 = vrot.slane %v314_v54, 5  ;;  %v12153_v27 = vshrl.u32 %v10346_v50, 16  ;;  %v9723_v37 = vld [vmem:[%s11930_s3 + $0x168] sm:$0xff]  }
  0x80   : > { %12151 = vst [vmem:[#allocation64_spill] sm:$0xff] %v10658_v5  ;;  %v2550_v62 = vrot.slane %v313_v0, 5  ;;  %8770 = vmatpush3.bf16.msra.mxu0 %v9715_v2  ;;  %8341 = vmatprep.subr.bf16.mxu1 %v10638_v10  ;;  %v10667_v7 = vcombine.low %v312_v44, %v313_v0  ;;  %v10674_v28 = vcombine.low %v2537_v36, %v2540_v6  ;;  %v317_v44 = vld [vmem:[%s10340_s11 + $0xb0] sm:$0x1]  ;;  %v7237_v54 = vrot.slane %v315_v17, 9 }
  0x81   : > { %v10672_v23 = vrot.slane %v12153_v27, 4  ;;  %8771 = vmatprep.subr.bf16.mxu0 %v9719_v47  ;;  %v2547_v2 = vsel %vm10390_vm5, %v2545_v14, %v2546_v60  ;;  %v9726_v36 = vld [vmem:[%s11929_s2 + $0x70] sm:$0xff]   ;;  %v2557_v14 = vrot.slane %v316_v16, 5  ;;  %v2560_v60 = vrot.slane %v317_v44, 5  ;;  %8740 = vmatmul.mubr.bf16.gmra.mrb[8].mxu0 %v10586_v55 }
  0x82   : > { %12152 = vst [vmem:[#allocation65_spill] sm:$0xff] %v10667_v7  ;;  %v2551_v0 = vsel %vm10390_vm5, %v7236_v13, %v2550_v62  ;;  %v2552_v61 = vrot.slane %v2550_v62, 4  ;;  %v10685_v59 = vcombine.low %v2544_v63, %v2547_v2  ;;  %v10694_v62 = vcombine.low %v315_v17, %v316_v16  ;;  %v318_v6 = vld [vmem:[%s10340_s11 + $0xb4] sm:$0xf]  ;;  %v319_v63 = vld [vmem:[%s10340_s11 + $0xb8] sm:$0xf]  ;;  %8743 = vmatprep.mubr.bf16.mxu0 %v10600_v24 }
  0x83   : > { %v1057_v27 = vor.u32 %v10404_v35, %v10402_v51  ;;  %v2558_v44 = vsel %vm10390_vm5, %v7237_v54, %v2557_v14  ;;  %v2559_v55 = vrot.slane %v2557_v14, 4  ;;  %v320_v17 = vld [vmem:[%s10340_s11 + $0xbc] sm:$0x1]  ;;  %8342 = vmatpush3.bf16.msra.mxu1 %v10638_v10  ;;  %v2564_v51 = vrot.slane %v319_v63, 5  ;;  %v321_v54 = vld [vmem:[%s10340_s11 + $0xc0] sm:$0xf] }
  0x84   : > { %v2554_v13 = vsel %vm10390_vm5, %v2552_v61, %v2553_v9  ;;  %12154 = vst [vmem:[#allocation66_spill] sm:$0xff] %v10694_v62  ;;  %v9727_v9 = vld [vmem:[%s11930_s3 + $0x170] sm:$0xff]   ;;  %v7238_v61 = vrot.slane %v318_v6, 9  ;;  %v9730_v35 = vld [vmem:[%s11929_s2 + $0x78] sm:$0xff]   ;;  %8772 = vmatpush3.bf16.msra.mxu0 %v9719_v47  ;;  %v10714_v16 = vcombine.low %v318_v6, %v319_v63  ;;  %8343 = vmatprep.subr.bf16.mxu1 %v9726_v36  ;;  %v322_v24 = vld [vmem:[%s10340_s11 + $0xc4] sm:$0xf] }
  0x85   : > { %v10702_v2 = vcombine.low %v2551_v0, %v2554_v13  ;;  %v2567_v0 = vrot.slane %v320_v17, 5  ;;  %8773 = vmatprep.subr.bf16.mxu0 %v9723_v37  ;;  %v2561_v13 = vsel %vm10390_vm5, %v2559_v55, %v2560_v60  ;;  %v12156_v47 = vshll.u32 %v10346_v50, 16  ;;  %v9731_v55 = vld [vmem:[%s11930_s3 + $0x178] sm:$0xff]   ;;  %v275_v60 = vld [vmem:[%s10340_s11 + $0x8] sm:$0x1] }
  0x86   : > { %8312 = vmatmul.mubr.bf16.gmra.mrb[12].mxu1 %v10566_v56  ;;  %12155 = vst [vmem:[#allocation67_spill] sm:$0xff] %v10714_v16  ;;  %v7435_v56 = vrot.slane %v321_v54, 9  ;;  %v10727_v63 = vcombine.low %v2558_v44, %v2561_v13  ;;  %v2565_v17 = vsel %vm10390_vm5, %v7238_v61, %v2564_v51  ;;  %v2566_v14 = vrot.slane %v2564_v51, 4 }
  0x87   : > { %8315 = vmatprep.mubr.bf16.mxu1 %v10592_v45  ;;  %v323_v45 = vld [vmem:[%s10340_s11 + $0xc8] sm:$0x1]  ;;  %v1032_v10 = vrot.slane %v12156_v47, 5  ;;  %v4444_v25 = vrot.slane %v322_v24, 5  ;;  %v1036_v54 = vshll.u32 %v10352_v15, 16  ;;  %v12157_v47 = vshrl.u32 %v10352_v15, 16  ;;  %8344 = vmatpush3.bf16.msra.mxu1 %v9726_v36 }
  0x88   : > { %v4447_v26 = vrot.slane %v323_v45, 5  ;;  %8774 = vmatpush3.bf16.msra.mxu0 %v9723_v37  ;;  %v2568_v61 = vsel %vm10390_vm5, %v2566_v14, %v2567_v0  ;;  %v1046_v51 = vshll.u32 %v275_v60, 16  ;;  %8345 = vmatprep.subr.bf16.mxu1 %v9730_v35  ;;  %v9896_v15 = vld [vmem:[%s10056_s24 + $0xc] sm:$0xf]  ;;  %v10749_v37 = vld [vmem:[%s11930_s3 + $0x40] sm:$0xff]  }
  0x89   : > { %v1033_v50 = vor.u32 %v1032_v10, %v10672_v23  ;;  %v1042_v44 = vrot.slane %v12157_v47, 4  ;;  %v4445_v45 = vsel %vm10390_vm5, %v7435_v56, %v4444_v25  ;;  %v4446_v24 = vrot.slane %v4444_v25, 4  ;;  %8775 = vmatprep.subr.bf16.mxu0 %v9727_v9  ;;  %8744 = vmatmul.mubr.bf16.gmra.mrb[12].mxu0 %v10629_v53  ;;  %v9897_v36 = vld [vmem:[%s10056_s24 + $0x10] sm:$0xf]  ;;  %v9898_v14 = vld [vmem:[%s10056_s24 + $0x14] sm:$0x1] }
  0x8a   : > { %v10743_v13 = vcombine.low %v2565_v17, %v2568_v61  ;;  %v1038_v10 = vrot.slane %v1036_v54, 5  ;;  %v7240_v47 = vrot.slane %v9896_v15, 9  ;;  %v1048_v56 = vrot.slane %v1046_v51, 5  ;;  %8747 = vmatprep.mubr.bf16.mxu0 %v10643_v32 }
  0x8b   : > { %v1034_v23 = vrot.slane %v1033_v50, 4  ;;  %v4448_v25 = vsel %vm10390_vm5, %v4446_v24, %v4447_v26  ;;  %v2594_v0 = vrot.slane %v9897_v36, 5  ;;  %v2597_v17 = vrot.slane %v9898_v14, 5  ;;  %8346 = vmatpush3.bf16.msra.mxu1 %v9730_v35  ;;  %v9899_v36 = vld [vmem:[%s10056_s24 + $0x18] sm:$0xf] }
  0x8c   : > { %v10759_v60 = vcombine.low %v4445_v45, %v4448_v25  ;;  %v1043_v54 = vor.u32 %v1042_v44, %v1038_v10  ;;  %v1058_v61 = vrot.slane %v1057_v27, 4  ;;  %8776 = vmatpush3.bf16.msra.mxu0 %v9727_v9  ;;  %v12159_v51 = vshll.u32 %v10373_v8, 16  ;;  %v10771_v45 = vld [vmem:[%s11929_s2 + $0x180] sm:$0xff]   ;;  %8379 = vmatprep.subr.bf16.mxu1 %v10749_v37  ;;  %v9900_v27 = vld [vmem:[%s10056_s24 + $0x1c] sm:$0xf] }
  0x8d   : > { %v1039_v50 = vsel %vm10096_vm2, %v1034_v23, %v1038_v10  ;;  %v2595_v26 = vsel %vm10390_vm5, %v7240_v47, %v2594_v0  ;;  %v2596_v24 = vrot.slane %v2594_v0, 4  ;;  %v7241_v14 = vrot.slane %v9899_v36, 9  ;;  %8777 = vmatprep.subr.bf16.mxu0 %v9731_v55 }
  0x8e   : > { %8316 = vmatmul.mubr.bf16.gmra.mrb[16].mxu1 %v10609_v46  ;;  %12158 = vst [vmem:[#allocation68_spill] sm:$0xff] %v10759_v60  ;;  %v1062_v15 = vrot.slane %v12159_v51, 5  ;;  %v1044_v23 = vrot.slane %v1043_v54, 4  ;;  %v2601_v9 = vrot.slane %v9900_v27, 5  ;;  %v1075_v35 = vshrl.u32 %v10378_v57, 16 }
  0x8f   : > { %8319 = vmatprep.mubr.bf16.mxu1 %v10624_v30  ;;  %v1078_v44 = vshll.u32 %v10378_v57, 16  ;;  %v2598_v8 = vsel %vm10390_vm5, %v2596_v24, %v2597_v17  ;;  %v1084_v25 = vshll.u32 %v10381_v4, 16 }
  0x90   : > { %v1063_v10 = vsel %vm10096_vm2, %v1058_v61, %v1062_v15  ;;  %v1067_v47 = vor.u32 %v10412_v58, %v1062_v15  ;;  %v1049_v0 = vsel %vm10096_vm2, %v1044_v23, %v1048_v56  ;;  %v10785_v54 = vcombine.low %v2595_v26, %v2598_v8  ;;  %8778 = vmatpush3.bf16.msra.mxu0 %v9731_v55  ;;  %v9901_v23 = vld [vmem:[%s10056_s24 + $0x24] sm:$0xf] }
  0x91   : > { %v2602_v51 = vsel %vm10390_vm5, %v7241_v14, %v2601_v9  ;;  %v2603_v36 = vrot.slane %v2601_v9, 4  ;;  %v10789_v57 = vcombine.low %v1039_v50, %v1049_v0  ;;  %v1077_v24 = vrot.slane %v1075_v35, 4  ;;  %8811 = vmatprep.subr.bf16.mxu0 %v10771_v45  ;;  %8748 = vmatmul.mubr.bf16.gmra.mrb[16].mxu0 %v10654_v39  ;;  %v9902_v35 = vld [vmem:[%s10056_s24 + $0x28] sm:$0xf] }
  0x92   : > { %v1068_v17 = vrot.slane %v1067_v47, 4  ;;  %v1080_v61 = vrot.slane %v1078_v44, 5  ;;  %v12160_v58 = vrot.slane %v10089_v43, 5  ;;  %v1086_v56 = vrot.slane %v1084_v25, 5  ;;  %8751 = vmatprep.mubr.bf16.mxu0 %v10674_v28  ;;  %v9903_v47 = vld [vmem:[%s10056_s24 + $0x2c] sm:$0x1] }
  0x93   : > { %v1088_v26 = vshrl.u32 %v10381_v4, 16  ;;  %v1094_v14 = vshll.u32 %v10384_v11, 16  ;;  %v7242_v27 = vrot.slane %v9901_v23, 9  ;;  %v2608_v44 = vrot.slane %v9902_v35, 5 }
  0x94   : > { %v2605_v15 = vsel %vm10390_vm5, %v2603_v36, %v12160_v58  ;;  %v1073_v43 = vsel %vm10096_vm2, %v1068_v17, %v10414_v42  ;;  %v1081_v50 = vor.u32 %v1080_v61, %v1077_v24  ;;  %v2611_v25 = vrot.slane %v9903_v47, 5 }
  0x95   : > { %v10803_v55 = vcombine.low %v2602_v51, %v2605_v15  ;;  %v10808_v4 = vcombine.low %v1063_v10, %v1073_v43  ;;  %v1090_v11 = vrot.slane %v1088_v26, 4  ;;  %v1096_v9 = vrot.slane %v1094_v14, 5 }
  0x96   : > { %8320 = vmatmul.mubr.bf16.gmra.mrb[20].mxu1 %v10645_v20  ;;  %v1082_v8 = vrot.slane %v1081_v50, 4  ;;  %v1099_v42 = vshrl.u32 %v10395_v19, 16  ;;  %v1102_v0 = vshll.u32 %v10395_v19, 16  ;;  %v2609_v36 = vsel %vm10390_vm5, %v7242_v27, %v2608_v44 }
  0x97   : > { %8323 = vmatprep.mubr.bf16.mxu1 %v10658_v5  ;;  %12161 = vst [vmem:[#allocation69_spill] sm:$0xff] %v10808_v4  ;;  %v1091_v51 = vor.u32 %v1090_v11, %v1086_v56  ;;  %v2610_v17 = vrot.slane %v2608_v44, 4  ;;  %v1108_v10 = vshll.u32 %v10398_v41, 16  ;;  %v1112_v15 = vshrl.u32 %v10398_v41, 16  ;;  %v9904_v11 = vld [vmem:[%s10056_s24 + $0x30] sm:$0xf] }
  0x98   : > { %v1087_v24 = vsel %vm10096_vm2, %v1082_v8, %v1086_v56  ;;  %v1101_v61 = vrot.slane %v1099_v42, 4  ;;  %v1104_v58 = vrot.slane %v1102_v0, 5  ;;  %v1118_v43 = vshll.u32 %v10408_v38, 16  ;;  %v9905_v8 = vld [vmem:[%s10056_s24 + $0x34] sm:$0xf] }
  0x99   : > { %v1092_v26 = vrot.slane %v1091_v51, 4  ;;  %v2612_v19 = vsel %vm10390_vm5, %v2610_v17, %v2611_v25  ;;  %v1110_v14 = vrot.slane %v1108_v10, 5  ;;  %v1114_v27 = vrot.slane %v1112_v15, 4  ;;  %v9906_v41 = vld [vmem:[%s10056_s24 + $0x38] sm:$0x1]  ;;  %8752 = vmatmul.mubr.bf16.gmra.mrb[20].mxu0 %v10685_v59 }
  0x9a   : > { %v10823_v50 = vcombine.low %v2609_v36, %v2612_v19  ;;  %v1105_v23 = vor.u32 %v1104_v58, %v1101_v61  ;;  %v7243_v35 = vrot.slane %v9904_v11, 9  ;;  %v1120_v44 = vrot.slane %v1118_v43, 5  ;;  %8755 = vmatprep.mubr.bf16.mxu0 %v10702_v2 }
  0x9b   : > { %v1097_v56 = vsel %vm10096_vm2, %v1092_v26, %v1096_v9  ;;  %v2615_v47 = vrot.slane %v9905_v8, 5  ;;  %v2618_v42 = vrot.slane %v9906_v41, 5  ;;  %v1115_v0 = vor.u32 %v1114_v27, %v1110_v14 }
  0x9c   : > { %v10832_v25 = vcombine.low %v1087_v24, %v1097_v56  ;;  %v1106_v38 = vrot.slane %v1105_v23, 4  ;;  %v1123_v51 = vshrl.u32 %v10417_v31, 16  ;;  %v1126_v17 = vshll.u32 %v10417_v31, 16 }
  0x9d   : > { %v2616_v9 = vsel %vm10390_vm5, %v7243_v35, %v2615_v47  ;;  %v2617_v36 = vrot.slane %v2615_v47, 4  ;;  %v1132_v10 = vshll.u32 %v10420_v40, 16  ;;  %v1116_v61 = vrot.slane %v1115_v0, 4  ;;  %v9908_v47 = vld [vmem:[%s10056_s24 + $0x40] sm:$0xf] }
  0x9e   : > { %8324 = vmatmul.mubr.bf16.gmra.mrb[24].mxu1 %v10667_v7  ;;  %v1111_v24 = vsel %vm10096_vm2, %v1106_v38, %v1110_v14  ;;  %v1125_v58 = vrot.slane %v1123_v51, 4  ;;  %v1136_v15 = vshrl.u32 %v10420_v40, 16  ;;  %v1128_v19 = vrot.slane %v1126_v17, 5  ;;  %v9907_v14 = vld [vmem:[%s10056_s24 + $0x3c] sm:$0xf] }
  0x9f   : > { %8327 = vmatprep.mubr.bf16.mxu1 %v10694_v62  ;;  %v2619_v26 = vsel %vm10390_vm5, %v2617_v36, %v2618_v42  ;;  %v1134_v43 = vrot.slane %v1132_v10, 5  ;;  %v1142_v23 = vshll.u32 %v10433_v52, 16  ;;  %v1121_v31 = vsel %vm10096_vm2, %v1116_v61, %v1120_v44  ;;  %v9909_v42 = vld [vmem:[%s10056_s24 + $0x44] sm:$0x1] }
  0xa0   : > { %v10849_v27 = vcombine.low %v2616_v9, %v2619_v26  ;;  %v1138_v11 = vrot.slane %v1136_v15, 4  ;;  %v7244_v35 = vrot.slane %v9907_v14, 9  ;;  %v10852_v56 = vcombine.low %v1111_v24, %v1121_v31 }
  0xa1   : > { %v1129_v8 = vor.u32 %v1128_v19, %v1125_v58  ;;  %v1144_v40 = vrot.slane %v1142_v23, 5  ;;  %v2622_v41 = vrot.slane %v9908_v47, 5  ;;  %v2625_v0 = vrot.slane %v9909_v42, 5  ;;  %8756 = vmatmul.mubr.bf16.gmra.mrb[24].mxu0 %v10727_v63  ;;  %v9912_v42 = vld [vmem:[%s10056_s24 + $0x50] sm:$0x1] }
  0xa2   : > { %12162 = vst [vmem:[#allocation70_spill] sm:$0xff] %v10849_v27  ;;  %12163 = vst [vmem:[#allocation71_spill] sm:$0xff] %v10852_v56  ;;  %v1139_v38 = vor.u32 %v1138_v11, %v1134_v43  ;;  %v1147_v51 = vshrl.u32 %v10436_v1, 16  ;;  %v1150_v52 = vshll.u32 %v10436_v1, 16  ;;  %v1156_v17 = vshll.u32 %v10453_v49, 16  ;;  %8759 = vmatprep.mubr.bf16.mxu0 %v10743_v13 }
  0xa3   : > { %v1130_v36 = vrot.slane %v1129_v8, 4  ;;  %v2623_v44 = vsel %vm10390_vm5, %v7244_v35, %v2622_v41  ;;  %v2624_v9 = vrot.slane %v2622_v41, 4  ;;  %v1160_v58 = vshrl.u32 %v10453_v49, 16  ;;  %v9910_v35 = vld [vmem:[%s10056_s24 + $0x48] sm:$0xf] }
  0xa4   : > { %v1140_v10 = vrot.slane %v1139_v38, 4  ;;  %v1149_v24 = vrot.slane %v1147_v51, 4  ;;  %v1152_v61 = vrot.slane %v1150_v52, 5  ;;  %v1158_v26 = vrot.slane %v1156_v17, 5 }
  0xa5   : > { %v1135_v1 = vsel %vm10096_vm2, %v1130_v36, %v1134_v43  ;;  %v2626_v15 = vsel %vm10390_vm5, %v2624_v9, %v2625_v0  ;;  %v1166_v19 = vshll.u32 %v10456_v12, 16  ;;  %v1162_v11 = vrot.slane %v1160_v58, 4  ;;  %v9911_v43 = vld [vmem:[%s10056_s24 + $0x4c] sm:$0xf] }
  0xa6   : > { %8328 = vmatmul.mubr.bf16.gmra.mrb[28].mxu1 %v10714_v16  ;;  %v1145_v23 = vsel %vm10096_vm2, %v1140_v10, %v1144_v40  ;;  %v10873_v31 = vcombine.low %v2623_v44, %v2626_v15  ;;  %v1153_v49 = vor.u32 %v1152_v61, %v1149_v24  ;;  %v7245_v8 = vrot.slane %v9910_v35, 9  ;;  %v9734_v44 = vld [vmem:[%s11930_s3 + $0x48] sm:$0xff]   ;;  %v9914_v35 = vld [vmem:[%s10056_s24 + $0x58] sm:$0xf] }
  0xa7   : > { %8347 = vmatprep.mubr.bf16.mxu1 %v10789_v57  ;;  %v10875_v14 = vcombine.low %v1135_v1, %v1145_v23  ;;  %v1168_v57 = vrot.slane %v1166_v19, 5  ;;  %v2629_v47 = vrot.slane %v9911_v43, 5  ;;  %v1163_v38 = vor.u32 %v1162_v11, %v1158_v26 }
  0xa8   : > { %12164 = vst [vmem:[#allocation72_spill] sm:$0xff] %v10873_v31  ;;  %v1154_v41 = vrot.slane %v1153_v49, 4  ;;  %v2632_v0 = vrot.slane %v9912_v42, 5  ;;  %v1171_v12 = vshrl.u32 %v10469_v21, 16  ;;  %v1174_v52 = vshll.u32 %v10469_v21, 16 }
  0xa9   : > { %12165 = vst [vmem:[#allocation73_spill] sm:$0xff] %v10875_v14  ;;  %v2630_v40 = vsel %vm10390_vm5, %v7245_v8, %v2629_v47  ;;  %v2631_v51 = vrot.slane %v2629_v47, 4  ;;  %v1180_v36 = vshll.u32 %v10472_v3, 16  ;;  %v1164_v17 = vrot.slane %v1163_v38, 4  ;;  %8760 = vmatmul.mubr.bf16.gmra.mrb[28].mxu0 %v10759_v60  ;;  %v9915_v47 = vld [vmem:[%s10056_s24 + $0x5c] sm:$0x1] }
  0xaa   : > { %v1159_v9 = vsel %vm10096_vm2, %v1154_v41, %v1158_v26  ;;  %v1173_v10 = vrot.slane %v1171_v12, 4  ;;  %v1184_v24 = vshrl.u32 %v10472_v3, 16  ;;  %v1176_v58 = vrot.slane %v1174_v52, 5  ;;  %v9913_v3 = vld [vmem:[%s10056_s24 + $0x54] sm:$0xf]  ;;  %8779 = vmatprep.mubr.bf16.mxu0 %v10785_v54 }
  0xab   : > { %v2633_v61 = vsel %vm10390_vm5, %v2631_v51, %v2632_v0  ;;  %v1182_v21 = vrot.slane %v1180_v36, 5  ;;  %v1190_v1 = vshll.u32 %v10475_v18, 16  ;;  %v1169_v15 = vsel %vm10096_vm2, %v1164_v17, %v1168_v57  ;;  %v9736_v57 = vld [vmem:[%s11930_s3 + $0x50] sm:$0xff]  }
  0xac   : > { %v10898_v26 = vcombine.low %v2630_v40, %v2633_v61  ;;  %v1186_v19 = vrot.slane %v1184_v24, 4  ;;  %v7246_v23 = vrot.slane %v9913_v3, 9  ;;  %v10903_v49 = vcombine.low %v1159_v9, %v1169_v15  ;;  %v12168_v40 = vld [vmem:[#allocation41_spill] sm:$0xff]  ;;  %v12169_v61 = vld [vmem:[#allocation43_spill] sm:$0xff] }
  0xad   : > { %v1177_v18 = vor.u32 %v1176_v58, %v1173_v10  ;;  %v1192_v11 = vrot.slane %v1190_v1, 5  ;;  %v2636_v8 = vrot.slane %v9914_v35, 5  ;;  %v2639_v41 = vrot.slane %v9915_v47, 5  ;;  %v9735_v1 = vld [vmem:[%s11929_s2 + $0x188] sm:$0xff]  }
  0xae   : > { %8348 = vmatmul.mubr.bf16.vlgmr.msra.gmra.mrb[0].mxu1 %v10808_v4  ;;  %12166 = vst [vmem:[#allocation74_spill] sm:$0xff] %v10898_v26  ;;  %12167 = vst [vmem:[#allocation75_spill] sm:$0xff] %v10903_v49  ;;  %v1187_v43 = vor.u32 %v1186_v19, %v1182_v21  ;;  %v1195_v38 = vshrl.u32 %v10494_v22, 16  ;;  %v1204_v51 = vshll.u32 %v12168_v40, 16  ;;  %v1208_v17 = vshrl.u32 %v12168_v40, 16 }
  0xaf   : > { %8380 = vmatpush3.bf16.msra.mxu1 %v10749_v37  ;;  %8351 = vmatprep.mubr.bf16.mxu1 %v10832_v25  ;;  %v1198_v37 = vshll.u32 %v10494_v22, 16  ;;  %v1178_v42 = vrot.slane %v1177_v18, 4  ;;  %v2637_v0 = vsel %vm10390_vm5, %v7246_v23, %v2636_v8  ;;  %v2638_v12 = vrot.slane %v2636_v8, 4  ;;  %v9916_v18 = vld [vmem:[%s10056_s24 + $0x60] sm:$0xf] }
  0xb0   : > { %8381 = vmatprep.subr.bf16.mxu1 %v9734_v44  ;;  %v1188_v52 = vrot.slane %v1187_v43, 4  ;;  %v1197_v36 = vrot.slane %v1195_v38, 4  ;;  %v1206_v24 = vrot.slane %v1204_v51, 5  ;;  %v1214_v58 = vshll.u32 %v12169_v61, 16  ;;  %v9917_v8 = vld [vmem:[%s10056_s24 + $0x64] sm:$0xf] }
  0xb1   : > { %v1200_v9 = vrot.slane %v1198_v37, 5  ;;  %v1183_v10 = vsel %vm10096_vm2, %v1178_v42, %v1182_v21  ;;  %v2640_v22 = vsel %vm10390_vm5, %v2638_v12, %v2639_v41  ;;  %v1210_v3 = vrot.slane %v1208_v17, 4  ;;  %8780 = vmatmul.mubr.bf16.vlgmr.msra.gmra.mrb[0].mxu0 %v10803_v55  ;;  %v9918_v38 = vld [vmem:[%s10056_s24 + $0x68] sm:$0x1]  ;;  %v12172_v42 = vld [vmem:[#allocation44_spill] sm:$0xff] }
  0xb2   : > { %v1193_v15 = vsel %vm10096_vm2, %v1188_v52, %v1192_v11  ;;  %v10927_v19 = vcombine.low %v2637_v0, %v2640_v22  ;;  %v1216_v23 = vrot.slane %v1214_v58, 5  ;;  %v7247_v35 = vrot.slane %v9916_v18, 9  ;;  %v9738_v11 = vld [vmem:[%s11930_s3 + $0x58] sm:$0xff]   ;;  %8812 = vmatpush3.bf16.msra.mxu0 %v10771_v45  ;;  %8783 = vmatprep.mubr.bf16.mxu0 %v10823_v50  ;;  %v12173_v52 = vld [vmem:[#allocation47_spill] sm:$0xff] }
  0xb3   : > { %8382 = vmatpush3.bf16.msra.mxu1 %v9734_v44  ;;  %v1201_v44 = vor.u32 %v1200_v9, %v1197_v36  ;;  %v10929_v21 = vcombine.low %v1183_v10, %v1193_v15  ;;  %v2643_v43 = vrot.slane %v9917_v8, 5  ;;  %v1211_v41 = vor.u32 %v1210_v3, %v1206_v24  ;;  %8813 = vmatprep.subr.bf16.mxu0 %v9735_v1  ;;  %v9737_v9 = vld [vmem:[%s11929_s2 + $0x190] sm:$0xff]   ;;  %v9919_v8 = vld [vmem:[%s10056_s24 + $0x6c] sm:$0xf] }
  0xb4   : > { %8383 = vmatprep.subr.bf16.mxu1 %v9736_v57  ;;  %12170 = vst [vmem:[#allocation41_spill] sm:$0xff] %v10927_v19  ;;  %v2646_v37 = vrot.slane %v9918_v38, 5  ;;  %v1219_v0 = vshrl.u32 %v12172_v42, 16  ;;  %v1222_v51 = vshll.u32 %v12172_v42, 16  ;;  %v1228_v36 = vshll.u32 %v12173_v52, 16 }
  0xb5   : > { %12171 = vst [vmem:[#allocation43_spill] sm:$0xff] %v10929_v21  ;;  %v1202_v47 = vrot.slane %v1201_v44, 4  ;;  %v2644_v12 = vsel %vm10390_vm5, %v7247_v35, %v2643_v43  ;;  %v2645_v40 = vrot.slane %v2643_v43, 4  ;;  %v1212_v17 = vrot.slane %v1211_v41, 4  ;;  %v12174_v44 = vld [vmem:[#allocation48_spill] sm:$0xff] }
  0xb6   : > { %8352 = vmatmul.mubr.bf16.gmra.mrb[4].mxu1 %v10852_v56  ;;  %v1221_v10 = vrot.slane %v1219_v0, 4  ;;  %v1232_v22 = vshrl.u32 %v12173_v52, 16  ;;  %v1224_v58 = vrot.slane %v1222_v51, 5  ;;  %v1230_v15 = vrot.slane %v1228_v36, 5  ;;  %8814 = vmatpush3.bf16.msra.mxu0 %v9735_v1  ;;  %v9740_v1 = vld [vmem:[%s11930_s3 + $0x60] sm:$0xff]  }
  0xb7   : > { %8355 = vmatprep.mubr.bf16.mxu1 %v10875_v14  ;;  %v1207_v45 = vsel %vm10096_vm2, %v1202_v47, %v1206_v24  ;;  %8384 = vmatpush3.bf16.msra.mxu1 %v9736_v57  ;;  %v2647_v61 = vsel %vm10390_vm5, %v2645_v40, %v2646_v37  ;;  %v1238_v3 = vshll.u32 %v12174_v44, 16  ;;  %v1217_v18 = vsel %vm10096_vm2, %v1212_v17, %v1216_v23  ;;  %v9739_v47 = vld [vmem:[%s11929_s2 + $0x198] sm:$0xff]   ;;  %v9920_v37 = vld [vmem:[%s10056_s24 + $0x70] sm:$0xf]  ;;  %v9921_v23 = vld [vmem:[%s10056_s24 + $0x74] sm:$0x1] }
  0xb8   : > { %8385 = vmatprep.subr.bf16.mxu1 %v9738_v11  ;;  %v10958_v35 = vcombine.low %v2644_v12, %v2647_v61  ;;  %v1234_v24 = vrot.slane %v1232_v22, 4  ;;  %v7248_v43 = vrot.slane %v9919_v8, 9  ;;  %v10961_v57 = vcombine.low %v1207_v45, %v1217_v18  ;;  %8815 = vmatprep.subr.bf16.mxu0 %v9737_v9  ;;  %v12177_v12 = vld [vmem:[#allocation51_spill] sm:$0xff] }
  0xb9   : > { %v1225_v41 = vor.u32 %v1224_v58, %v1221_v10  ;;  %v1240_v38 = vrot.slane %v1238_v3, 5  ;;  %v2650_v42 = vrot.slane %v9920_v37, 5  ;;  %v2653_v40 = vrot.slane %v9921_v23, 5  ;;  %v12178_v10 = vld [vmem:[#allocation52_spill] sm:$0xff]  ;;  %v10979_v61 = vld [vmem:[%s11930_s3 + $0x68] sm:$0xff]   ;;  %8784 = vmatmul.mubr.bf16.gmra.mrb[4].mxu0 %v10849_v27 }
  0xba   : > { %12175 = vst [vmem:[#allocation44_spill] sm:$0xff] %v10958_v35  ;;  %12176 = vst [vmem:[#allocation47_spill] sm:$0xff] %v10961_v57  ;;  %v1235_v0 = vor.u32 %v1234_v24, %v1230_v15  ;;  %v1243_v51 = vshrl.u32 %v12177_v12, 16  ;;  %v1246_v52 = vshll.u32 %v12177_v12, 16  ;;  %v1252_v22 = vshll.u32 %v12178_v10, 16  ;;  %8787 = vmatprep.mubr.bf16.mxu0 %v10873_v31  ;;  %8816 = vmatpush3.bf16.msra.mxu0 %v9737_v9 }
  0xbb   : > { %8386 = vmatpush3.bf16.msra.mxu1 %v9738_v11  ;;  %v1226_v36 = vrot.slane %v1225_v41, 4  ;;  %v2651_v45 = vsel %vm10390_vm5, %v7248_v43, %v2650_v42  ;;  %v2652_v17 = vrot.slane %v2650_v42, 4  ;;  %v1256_v11 = vshrl.u32 %v12178_v10, 16  ;;  %v12179_v43 = vld [vmem:[#allocation53_spill] sm:$0xff]  ;;  %8817 = vmatprep.subr.bf16.mxu0 %v9739_v47 }
  0xbc   : > { %v1236_v58 = vrot.slane %v1235_v0, 4  ;;  %v1245_v44 = vrot.slane %v1243_v51, 4  ;;  %v1248_v3 = vrot.slane %v1246_v52, 5  ;;  %v1254_v8 = vrot.slane %v1252_v22, 5  ;;  %8387 = vmatprep.subr.bf16.mxu1 %v9740_v1  ;;  %v9922_v12 = vld [vmem:[%s10056_s24 + $0x78] sm:$0xf] }
  0xbd   : > { %v1231_v18 = vsel %vm10096_vm2, %v1226_v36, %v1230_v15  ;;  %v2654_v24 = vsel %vm10390_vm5, %v2652_v17, %v2653_v40  ;;  %v1262_v41 = vshll.u32 %v12179_v43, 16  ;;  %v1258_v0 = vrot.slane %v1256_v11, 4  ;;  %v9741_v15 = vld [vmem:[%s11929_s2 + $0x1a0] sm:$0xff]   ;;  %v9923_v52 = vld [vmem:[%s10056_s24 + $0x7c] sm:$0xf] }
  0xbe   : > { %8356 = vmatmul.mubr.bf16.gmra.mrb[8].mxu1 %v10903_v49  ;;  %v1241_v37 = vsel %vm10096_vm2, %v1236_v58, %v1240_v38  ;;  %v10993_v42 = vcombine.low %v2651_v45, %v2654_v24  ;;  %v1249_v9 = vor.u32 %v1248_v3, %v1245_v44  ;;  %v7249_v51 = vrot.slane %v9922_v12, 9  ;;  %v9924_v22 = vld [vmem:[%s10056_s24 + $0x80] sm:$0x1]  ;;  %v12182_v45 = vld [vmem:[#allocation55_spill] sm:$0xff]  ;;  %8818 = vmatpush3.bf16.msra.mxu0 %v9739_v47 }
  0xbf   : > { %8359 = vmatprep.mubr.bf16.mxu1 %v10929_v21  ;;  %v10998_v23 = vcombine.low %v1231_v18, %v1241_v37  ;;  %v1264_v40 = vrot.slane %v1262_v41, 5  ;;  %v2657_v36 = vrot.slane %v9923_v52, 5  ;;  %v1259_v10 = vor.u32 %v1258_v0, %v1254_v8  ;;  %8388 = vmatpush3.bf16.msra.mxu1 %v9740_v1  ;;  %v12183_v18 = vld [vmem:[#allocation57_spill] sm:$0xff]  ;;  %v9743_v47 = vld [vmem:[%s11929_s2 + $0x1a8] sm:$0xff]  }
  0xc0   : > { %12180 = vst [vmem:[#allocation48_spill] sm:$0xff] %v10993_v42  ;;  %v1250_v17 = vrot.slane %v1249_v9, 4  ;;  %v2660_v38 = vrot.slane %v9924_v22, 5  ;;  %v1267_v58 = vshrl.u32 %v12182_v45, 16  ;;  %v1270_v11 = vshll.u32 %v12182_v45, 16  ;;  %8389 = vmatprep.subr.bf16.mxu1 %v10979_v61  ;;  %8819 = vmatprep.subr.bf16.mxu0 %v9741_v15 }
  0xc1   : > { %12181 = vst [vmem:[#allocation51_spill] sm:$0xff] %v10998_v23  ;;  %v2658_v44 = vsel %vm10390_vm5, %v7249_v51, %v2657_v36  ;;  %v2659_v3 = vrot.slane %v2657_v36, 4  ;;  %v1276_v24 = vshll.u32 %v12183_v18, 16  ;;  %v1260_v41 = vrot.slane %v1259_v10, 4  ;;  %v9925_v51 = vld [vmem:[%s10340_s11 + $0x80] sm:$0x1]  ;;  %8788 = vmatmul.mubr.bf16.gmra.mrb[8].mxu0 %v10898_v26 }
  0xc2   : > { %v1255_v43 = vsel %vm10096_vm2, %v1250_v17, %v1254_v8  ;;  %v1269_v1 = vrot.slane %v1267_v58, 4  ;;  %v1280_v37 = vshrl.u32 %v12183_v18, 16  ;;  %v1272_v0 = vrot.slane %v1270_v11, 5  ;;  %v9744_v8 = vld [vmem:[%s11930_s3 + $0x70] sm:$0xff]   ;;  %v9926_v22 = vld [vmem:[%s10056_s24 + $0x84] sm:$0xf]  ;;  %8791 = vmatprep.mubr.bf16.mxu0 %v10927_v19  ;;  %8820 = vmatpush3.bf16.msra.mxu0 %v9741_v15 }
  0xc3   : > { %v2661_v9 = vsel %vm10390_vm5, %v2659_v3, %v2660_v38  ;;  %v1278_v12 = vrot.slane %v1276_v24, 5  ;;  %v1286_v52 = vshll.u32 %v9925_v51, 16  ;;  %v1265_v36 = vsel %vm10096_vm2, %v1260_v41, %v1264_v40  ;;  %v9927_v11 = vld [vmem:[%s10056_s24 + $0x88] sm:$0xf]  ;;  %v9928_v40 = vld [vmem:[%s10056_s24 + $0x8c] sm:$0x1]  ;;  %8390 = vmatpush3.bf16.msra.mxu1 %v10979_v61  ;;  %8821 = vmatprep.subr.bf16.mxu0 %v9743_v47 }
  0xc4   : > { %v11025_v17 = vcombine.low %v2658_v44, %v2661_v9  ;;  %v1282_v10 = vrot.slane %v1280_v37, 4  ;;  %v7250_v38 = vrot.slane %v9926_v22, 9  ;;  %v11030_v45 = vcombine.low %v1255_v43, %v1265_v36  ;;  %v9929_v44 = vld [vmem:[%s10340_s11 + $0x84] sm:$0xf]  ;;  %v9745_v51 = vld [vmem:[%s11929_s2 + $0x1b0] sm:$0xff]   ;;  %8391 = vmatprep.subr.bf16.mxu1 %v9744_v8  ;;  %v9746_v36 = vld [vmem:[%s11930_s3 + $0x78] sm:$0xff]  }
  0xc5   : > { %v1273_v58 = vor.u32 %v1272_v0, %v1269_v1  ;;  %v1288_v3 = vrot.slane %v1286_v52, 5  ;;  %v2664_v18 = vrot.slane %v9927_v11, 5  ;;  %v2667_v41 = vrot.slane %v9928_v40, 5  ;;  %v9930_v52 = vld [vmem:[%s10340_s11 + $0x88] sm:$0xf] }
  0xc6   : > { %8360 = vmatmul.mubr.bf16.gmra.mrb[12].mxu1 %v10961_v57  ;;  %12184 = vst [vmem:[#allocation52_spill] sm:$0xff] %v11025_v17  ;;  %12185 = vst [vmem:[#allocation53_spill] sm:$0xff] %v11030_v45  ;;  %v1283_v24 = vor.u32 %v1282_v10, %v1278_v12  ;;  %v1291_v9 = vshrl.u32 %v9929_v44, 16  ;;  %v1294_v37 = vshll.u32 %v9929_v44, 16  ;;  %v1300_v15 = vshll.u32 %v9930_v52, 16  ;;  %8822 = vmatpush3.bf16.msra.mxu0 %v9743_v47  ;;  %v11064_v47 = vld [vmem:[%s11929_s2 + $0x80] sm:$0xff]  }
  0xc7   : > { %8363 = vmatprep.mubr.bf16.mxu1 %v10998_v23  ;;  %v1274_v43 = vrot.slane %v1273_v58, 4  ;;  %v2665_v1 = vsel %vm10390_vm5, %v7250_v38, %v2664_v18  ;;  %v2666_v0 = vrot.slane %v2664_v18, 4  ;;  %v1304_v11 = vshrl.u32 %v9930_v52, 16  ;;  %v9931_v40 = vld [vmem:[%s10340_s11 + $0x8c] sm:$0x1]  ;;  %8392 = vmatpush3.bf16.msra.mxu1 %v9744_v8 }
  0xc8   : > { %v1284_v10 = vrot.slane %v1283_v24, 4  ;;  %v1293_v61 = vrot.slane %v1291_v9, 4  ;;  %v1296_v22 = vrot.slane %v1294_v37, 5  ;;  %v1302_v18 = vrot.slane %v1300_v15, 5  ;;  %v9933_v52 = vld [vmem:[%s10056_s24 + $0x94] sm:$0xf]  ;;  %8823 = vmatprep.subr.bf16.mxu0 %v9745_v51  ;;  %8393 = vmatprep.subr.bf16.mxu1 %v9746_v36 }
  0xc9   : > { %v1279_v58 = vsel %vm10096_vm2, %v1274_v43, %v1278_v12  ;;  %v2668_v38 = vsel %vm10390_vm5, %v2666_v0, %v2667_v41  ;;  %v1310_v44 = vshll.u32 %v9931_v40, 16  ;;  %v1306_v9 = vrot.slane %v1304_v11, 4  ;;  %v9747_v12 = vld [vmem:[%s11929_s2 + $0x1b8] sm:$0xff]   ;;  %v9932_v43 = vld [vmem:[%s10056_s24 + $0x90] sm:$0xf]  ;;  %8792 = vmatmul.mubr.bf16.gmra.mrb[12].mxu0 %v10958_v35 }
  0xca   : > { %v1289_v6 = vsel %vm10096_vm2, %v1284_v10, %v1288_v3  ;;  %v11052_v4 = vcombine.low %v2665_v1, %v2668_v38  ;;  %v1297_v24 = vor.u32 %v1296_v22, %v1293_v61  ;;  %v7251_v0 = vrot.slane %v9932_v43, 9  ;;  %v9934_v3 = vld [vmem:[%s10056_s24 + $0x98] sm:$0x1]  ;;  %v9935_v10 = vld [vmem:[%s10340_s11 + $0x90] sm:$0xf]  ;;  %8795 = vmatprep.mubr.bf16.mxu0 %v10993_v42  ;;  %8824 = vmatpush3.bf16.msra.mxu0 %v9745_v51 }
  0xcb   : > { %v11057_v37 = vcombine.low %v1279_v58, %v1289_v6  ;;  %v1312_v41 = vrot.slane %v1310_v44, 5  ;;  %v2671_v15 = vrot.slane %v9933_v52, 5  ;;  %v1307_v6 = vor.u32 %v1306_v9, %v1302_v18  ;;  %v9936_v38 = vld [vmem:[%s10340_s11 + $0x94] sm:$0xf]  ;;  %8394 = vmatpush3.bf16.msra.mxu1 %v9746_v36  ;;  %8825 = vmatprep.subr.bf16.mxu0 %v9747_v12 }
  0xcc   : > { %12186 = vst [vmem:[#allocation55_spill] sm:$0xff] %v11052_v4  ;;  %v1298_v8 = vrot.slane %v1297_v24, 4  ;;  %v2674_v1 = vrot.slane %v9934_v3, 5  ;;  %v1315_v61 = vshrl.u32 %v9935_v10, 16  ;;  %v1318_v58 = vshll.u32 %v9935_v10, 16  ;;  %8427 = vmatprep.subr.bf16.mxu1 %v11064_v47 }
  0xcd   : > { %12187 = vst [vmem:[#allocation57_spill] sm:$0xff] %v11057_v37  ;;  %v2672_v22 = vsel %vm10390_vm5, %v7251_v0, %v2671_v15  ;;  %v2673_v11 = vrot.slane %v2671_v15, 4  ;;  %v1324_v40 = vshll.u32 %v9936_v38, 16  ;;  %v1308_v24 = vrot.slane %v1307_v6, 4  ;;  %v9937_v0 = vld [vmem:[%s10340_s11 + $0x98] sm:$0x1] }
  0xce   : > { %8364 = vmatmul.mubr.bf16.gmra.mrb[16].mxu1 %v11030_v45  ;;  %v1303_v44 = vsel %vm10096_vm2, %v1298_v8, %v1302_v18  ;;  %v1317_v9 = vrot.slane %v1315_v61, 4  ;;  %v1328_v43 = vshrl.u32 %v9936_v38, 16  ;;  %v1320_v3 = vrot.slane %v1318_v58, 5  ;;  %v11084_v18 = vld [vmem:[%s11930_s3 + $0x180] sm:$0xff]   ;;  %v9938_v6 = vld [vmem:[%s10056_s24 + $0x9c] sm:$0xf]  ;;  %8826 = vmatpush3.bf16.msra.mxu0 %v9747_v12 }
  0xcf   : > { %8367 = vmatprep.mubr.bf16.mxu1 %v11057_v37  ;;  %v2675_v52 = vsel %vm10390_vm5, %v2673_v11, %v2674_v1  ;;  %v1326_v60 = vrot.slane %v1324_v40, 5  ;;  %v1334_v15 = vshll.u32 %v9937_v0, 16  ;;  %v1313_v51 = vsel %vm10096_vm2, %v1308_v24, %v1312_v41  ;;  %v9939_v58 = vld [vmem:[%s10056_s24 + $0xa0] sm:$0xf]  ;;  %v9940_v0 = vld [vmem:[%s10056_s24 + $0xa4] sm:$0x1]  ;;  %8859 = vmatprep.subr.bf16.mxu0 %v11084_v18 }
  0xd0   : > { %v11088_v36 = vcombine.low %v2672_v22, %v2675_v52  ;;  %v1330_v8 = vrot.slane %v1328_v43, 4  ;;  %v7252_v1 = vrot.slane %v9938_v6, 9  ;;  %v11091_v10 = vcombine.low %v1303_v44, %v1313_v51  ;;  %v9941_v37 = vld [vmem:[%s10340_s11 + $0x9c] sm:$0xf]  ;;  %v9942_v43 = vld [vmem:[%s10340_s11 + $0xa0] sm:$0xf] }
  0xd1   : > { %v1321_v61 = vor.u32 %v1320_v3, %v1317_v9  ;;  %v1336_v11 = vrot.slane %v1334_v15, 5  ;;  %v2678_v38 = vrot.slane %v9939_v58, 5  ;;  %v2681_v42 = vrot.slane %v9940_v0, 5  ;;  %8796 = vmatmul.mubr.bf16.gmra.mrb[16].mxu0 %v11025_v17  ;;  %v9945_v0 = vld [vmem:[%s10056_s24 + $0xac] sm:$0xf] }
  0xd2   : > { %12188 = vst [vmem:[#allocation76_spill] sm:$0xff] %v11088_v36  ;;  %12189 = vst [vmem:[#allocation77_spill] sm:$0xff] %v11091_v10  ;;  %v1331_v40 = vor.u32 %v1330_v8, %v1326_v60  ;;  %v1339_v35 = vshrl.u32 %v9941_v37, 16  ;;  %v1342_v45 = vshll.u32 %v9941_v37, 16  ;;  %v1348_v44 = vshll.u32 %v9942_v43, 16  ;;  %8799 = vmatprep.mubr.bf16.mxu0 %v11052_v4 }
  0xd3   : > { %v1322_v41 = vrot.slane %v1321_v61, 4  ;;  %v2679_v22 = vsel %vm10390_vm5, %v7252_v1, %v2678_v38  ;;  %v2680_v24 = vrot.slane %v2678_v38, 4  ;;  %v1352_v12 = vshrl.u32 %v9942_v43, 16  ;;  %v9943_v8 = vld [vmem:[%s10340_s11 + $0xa4] sm:$0x1] }
  0xd4   : > { %v1332_v9 = vrot.slane %v1331_v40, 4  ;;  %v1341_v52 = vrot.slane %v1339_v35, 4  ;;  %v1344_v3 = vrot.slane %v1342_v45, 5  ;;  %v1350_v51 = vrot.slane %v1348_v44, 5  ;;  %v9946_v43 = vld [vmem:[%s10056_s24 + $0xb0] sm:$0x1] }
  0xd5   : > { %v1327_v37 = vsel %vm10096_vm2, %v1322_v41, %v1326_v60  ;;  %v2682_v15 = vsel %vm10390_vm5, %v2680_v24, %v2681_v42  ;;  %v1358_v6 = vshll.u32 %v9943_v8, 16  ;;  %v1354_v61 = vrot.slane %v1352_v12, 4  ;;  %v9944_v60 = vld [vmem:[%s10056_s24 + $0xa8] sm:$0xf] }
  0xd6   : > { %8368 = vmatmul.mubr.bf16.gmra.mrb[20].mxu1 %v11091_v10  ;;  %v1337_v1 = vsel %vm10096_vm2, %v1332_v9, %v1336_v11  ;;  %v11110_v35 = vcombine.low %v2679_v22, %v2682_v15  ;;  %v1345_v45 = vor.u32 %v1344_v3, %v1341_v52  ;;  %v7253_v40 = vrot.slane %v9944_v60, 9  ;;  %v9947_v8 = vld [vmem:[%s10340_s11 + $0xa8] sm:$0xf]  ;;  %v9948_v52 = vld [vmem:[%s10340_s11 + $0xac] sm:$0xf] }
  0xd7   : > { %v11112_v58 = vcombine.low %v1327_v37, %v1337_v1  ;;  %v1360_v38 = vrot.slane %v1358_v6, 5  ;;  %v2685_v42 = vrot.slane %v9945_v0, 5  ;;  %v1355_v24 = vor.u32 %v1354_v61, %v1350_v51  ;;  %v9949_v60 = vld [vmem:[%s10340_s11 + $0xb0] sm:$0x1] }
  0xd8   : > { %12190 = vst [vmem:[#allocation78_spill] sm:$0xff] %v11110_v35  ;;  %v1346_v41 = vrot.slane %v1345_v45, 4  ;;  %v2688_v44 = vrot.slane %v9946_v43, 5  ;;  %v1363_v4 = vshrl.u32 %v9947_v8, 16  ;;  %v1366_v9 = vshll.u32 %v9947_v8, 16 }
  0xd9   : > { %12191 = vst [vmem:[#allocation79_spill] sm:$0xff] %v11112_v58  ;;  %8371 = vmatprep.mubr.bf16.mxu1 %v11112_v58  ;;  %v2686_v11 = vsel %vm10390_vm5, %v7253_v40, %v2685_v42  ;;  %v2687_v22 = vrot.slane %v2685_v42, 4  ;;  %v1372_v3 = vshll.u32 %v9948_v52, 16  ;;  %v1356_v37 = vrot.slane %v1355_v24, 4  ;;  %8800 = vmatmul.mubr.bf16.gmra.mrb[20].mxu0 %v11088_v36  ;;  %v9951_v8 = vld [vmem:[%s10056_s24 + $0xb8] sm:$0xf] }
  0xda   : > { %v1351_v12 = vsel %vm10096_vm2, %v1346_v41, %v1350_v51  ;;  %v1365_v15 = vrot.slane %v1363_v4, 4  ;;  %v1376_v6 = vshrl.u32 %v9948_v52, 16  ;;  %v1368_v45 = vrot.slane %v1366_v9, 5  ;;  %v9950_v4 = vld [vmem:[%s10056_s24 + $0xb4] sm:$0xf]  ;;  %8803 = vmatprep.mubr.bf16.mxu0 %v11110_v35 }
  0xdb   : > { %v2689_v1 = vsel %vm10390_vm5, %v2687_v22, %v2688_v44  ;;  %v1374_v61 = vrot.slane %v1372_v3, 5  ;;  %v1382_v40 = vshll.u32 %v9949_v60, 16  ;;  %v1361_v0 = vsel %vm10096_vm2, %v1356_v37, %v1360_v38  ;;  %v9952_v52 = vld [vmem:[%s10056_s24 + $0xbc] sm:$0x1]  ;;  %v9953_v60 = vld [vmem:[%s10340_s11 + $0xb4] sm:$0xf] }
  0xdc   : > { %v11130_v42 = vcombine.low %v2686_v11, %v2689_v1  ;;  %v1378_v51 = vrot.slane %v1376_v6, 4  ;;  %v7254_v41 = vrot.slane %v9950_v4, 9  ;;  %v11134_v24 = vcombine.low %v1351_v12, %v1361_v0  ;;  %v9954_v1 = vld [vmem:[%s10340_s11 + $0xb8] sm:$0xf]  ;;  %v329_v4 = vld [vmem:[%s10056_s24 + $0x8] sm:$0x1] }
  0xdd   : > { %v1369_v43 = vor.u32 %v1368_v45, %v1365_v15  ;;  %v1384_v44 = vrot.slane %v1382_v40, 5  ;;  %v2692_v22 = vrot.slane %v9951_v8, 5  ;;  %v2695_v3 = vrot.slane %v9952_v52, 5  ;;  %v11156_v36 = vld [vmem:[%s10056_s24 + $0xc0] sm:$0xf] }
  0xde   : > { %12192 = vst [vmem:[#allocation80_spill] sm:$0xff] %v11130_v42  ;;  %v1379_v9 = vor.u32 %v1378_v51, %v1374_v61  ;;  %v1387_v38 = vshrl.u32 %v9953_v60, 16  ;;  %v1390_v11 = vshll.u32 %v9953_v60, 16  ;;  %8372 = vmatmul.mubr.bf16.gmra.mrb[24].mxu1 %v11134_v24  ;;  %v1396_v15 = vshll.u32 %v9954_v1, 16  ;;  %v9955_v60 = vld [vmem:[%s10340_s11 + $0xbc] sm:$0x1] }
  0xdf   : > { %v1370_v37 = vrot.slane %v1369_v43, 4  ;;  %v2693_v6 = vsel %vm10390_vm5, %v7254_v41, %v2692_v22  ;;  %v2694_v12 = vrot.slane %v2692_v22, 4  ;;  %v1400_v51 = vshrl.u32 %v9954_v1, 16 }
  0xe0   : > { %v1380_v45 = vrot.slane %v1379_v9, 4  ;;  %v1389_v40 = vrot.slane %v1387_v38, 4  ;;  %v1392_v0 = vrot.slane %v1390_v11, 5  ;;  %v1398_v43 = vrot.slane %v1396_v15, 5 }
  0xe1   : > { %v1375_v8 = vsel %vm10096_vm2, %v1370_v37, %v1374_v61  ;;  %v2696_v52 = vsel %vm10390_vm5, %v2694_v12, %v2695_v3  ;;  %v1406_v41 = vshll.u32 %v9955_v60, 16  ;;  %v1402_v11 = vrot.slane %v1400_v51, 4  ;;  %v11160_v37 = vld [vmem:[%s10056_s24 + $0xc4] sm:$0xf]  ;;  %8804 = vmatmul.mubr.bf16.gmra.mrb[24].mxu0 %v11130_v42 }
  0xe2   : > { %v1385_v22 = vsel %vm10096_vm2, %v1380_v45, %v1384_v44  ;;  %v11151_v9 = vcombine.low %v2693_v6, %v2696_v52  ;;  %v1393_v38 = vor.u32 %v1392_v0, %v1389_v40  ;;  %v7436_v61 = vrot.slane %v11156_v36, 9  ;;  %v9958_v6 = vld [vmem:[%s10056_s24 + $0xc8] sm:$0x1]  ;;  %v12195_v40 = vld [vmem:[#allocation2_spill] sm:$0xff] }
  0xe3   : > { %v11153_v35 = vcombine.low %v1375_v8, %v1385_v22  ;;  %v1408_v1 = vrot.slane %v1406_v41, 5  ;;  %v4452_v3 = vrot.slane %v11160_v37, 5  ;;  %v1403_v44 = vor.u32 %v1402_v11, %v1398_v43  ;;  %v12194_v45 = vld [vmem:[#allocation3_spill] sm:$0xff] }
  0xe4   : > { %12193 = vst [vmem:[#allocation81_spill] sm:$0xff] %v11151_v9  ;;  %v1394_v12 = vrot.slane %v1393_v38, 4  ;;  %v4455_v15 = vrot.slane %v9958_v6, 5  ;;  %v12196_v0 = vor.u32 %v12194_v45, %v12195_v40  ;;  %8807 = vmatprep.mubr.bf16.mxu0 %v11151_v9  ;;  %v12197_v60 = vor.u32 %v10081_v33, %v10079_v29 }
  0xe5   : > { %8375 = vmatprep.mubr.bf16.mxu1 %v11153_v35  ;;  %v4453_v8 = vsel %vm10390_vm5, %v7436_v61, %v4452_v3  ;;  %v4454_v52 = vrot.slane %v4452_v3, 4  ;;  %v1430_v22 = vshll.u32 %v329_v4, 16  ;;  %v1404_v11 = vrot.slane %v1403_v44, 4 }
  0xe6   : > { %v1418_v51 = vrot.slane %v12196_v0, 4  ;;  %v1428_v41 = vrot.slane %v12197_v60, 4  ;;  %v1399_v38 = vsel %vm10096_vm2, %v1394_v12, %v1398_v43  ;;  %v9959_v0 = vld [vmem:[%s10056_s24] sm:$0xf]  ;;  %v9960_v60 = vld [vmem:[%s10056_s24 + $0x4] sm:$0xf] }
  0xe7   : > { %v4456_v45 = vsel %vm10390_vm5, %v4454_v52, %v4455_v15  ;;  %v1432_v40 = vrot.slane %v1430_v22, 5  ;;  %v7239_v61 = vrot.slane %v9959_v0, 9  ;;  %v1409_v3 = vsel %vm10096_vm2, %v1404_v11, %v1408_v1  ;;  %v12199_v1 = vld [vmem:[#allocation37_spill] sm:$0xff]  ;;  %v12200_v22 = vld [vmem:[#allocation6_spill] sm:$0xff]  ;;  %v12202_v11 = vld [vmem:[#allocation8_spill] sm:$0xff] }
  0xe8   : > { %v1423_v6 = vsel %vm10096_vm2, %v1418_v51, %v10079_v29  ;;  %v11185_v33 = vcombine.low %v4453_v8, %v4456_v45  ;;  %v2587_v9 = vrot.slane %v9960_v60, 5  ;;  %v11188_v42 = vcombine.low %v1399_v38, %v1409_v3  ;;  %v9750_v8 = vld [vmem:[%s11929_s2 + $0x88] sm:$0xff]   ;;  %v9753_v38 = vld [vmem:[%s11930_s3 + $0x190] sm:$0xff]   ;;  %v9754_v45 = vld [vmem:[%s11929_s2 + $0x98] sm:$0xff]  }
  0xe9   : > { %v1433_v43 = vsel %vm10096_vm2, %v1428_v41, %v1432_v40  ;;  %v2590_v15 = vrot.slane %v329_v4, 5  ;;  %v9751_v41 = vld [vmem:[%s11930_s3 + $0x188] sm:$0xff]   ;;  %v9752_v4 = vld [vmem:[%s11929_s2 + $0x90] sm:$0xff]   ;;  %v12205_v40 = vld [vmem:[#allocation46_spill] sm:$0xff] }
  0xea   : > { %12198 = vst [vmem:[#allocation3_spill] sm:$0xff] %v11185_v33  ;;  %v7199_v12 = vcombine.low %v1423_v6, %v1433_v43  ;;  %8376 = vmatmul.mubr.bf16.gmra.mrb[28].mxu1 %v11188_v42  ;;  %8808 = vmatmul.mubr.bf16.gmra.mrb[28].mxu0 %v11185_v33  ;;  %v11196_v29 = vsel %vm10390_vm5, %v7239_v61, %v2587_v9  ;;  %v2589_v44 = vrot.slane %v2587_v9, 4  ;;  %v12201_v9 = vld [vmem:[#allocation39_spill] sm:$0xff]  ;;  %v12203_v6 = vld [vmem:[#allocation40_spill] sm:$0xff]  ;;  %v9756_v61 = vld [vmem:[%s11929_s2 + $0xa0] sm:$0xff]  }
  0xeb   : > { %8827 = vmatprep.mubr.bf16.mxu0 %v12199_v1  ;;  %v12206_v0 = vld [vmem:[#allocation12_spill] sm:$0xff]  ;;  %v12207_v3 = vld [vmem:[#allocation50_spill] sm:$0xff]  ;;  %v9758_v43 = vld [vmem:[%s11929_s2 + $0xa8] sm:$0xff]  }
  0xec   : > { %8395 = vmatprep.mubr.bf16.mxu1 %v7199_v12  ;;  %v11201_v51 = vsel %vm10390_vm5, %v2589_v44, %v2590_v15  ;;  %v9757_v60 = vld [vmem:[%s11930_s3 + $0x1a0] sm:$0xff]   ;;  %v9759_v44 = vld [vmem:[%s11930_s3 + $0x1a8] sm:$0xff]   ;;  %v12217_v52 = vld [vmem:[#allocation28_spill] sm:$0xff] }
  0xed   : > { %v12208_v12 = vld [vmem:[#allocation14_spill] sm:$0xff] }
  0xee   : > { %v12209_v15 = vld [vmem:[#allocation54_spill] sm:$0xff] }
  0xef   : > { %v11281_v33 = vld [vmem:[%s10340_s11 + $0xc0] sm:$0xf] }
  0xf2   : > { %8396 = vmatmul.mubr.bf16.vlgmr.msra.gmra.mrb[0].mxu1 %v12200_v22  ;;  %8828 = vmatmul.mubr.bf16.vlgmr.msra.gmra.mrb[0].mxu0 %v12201_v9  ;;  %v9760_v22 = vld [vmem:[%s11929_s2 + $0xb0] sm:$0xff]  }
  0xf3   : > { %8428 = vmatpush3.bf16.msra.mxu1 %v11064_v47  ;;  %8860 = vmatpush3.bf16.msra.mxu0 %v11084_v18  ;;  %v12204_v47 = vld [vmem:[#allocation10_spill] sm:$0xff]  ;;  %v9755_v18 = vld [vmem:[%s11930_s3 + $0x198] sm:$0xff]  }
  0xf4   : > { %8399 = vmatprep.mubr.bf16.mxu1 %v12202_v11  ;;  %8831 = vmatprep.mubr.bf16.mxu0 %v12203_v6 }
  0xf5   : > { %8429 = vmatprep.subr.bf16.mxu1 %v9750_v8  ;;  %8861 = vmatprep.subr.bf16.mxu0 %v9751_v41 }
  0xf7   : > { %8430 = vmatpush3.bf16.msra.mxu1 %v9750_v8  ;;  %8862 = vmatpush3.bf16.msra.mxu0 %v9751_v41  ;;  %v12210_v8 = vld [vmem:[#allocation16_spill] sm:$0xff]  ;;  %v12211_v41 = vld [vmem:[#allocation59_spill] sm:$0xff] }
  0xf8   : > { %8431 = vmatprep.subr.bf16.mxu1 %v9752_v4  ;;  %8863 = vmatprep.subr.bf16.mxu0 %v9753_v38 }
  0xfa   : > { %8400 = vmatmul.mubr.bf16.gmra.mrb[4].mxu1 %v12204_v47  ;;  %8832 = vmatmul.mubr.bf16.gmra.mrb[4].mxu0 %v12205_v40 }
  0xfb   : > { %8403 = vmatprep.mubr.bf16.mxu1 %v12206_v0  ;;  %8835 = vmatprep.mubr.bf16.mxu0 %v12207_v3 }
  0xfc   : > { %8432 = vmatpush3.bf16.msra.mxu1 %v9752_v4  ;;  %8864 = vmatpush3.bf16.msra.mxu0 %v9753_v38  ;;  %v9761_v4 = vld [vmem:[%s11930_s3 + $0x1b0] sm:$0xff]   ;;  %v9763_v38 = vld [vmem:[%s11929_s2 + $0xb8] sm:$0xff]  }
  0xfd   : > { %8433 = vmatprep.subr.bf16.mxu1 %v9754_v45  ;;  %8865 = vmatprep.subr.bf16.mxu0 %v9755_v18 }
 0x100   : > { %8434 = vmatpush3.bf16.msra.mxu1 %v9754_v45  ;;  %8866 = vmatpush3.bf16.msra.mxu0 %v9755_v18  ;;  %v12212_v45 = vld [vmem:[#allocation18_spill] sm:$0xff]  ;;  %v9765_v18 = vld [vmem:[%s11930_s3 + $0x1b8] sm:$0xff]  }
 0x101   : > { %8435 = vmatprep.subr.bf16.mxu1 %v9756_v61  ;;  %8867 = vmatprep.subr.bf16.mxu0 %v9757_v60 }
 0x102   : > { %8404 = vmatmul.mubr.bf16.gmra.mrb[8].mxu1 %v12208_v12  ;;  %8836 = vmatmul.mubr.bf16.gmra.mrb[8].mxu0 %v12209_v15 }
 0x103   : > { %8407 = vmatprep.mubr.bf16.mxu1 %v12210_v8  ;;  %8839 = vmatprep.mubr.bf16.mxu0 %v12211_v41 }
 0x104   : > { %8436 = vmatpush3.bf16.msra.mxu1 %v9756_v61  ;;  %8868 = vmatpush3.bf16.msra.mxu0 %v9757_v60  ;;  %v12213_v61 = vld [vmem:[#allocation20_spill] sm:$0xff]  ;;  %v9766_v60 = vld [vmem:[%s11930_s3 + $0x80] sm:$0xff]  }
 0x105   : > { %8437 = vmatprep.subr.bf16.mxu1 %v9758_v43  ;;  %8869 = vmatprep.subr.bf16.mxu0 %v9759_v44 }
 0x108   : > { %8438 = vmatpush3.bf16.msra.mxu1 %v9758_v43  ;;  %8870 = vmatpush3.bf16.msra.mxu0 %v9759_v44  ;;  %v9767_v43 = vld [vmem:[%s11929_s2 + $0x1c0] sm:$0xff]  }
 0x109   : > { %8439 = vmatprep.subr.bf16.mxu1 %v9760_v22  ;;  %8871 = vmatprep.subr.bf16.mxu0 %v9761_v4  ;;  %v12214_v44 = vld [vmem:[#allocation22_spill] sm:$0xff] }
 0x10a   : > { %8408 = vmatmul.mubr.bf16.gmra.mrb[12].mxu1 %v12212_v45  ;;  %8840 = vmatmul.mubr.bf16.gmra.mrb[12].mxu0 %v10609_v46 }
 0x10b   : > { %8411 = vmatprep.mubr.bf16.mxu1 %v12213_v61  ;;  %8843 = vmatprep.mubr.bf16.mxu0 %v10624_v30  ;;  %v11284_v30 = vld [vmem:[%s10340_s11 + $0xc4] sm:$0xf]  ;;  %v12221_v61 = vld [vmem:[#allocation33_spill] sm:$0xff] }
 0x10c   : > { %8440 = vmatpush3.bf16.msra.mxu1 %v9760_v22  ;;  %8872 = vmatpush3.bf16.msra.mxu0 %v9761_v4  ;;  %v12215_v22 = vld [vmem:[#allocation24_spill] sm:$0xff]  ;;  %v12216_v4 = vld [vmem:[#allocation26_spill] sm:$0xff] }
 0x10d   : > { %8441 = vmatprep.subr.bf16.mxu1 %v9763_v38  ;;  %8873 = vmatprep.subr.bf16.mxu0 %v9765_v18 }
 0x110   : > { %8442 = vmatpush3.bf16.msra.mxu1 %v9763_v38  ;;  %8874 = vmatpush3.bf16.msra.mxu0 %v9765_v18  ;;  %v9961_v38 = vld [vmem:[%s10340_s11 + $0x4] sm:$0xf] }
 0x111   : > { %8475 = vmatprep.subr.bf16.mxu1 %v9766_v60  ;;  %8907 = vmatprep.subr.bf16.mxu0 %v9767_v43  ;;  %v2459_v18 = vrot.slane %v9961_v38, 5  ;;  %v11297_v38 = vld [vmem:[%s10340_s11 + $0xcc] sm:$0xf] }
 0x112   : > { %8412 = vmatmul.mubr.bf16.gmra.mrb[16].mxu1 %v12214_v44  ;;  %8844 = vmatmul.mubr.bf16.gmra.mrb[16].mxu0 %v10645_v20  ;;  %v11288_v20 = vcombine.low %v11281_v33, %v11284_v30  ;;  %v11300_v44 = vld [vmem:[%s10340_s11 + $0xd0] sm:$0xf] }
 0x113   : > { %8415 = vmatprep.mubr.bf16.mxu1 %v12215_v22  ;;  %8847 = vmatprep.mubr.bf16.mxu0 %v10658_v5  ;;  %v9964_v5 = vld [vmem:[%s10340_s11] sm:$0xf]  ;;  %v2461_v22 = vrot.slane %v2459_v18, 4 }
 0x114   : > { %12218 = vst [vmem:[#allocation2_spill] sm:$0xff] %v11288_v20 }
 0x11a   : > { %8416 = vmatmul.mubr.bf16.gmra.mrb[20].mxu1 %v12216_v4  ;;  %8848 = vmatmul.mubr.bf16.gmra.mrb[20].mxu0 %v10667_v7  ;;  %v7223_v4 = vrot.slane %v9964_v5, 9  ;;  %v9965_v7 = vld [vmem:[%s10340_s11 + $0x8] sm:$0x1] }
 0x11b   : > { %8419 = vmatprep.mubr.bf16.mxu1 %v12217_v52  ;;  %8851 = vmatprep.mubr.bf16.mxu0 %v10694_v62  ;;  %v2462_v46 = vrot.slane %v9965_v7, 5  ;;  %v12219_v52 = vld [vmem:[#allocation30_spill] sm:$0xff]  ;;  %v12220_v62 = vld [vmem:[#allocation32_spill] sm:$0xff]  ;;  %v7503_v7 = vcombine.low %v11297_v38, %v11300_v44 }
 0x11c   : > { %v2460_v41 = vsel %vm10390_vm5, %v7223_v4, %v2459_v18  ;;  %v12226_v4 = vld [vmem:[#allocation9_spill] sm:$0xff] }
 0x11d   : > { %v2463_v5 = vsel %vm10390_vm5, %v2461_v22, %v2462_v46  ;;  %v9769_v46 = vld [vmem:[%s11929_s2 + $0x1c8] sm:$0xff]   ;;  %v9773_v18 = vld [vmem:[%s11929_s2 + $0x1d8] sm:$0xff]  }
 0x11e   : > { %v12224_v22 = vld [vmem:[#allocation7_spill] sm:$0xff] }
 0x122   : > { %8420 = vmatmul.mubr.bf16.gmra.mrb[24].mxu1 %v12219_v52  ;;  %8852 = vmatmul.mubr.bf16.gmra.mrb[24].mxu0 %v10714_v16  ;;  %v7271_v52 = vcombine.low %v2460_v41, %v2463_v5  ;;  %v12222_v16 = vld [vmem:[#allocation5_spill] sm:$0xff]  ;;  %v12225_v41 = vld [vmem:[#allocation42_spill] sm:$0xff]  ;;  %v12228_v5 = vld [vmem:[#allocation11_spill] sm:$0xff] }
 0x123   : > { %8423 = vmatprep.mubr.bf16.mxu1 %v12220_v62  ;;  %8855 = vmatprep.mubr.bf16.mxu0 %v11288_v20  ;;  %v9768_v20 = vld [vmem:[%s11930_s3 + $0x88] sm:$0xff]   ;;  %v12223_v62 = vld [vmem:[#allocation38_spill] sm:$0xff] }
 0x12a   : > { %8424 = vmatmul.mubr.bf16.gmra.mrb[28].mxu1 %v12221_v61  ;;  %8856 = vmatmul.mubr.bf16.gmra.mrb[28].mxu0 %v7503_v7  ;;  %v12229_v7 = vld [vmem:[#allocation49_spill] sm:$0xff] }
 0x12b   : > { %8443 = vmatprep.mubr.bf16.mxu1 %v7271_v52  ;;  %8875 = vmatprep.mubr.bf16.mxu0 %v12222_v16  ;;  %v9770_v52 = vld [vmem:[%s11930_s3 + $0x90] sm:$0xff]  }
 0x132   : > { %8444 = vmatmul.mubr.bf16.vlgmr.msra.gmra.mrb[0].mxu1 %v12223_v62  ;;  %8876 = vmatmul.mubr.bf16.vlgmr.msra.gmra.mrb[0].mxu0 %v12224_v22  ;;  %v9771_v62 = vld [vmem:[%s11929_s2 + $0x1d0] sm:$0xff]  }
 0x133   : > { %8476 = vmatpush3.bf16.msra.mxu1 %v9766_v60  ;;  %8908 = vmatpush3.bf16.msra.mxu0 %v9767_v43  ;;  %v9772_v60 = vld [vmem:[%s11930_s3 + $0x98] sm:$0xff]  }
 0x134   : > { %8447 = vmatprep.mubr.bf16.mxu1 %v12225_v41  ;;  %8879 = vmatprep.mubr.bf16.mxu0 %v12226_v4  ;;  %v12227_v43 = vld [vmem:[#allocation45_spill] sm:$0xff]  ;;  %v12233_v4 = vld [vmem:[#allocation58_spill] sm:$0xff] }
 0x135   : > { %8477 = vmatprep.subr.bf16.mxu1 %v9768_v20  ;;  %8909 = vmatprep.subr.bf16.mxu0 %v9769_v46 }
 0x137   : > { %8478 = vmatpush3.bf16.msra.mxu1 %v9768_v20  ;;  %8910 = vmatpush3.bf16.msra.mxu0 %v9769_v46  ;;  %v9774_v20 = vld [vmem:[%s11930_s3 + $0xa0] sm:$0xff]  }
 0x138   : > { %8479 = vmatprep.subr.bf16.mxu1 %v9770_v52  ;;  %8911 = vmatprep.subr.bf16.mxu0 %v9771_v62  ;;  %v9775_v46 = vld [vmem:[%s11929_s2 + $0x1e0] sm:$0xff]  }
 0x13a   : > { %8448 = vmatmul.mubr.bf16.gmra.mrb[4].mxu1 %v12227_v43  ;;  %8880 = vmatmul.mubr.bf16.gmra.mrb[4].mxu0 %v12228_v5  ;;  %v9776_v5 = vld [vmem:[%s11930_s3 + $0xa8] sm:$0xff]  }
 0x13b   : > { %8451 = vmatprep.mubr.bf16.mxu1 %v12229_v7  ;;  %8883 = vmatprep.mubr.bf16.mxu0 %v12230_v34  ;;  %v12231_v34 = vld [vmem:[#allocation56_spill] sm:$0xff]  ;;  %v12234_v7 = vld [vmem:[#allocation17_spill] sm:$0xff] }
 0x13c   : > { %8480 = vmatpush3.bf16.msra.mxu1 %v9770_v52  ;;  %8912 = vmatpush3.bf16.msra.mxu0 %v9771_v62  ;;  %v9777_v52 = vld [vmem:[%s11929_s2 + $0x1e8] sm:$0xff]  }
 0x13d   : > { %8481 = vmatprep.subr.bf16.mxu1 %v9772_v60  ;;  %8913 = vmatprep.subr.bf16.mxu0 %v9773_v18  ;;  %v12232_v62 = vld [vmem:[#allocation15_spill] sm:$0xff] }
 0x140   : > { %8482 = vmatpush3.bf16.msra.mxu1 %v9772_v60  ;;  %8914 = vmatpush3.bf16.msra.mxu0 %v9773_v18  ;;  %v9778_v60 = vld [vmem:[%s11930_s3 + $0xb0] sm:$0xff]  }
 0x141   : > { %8483 = vmatprep.subr.bf16.mxu1 %v9774_v20  ;;  %8915 = vmatprep.subr.bf16.mxu0 %v9775_v46  ;;  %v9779_v18 = vld [vmem:[%s11929_s2 + $0x1f0] sm:$0xff]  }
 0x142   : > { %8452 = vmatmul.mubr.bf16.gmra.mrb[8].mxu1 %v12231_v34  ;;  %8884 = vmatmul.mubr.bf16.gmra.mrb[8].mxu0 %v12232_v62  ;;  %v9781_v62 = vld [vmem:[%s11930_s3 + $0xb8] sm:$0xff]  }
 0x143   : > { %8455 = vmatprep.mubr.bf16.mxu1 %v12233_v4  ;;  %8887 = vmatprep.mubr.bf16.mxu0 %v12234_v7  ;;  %v12235_v7 = vld [vmem:[#allocation60_spill] sm:$0xff]  ;;  %v12237_v4 = vld [vmem:[#allocation21_spill] sm:$0xff] }
 0x144   : > { %8484 = vmatpush3.bf16.msra.mxu1 %v9774_v20  ;;  %8916 = vmatpush3.bf16.msra.mxu0 %v9775_v46  ;;  %v9783_v20 = vld [vmem:[%s11929_s2 + $0x1f8] sm:$0xff]   ;;  %v12236_v46 = vld [vmem:[#allocation19_spill] sm:$0xff] }
 0x145   : > { %8485 = vmatprep.subr.bf16.mxu1 %v9776_v5  ;;  %8917 = vmatprep.subr.bf16.mxu0 %v9777_v52 }
 0x148   : > { %8486 = vmatpush3.bf16.msra.mxu1 %v9776_v5  ;;  %8918 = vmatpush3.bf16.msra.mxu0 %v9777_v52  ;;  %v9784_v5 = vld [vmem:[%s11929_s2 + $0xc0] sm:$0xff]  }
 0x149   : > { %8487 = vmatprep.subr.bf16.mxu1 %v9778_v60  ;;  %8919 = vmatprep.subr.bf16.mxu0 %v9779_v18  ;;  %v9785_v52 = vld [vmem:[%s11930_s3 + $0x1c0] sm:$0xff]  }
 0x14a   : > { %8456 = vmatmul.mubr.bf16.gmra.mrb[12].mxu1 %v12235_v7  ;;  %8888 = vmatmul.mubr.bf16.gmra.mrb[12].mxu0 %v12236_v46  ;;  %v12243_v46 = vld [vmem:[#allocation31_spill] sm:$0xff] }
 0x14b   : > { %8459 = vmatprep.mubr.bf16.mxu1 %v10629_v53  ;;  %8891 = vmatprep.mubr.bf16.mxu0 %v12237_v4  ;;  %v12240_v4 = vld [vmem:[#allocation27_spill] sm:$0xff] }
 0x14c   : > { %8488 = vmatpush3.bf16.msra.mxu1 %v9778_v60  ;;  %8920 = vmatpush3.bf16.msra.mxu0 %v9779_v18  ;;  %v12238_v60 = vld [vmem:[#allocation23_spill] sm:$0xff]  ;;  %v12239_v18 = vld [vmem:[#allocation25_spill] sm:$0xff] }
 0x14d   : > { %8489 = vmatprep.subr.bf16.mxu1 %v9781_v62  ;;  %8921 = vmatprep.subr.bf16.mxu0 %v9783_v20 }
 0x150   : > { %8490 = vmatpush3.bf16.msra.mxu1 %v9781_v62  ;;  %8922 = vmatpush3.bf16.msra.mxu0 %v9783_v20  ;;  %v12241_v62 = vld [vmem:[#allocation29_spill] sm:$0xff]  ;;  %v11384_v20 = vcombine.low %v11156_v36, %v11160_v37  ;;  %v12244_v36 = vcombine.low %v11196_v29, %v11201_v51  ;;  %v9786_v37 = vld [vmem:[%s11929_s2 + $0xc8] sm:$0xff]   ;;  %v9788_v29 = vld [vmem:[%s11929_s2 + $0xd0] sm:$0xff]  }
 0x151   : > { %8523 = vmatprep.subr.bf16.mxu1 %v9784_v5  ;;  %8955 = vmatprep.subr.bf16.mxu0 %v9785_v52  ;;  %v9790_v51 = vld [vmem:[%s11929_s2 + $0xd8] sm:$0xff]  }
 0x152   : > { %8460 = vmatmul.mubr.bf16.gmra.mrb[16].mxu1 %v10643_v32  ;;  %8892 = vmatmul.mubr.bf16.gmra.mrb[16].mxu0 %v12238_v60  ;;  %12242 = vst [vmem:[#allocation37_spill] sm:$0xff] %v11384_v20  ;;  %v11394_v60 = vld [vmem:[%s10056_s24 + $0xd0] sm:$0xf] }
 0x153   : > { %8463 = vmatprep.mubr.bf16.mxu1 %v10654_v39  ;;  %8895 = vmatprep.mubr.bf16.mxu0 %v12239_v18  ;;  %v11391_v18 = vld [vmem:[%s10056_s24 + $0xcc] sm:$0xf] }
 0x15a   : > { %8464 = vmatmul.mubr.bf16.gmra.mrb[20].mxu1 %v10674_v28  ;;  %8896 = vmatmul.mubr.bf16.gmra.mrb[20].mxu0 %v12240_v4  ;;  %v7528_v4 = vcombine.low %v11391_v18, %v11394_v60 }
 0x15b   : > { %8467 = vmatprep.mubr.bf16.mxu1 %v10685_v59  ;;  %8899 = vmatprep.mubr.bf16.mxu0 %v12241_v62 }
 0x162   : > { %8468 = vmatmul.mubr.bf16.gmra.mrb[24].mxu1 %v10702_v2  ;;  %8900 = vmatmul.mubr.bf16.gmra.mrb[24].mxu0 %v12243_v46 }
 0x163   : > { %8471 = vmatprep.mubr.bf16.mxu1 %v10727_v63  ;;  %8903 = vmatprep.mubr.bf16.mxu0 %v11384_v20  ;;  %v9787_v20 = vld [vmem:[%s11930_s3 + $0x1c8] sm:$0xff]  }
 0x16a   : > { %8472 = vmatmul.mubr.bf16.gmra.mrb[28].mxu1 %v10743_v13  ;;  %8904 = vmatmul.mubr.bf16.gmra.mrb[28].mxu0 %v7528_v4  ;;  %v9791_v4 = vld [vmem:[%s11930_s3 + $0x1d8] sm:$0xff]  }
 0x16b   : > { %8491 = vmatprep.mubr.bf16.mxu1 %v12244_v36  ;;  %8923 = vmatprep.mubr.bf16.mxu0 %v10832_v25  ;;  %v9795_v36 = vld [vmem:[%s11930_s3 + $0x1e8] sm:$0xff]  }
 0x172   : > { %8492 = vmatmul.mubr.bf16.vlgmr.msra.gmra.mrb[0].mxu1 %v10785_v54  ;;  %8924 = vmatmul.mubr.bf16.vlgmr.msra.gmra.mrb[0].mxu0 %v10852_v56  ;;  %v9789_v54 = vld [vmem:[%s11930_s3 + $0x1d0] sm:$0xff]   ;;  %v12249_v56 = vld [vmem:[#allocation55_spill] sm:$0xff] }
 0x173   : > { %8524 = vmatpush3.bf16.msra.mxu1 %v9784_v5  ;;  %8956 = vmatpush3.bf16.msra.mxu0 %v9785_v52  ;;  %v9792_v5 = vld [vmem:[%s11929_s2 + $0xe0] sm:$0xff]  }
 0x174   : > { %8495 = vmatprep.mubr.bf16.mxu1 %v10803_v55  ;;  %8927 = vmatprep.mubr.bf16.mxu0 %v10875_v14  ;;  %v9793_v52 = vld [vmem:[%s11930_s3 + $0x1e0] sm:$0xff]  }
 0x175   : > { %8525 = vmatprep.subr.bf16.mxu1 %v9786_v37  ;;  %8957 = vmatprep.subr.bf16.mxu0 %v9787_v20 }
 0x177   : > { %8526 = vmatpush3.bf16.msra.mxu1 %v9786_v37  ;;  %8958 = vmatpush3.bf16.msra.mxu0 %v9787_v20  ;;  %v9794_v20 = vld [vmem:[%s11929_s2 + $0xe8] sm:$0xff]   ;;  %v9796_v37 = vld [vmem:[%s11929_s2 + $0xf0] sm:$0xff]  }
 0x178   : > { %8527 = vmatprep.subr.bf16.mxu1 %v9788_v29  ;;  %8959 = vmatprep.subr.bf16.mxu0 %v9789_v54 }
 0x17a   : > { %8496 = vmatmul.mubr.bf16.gmra.mrb[4].mxu1 %v10823_v50  ;;  %8928 = vmatmul.mubr.bf16.gmra.mrb[4].mxu0 %v10903_v49 }
 0x17b   : > { %8499 = vmatprep.mubr.bf16.mxu1 %v10849_v27  ;;  %8931 = vmatprep.mubr.bf16.mxu0 %v10929_v21  ;;  %v5513_v21 = vshll.u32 %v11297_v38, 16  ;;  %v11481_v27 = vld [vmem:[%s10340_s11 + $0xd4] sm:$0x1] }
 0x17c   : > { %8528 = vmatpush3.bf16.msra.mxu1 %v9788_v29  ;;  %8960 = vmatpush3.bf16.msra.mxu0 %v9789_v54  ;;  %v9797_v29 = vld [vmem:[%s11930_s3 + $0x1f0] sm:$0xff]   ;;  %v9798_v54 = vld [vmem:[%s11929_s2 + $0xf8] sm:$0xff]  }
 0x17d   : > { %8529 = vmatprep.subr.bf16.mxu1 %v9790_v51  ;;  %8961 = vmatprep.subr.bf16.mxu0 %v9791_v4 }
 0x180   : > { %8530 = vmatpush3.bf16.msra.mxu1 %v9790_v51  ;;  %8962 = vmatpush3.bf16.msra.mxu0 %v9791_v4  ;;  %v9799_v51 = vld [vmem:[%s11930_s3 + $0x1f8] sm:$0xff]  }
 0x181   : > { %8531 = vmatprep.subr.bf16.mxu1 %v9792_v5  ;;  %8963 = vmatprep.subr.bf16.mxu0 %v9793_v52  ;;  %v12245_v4 = vld [vmem:[#allocation53_spill] sm:$0xff] }
 0x182   : > { %8500 = vmatmul.mubr.bf16.gmra.mrb[8].mxu1 %v10873_v31  ;;  %8932 = vmatmul.mubr.bf16.gmra.mrb[8].mxu0 %v10961_v57  ;;  %v3883_v57 = vshrl.u32 %v11284_v30, 16 }
 0x183   : > { %8503 = vmatprep.mubr.bf16.mxu1 %v10898_v26  ;;  %8935 = vmatprep.mubr.bf16.mxu0 %v10998_v23  ;;  %v3879_v23 = vshll.u32 %v11284_v30, 16  ;;  %v5510_v30 = vshrl.u32 %v11297_v38, 16  ;;  %v5515_v26 = vrot.slane %v5513_v21, 5 }
 0x184   : > { %8532 = vmatpush3.bf16.msra.mxu1 %v9792_v5  ;;  %8964 = vmatpush3.bf16.msra.mxu0 %v9793_v52  ;;  %v12246_v5 = vld [vmem:[#allocation44_spill] sm:$0xff]  ;;  %v12247_v52 = vld [vmem:[#allocation57_spill] sm:$0xff] }
 0x185   : > { %8533 = vmatprep.subr.bf16.mxu1 %v9794_v20  ;;  %8965 = vmatprep.subr.bf16.mxu0 %v9795_v36 }
 0x188   : > { %8534 = vmatpush3.bf16.msra.mxu1 %v9794_v20  ;;  %8966 = vmatpush3.bf16.msra.mxu0 %v9795_v36  ;;  %v3870_v20 = vshrl.u32 %v11281_v33, 16  ;;  %v3873_v36 = vshll.u32 %v11281_v33, 16  ;;  %v3885_v33 = vrot.slane %v3883_v57, 4  ;;  %v5519_v57 = vshll.u32 %v11300_v44, 16 }
 0x189   : > { %8535 = vmatprep.subr.bf16.mxu1 %v9796_v37  ;;  %8967 = vmatprep.subr.bf16.mxu0 %v9797_v29 }
 0x18a   : > { %8504 = vmatmul.mubr.bf16.gmra.mrb[12].mxu1 %v10927_v19  ;;  %8936 = vmatmul.mubr.bf16.gmra.mrb[12].mxu0 %v12245_v4  ;;  %v9800_v19 = vld [vmem:[%s11930_s3 + $0xc0] sm:$0xff]   ;;  %v3881_v4 = vrot.slane %v3879_v23, 5 }
 0x18b   : > { %8507 = vmatprep.mubr.bf16.mxu1 %v12246_v5  ;;  %8939 = vmatprep.mubr.bf16.mxu0 %v12247_v52  ;;  %v9801_v52 = vld [vmem:[%s11929_s2 + $0x200] sm:$0xff]   ;;  %v12248_v5 = vld [vmem:[#allocation48_spill] sm:$0xff] }
 0x18c   : > { %8536 = vmatpush3.bf16.msra.mxu1 %v9796_v37  ;;  %8968 = vmatpush3.bf16.msra.mxu0 %v9797_v29  ;;  %v3872_v37 = vrot.slane %v3870_v20, 4  ;;  %v3875_v29 = vrot.slane %v3873_v36, 5  ;;  %v9966_v20 = vld [vmem:[%s10340_s11 + $0xc8] sm:$0x1] }
 0x18d   : > { %8537 = vmatprep.subr.bf16.mxu1 %v9798_v54  ;;  %8969 = vmatprep.subr.bf16.mxu0 %v9799_v51  ;;  %v3889_v36 = vshll.u32 %v9966_v20, 16  ;;  %v12251_v20 = vld [vmem:[#allocation78_spill] sm:$0xff] }
 0x18e   : > { %v3876_v23 = vor.u32 %v3875_v29, %v3872_v37 }
 0x18f   : > { %v3891_v14 = vrot.slane %v3889_v36, 5  ;;  %v12252_v36 = vld [vmem:[#allocation80_spill] sm:$0xff] }
 0x190   : > { %8538 = vmatpush3.bf16.msra.mxu1 %v9798_v54  ;;  %8970 = vmatpush3.bf16.msra.mxu0 %v9799_v51  ;;  %v5523_v54 = vshrl.u32 %v11300_v44, 16  ;;  %v3886_v51 = vor.u32 %v3885_v33, %v3881_v4  ;;  %v5529_v33 = vshll.u32 %v11481_v27, 16 }
 0x191   : > { %8571 = vmatprep.subr.bf16.mxu1 %v9800_v19  ;;  %9003 = vmatprep.subr.bf16.mxu0 %v9801_v52 }
 0x192   : > { %8508 = vmatmul.mubr.bf16.gmra.mrb[16].mxu1 %v12248_v5  ;;  %8940 = vmatmul.mubr.bf16.gmra.mrb[16].mxu0 %v11091_v10  ;;  %v5512_v5 = vrot.slane %v5510_v30, 4  ;;  %v5521_v10 = vrot.slane %v5519_v57, 5  ;;  %v5525_v49 = vrot.slane %v5523_v54, 4  ;;  %v3887_v31 = vrot.slane %v3886_v51, 4 }
 0x193   : > { %8511 = vmatprep.mubr.bf16.mxu1 %v11025_v17  ;;  %8943 = vmatprep.mubr.bf16.mxu0 %v11112_v58  ;;  %v3877_v17 = vrot.slane %v3876_v23, 4  ;;  %v12250_v58 = vld [vmem:[#allocation76_spill] sm:$0xff]  ;;  %v5531_v51 = vrot.slane %v5529_v33, 5  ;;  %v9816_v33 = vld [vmem:[%s11929_s2 + $0x100] sm:$0xff]  }
 0x194   : > { %v5516_v37 = vor.u32 %v5515_v26, %v5512_v5  ;;  %v5526_v29 = vor.u32 %v5525_v49, %v5521_v10  ;;  %v3892_v30 = vsel %vm10096_vm2, %v3887_v31, %v3891_v14  ;;  %v12253_v14 = vld [vmem:[#allocation81_spill] sm:$0xff] }
 0x195   : > { %v3882_v21 = vsel %vm10096_vm2, %v3877_v17, %v3881_v4  ;;  %v12254_v17 = vld [vmem:[#allocation36_spill] sm:$0xff]  ;;  %v9802_v4 = vld [vmem:[%s11930_s3 + $0xc8] sm:$0xff]   ;;  %v9815_v5 = vld [vmem:[%s11929_s2 + $0x238] sm:$0xff]  }
 0x196   : > { %v11492_v54 = vcombine.low %v3882_v21, %v3892_v30  ;;  %v5517_v57 = vrot.slane %v5516_v37, 4  ;;  %v5527_v23 = vrot.slane %v5526_v29, 4  ;;  %v12258_v37 = vld [vmem:[#allocation61_spill] sm:$0xff]  ;;  %v12259_v29 = vld [vmem:[#allocation24_spill] sm:$0xff]  ;;  %v9817_v21 = vld [vmem:[%s11930_s3 + $0x200] sm:$0xff]  }
 0x197   : > { %v12260_v30 = vld [vmem:[#allocation62_spill] sm:$0xff] }
 0x198   : > { %v5522_v26 = vsel %vm10096_vm2, %v5517_v57, %v5521_v10  ;;  %v5532_v49 = vsel %vm10096_vm2, %v5527_v23, %v5531_v51  ;;  %v9803_v10 = vld [vmem:[%s11929_s2 + $0x208] sm:$0xff]   ;;  %v12261_v57 = vld [vmem:[#allocation26_spill] sm:$0xff]  ;;  %v5534_v51 = vshrl.u32 %v11391_v18, 16 }
 0x199   : > { %v7553_v31 = vcombine.low %v5522_v26, %v5532_v49  ;;  %v12262_v23 = vld [vmem:[#allocation63_spill] sm:$0xff]  ;;  %v5537_v26 = vshll.u32 %v11391_v18, 16  ;;  %v5547_v49 = vshrl.u32 %v11394_v60, 16 }
 0x19a   : > { %8512 = vmatmul.mubr.bf16.gmra.mrb[20].mxu1 %v12249_v56  ;;  %8944 = vmatmul.mubr.bf16.gmra.mrb[20].mxu0 %v11134_v24 }
 0x19b   : > { %8515 = vmatprep.mubr.bf16.mxu1 %v12250_v58  ;;  %8947 = vmatprep.mubr.bf16.mxu0 %v11153_v35 }
 0x1a2   : > { %8516 = vmatmul.mubr.bf16.gmra.mrb[24].mxu1 %v12251_v20  ;;  %8948 = vmatmul.mubr.bf16.gmra.mrb[24].mxu0 %v11188_v42 }
 0x1a3   : > { %8519 = vmatprep.mubr.bf16.mxu1 %v12252_v36  ;;  %8951 = vmatprep.mubr.bf16.mxu0 %v11492_v54 }
 0x1aa   : > { %8520 = vmatmul.mubr.bf16.gmra.mrb[28].mxu1 %v12253_v14  ;;  %8952 = vmatmul.mubr.bf16.gmra.mrb[28].mxu0 %v7553_v31  ;;  %v12263_v31 = vld [vmem:[#allocation28_spill] sm:$0xff] }
 0x1ab   : > { %8539 = vmatprep.mubr.bf16.mxu1 %v12254_v17  ;;  %8971 = vmatprep.mubr.bf16.mxu0 %v12202_v11  ;;  %v9804_v11 = vld [vmem:[%s11930_s3 + $0xd0] sm:$0xff]   ;;  %v5543_v17 = vshll.u32 %v11394_v60, 16 }
 0x1b2   : > { %8540 = vmatmul.mubr.bf16.vlgmr.msra.gmra.mrb[0].mxu1 %v12199_v1  ;;  %8972 = vmatmul.mubr.bf16.vlgmr.msra.gmra.mrb[0].mxu0 %v12204_v47  ;;  %v9805_v1 = vld [vmem:[%s11929_s2 + $0x210] sm:$0xff]   ;;  %v9808_v47 = vld [vmem:[%s11930_s3 + $0xe0] sm:$0xff]  }
 0x1b3   : > { %8572 = vmatpush3.bf16.msra.mxu1 %v9800_v19  ;;  %9004 = vmatpush3.bf16.msra.mxu0 %v9801_v52  ;;  %v9806_v19 = vld [vmem:[%s11930_s3 + $0xd8] sm:$0xff]   ;;  %v12257_v52 = vld [vmem:[#allocation22_spill] sm:$0xff] }
 0x1b4   : > { %8543 = vmatprep.mubr.bf16.mxu1 %v12201_v9  ;;  %8975 = vmatprep.mubr.bf16.mxu0 %v12206_v0  ;;  %v9807_v9 = vld [vmem:[%s11929_s2 + $0x218] sm:$0xff]   ;;  %v9811_v0 = vld [vmem:[%s11929_s2 + $0x228] sm:$0xff]  }
 0x1b5   : > { %8573 = vmatprep.subr.bf16.mxu1 %v9802_v4  ;;  %9005 = vmatprep.subr.bf16.mxu0 %v9803_v10 }
 0x1b7   : > { %8574 = vmatpush3.bf16.msra.mxu1 %v9802_v4  ;;  %9006 = vmatpush3.bf16.msra.mxu0 %v9803_v10  ;;  %v5536_v4 = vrot.slane %v5534_v51, 4  ;;  %v5539_v10 = vrot.slane %v5537_v26, 5  ;;  %v12272_v51 = vld [vmem:[#allocation4_spill] sm:$0xff]  ;;  %v9819_v26 = vld [vmem:[%s11930_s3 + $0x208] sm:$0xff]  }
 0x1b8   : > { %8575 = vmatprep.subr.bf16.mxu1 %v9804_v11  ;;  %9007 = vmatprep.subr.bf16.mxu0 %v9805_v1 }
 0x1ba   : > { %8544 = vmatmul.mubr.bf16.gmra.mrb[4].mxu1 %v12203_v6  ;;  %8976 = vmatmul.mubr.bf16.gmra.mrb[4].mxu0 %v12208_v12  ;;  %v9809_v6 = vld [vmem:[%s11929_s2 + $0x220] sm:$0xff]   ;;  %v12255_v12 = vld [vmem:[#allocation20_spill] sm:$0xff] }
 0x1bb   : > { %8547 = vmatprep.mubr.bf16.mxu1 %v12205_v40  ;;  %8979 = vmatprep.mubr.bf16.mxu0 %v12210_v8  ;;  %v9810_v40 = vld [vmem:[%s11930_s3 + $0xe8] sm:$0xff]   ;;  %v9812_v8 = vld [vmem:[%s11930_s3 + $0xf0] sm:$0xff]  }
 0x1bc   : > { %8576 = vmatpush3.bf16.msra.mxu1 %v9804_v11  ;;  %9008 = vmatpush3.bf16.msra.mxu0 %v9805_v1  ;;  %v5545_v11 = vrot.slane %v5543_v17, 5  ;;  %v5549_v1 = vrot.slane %v5547_v49, 4  ;;  %v12276_v49 = vld [vmem:[#allocation58_spill] sm:$0xff] }
 0x1bd   : > { %8577 = vmatprep.subr.bf16.mxu1 %v9806_v19  ;;  %9009 = vmatprep.subr.bf16.mxu0 %v9807_v9  ;;  %v9825_v17 = vld [vmem:[%s11930_s3 + $0x220] sm:$0xff]  }
 0x1c0   : > { %8578 = vmatpush3.bf16.msra.mxu1 %v9806_v19  ;;  %9010 = vmatpush3.bf16.msra.mxu0 %v9807_v9  ;;  %v11578_v19 = vld [vmem:[%s10056_s24 + $0xd4] sm:$0x1] }
 0x1c1   : > { %8579 = vmatprep.subr.bf16.mxu1 %v9808_v47  ;;  %9011 = vmatprep.subr.bf16.mxu0 %v9809_v6  ;;  %v12264_v9 = vld [vmem:[#allocation64_spill] sm:$0xff] }
 0x1c2   : > { %8548 = vmatmul.mubr.bf16.gmra.mrb[8].mxu1 %v12207_v3  ;;  %8980 = vmatmul.mubr.bf16.gmra.mrb[8].mxu0 %v12212_v45  ;;  %v9813_v3 = vld [vmem:[%s11929_s2 + $0x230] sm:$0xff]   ;;  %v12256_v45 = vld [vmem:[#allocation59_spill] sm:$0xff] }
 0x1c3   : > { %8551 = vmatprep.mubr.bf16.mxu1 %v12209_v15  ;;  %8983 = vmatprep.mubr.bf16.mxu0 %v12255_v12  ;;  %v9814_v15 = vld [vmem:[%s11930_s3 + $0xf8] sm:$0xff]   ;;  %v5550_v12 = vor.u32 %v5549_v1, %v5545_v11  ;;  %v9828_v1 = vld [vmem:[%s11929_s2 + $0x130] sm:$0xff]  }
 0x1c4   : > { %8580 = vmatpush3.bf16.msra.mxu1 %v9808_v47  ;;  %9012 = vmatpush3.bf16.msra.mxu0 %v9809_v6  ;;  %v12265_v47 = vld [vmem:[#allocation30_spill] sm:$0xff]  ;;  %v12266_v6 = vld [vmem:[#allocation65_spill] sm:$0xff] }
 0x1c5   : > { %8581 = vmatprep.subr.bf16.mxu1 %v9810_v40  ;;  %9013 = vmatprep.subr.bf16.mxu0 %v9811_v0 }
 0x1c8   : > { %8582 = vmatpush3.bf16.msra.mxu1 %v9810_v40  ;;  %9014 = vmatpush3.bf16.msra.mxu0 %v9811_v0  ;;  %v12267_v40 = vld [vmem:[#allocation32_spill] sm:$0xff]  ;;  %v5540_v0 = vor.u32 %v5539_v10, %v5536_v4  ;;  %v12277_v4 = vld [vmem:[#allocation13_spill] sm:$0xff]  ;;  %v9827_v10 = vld [vmem:[%s11930_s3 + $0x228] sm:$0xff]  }
 0x1c9   : > { %8583 = vmatprep.subr.bf16.mxu1 %v9812_v8  ;;  %9015 = vmatprep.subr.bf16.mxu0 %v9813_v3 }
 0x1ca   : > { %8552 = vmatmul.mubr.bf16.gmra.mrb[12].mxu1 %v12256_v45  ;;  %8984 = vmatmul.mubr.bf16.gmra.mrb[12].mxu0 %v12257_v52  ;;  %v12269_v52 = vld [vmem:[#allocation67_spill] sm:$0xff] }
 0x1cb   : > { %8555 = vmatprep.mubr.bf16.mxu1 %v12258_v37  ;;  %8987 = vmatprep.mubr.bf16.mxu0 %v12259_v29  ;;  %v12270_v37 = vld [vmem:[#allocation35_spill] sm:$0xff] }
 0x1cc   : > { %8584 = vmatpush3.bf16.msra.mxu1 %v9812_v8  ;;  %9016 = vmatpush3.bf16.msra.mxu0 %v9813_v3  ;;  %v5553_v8 = vshll.u32 %v11578_v19, 16  ;;  %v5541_v3 = vrot.slane %v5540_v0, 4  ;;  %v12282_v0 = vld [vmem:[#allocation23_spill] sm:$0xff] }
 0x1cd   : > { %8585 = vmatprep.subr.bf16.mxu1 %v9814_v15  ;;  %9017 = vmatprep.subr.bf16.mxu0 %v9815_v5 }
 0x1ce   : > { %v5555_v45 = vrot.slane %v5553_v8, 5  ;;  %v5546_v29 = vsel %vm10096_vm2, %v5541_v3, %v5545_v11  ;;  %v12278_v11 = vld [vmem:[#allocation15_spill] sm:$0xff]  ;;  %v7587_v8 = vrot.slane %v11297_v38, 9  ;;  %v12288_v38 = vld [vmem:[#allocation69_spill] sm:$0xff] }
 0x1d0   : > { %8586 = vmatpush3.bf16.msra.mxu1 %v9814_v15  ;;  %9018 = vmatpush3.bf16.msra.mxu0 %v9815_v5  ;;  %v5551_v15 = vrot.slane %v5550_v12, 4  ;;  %v12268_v5 = vld [vmem:[#allocation66_spill] sm:$0xff]  ;;  %v12283_v12 = vld [vmem:[#allocation25_spill] sm:$0xff] }
 0x1d1   : > { %8619 = vmatprep.subr.bf16.mxu1 %v9816_v33  ;;  %9051 = vmatprep.subr.bf16.mxu0 %v9817_v21 }
 0x1d2   : > { %8556 = vmatmul.mubr.bf16.gmra.mrb[16].mxu1 %v12260_v30  ;;  %8988 = vmatmul.mubr.bf16.gmra.mrb[16].mxu0 %v12261_v57  ;;  %v5556_v30 = vsel %vm10096_vm2, %v5551_v15, %v5555_v45  ;;  %v6087_v15 = vrot.slane %v11481_v27, 5  ;;  %v12287_v45 = vld [vmem:[#allocation37_spill] sm:$0xff]  ;;  %v12290_v27 = vld [vmem:[#allocation70_spill] sm:$0xff] }
 0x1d3   : > { %8559 = vmatprep.mubr.bf16.mxu1 %v12262_v23  ;;  %8991 = vmatprep.mubr.bf16.mxu0 %v12263_v31  ;;  %v7578_v57 = vcombine.low %v5546_v29, %v5556_v30  ;;  %v12271_v23 = vld [vmem:[#allocation2_spill] sm:$0xff]  ;;  %v12296_v29 = vld [vmem:[#allocation41_spill] sm:$0xff]  ;;  %v12300_v30 = vld [vmem:[#allocation48_spill] sm:$0xff] }
 0x1d4   : > { %v9824_v31 = vld [vmem:[%s11929_s2 + $0x120] sm:$0xff]  }
 0x1da   : > { %8560 = vmatmul.mubr.bf16.gmra.mrb[20].mxu1 %v12264_v9  ;;  %8992 = vmatmul.mubr.bf16.gmra.mrb[20].mxu0 %v12265_v47  ;;  %v9829_v9 = vld [vmem:[%s11930_s3 + $0x230] sm:$0xff]   ;;  %v9831_v47 = vld [vmem:[%s11930_s3 + $0x238] sm:$0xff]  }
 0x1db   : > { %8563 = vmatprep.mubr.bf16.mxu1 %v12266_v6  ;;  %8995 = vmatprep.mubr.bf16.mxu0 %v12267_v40  ;;  %v12280_v6 = vld [vmem:[#allocation19_spill] sm:$0xff]  ;;  %v12281_v40 = vld [vmem:[#allocation21_spill] sm:$0xff] }
 0x1e2   : > { %8564 = vmatmul.mubr.bf16.gmra.mrb[24].mxu1 %v12268_v5  ;;  %8996 = vmatmul.mubr.bf16.gmra.mrb[24].mxu0 %v12221_v61  ;;  %v9818_v61 = vld [vmem:[%s11929_s2 + $0x108] sm:$0xff]  }
 0x1e3   : > { %8567 = vmatprep.mubr.bf16.mxu1 %v12269_v52  ;;  %8999 = vmatprep.mubr.bf16.mxu0 %v12270_v37  ;;  %v12293_v5 = vld [vmem:[#allocation75_spill] sm:$0xff]  ;;  %v12294_v52 = vld [vmem:[#allocation74_spill] sm:$0xff] }
 0x1e4   : > { %v12295_v37 = vld [vmem:[#allocation43_spill] sm:$0xff] }
 0x1ea   : > { %8568 = vmatmul.mubr.bf16.gmra.mrb[28].mxu1 %v12271_v23  ;;  %9000 = vmatmul.mubr.bf16.gmra.mrb[28].mxu0 %v7578_v57  ;;  %v12301_v57 = vld [vmem:[#allocation53_spill] sm:$0xff]  ;;  %v12302_v23 = vld [vmem:[#allocation52_spill] sm:$0xff] }
 0x1eb   : > { %8587 = vmatprep.mubr.bf16.mxu1 %v12272_v51  ;;  %9019 = vmatprep.mubr.bf16.mxu0 %v12225_v41  ;;  %v12273_v41 = vld [vmem:[#allocation49_spill] sm:$0xff] }
 0x1ec   : > { %v12303_v51 = vld [vmem:[#allocation57_spill] sm:$0xff] }
 0x1f2   : > { %8588 = vmatmul.mubr.bf16.vlgmr.msra.gmra.mrb[0].mxu1 %v12222_v16  ;;  %9020 = vmatmul.mubr.bf16.vlgmr.msra.gmra.mrb[0].mxu0 %v12227_v43  ;;  %v9821_v16 = vld [vmem:[%s11930_s3 + $0x210] sm:$0xff]   ;;  %v12274_v43 = vld [vmem:[#allocation9_spill] sm:$0xff] }
 0x1f3   : > { %8620 = vmatpush3.bf16.msra.mxu1 %v9816_v33  ;;  %9052 = vmatpush3.bf16.msra.mxu0 %v9817_v21  ;;  %v9823_v33 = vld [vmem:[%s11930_s3 + $0x218] sm:$0xff]   ;;  %v12275_v21 = vld [vmem:[#allocation11_spill] sm:$0xff] }
 0x1f4   : > { %8591 = vmatprep.mubr.bf16.mxu1 %v12224_v22  ;;  %9023 = vmatprep.mubr.bf16.mxu0 %v12273_v41  ;;  %v9822_v22 = vld [vmem:[%s11929_s2 + $0x118] sm:$0xff]   ;;  %v7588_v41 = vrot.slane %v11391_v18, 9 }
 0x1f5   : > { %8621 = vmatprep.subr.bf16.mxu1 %v9818_v61  ;;  %9053 = vmatprep.subr.bf16.mxu0 %v9819_v26 }
 0x1f7   : > { %8622 = vmatpush3.bf16.msra.mxu1 %v9818_v61  ;;  %9054 = vmatpush3.bf16.msra.mxu0 %v9819_v26  ;;  %v12304_v61 = vld [vmem:[#allocation77_spill] sm:$0xff]  ;;  %v12305_v26 = vld [vmem:[#allocation79_spill] sm:$0xff] }
 0x1f8   : > { %8623 = vmatprep.subr.bf16.mxu1 %v9820_v48  ;;  %9055 = vmatprep.subr.bf16.mxu0 %v9821_v16 }
 0x1fa   : > { %8592 = vmatmul.mubr.bf16.gmra.mrb[4].mxu1 %v12274_v43  ;;  %9024 = vmatmul.mubr.bf16.gmra.mrb[4].mxu0 %v12231_v34  ;;  %v9826_v34 = vld [vmem:[%s11929_s2 + $0x128] sm:$0xff]   ;;  %v11720_v43 = vld [vmem:[%s11932_s5] ss:$0 sm:$0xff] }
 0x1fb   : > { %8595 = vmatprep.mubr.bf16.mxu1 %v12275_v21  ;;  %9027 = vmatprep.mubr.bf16.mxu0 %v12276_v49 }
 0x1fc   : > { %8624 = vmatpush3.bf16.msra.mxu1 %v9820_v48  ;;  %9056 = vmatpush3.bf16.msra.mxu0 %v9821_v16  ;;  %v6092_v48 = vrot.slane %v11394_v60, 5 }
 0x1fd   : > { %8625 = vmatprep.subr.bf16.mxu1 %v9822_v22  ;;  %9057 = vmatprep.subr.bf16.mxu0 %v9823_v33 }
 0x1fe   : > { %v6094_v16 = vrot.slane %v6092_v48, 4 }
 0x200   : > { %8626 = vmatpush3.bf16.msra.mxu1 %v9822_v22  ;;  %9058 = vmatpush3.bf16.msra.mxu0 %v9823_v33  ;;  %v6095_v22 = vrot.slane %v11578_v19, 5 }
 0x201   : > { %8627 = vmatprep.subr.bf16.mxu1 %v9824_v31  ;;  %9059 = vmatprep.subr.bf16.mxu0 %v9825_v17 }
 0x202   : > { %8596 = vmatmul.mubr.bf16.gmra.mrb[8].mxu1 %v12277_v4  ;;  %9028 = vmatmul.mubr.bf16.gmra.mrb[8].mxu0 %v12235_v7  ;;  %v9830_v7 = vld [vmem:[%s11929_s2 + $0x138] sm:$0xff]  }
 0x203   : > { %8599 = vmatprep.mubr.bf16.mxu1 %v12278_v11  ;;  %9031 = vmatprep.mubr.bf16.mxu0 %v10629_v53  ;;  %v12279_v53 = vld [vmem:[#allocation17_spill] sm:$0xff] }
 0x204   : > { %8628 = vmatpush3.bf16.msra.mxu1 %v9824_v31  ;;  %9060 = vmatpush3.bf16.msra.mxu0 %v9825_v17 }
 0x205   : > { %8629 = vmatprep.subr.bf16.mxu1 %v9826_v34  ;;  %9061 = vmatprep.subr.bf16.mxu0 %v9827_v10 }
 0x208   : > { %8630 = vmatpush3.bf16.msra.mxu1 %v9826_v34  ;;  %9062 = vmatpush3.bf16.msra.mxu0 %v9827_v10 }
 0x209   : > { %8631 = vmatprep.subr.bf16.mxu1 %v9828_v1  ;;  %9063 = vmatprep.subr.bf16.mxu0 %v9829_v9 }
 0x20a   : > { %8600 = vmatmul.mubr.bf16.gmra.mrb[12].mxu1 %v12279_v53  ;;  %9032 = vmatmul.mubr.bf16.gmra.mrb[12].mxu0 %v10643_v32  ;;  %v12284_v32 = vld [vmem:[#allocation27_spill] sm:$0xff] }
 0x20b   : > { %8603 = vmatprep.mubr.bf16.mxu1 %v12280_v6  ;;  %9035 = vmatprep.mubr.bf16.mxu0 %v10654_v39  ;;  %v6084_v39 = vrot.slane %v11300_v44, 5 }
 0x20c   : > { %8632 = vmatpush3.bf16.msra.mxu1 %v9828_v1  ;;  %9064 = vmatpush3.bf16.msra.mxu0 %v9829_v9 }
 0x20d   : > { %8633 = vmatprep.subr.bf16.mxu1 %v9830_v7  ;;  %9065 = vmatprep.subr.bf16.mxu0 %v9831_v47  ;;  %v6086_v3 = vrot.slane %v6084_v39, 4 }
 0x210   : > { %8634 = vmatpush3.bf16.msra.mxu1 %v9830_v7  ;;  %9066 = vmatpush3.bf16.msra.mxu0 %v9831_v47 }
 0x212   : > { %8604 = vmatmul.mubr.bf16.gmra.mrb[16].mxu1 %v12281_v40  ;;  %9036 = vmatmul.mubr.bf16.gmra.mrb[16].mxu0 %v10674_v28  ;;  %v12285_v28 = vld [vmem:[#allocation68_spill] sm:$0xff] }
 0x213   : > { %8607 = vmatprep.mubr.bf16.mxu1 %v12282_v0  ;;  %9039 = vmatprep.mubr.bf16.mxu0 %v10685_v59 }
 0x21a   : > { %8608 = vmatmul.mubr.bf16.gmra.mrb[20].mxu1 %v12283_v12  ;;  %9040 = vmatmul.mubr.bf16.gmra.mrb[20].mxu0 %v10702_v2  ;;  %v6085_v2 = vsel %vm10390_vm5, %v7587_v8, %v6084_v39 }
 0x21b   : > { %8611 = vmatprep.mubr.bf16.mxu1 %v12284_v32  ;;  %9043 = vmatprep.mubr.bf16.mxu0 %v10727_v63  ;;  %v6088_v63 = vsel %vm10390_vm5, %v6086_v3, %v6087_v15 }
 0x21c   : > { %v7605_v44 = vcombine.low %v6085_v2, %v6088_v63 }
 0x222   : > { %8612 = vmatmul.mubr.bf16.gmra.mrb[24].mxu1 %v12241_v62  ;;  %9044 = vmatmul.mubr.bf16.gmra.mrb[24].mxu0 %v10743_v13  ;;  %v12289_v13 = vld [vmem:[#allocation71_spill] sm:$0xff]  ;;  %v12292_v62 = vld [vmem:[#allocation72_spill] sm:$0xff] }
 0x223   : > { %8615 = vmatprep.mubr.bf16.mxu1 %v12243_v46  ;;  %9047 = vmatprep.mubr.bf16.mxu0 %v12285_v28  ;;  %v12291_v46 = vld [vmem:[#allocation73_spill] sm:$0xff] }
 0x22a   : > { %8616 = vmatmul.mubr.bf16.gmra.mrb[28].mxu1 %v12287_v45  ;;  %9048 = vmatmul.mubr.bf16.gmra.mrb[28].mxu0 %v7605_v44 }
 0x22b   : > { %8635 = vmatprep.mubr.bf16.mxu1 %v12288_v38  ;;  %9067 = vmatprep.mubr.bf16.mxu0 %v10803_v55  ;;  %v12297_v55 = vld [vmem:[#allocation47_spill] sm:$0xff] }
 0x232   : > { %8636 = vmatmul.mubr.bf16.vlgmr.msra.gmra.mrb[0].mxu1 %v10832_v25  ;;  %9068 = vmatmul.mubr.bf16.vlgmr.msra.gmra.mrb[0].mxu0 %v10823_v50  ;;  %v12298_v25 = vld [vmem:[#allocation44_spill] sm:$0xff]  ;;  %v12299_v50 = vld [vmem:[#allocation51_spill] sm:$0xff] }
 0x233   : > { %8639 = vmatprep.mubr.bf16.mxu1 %v12289_v13  ;;  %9071 = vmatprep.mubr.bf16.mxu0 %v12290_v27 }
 0x23a   : > { %8640 = vmatmul.mubr.bf16.gmra.mrb[4].mxu1 %v12291_v46  ;;  %9072 = vmatmul.mubr.bf16.gmra.mrb[4].mxu0 %v12292_v62 }
 0x23b   : > { %8643 = vmatprep.mubr.bf16.mxu1 %v12293_v5  ;;  %9075 = vmatprep.mubr.bf16.mxu0 %v12294_v52 }
 0x242   : > { %8644 = vmatmul.mubr.bf16.gmra.mrb[8].mxu1 %v12295_v37  ;;  %9076 = vmatmul.mubr.bf16.gmra.mrb[8].mxu0 %v12296_v29 }
 0x243   : > { %8647 = vmatprep.mubr.bf16.mxu1 %v12297_v55  ;;  %9079 = vmatprep.mubr.bf16.mxu0 %v12298_v25 }
 0x24a   : > { %8648 = vmatmul.mubr.bf16.gmra.mrb[12].mxu1 %v12299_v50  ;;  %9080 = vmatmul.mubr.bf16.gmra.mrb[12].mxu0 %v12300_v30 }
 0x24b   : > { %8651 = vmatprep.mubr.bf16.mxu1 %v12301_v57  ;;  %9083 = vmatprep.mubr.bf16.mxu0 %v12302_v23 }
 0x252   : > { %8652 = vmatmul.mubr.bf16.gmra.mrb[16].mxu1 %v12303_v51  ;;  %9084 = vmatmul.mubr.bf16.gmra.mrb[16].mxu0 %v12249_v56  ;;  %v12306_v56 = vld [vmem:[#allocation3_spill] sm:$0xff] }
 0x253   : > { %8655 = vmatprep.mubr.bf16.mxu1 %v12304_v61  ;;  %9087 = vmatprep.mubr.bf16.mxu0 %v12250_v58  ;;  %v6093_v58 = vsel %vm10390_vm5, %v7588_v41, %v6092_v48 }
 0x25a   : > { %8656 = vmatmul.mubr.bf16.gmra.mrb[20].mxu1 %v12305_v26  ;;  %9088 = vmatmul.mubr.bf16.gmra.mrb[20].mxu0 %v12251_v20 }
 0x25b   : > { %8659 = vmatprep.mubr.bf16.mxu1 %v11134_v24  ;;  %9091 = vmatprep.mubr.bf16.mxu0 %v12252_v36  ;;  %v6096_v24 = vsel %vm10390_vm5, %v6094_v16, %v6095_v22 }
 0x25c   : > { %v7630_v60 = vcombine.low %v6093_v58, %v6096_v24 }
 0x262   : > { %8660 = vmatmul.mubr.bf16.gmra.mrb[24].mxu1 %v11153_v35  ;;  %9092 = vmatmul.mubr.bf16.gmra.mrb[24].mxu0 %v12253_v14  ;;  %v11715_v35 = vld [vmem:[%s11931_s4] ss:$0 sm:$0xff] }
 0x263   : > { %8663 = vmatprep.mubr.bf16.mxu1 %v11188_v42  ;;  %9095 = vmatprep.mubr.bf16.mxu0 %v12306_v56 }
 0x26a   : > { %8664 = vmatmul.mubr.bf16.gmra.mrb[28].mxu1 %v11492_v54  ;;  %9096 = vmatmul.mubr.bf16.gmra.mrb[28].mxu0 %v7630_v60 }
 0x305   : > { %v8637_v18 = vpop.f32.mrb[0].mxu1  ;;  %v9069_v20 = vpop.f32.mrb[0].mxu0 }
 0x306   : > { %v4020_v42 = vpop.f32.mrb[1].mxu1  ;;  %v9099_v36 = vadd.f32 %v9069_v20, %v8637_v18  ;;  %v6462_v14 = vpop.f32.mrb[1].mxu0 }
 0x307   : > { %v8638_v19 = vpop.f32.mrb[2].mxu1  ;;  %v9100_v33 = vadd.f32 %v6462_v14, %v4020_v42  ;;  %v9070_v21 = vpop.f32.mrb[2].mxu0 }
 0x308   : > { %v4023_v54 = vpop.f32.mrb[3].mxu1  ;;  %v6630_v49 = vmul.f32 %v9099_v36, %v11715_v35  ;;  %v9101_v31 = vadd.f32 %v9070_v21, %v8638_v19  ;;  %v6465_v17 = vpop.f32.mrb[3].mxu0 }
 0x309   : > { %v6628_v34 = vmul.f32 %v9100_v33, %v11715_v35  ;;  %v9102_v4 = vadd.f32 %v6465_v17, %v4023_v54 }
 0x30a   : > { %v11725_v10 = vadd.f32 %v11720_v43, %v6630_v49  ;;  %v6631_v11 = vmul.f32 %v9101_v31, %v11715_v35 }
 0x30b   : > { %v11729_v1 = vadd.f32 %v11720_v43, %v6628_v34  ;;  %v6629_v9 = vmul.f32 %v9102_v4, %v11715_v35 }
 0x30c   : > { %v6701_v7 = vmul.f32 0.5, %v11725_v10  ;;  %v11734_v53 = vadd.f32 %v11720_v43, %v6631_v11 }
 0x30d   : > { %v8641_v47 = vpop.f32.mrb[4].mxu1  ;;  %v6699_v6 = vmul.f32 0.5, %v11729_v1  ;;  %v11738_v40 = vadd.f32 %v11720_v43, %v6629_v9  ;;  %v9073_v0 = vpop.f32.mrb[4].mxu0 }
 0x30e   : > { %v4036_v12 = vpop.f32.mrb[5].mxu1  ;;  %9832 = vtanh.f32 %v6701_v7  ;;  %v6702_v32 = vmul.f32 0.5, %v11734_v53  ;;  %v9103_v39 = vadd.f32 %v9073_v0, %v8641_v47  ;;  %v6478_v8 = vpop.f32.mrb[5].mxu0 }
 0x30f   : > { %v8642_v3 = vpop.f32.mrb[6].mxu1  ;;  %9834 = vtanh.f32 %v6699_v6  ;;  %v6700_v15 = vmul.f32 0.5, %v11738_v40  ;;  %v9104_v28 = vadd.f32 %v6478_v8, %v4036_v12  ;;  %v9074_v59 = vpop.f32.mrb[6].mxu0 }
 0x310   : > { %v4039_v2 = vpop.f32.mrb[7].mxu1  ;;  %9836 = vtanh.f32 %v6702_v32  ;;  %v6634_v63 = vmul.f32 %v9103_v39, %v11715_v35  ;;  %v9105_v44 = vadd.f32 %v9074_v59, %v8642_v3  ;;  %v6481_v45 = vpop.f32.mrb[7].mxu0 }
 0x311   : > { %9838 = vtanh.f32 %v6700_v15  ;;  %v6632_v38 = vmul.f32 %v9104_v28, %v11715_v35  ;;  %v9106_v13 = vadd.f32 %v6481_v45, %v4039_v2 }
 0x312   : > { %v11745_v27 = vadd.f32 %v11720_v43, %v6634_v63  ;;  %v6635_v46 = vmul.f32 %v9105_v44, %v11715_v35 }
 0x313   : > { %v11749_v62 = vadd.f32 %v11720_v43, %v6632_v38  ;;  %v6633_v5 = vmul.f32 %v9106_v13, %v11715_v35 }
 0x314   : > { %v6705_v52 = vmul.f32 0.5, %v11745_v27  ;;  %v11754_v37 = vadd.f32 %v11720_v43, %v6635_v46 }
 0x315   : > { %v8645_v29 = vpop.f32.mrb[8].mxu1  ;;  %v6703_v55 = vmul.f32 0.5, %v11749_v62  ;;  %v11758_v25 = vadd.f32 %v11720_v43, %v6633_v5  ;;  %v9077_v50 = vpop.f32.mrb[8].mxu0 }
 0x316   : > { %v4052_v30 = vpop.f32.mrb[9].mxu1  ;;  %9840 = vtanh.f32 %v6705_v52  ;;  %v6706_v57 = vmul.f32 0.5, %v11754_v37  ;;  %v9107_v23 = vadd.f32 %v9077_v50, %v8645_v29  ;;  %v6494_v51 = vpop.f32.mrb[9].mxu0 }
 0x317   : > { %v8646_v61 = vpop.f32.mrb[10].mxu1  ;;  %9842 = vtanh.f32 %v6703_v55  ;;  %v6704_v26 = vmul.f32 0.5, %v11758_v25  ;;  %v9108_v48 = vadd.f32 %v6494_v51, %v4052_v30  ;;  %v9078_v41 = vpop.f32.mrb[10].mxu0 }
 0x318   : > { %v4055_v16 = vpop.f32.mrb[11].mxu1  ;;  %v9833_v22 = vpop.eup %9832  ;;  %9844 = vtanh.f32 %v6706_v57  ;;  %v6638_v56 = vmul.f32 %v9107_v23, %v11715_v35  ;;  %v9109_v58 = vadd.f32 %v9078_v41, %v8646_v61 }
 0x319   : > { %v6497_v24 = vpop.f32.mrb[11].mxu0  ;;  %v9835_v60 = vpop.eup %9834  ;;  %v6765_v18 = vmul.f32 0.5, %v9833_v22  ;;  %9846 = vtanh.f32 %v6704_v26  ;;  %v6636_v20 = vmul.f32 %v9108_v48, %v11715_v35 }
 0x31a   : > { %v9110_v42 = vadd.f32 %v6497_v24, %v4055_v16  ;;  %v9837_v36 = vpop.eup %9836  ;;  %v6763_v14 = vmul.f32 0.5, %v9835_v60  ;;  %v11765_v19 = vadd.f32 %v11720_v43, %v6638_v56  ;;  %v6639_v33 = vmul.f32 %v9109_v58, %v11715_v35 }
 0x31b   : > { %v9839_v21 = vpop.eup %9838  ;;  %v6797_v54 = vadd.f32 0.5, %v6765_v18  ;;  %v6766_v49 = vmul.f32 0.5, %v9837_v36  ;;  %v11769_v31 = vadd.f32 %v11720_v43, %v6636_v20 }
 0x31c   : > { %v6637_v17 = vmul.f32 %v9110_v42, %v11715_v35  ;;  %v6795_v34 = vadd.f32 0.5, %v6763_v14  ;;  %v6764_v4 = vmul.f32 0.5, %v9839_v21  ;;  %v6709_v11 = vmul.f32 0.5, %v11765_v19 }
 0x31d   : > { %v11774_v9 = vadd.f32 %v11720_v43, %v6639_v33  ;;  %v8649_v7 = vpop.f32.mrb[12].mxu1  ;;  %v6829_v47 = vmul.f32 %v6797_v54, %v11725_v10  ;;  %v6798_v6 = vadd.f32 0.5, %v6766_v49  ;;  %v6707_v0 = vmul.f32 0.5, %v11769_v31  ;;  %v9081_v32 = vpop.f32.mrb[12].mxu0 }
 0x31e   : > { %v11780_v12 = vadd.f32 %v11720_v43, %v6637_v17  ;;  %v4068_v39 = vpop.f32.mrb[13].mxu1  ;;  %v6827_v8 = vmul.f32 %v6795_v34, %v11729_v1  ;;  %v6796_v3 = vadd.f32 0.5, %v6764_v4  ;;  %9848 = vtanh.f32 %v6709_v11  ;;  %v6510_v28 = vpop.f32.mrb[13].mxu0 }
 0x31f   : > { %v6710_v15 = vmul.f32 0.5, %v11774_v9  ;;  %v8650_v59 = vpop.f32.mrb[14].mxu1  ;;  %v6830_v2 = vmul.f32 %v6798_v6, %v11734_v53  ;;  %9850 = vtanh.f32 %v6707_v0  ;;  %v9111_v63 = vadd.f32 %v9081_v32, %v8649_v7  ;;  %v9082_v44 = vpop.f32.mrb[14].mxu0 }
 0x320   : > { %v6708_v10 = vmul.f32 0.5, %v11780_v12  ;;  %v4071_v45 = vpop.f32.mrb[15].mxu1  ;;  %v9841_v38 = vpop.eup %9840  ;;  %v6828_v1 = vmul.f32 %v6796_v3, %v11738_v40  ;;  %v9112_v13 = vadd.f32 %v6510_v28, %v4068_v39  ;;  %v9113_v46 = vadd.f32 %v9082_v44, %v8650_v59 }
 0x321   : > { %9852 = vtanh.f32 %v6710_v15  ;;  %v6513_v5 = vpop.f32.mrb[15].mxu0  ;;  %v9843_v53 = vpop.eup %9842  ;;  %v7716_v52 = vpack.c.bf16 %v6830_v2, %v6829_v47  ;;  %v6769_v29 = vmul.f32 0.5, %v9841_v38  ;;  %v6642_v55 = vmul.f32 %v9111_v63, %v11715_v35 }
 0x322   : > { %9854 = vtanh.f32 %v6708_v10  ;;  %v9845_v50 = vpop.eup %9844  ;;  %v7711_v30 = vpack.c.bf16 %v6828_v1, %v6827_v8  ;;  %v6767_v57 = vmul.f32 0.5, %v9843_v53  ;;  %v6640_v23 = vmul.f32 %v9112_v13, %v11715_v35 }
 0x323   : > { %v6643_v51 = vmul.f32 %v9113_v46, %v11715_v35  ;;  %v9847_v40 = vpop.eup %9846  ;;  %7788 = vst [vmem:[%s11789_s15 + $0x8] sm:$0xff] %v7716_v52   ;;  %v6801_v61 = vadd.f32 0.5, %v6769_v29  ;;  %v6770_v26 = vmul.f32 0.5, %v9845_v50  ;;  %v11797_v48 = vadd.f32 %v11720_v43, %v6642_v55 }
 0x324   : > { %v9114_v41 = vadd.f32 %v6513_v5, %v4071_v45  ;;  %7712 = vst [vmem:[%s11789_s15] sm:$0xff] %v7711_v30   ;;  %v6799_v16 = vadd.f32 0.5, %v6767_v57  ;;  %v6768_v22 = vmul.f32 0.5, %v9847_v40  ;;  %v11801_v56 = vadd.f32 %v11720_v43, %v6640_v23 }
 0x325   : > { %v11804_v58 = vadd.f32 %v11720_v43, %v6643_v51  ;;  %v8653_v24 = vpop.f32.mrb[16].mxu1  ;;  %v6833_v60 = vmul.f32 %v6801_v61, %v11745_v27  ;;  %v6802_v18 = vadd.f32 0.5, %v6770_v26  ;;  %v6713_v20 = vmul.f32 0.5, %v11797_v48  ;;  %v9085_v36 = vpop.f32.mrb[16].mxu0 }
 0x326   : > { %v6641_v42 = vmul.f32 %v9114_v41, %v11715_v35  ;;  %v4084_v14 = vpop.f32.mrb[17].mxu1  ;;  %v6831_v33 = vmul.f32 %v6799_v16, %v11749_v62  ;;  %v6800_v21 = vadd.f32 0.5, %v6768_v22  ;;  %v6711_v54 = vmul.f32 0.5, %v11801_v56  ;;  %v6526_v17 = vpop.f32.mrb[17].mxu0 }
 0x327   : > { %v6714_v49 = vmul.f32 0.5, %v11804_v58  ;;  %v8654_v34 = vpop.f32.mrb[18].mxu1  ;;  %v6834_v4 = vmul.f32 %v6802_v18, %v11754_v37  ;;  %9856 = vtanh.f32 %v6713_v20  ;;  %v9115_v11 = vadd.f32 %v9085_v36, %v8653_v24  ;;  %v9086_v7 = vpop.f32.mrb[18].mxu0 }
 0x328   : > { %v11814_v27 = vadd.f32 %v11720_v43, %v6641_v42  ;;  %v4087_v47 = vpop.f32.mrb[19].mxu1  ;;  %v9849_v6 = vpop.eup %9848  ;;  %v6832_v0 = vmul.f32 %v6800_v21, %v11758_v25  ;;  %9858 = vtanh.f32 %v6711_v54  ;;  %v9116_v62 = vadd.f32 %v6526_v17, %v4084_v14 }
 0x329   : > { %v9117_v32 = vadd.f32 %v9086_v7, %v8654_v34  ;;  %v6529_v39 = vpop.f32.mrb[19].mxu0  ;;  %v9851_v8 = vpop.eup %9850  ;;  %v7726_v3 = vpack.c.bf16 %v6834_v4, %v6833_v60  ;;  %v6773_v15 = vmul.f32 0.5, %v9849_v6  ;;  %9860 = vtanh.f32 %v6714_v49 }
 0x32a   : > { %v6712_v37 = vmul.f32 0.5, %v11814_v27  ;;  %v7721_v59 = vpack.c.bf16 %v6832_v0, %v6831_v33  ;;  %v6771_v2 = vmul.f32 0.5, %v9851_v8  ;;  %v6646_v10 = vmul.f32 %v9115_v11, %v11715_v35 }
 0x32b   : > { %v9853_v28 = vpop.eup %9852  ;;  %v6644_v63 = vmul.f32 %v9116_v62, %v11715_v35  ;;  %7790 = vst [vmem:[%s11789_s15 + $0x18] sm:$0xff] %v7726_v3   ;;  %v6805_v44 = vadd.f32 0.5, %v6773_v15  ;;  %v6647_v38 = vmul.f32 %v9117_v32, %v11715_v35  ;;  %v9118_v50 = vadd.f32 %v6529_v39, %v4087_v47 }
 0x32c   : > { %v9855_v25 = vpop.eup %9854  ;;  %v6774_v45 = vmul.f32 0.5, %v9853_v28  ;;  %9862 = vtanh.f32 %v6712_v37  ;;  %7789 = vst [vmem:[%s11789_s15 + $0x10] sm:$0xff] %v7721_v59   ;;  %v6803_v1 = vadd.f32 0.5, %v6771_v2  ;;  %v11824_v46 = vadd.f32 %v11720_v43, %v6646_v10 }
 0x32d   : > { %v6772_v13 = vmul.f32 0.5, %v9855_v25  ;;  %v11827_v5 = vadd.f32 %v11720_v43, %v6644_v63  ;;  %v8657_v53 = vpop.f32.mrb[20].mxu1  ;;  %v6837_v52 = vmul.f32 %v6805_v44, %v11765_v19  ;;  %v11831_v55 = vadd.f32 %v11720_v43, %v6647_v38  ;;  %v9089_v30 = vpop.f32.mrb[20].mxu0 }
 0x32e   : > { %v6806_v29 = vadd.f32 0.5, %v6774_v45  ;;  %v4100_v57 = vpop.f32.mrb[21].mxu1  ;;  %v6835_v23 = vmul.f32 %v6803_v1, %v11769_v31  ;;  %v6717_v40 = vmul.f32 0.5, %v11824_v46  ;;  %v6542_v26 = vpop.f32.mrb[21].mxu0  ;;  %v6645_v22 = vmul.f32 %v9118_v50, %v11715_v35 }
 0x32f   : > { %v6804_v51 = vadd.f32 0.5, %v6772_v13  ;;  %v6715_v61 = vmul.f32 0.5, %v11827_v5  ;;  %v8658_v41 = vpop.f32.mrb[22].mxu1  ;;  %v6718_v19 = vmul.f32 0.5, %v11831_v55  ;;  %v9119_v24 = vadd.f32 %v9089_v30, %v8657_v53  ;;  %v9090_v60 = vpop.f32.mrb[22].mxu0 }
 0x330   : > { %v6838_v16 = vmul.f32 %v6806_v29, %v11774_v9  ;;  %v4103_v18 = vpop.f32.mrb[23].mxu1  ;;  %9864 = vtanh.f32 %v6717_v40  ;;  %v9120_v31 = vadd.f32 %v6542_v26, %v4100_v57  ;;  %v9121_v42 = vadd.f32 %v9090_v60, %v8658_v41  ;;  %v6545_v36 = vpop.f32.mrb[23].mxu0 }
 0x331   : > { %v6836_v20 = vmul.f32 %v6804_v51, %v11780_v12  ;;  %v9857_v14 = vpop.eup %9856  ;;  %9866 = vtanh.f32 %v6715_v61  ;;  %v11841_v9 = vadd.f32 %v11720_v43, %v6645_v22  ;;  %v6650_v21 = vmul.f32 %v9119_v24, %v11715_v35 }
 0x332   : > { %v7736_v33 = vpack.c.bf16 %v6838_v16, %v6837_v52  ;;  %v9859_v54 = vpop.eup %9858  ;;  %v6777_v17 = vmul.f32 0.5, %v9857_v14  ;;  %9868 = vtanh.f32 %v6718_v19  ;;  %v6648_v12 = vmul.f32 %v9120_v31, %v11715_v35 }
 0x333   : > { %v7731_v49 = vpack.c.bf16 %v6836_v20, %v6835_v23  ;;  %v9861_v34 = vpop.eup %9860  ;;  %v6775_v4 = vmul.f32 0.5, %v9859_v54  ;;  %v6716_v11 = vmul.f32 0.5, %v11841_v9  ;;  %v11848_v7 = vadd.f32 %v11720_v43, %v6650_v21 }
 0x334   : > { %7792 = vst [vmem:[%s11789_s15 + $0x28] sm:$0xff] %v7736_v33   ;;  %v6651_v47 = vmul.f32 %v9121_v42, %v11715_v35  ;;  %v6809_v6 = vadd.f32 0.5, %v6777_v17  ;;  %v6778_v0 = vmul.f32 0.5, %v9861_v34  ;;  %v11853_v62 = vadd.f32 %v11720_v43, %v6648_v12 }
 0x335   : > { %7791 = vst [vmem:[%s11789_s15 + $0x20] sm:$0xff] %v7731_v49   ;;  %v9122_v32 = vadd.f32 %v6545_v36, %v4103_v18  ;;  %v8661_v39 = vpop.f32.mrb[24].mxu1  ;;  %v6807_v3 = vadd.f32 0.5, %v6775_v4  ;;  %9870 = vtanh.f32 %v6716_v11  ;;  %v6721_v15 = vmul.f32 0.5, %v11848_v7  ;;  %v9093_v28 = vpop.f32.mrb[24].mxu0 }
 0x336   : > { %v9863_v8 = vpop.eup %9862  ;;  %v11857_v37 = vadd.f32 %v11720_v43, %v6651_v47  ;;  %v4116_v59 = vpop.f32.mrb[25].mxu1  ;;  %v6841_v2 = vmul.f32 %v6809_v6, %v11797_v48  ;;  %v6810_v10 = vadd.f32 0.5, %v6778_v0  ;;  %v6719_v25 = vmul.f32 0.5, %v11853_v62 }
 0x337   : > { %v6776_v63 = vmul.f32 0.5, %v9863_v8  ;;  %v6558_v44 = vpop.f32.mrb[25].mxu0  ;;  %v8662_v45 = vpop.f32.mrb[26].mxu1  ;;  %v6839_v38 = vmul.f32 %v6807_v3, %v11801_v56  ;;  %9872 = vtanh.f32 %v6721_v15  ;;  %v6649_v13 = vmul.f32 %v9122_v32, %v11715_v35 }
 0x338   : > { %v6722_v1 = vmul.f32 0.5, %v11857_v37  ;;  %v9094_v53 = vpop.f32.mrb[26].mxu0  ;;  %v4119_v52 = vpop.f32.mrb[27].mxu1  ;;  %v6842_v29 = vmul.f32 %v6810_v10, %v11804_v58  ;;  %9874 = vtanh.f32 %v6719_v25  ;;  %v9123_v48 = vadd.f32 %v9093_v28, %v8661_v39 }
 0x339   : > { %v6808_v50 = vadd.f32 0.5, %v6776_v63  ;;  %v6561_v30 = vpop.f32.mrb[27].mxu0  ;;  %v11866_v57 = vadd.f32 %v11720_v43, %v6649_v13  ;;  %v9124_v23 = vadd.f32 %v6558_v44, %v4116_v59  ;;  %v9125_v56 = vadd.f32 %v9094_v53, %v8662_v45 }
 0x33a   : > { %9876 = vtanh.f32 %v6722_v1  ;;  %v9865_v51 = vpop.eup %9864  ;;  %v7746_v40 = vpack.c.bf16 %v6842_v29, %v6841_v2  ;;  %v6654_v26 = vmul.f32 %v9123_v48, %v11715_v35  ;;  %v9126_v41 = vadd.f32 %v6561_v30, %v4119_v52 }
 0x33b   : > { %v6840_v61 = vmul.f32 %v6808_v50, %v11814_v27  ;;  %v9867_v16 = vpop.eup %9866  ;;  %v6781_v58 = vmul.f32 0.5, %v9865_v51  ;;  %v6720_v19 = vmul.f32 0.5, %v11866_v57  ;;  %v6652_v22 = vmul.f32 %v9124_v23, %v11715_v35 }
 0x33c   : > { %v6655_v24 = vmul.f32 %v9125_v56, %v11715_v35  ;;  %v9869_v60 = vpop.eup %9868  ;;  %7794 = vst [vmem:[%s11789_s15 + $0x38] sm:$0xff] %v7746_v40   ;;  %v6779_v20 = vmul.f32 0.5, %v9867_v16  ;;  %v11875_v31 = vadd.f32 %v11720_v43, %v6654_v26  ;;  %v6653_v27 = vmul.f32 %v9126_v41, %v11715_v35 }
 0x33d   : > { %v7741_v18 = vpack.c.bf16 %v6840_v61, %v6839_v38  ;;  %v8665_v42 = vpop.f32.mrb[28].mxu1  ;;  %v6813_v36 = vadd.f32 0.5, %v6781_v58  ;;  %v6782_v14 = vmul.f32 0.5, %v9869_v60  ;;  %9878 = vtanh.f32 %v6720_v19  ;;  %v9097_v21 = vpop.f32.mrb[28].mxu0 }
 0x33e   : > { %v11879_v33 = vadd.f32 %v11720_v43, %v6652_v22  ;;  %v4132_v54 = vpop.f32.mrb[29].mxu1  ;;  %v6811_v49 = vadd.f32 0.5, %v6779_v20  ;;  %v6725_v17 = vmul.f32 0.5, %v11875_v31  ;;  %v11884_v12 = vadd.f32 %v11720_v43, %v6655_v24  ;;  %v6574_v4 = vpop.f32.mrb[29].mxu0 }
 0x33f   : > { %7793 = vst [vmem:[%s11789_s15 + $0x30] sm:$0xff] %v7741_v18   ;;  %v11887_v34 = vadd.f32 %v11720_v43, %v6653_v27  ;;  %v8666_v11 = vpop.f32.mrb[30].mxu1  ;;  %v9871_v47 = vpop.eup %9870  ;;  %v6845_v6 = vmul.f32 %v6813_v36, %v11824_v46  ;;  %v6814_v0 = vadd.f32 0.5, %v6782_v14  ;;  %v9127_v39 = vadd.f32 %v9097_v21, %v8665_v42 }
 0x340   : > { %v6723_v32 = vmul.f32 0.5, %v11879_v33  ;;  %v9098_v8 = vpop.f32.mrb[30].mxu0  ;;  %v4135_v3 = vpop.f32.mrb[31].mxu1  ;;  %v6843_v15 = vmul.f32 %v6811_v49, %v11827_v5  ;;  %v6780_v28 = vmul.f32 0.5, %v9871_v47  ;;  %9880 = vtanh.f32 %v6725_v17 }
 0x341   : > { %v6726_v59 = vmul.f32 0.5, %v11884_v12  ;;  %v6577_v2 = vpop.f32.mrb[31].mxu0  ;;  %v9873_v10 = vpop.eup %9872  ;;  %v6846_v63 = vmul.f32 %v6814_v0, %v11831_v55  ;;  %v6724_v25 = vmul.f32 0.5, %v11887_v34  ;;  %v6658_v46 = vmul.f32 %v9127_v39, %v11715_v35 }
 0x342   : > { %9882 = vtanh.f32 %v6723_v32  ;;  %v9875_v44 = vpop.eup %9874  ;;  %v6812_v45 = vadd.f32 0.5, %v6780_v28  ;;  %v6785_v38 = vmul.f32 0.5, %v9873_v10  ;;  %v9128_v1 = vadd.f32 %v6574_v4, %v4132_v54 }
 0x343   : > { %9884 = vtanh.f32 %v6726_v59  ;;  %v7756_v13 = vpack.c.bf16 %v6846_v63, %v6845_v6  ;;  %v6783_v53 = vmul.f32 0.5, %v9875_v44  ;;  %v11897_v52 = vadd.f32 %v11720_v43, %v6658_v46 }
 0x344   : > { %v9877_v5 = vpop.eup %9876  ;;  %9886 = vtanh.f32 %v6724_v25  ;;  %v6844_v55 = vmul.f32 %v6812_v45, %v11841_v9  ;;  %v6817_v29 = vadd.f32 0.5, %v6785_v38  ;;  %v6656_v48 = vmul.f32 %v9128_v1, %v11715_v35 }
 0x345   : > { %v6786_v50 = vmul.f32 0.5, %v9877_v5  ;;  %7796 = vst [vmem:[%s11789_s15 + $0x48] sm:$0xff] %v7756_v13   ;;  %v6729_v30 = vmul.f32 0.5, %v11897_v52  ;;  %v9129_v23 = vadd.f32 %v9098_v8, %v8666_v11  ;;  %v9130_v56 = vadd.f32 %v6577_v2, %v4135_v3 }
 0x346   : > { %v7751_v51 = vpack.c.bf16 %v6844_v55, %v6843_v15  ;;  %v6695_v61 = vadd.f32 %v11720_v43, %v6656_v48  ;;  %v6815_v41 = vadd.f32 0.5, %v6783_v53  ;;  %v6849_v58 = vmul.f32 %v6817_v29, %v11848_v7 }
 0x347   : > { %v6818_v40 = vadd.f32 0.5, %v6786_v50  ;;  %v9879_v26 = vpop.eup %9878  ;;  %9888 = vtanh.f32 %v6729_v30  ;;  %v6659_v16 = vmul.f32 %v9129_v23, %v11715_v35  ;;  %v6657_v9 = vmul.f32 %v9130_v56, %v11715_v35 }
 0x348   : > { %7795 = vst [vmem:[%s11789_s15 + $0x40] sm:$0xff] %v7751_v51   ;;  %v6784_v22 = vmul.f32 0.5, %v9879_v26  ;;  %v6727_v24 = vmul.f32 0.5, %v6695_v61  ;;  %v6847_v7 = vmul.f32 %v6815_v41, %v11853_v62 }
 0x349   : > { %v6850_v19 = vmul.f32 %v6818_v40, %v11857_v37  ;;  %v6698_v60 = vadd.f32 %v11720_v43, %v6659_v16  ;;  %v6696_v18 = vadd.f32 %v11720_v43, %v6657_v9 }
 0x34a   : > { %v9881_v20 = vpop.eup %9880  ;;  %v6816_v42 = vadd.f32 0.5, %v6784_v22  ;;  %9890 = vtanh.f32 %v6727_v24 }
 0x34b   : > { %v7766_v27 = vpack.c.bf16 %v6850_v19, %v6849_v58  ;;  %v6789_v14 = vmul.f32 0.5, %v9881_v20  ;;  %v6730_v21 = vmul.f32 0.5, %v6698_v60  ;;  %v6728_v35 = vmul.f32 0.5, %v6696_v18 }
 0x34c   : > { %v9883_v36 = vpop.eup %9882  ;;  %v6848_v37 = vmul.f32 %v6816_v42, %v11866_v57 }
 0x34d   : > { %v9885_v54 = vpop.eup %9884  ;;  %7798 = vst [vmem:[%s11789_s15 + $0x58] sm:$0xff] %v7766_v27   ;;  %v6787_v49 = vmul.f32 0.5, %v9883_v36  ;;  %v6821_v4 = vadd.f32 0.5, %v6789_v14  ;;  %9892 = vtanh.f32 %v6730_v21 }
 0x34e   : > { %v9887_v17 = vpop.eup %9886  ;;  %v6790_v11 = vmul.f32 0.5, %v9885_v54  ;;  %v7761_v43 = vpack.c.bf16 %v6848_v37, %v6847_v7  ;;  %9894 = vtanh.f32 %v6728_v35 }
 0x34f   : > { %v6819_v47 = vadd.f32 0.5, %v6787_v49  ;;  %v6788_v6 = vmul.f32 0.5, %v9887_v17  ;;  %v6853_v62 = vmul.f32 %v6821_v4, %v11875_v31 }
 0x350   : > { %v6822_v0 = vadd.f32 0.5, %v6790_v11  ;;  %7797 = vst [vmem:[%s11789_s15 + $0x50] sm:$0xff] %v7761_v43  }
 0x351   : > { %v6820_v32 = vadd.f32 0.5, %v6788_v6  ;;  %v9889_v39 = vpop.eup %9888  ;;  %v6851_v57 = vmul.f32 %v6819_v47, %v11879_v33 }
 0x352   : > { %v6854_v8 = vmul.f32 %v6822_v0, %v11884_v12  ;;  %v6793_v2 = vmul.f32 0.5, %v9889_v39 }
 0x353   : > { %v6852_v3 = vmul.f32 %v6820_v32, %v11887_v34 }
 0x354   : > { %v7776_v15 = vpack.c.bf16 %v6854_v8, %v6853_v62  ;;  %v9891_v28 = vpop.eup %9890  ;;  %v6825_v46 = vadd.f32 0.5, %v6793_v2 }
 0x355   : > { %v7771_v59 = vpack.c.bf16 %v6852_v3, %v6851_v57  ;;  %v6791_v10 = vmul.f32 0.5, %v9891_v28 }
 0x356   : > { %7800 = vst [vmem:[%s11789_s15 + $0x68] sm:$0xff] %v7776_v15   ;;  %v6857_v33 = vmul.f32 %v6825_v46, %v11897_v52 }
 0x357   : > { %7799 = vst [vmem:[%s11789_s15 + $0x60] sm:$0xff] %v7771_v59   ;;  %v9893_v63 = vpop.eup %9892  ;;  %v6823_v31 = vadd.f32 0.5, %v6791_v10 }
 0x358   : > { %v9895_v25 = vpop.eup %9894  ;;  %v6794_v44 = vmul.f32 0.5, %v9893_v63 }
 0x359   : > { %v6792_v45 = vmul.f32 0.5, %v9895_v25  ;;  %v6855_v1 = vmul.f32 %v6823_v31, %v6695_v61 }
 0x35a   : > { %v6826_v12 = vadd.f32 0.5, %v6794_v44 }
 0x35b   : > { %v6824_v38 = vadd.f32 0.5, %v6792_v45 }
 0x35c   : > { %v6858_v34 = vmul.f32 %v6826_v12, %v6698_v60 }
 0x35d   : > { %v6856_v5 = vmul.f32 %v6824_v38, %v6696_v18 }
 0x35e   : > { %v7786_v13 = vpack.c.bf16 %v6858_v34, %v6857_v33 }
 0x35f   : > { %v7781_v53 = vpack.c.bf16 %v6856_v5, %v6855_v1 }
 0x360   : > { %7802 = vst [vmem:[%s11789_s15 + $0x78] sm:$0xff] %v7786_v13  }
 0x361   : > { %7801 = vst [vmem:[%s11789_s15 + $0x70] sm:$0xff] %v7781_v53  }
 0x362 PF: > { %s16_s21 = sadd.s32 1, %s9973_s21  }
 0x363   : > { %p13_p4 = scmp.ge.s32.totalorder %s16_s21, 4  }
 0x365   :  { %15 = sbr.rel (!%p13_p4) target bundleno = 1 (0x1), region = 93 }

</bundles_post_ra>
